<compile_context>
chip_gen: v5e
topology: v5e:2x2
jax: 0.10.0
libtpu: 0.0.40
codegen_flags: <defaults>
</compile_context>

<pallas_src>
import math

import jax
import jax.numpy as jnp
from jax.experimental import pallas as pl
from jax.experimental.pallas import tpu as pltpu

EPS = 1e-5


def _round_up(a, b):
    return (a + b - 1) // b * b


def _pick_tiles(M, K, N):
    """MXU-aligned padded sizes + tile sizes for an (M,K)@(K,N) matmul."""
    Np = _round_up(N, 128)
    tn = 256 if (Np % 256 == 0) else 128
    Kp = _round_up(K, 128)
    if Kp % 512 == 0:
        tk = 512
    elif Kp % 256 == 0:
        tk = 256
    else:
        tk = 128
    Mp = _round_up(M, 8)
    if Mp >= 256:
        tm = 256
        Mp = _round_up(Mp, tm)
    else:
        tm = Mp
    return Mp, Kp, Np, tm, tk, tn


# ----------------------------------------------------------------------------
# Pallas kernels
# ----------------------------------------------------------------------------
def _matmul_stats_kernel(x_ref, w_ref, y_ref, s_ref, ss_ref, acc_ref):
    """bf16 x bf16 -> f32 tiled matmul; epilogue emits per-channel sum/sumsq."""
    k = pl.program_id(2)

    @pl.when(k == 0)
    def _():
        acc_ref[...] = jnp.zeros_like(acc_ref)

    acc_ref[...] += jnp.dot(x_ref[...], w_ref[...],
                            preferred_element_type=jnp.float32)

    @pl.when(k == pl.num_programs(2) - 1)
    def _():
        y = acc_ref[...]
        y_ref[...] = y
        s_ref[...] = jnp.sum(y, axis=0, keepdims=True).reshape(s_ref.shape)
        ss_ref[...] = jnp.sum(y * y, axis=0, keepdims=True).reshape(ss_ref.shape)


def conv_matmul_stats(patches, w, tm, tk, tn):
    """patches: (Mp, Kp) bf16, w: (Kp, Np) bf16 -> (y f32, psum, psumsq)."""
    Mp, Kp = patches.shape
    _, Np = w.shape
    gm, gn, gk = Mp // tm, Np // tn, Kp // tk
    return pl.pallas_call(
        _matmul_stats_kernel,
        out_shape=(
            jax.ShapeDtypeStruct((Mp, Np), jnp.float32),
            jax.ShapeDtypeStruct((gm, 1, Np), jnp.float32),
            jax.ShapeDtypeStruct((gm, 1, Np), jnp.float32),
        ),
        grid=(gm, gn, gk),
        in_specs=[
            pl.BlockSpec((tm, tk), lambda i, j, k: (i, k)),
            pl.BlockSpec((tk, tn), lambda i, j, k: (k, j)),
        ],
        out_specs=(
            pl.BlockSpec((tm, tn), lambda i, j, k: (i, j)),
            pl.BlockSpec((1, 1, tn), lambda i, j, k: (i, 0, j)),
            pl.BlockSpec((1, 1, tn), lambda i, j, k: (i, 0, j)),
        ),
        scratch_shapes=[pltpu.VMEM((tm, tn), jnp.float32)],
        compiler_params=pltpu.CompilerParams(
            dimension_semantics=("parallel", "parallel", "arbitrary")),
    )(patches, w)


def _bn_kernel(y_ref, sc_ref, sh_ref, o_ref):
    o_ref[...] = y_ref[...] * sc_ref[...] + sh_ref[...]


def _bn_relu_kernel(y_ref, sc_ref, sh_ref, o_ref):
    o_ref[...] = jnp.maximum(y_ref[...] * sc_ref[...] + sh_ref[...], 0.0)


def _bn_add_relu_kernel(y_ref, sc_ref, sh_ref, r_ref, o_ref):
    o_ref[...] = jnp.maximum(
        y_ref[...] * sc_ref[...] + sh_ref[...] + r_ref[...], 0.0)


def bn_apply(y, scale, shift, residual, mode, tm, tn):
    """y: (Mp, Np) f32; scale/shift: (1, Np); optional residual: (Mp, Np)."""
    Mp, Np = y.shape
    gm, gn = Mp // tm, Np // tn
    yspec = pl.BlockSpec((tm, tn), lambda i, j: (i, j))
    vspec = pl.BlockSpec((1, tn), lambda i, j: (0, j))
    if mode == "add_relu":
        kernel, ins, specs = _bn_add_relu_kernel, (y, scale, shift, residual), \
            [yspec, vspec, vspec, yspec]
    elif mode == "relu":
        kernel, ins, specs = _bn_relu_kernel, (y, scale, shift), \
            [yspec, vspec, vspec]
    else:  # "none"
        kernel, ins, specs = _bn_kernel, (y, scale, shift), \
            [yspec, vspec, vspec]
    return pl.pallas_call(
        kernel,
        out_shape=jax.ShapeDtypeStruct((Mp, Np), jnp.float32),
        grid=(gm, gn),
        in_specs=specs,
        out_specs=yspec,
        input_output_aliases={0: 0},   # reuse the conv-output buffer
        compiler_params=pltpu.CompilerParams(
            dimension_semantics=("parallel", "parallel")),
    )(*ins)


# ----------------------------------------------------------------------------
# JAX glue: im2col, conv+bn(+relu/residual), maxpool, blocks, network
# ----------------------------------------------------------------------------
def im2col(x, kh, kw, stride, padding):
    """x: (N, H, W, C) -> patches (N*Ho*Wo, kh*kw*C), feature order (i, j, c)."""
    # TODO(synk): extract conv taps inside the kernel (halo/strided BlockSpecs)
    # to avoid the kh*kw im2col HBM inflation for large inputs.
    N, H, W, C = x.shape
    xp = jnp.pad(x, ((0, 0), (padding, padding), (padding, padding), (0, 0)))
    Hp, Wp = H + 2 * padding, W + 2 * padding
    Ho = (Hp - kh) // stride + 1
    Wo = (Wp - kw) // stride + 1
    cols = []
    for i in range(kh):
        for j in range(kw):
            cols.append(xp[:, i:i + (Ho - 1) * stride + 1:stride,
                              j:j + (Wo - 1) * stride + 1:stride, :])
    patches = jnp.concatenate(cols, axis=-1)          # (N, Ho, Wo, kh*kw*C)
    return patches.reshape(N * Ho * Wo, kh * kw * C), (N, Ho, Wo)


def conv_bn(x, wp, stride, padding, mode="relu", residual=None):
    """Conv2d(bias=False) + BatchNorm2d (train-mode stats) [+ add] [+ ReLU]."""
    kh, kw, cout = wp["kh"], wp["kw"], wp["cout"]
    patches, (N, Ho, Wo) = im2col(x.astype(jnp.bfloat16), kh, kw,
                                  stride, padding)
    M, K = patches.shape
    Mp, Kp, Np, tm, tk, tn = _pick_tiles(M, K, cout)
    assert wp["w"].shape == (Kp, Np), (wp["w"].shape, (Kp, Np))
    patches = jnp.pad(patches, ((0, Mp - M), (0, Kp - K)))

    y, psum, psumsq = conv_matmul_stats(patches, wp["w"], tm, tk, tn)

    # BN batch statistics over M = N*Ho*Wo.  Padded rows are exactly zero, so
    # dividing the kernel-produced sums by the true M gives the exact moments.
    mean = jnp.sum(psum, axis=0) / M                  # (1, Np)
    ex2 = jnp.sum(psumsq, axis=0) / M
    var = jnp.maximum(ex2 - mean * mean, 0.0)         # biased (population)
    inv = jax.lax.rsqrt(var + EPS)
    scale = inv                                       # gamma = 1
    shift = -mean * inv                               # beta  = 0

    res = None
    if residual is not None:
        res = residual.reshape(M, cout)
        res = jnp.pad(res, ((0, Mp - M), (0, Np - cout)))

    out = bn_apply(y, scale, shift, res, mode, tm, tn)
    return out[:M, :cout].reshape(N, Ho, Wo, cout)


def maxpool_3x3_s2_p1(x):
    """MaxPool2d(3, stride=2, padding=1) on NHWC via XLA-fused pairwise max
    (no (9, M, C) stack materialized in HBM)."""
    N, H, W, C = x.shape
    xp = jnp.pad(x, ((0, 0), (1, 1), (1, 1), (0, 0)),
                 constant_values=-jnp.inf)
    Ho = (H + 2 - 3) // 2 + 1
    Wo = (W + 2 - 3) // 2 + 1
    out = None
    for i in range(3):
        for j in range(3):
            tap = xp[:, i:i + (Ho - 1) * 2 + 1:2,
                        j:j + (Wo - 1) * 2 + 1:2, :]
            out = tap if out is None else jnp.maximum(out, tap)
    return out


def basic_block(x, bp, stride):
    identity = x
    out = conv_bn(x, bp["conv1"], stride=stride, padding=1, mode="relu")
    if "down_conv" in bp:
        identity = conv_bn(x, bp["down_conv"], stride=stride, padding=0,
                           mode="none")
    out = conv_bn(out, bp["conv2"], stride=1, padding=1, mode="add_relu",
                  residual=identity)
    return out


def run_layer(x, blocks, first_stride):
    for b, bp in enumerate(blocks):
        x = basic_block(x, bp, first_stride if b == 0 else 1)
    return x


def resnet_forward(params, x_nchw):
    x = jnp.transpose(x_nchw, (0, 2, 3, 1))                  # NCHW -> NHWC
    x = conv_bn(x, params["conv1"], stride=2, padding=3, mode="relu")
    x = maxpool_3x3_s2_p1(x)
    l1 = run_layer(x, params["layer1"], first_stride=1)
    l2 = run_layer(l1, params["layer2"], first_stride=2)
    l3 = run_layer(l2, params["layer3"], first_stride=2)
    l4 = run_layer(l3, params["layer4"], first_stride=2)
    to_nchw = lambda t: jnp.transpose(t, (0, 3, 1, 2))
    return [to_nchw(l4), to_nchw(l3), to_nchw(l2)]           # [layer4, layer3, layer2]


# ----------------------------------------------------------------------------
# Parameter init (PyTorch Conv2d default uniform) + one-time weight prep
# ----------------------------------------------------------------------------
def _make_conv_w(key, cout, cin, k):
    fan_in = cin * k * k
    bound = 1.0 / math.sqrt(fan_in)
    return jax.random.uniform(key, (cout, cin, k, k), jnp.float32,
                              -bound, bound)


def init_resnet_params(key, layers=(1, 1, 1, 1), n_channels=3):
    keys = iter(jax.random.split(key, 128))
    params = {"conv1": _make_conv_w(next(keys), 64, n_channels, 7)}
    inplanes = 64
    for li, (planes, nblocks, stride) in enumerate(
            zip((64, 128, 256, 512), layers, (1, 2, 2, 2)), start=1):
        blocks = []
        for b in range(nblocks):
            s = stride if b == 0 else 1
            bp = {"conv1": _make_conv_w(next(keys), planes, inplanes, 3),
                  "conv2": _make_conv_w(next(keys), planes, planes, 3)}
            if b == 0 and (s != 1 or inplanes != planes):
                bp["down_conv"] = _make_conv_w(next(keys), planes, inplanes, 1)
            blocks.append(bp)
            inplanes = planes
        params[f"layer{li}"] = blocks
    return params


def prepare_conv(w_torch):
    """Torch-layout (Cout, Cin, kh, kw) -> padded MXU-ready (Kp, Np) bf16."""
    cout, cin, kh, kw = w_torch.shape
    K = kh * kw * cin
    Kp = _round_up(K, 128)
    Np = _round_up(cout, 128)
    w2 = jnp.transpose(w_torch, (2, 3, 1, 0)).reshape(K, cout)
    w2 = jnp.pad(w2, ((0, Kp - K), (0, Np - cout))).astype(jnp.bfloat16)
    return {"w": w2, "kh": kh, "kw": kw, "cin": cin, "cout": cout}


def prepare_resnet_params(raw):
    out = {"conv1": prepare_conv(raw["conv1"])}
    for li in range(1, 5):
        out[f"layer{li}"] = [{k: prepare_conv(v) for k, v in bp.items()}
                             for bp in raw[f"layer{li}"]]
    return out


# ----------------------------------------------------------------------------
if __name__ == "__main__":
    key = jax.random.PRNGKey(0)
    pkey, xkey = jax.random.split(key)

    raw_params = init_resnet_params(pkey, layers=(1, 1, 1, 1), n_channels=3)
    params = prepare_resnet_params(raw_params)      # one-time layout prep
    x = jax.random.normal(xkey, (2, 3, 32, 32), dtype=jnp.float32)  # NCHW

    fwd = jax.jit(lambda inp: resnet_forward(params, inp))
    outs = jax.block_until_ready(fwd(x))

    # expected feature-map shapes for 32x32 input:
    #   layer4: (2, 512, 1, 1), layer3: (2, 256, 2, 2), layer2: (2, 128, 4, 4)
    assert outs[0].shape == (2, 512, 1, 1)
    assert outs[1].shape == (2, 256, 2, 2)
    assert outs[2].shape == (2, 128, 4, 4)
    assert all(bool(jnp.all(jnp.isfinite(o))) for o in outs)

    print("KERNEL_OK")
</pallas_src>

<mosaic_0001>
module attributes {stable_mosaic.version = 11 : i64} {
  func.func @_bn_relu_kernel(%arg0: i32, %arg1: i32, %arg2: memref<256x128xf32, #tpu.memory_space<vmem>>, %arg3: memref<1x128xf32, #tpu.memory_space<vmem>>, %arg4: memref<1x128xf32, #tpu.memory_space<vmem>>, %arg5: memref<256x128xf32, #tpu.memory_space<vmem>>) attributes {dimension_semantics = [#tpu.dimension_semantics<parallel>, #tpu.dimension_semantics<parallel>], iteration_bounds = array<i64: 2, 1>, scalar_prefetch = 0 : i64, scratch_operands = 0 : i64, tpu.core_type = #tpu.core_type<tc>, window_params = [{transform_indices = @transform_0, window_bounds = array<i64: 256, 128>}, {transform_indices = @transform_1, window_bounds = array<i64: 1, 128>}, {transform_indices = @transform_2, window_bounds = array<i64: 1, 128>}, {transform_indices = @transform_3, window_bounds = array<i64: 256, 128>}]} {
    %c0 = arith.constant 0 : index
    %c0_0 = arith.constant 0 : index
    %0 = vector.load %arg2[%c0, %c0_0] : memref<256x128xf32, #tpu.memory_space<vmem>>, vector<256x128xf32>
    %c0_1 = arith.constant 0 : index
    %c0_2 = arith.constant 0 : index
    %1 = vector.load %arg3[%c0_1, %c0_2] : memref<1x128xf32, #tpu.memory_space<vmem>>, vector<1x128xf32>
    %2 = vector.broadcast %1 : vector<1x128xf32> to vector<256x128xf32>
    %3 = arith.mulf %0, %2 : vector<256x128xf32>
    %c0_3 = arith.constant 0 : index
    %c0_4 = arith.constant 0 : index
    %4 = vector.load %arg4[%c0_3, %c0_4] : memref<1x128xf32, #tpu.memory_space<vmem>>, vector<1x128xf32>
    %5 = vector.broadcast %4 : vector<1x128xf32> to vector<256x128xf32>
    %6 = arith.addf %3, %5 : vector<256x128xf32>
    %cst = arith.constant 0.000000e+00 : f32
    %7 = vector.broadcast %cst : f32 to vector<256x128xf32>
    %8 = arith.maximumf %6, %7 : vector<256x128xf32>
    %c0_5 = arith.constant 0 : index
    %c0_6 = arith.constant 0 : index
    %9 = vector.load %arg5[%c0_5, %c0_6] : memref<256x128xf32, #tpu.memory_space<vmem>>, vector<256x128xf32>
    tpu.vector_store %arg5[%c0_5, %c0_6], %8 {strides = array<i32>} : memref<256x128xf32, #tpu.memory_space<vmem>>, vector<256x128xf32>,
    return
  }
  func.func @transform_0(%arg0: i32, %arg1: i32) -> (i32, i32) {
    %c0_i32 = arith.constant 0 : i32
    return %arg0, %arg1 : i32, i32
  }
  func.func @transform_1(%arg0: i32, %arg1: i32) -> (i32, i32) {
    %c0_i32 = arith.constant 0 : i32
    %c0_i32_0 = arith.constant 0 : i32
    return %c0_i32, %arg1 : i32, i32
  }
  func.func @transform_2(%arg0: i32, %arg1: i32) -> (i32, i32) {
    %c0_i32 = arith.constant 0 : i32
    %c0_i32_0 = arith.constant 0 : i32
    return %c0_i32, %arg1 : i32, i32
  }
  func.func @transform_3(%arg0: i32, %arg1: i32) -> (i32, i32) {
    %c0_i32 = arith.constant 0 : i32
    return %arg0, %arg1 : i32, i32
  }
}

module attributes {stable_mosaic.version = 11 : i64} {
  func.func @_matmul_stats_kernel(%arg0: i32, %arg1: i32, %arg2: i32, %arg3: memref<256x256xbf16, #tpu.memory_space<vmem>>, %arg4: memref<256x128xbf16, #tpu.memory_space<vmem>>, %arg5: memref<256x128xf32, #tpu.memory_space<vmem>>, %arg6: memref<1x1x128xf32, #tpu.memory_space<vmem>>, %arg7: memref<1x1x128xf32, #tpu.memory_space<vmem>>, %arg8: memref<256x128xf32, #tpu.memory_space<vmem>>) attributes {dimension_semantics = [#tpu.dimension_semantics<parallel>, #tpu.dimension_semantics<parallel>, #tpu.dimension_semantics<arbitrary>], iteration_bounds = array<i64: 2, 1, 1>, scalar_prefetch = 0 : i64, scratch_operands = 1 : i64, tpu.core_type = #tpu.core_type<tc>, window_params = [{transform_indices = @transform_0, window_bounds = array<i64: 256, 256>}, {transform_indices = @transform_1, window_bounds = array<i64: 256, 128>}, {transform_indices = @transform_2, window_bounds = array<i64: 256, 128>}, {transform_indices = @transform_3, window_bounds = array<i64: 1, 1, 128>}, {transform_indices = @transform_4, window_bounds = array<i64: 1, 1, 128>}]} {
    %c0_i32 = arith.constant 0 : i32
    %0 = arith.cmpi eq, %arg2, %c0_i32 : i32
    %1 = arith.extui %0 : i1 to i32
    %c0_i32_0 = arith.constant 0 : i32
    %2 = arith.cmpi ne, %1, %c0_i32_0 : i32
    scf.if %2 {
      %cst_10 = arith.constant 0.000000e+00 : f32
      %12 = vector.broadcast %cst_10 : f32 to vector<256x128xf32>
      %c0_11 = arith.constant 0 : index
      %c0_12 = arith.constant 0 : index
      %13 = vector.load %arg8[%c0_11, %c0_12] : memref<256x128xf32, #tpu.memory_space<vmem>>, vector<256x128xf32>
      tpu.vector_store %arg8[%c0_11, %c0_12], %12 {strides = array<i32>} : memref<256x128xf32, #tpu.memory_space<vmem>>, vector<256x128xf32>,
    } else {
    }
    %c0 = arith.constant 0 : index
    %c0_1 = arith.constant 0 : index
    %3 = vector.load %arg8[%c0, %c0_1] : memref<256x128xf32, #tpu.memory_space<vmem>>, vector<256x128xf32>
    %c0_2 = arith.constant 0 : index
    %c0_3 = arith.constant 0 : index
    %4 = vector.load %arg3[%c0_2, %c0_3] : memref<256x256xbf16, #tpu.memory_space<vmem>>, vector<256x256xbf16>
    %c0_4 = arith.constant 0 : index
    %c0_5 = arith.constant 0 : index
    %5 = vector.load %arg4[%c0_4, %c0_5] : memref<256x128xbf16, #tpu.memory_space<vmem>>, vector<256x128xbf16>
    %cst = arith.constant dense<0.000000e+00> : vector<256x128xf32>
    %6 = tpu.matmul %4, %5, %cst {dimension_numbers = #tpu.dot_dimension_numbers<[1], [0], [0], [1], [0, 0, 1, 1], [], []>} : vector<256x256xbf16>, vector<256x128xbf16>, vector<256x128xf32> -> vector<256x128xf32>
    %7 = arith.addf %3, %6 : vector<256x128xf32>
    %c0_6 = arith.constant 0 : index
    %c0_7 = arith.constant 0 : index
    %8 = vector.load %arg8[%c0_6, %c0_7] : memref<256x128xf32, #tpu.memory_space<vmem>>, vector<256x128xf32>
    tpu.vector_store %arg8[%c0_6, %c0_7], %7 {strides = array<i32>} : memref<256x128xf32, #tpu.memory_space<vmem>>, vector<256x128xf32>,
    %c0_i32_8 = arith.constant 0 : i32
    %9 = arith.cmpi eq, %arg2, %c0_i32_8 : i32
    %10 = arith.extui %9 : i1 to i32
    %c0_i32_9 = arith.constant 0 : i32
    %11 = arith.cmpi ne, %10, %c0_i32_9 : i32
    scf.if %11 {
      %c0_10 = arith.constant 0 : index
      %c0_11 = arith.constant 0 : index
      %12 = vector.load %arg8[%c0_10, %c0_11] : memref<256x128xf32, #tpu.memory_space<vmem>>, vector<256x128xf32>
      %c0_12 = arith.constant 0 : index
      %c0_13 = arith.constant 0 : index
      %13 = vector.load %arg5[%c0_12, %c0_13] : memref<256x128xf32, #tpu.memory_space<vmem>>, vector<256x128xf32>
      tpu.vector_store %arg5[%c0_12, %c0_13], %12 {strides = array<i32>} : memref<256x128xf32, #tpu.memory_space<vmem>>, vector<256x128xf32>,
      %cst_14 = arith.constant dense<0.000000e+00> : vector<128xf32>
      %14 = vector.multi_reduction <add>, %12, %cst_14 [0] : vector<256x128xf32> to vector<128xf32>
      %15 = vector.shape_cast %14 : vector<128xf32> to vector<1x128xf32>
      %16 = vector.shape_cast %15 : vector<1x128xf32> to vector<1x1x128xf32>
      %c0_15 = arith.constant 0 : index
      %c0_16 = arith.constant 0 : index
      %c0_17 = arith.constant 0 : index
      %17 = vector.load %arg6[%c0_15, %c0_16, %c0_17] : memref<1x1x128xf32, #tpu.memory_space<vmem>>, vector<1x1x128xf32>
      tpu.vector_store %arg6[%c0_15, %c0_16, %c0_17], %16 {strides = array<i32>} : memref<1x1x128xf32, #tpu.memory_space<vmem>>, vector<1x1x128xf32>,
      %18 = arith.mulf %12, %12 : vector<256x128xf32>
      %cst_18 = arith.constant dense<0.000000e+00> : vector<128xf32>
      %19 = vector.multi_reduction <add>, %18, %cst_18 [0] : vector<256x128xf32> to vector<128xf32>
      %20 = vector.shape_cast %19 : vector<128xf32> to vector<1x128xf32>
      %21 = vector.shape_cast %20 : vector<1x128xf32> to vector<1x1x128xf32>
      %c0_19 = arith.constant 0 : index
      %c0_20 = arith.constant 0 : index
      %c0_21 = arith.constant 0 : index
      %22 = vector.load %arg7[%c0_19, %c0_20, %c0_21] : memref<1x1x128xf32, #tpu.memory_space<vmem>>, vector<1x1x128xf32>
      tpu.vector_store %arg7[%c0_19, %c0_20, %c0_21], %21 {strides = array<i32>} : memref<1x1x128xf32, #tpu.memory_space<vmem>>, vector<1x1x128xf32>,
    } else {
    }
    return
  }
  func.func @transform_0(%arg0: i32, %arg1: i32, %arg2: i32) -> (i32, i32) {
    %c0_i32 = arith.constant 0 : i32
    return %arg0, %arg2 : i32, i32
  }
  func.func @transform_1(%arg0: i32, %arg1: i32, %arg2: i32) -> (i32, i32) {
    %c0_i32 = arith.constant 0 : i32
    return %arg2, %arg1 : i32, i32
  }
  func.func @transform_2(%arg0: i32, %arg1: i32, %arg2: i32) -> (i32, i32) {
    %c0_i32 = arith.constant 0 : i32
    return %arg0, %arg1 : i32, i32
  }
  func.func @transform_3(%arg0: i32, %arg1: i32, %arg2: i32) -> (i32, i32, i32) {
    %c0_i32 = arith.constant 0 : i32
    %c0_i32_0 = arith.constant 0 : i32
    return %arg0, %c0_i32, %arg1 : i32, i32, i32
  }
  func.func @transform_4(%arg0: i32, %arg1: i32, %arg2: i32) -> (i32, i32, i32) {
    %c0_i32 = arith.constant 0 : i32
    %c0_i32_0 = arith.constant 0 : i32
    return %arg0, %c0_i32, %arg1 : i32, i32, i32
  }
}

module attributes {stable_mosaic.version = 11 : i64} {
  func.func @_matmul_stats_kernel(%arg0: i32, %arg1: i32, %arg2: i32, %arg3: memref<128x128xbf16, #tpu.memory_space<vmem>>, %arg4: memref<128x128xbf16, #tpu.memory_space<vmem>>, %arg5: memref<128x128xf32, #tpu.memory_space<vmem>>, %arg6: memref<1x1x128xf32, #tpu.memory_space<vmem>>, %arg7: memref<1x1x128xf32, #tpu.memory_space<vmem>>, %arg8: memref<128x128xf32, #tpu.memory_space<vmem>>) attributes {dimension_semantics = [#tpu.dimension_semantics<parallel>, #tpu.dimension_semantics<parallel>, #tpu.dimension_semantics<arbitrary>], iteration_bounds = array<i64: 1, 1, 5>, scalar_prefetch = 0 : i64, scratch_operands = 1 : i64, tpu.core_type = #tpu.core_type<tc>, window_params = [{transform_indices = @transform_0, window_bounds = array<i64: 128, 128>}, {transform_indices = @transform_1, window_bounds = array<i64: 128, 128>}, {transform_indices = @transform_2, window_bounds = array<i64: 128, 128>}, {transform_indices = @transform_3, window_bounds = array<i64: 1, 1, 128>}, {transform_indices = @transform_4, window_bounds = array<i64: 1, 1, 128>}]} {
    %c0_i32 = arith.constant 0 : i32
    %0 = arith.cmpi eq, %arg2, %c0_i32 : i32
    %1 = arith.extui %0 : i1 to i32
    %c0_i32_0 = arith.constant 0 : i32
    %2 = arith.cmpi ne, %1, %c0_i32_0 : i32
    scf.if %2 {
      %cst_9 = arith.constant 0.000000e+00 : f32
      %12 = vector.broadcast %cst_9 : f32 to vector<128x128xf32>
      %c0_10 = arith.constant 0 : index
      %c0_11 = arith.constant 0 : index
      %13 = vector.load %arg8[%c0_10, %c0_11] : memref<128x128xf32, #tpu.memory_space<vmem>>, vector<128x128xf32>
      tpu.vector_store %arg8[%c0_10, %c0_11], %12 {strides = array<i32>} : memref<128x128xf32, #tpu.memory_space<vmem>>, vector<128x128xf32>,
    } else {
    }
    %c0 = arith.constant 0 : index
    %c0_1 = arith.constant 0 : index
    %3 = vector.load %arg8[%c0, %c0_1] : memref<128x128xf32, #tpu.memory_space<vmem>>, vector<128x128xf32>
    %c0_2 = arith.constant 0 : index
    %c0_3 = arith.constant 0 : index
    %4 = vector.load %arg3[%c0_2, %c0_3] : memref<128x128xbf16, #tpu.memory_space<vmem>>, vector<128x128xbf16>
    %c0_4 = arith.constant 0 : index
    %c0_5 = arith.constant 0 : index
    %5 = vector.load %arg4[%c0_4, %c0_5] : memref<128x128xbf16, #tpu.memory_space<vmem>>, vector<128x128xbf16>
    %cst = arith.constant dense<0.000000e+00> : vector<128x128xf32>
    %6 = tpu.matmul %4, %5, %cst {dimension_numbers = #tpu.dot_dimension_numbers<[1], [0], [0], [1], [0, 0, 1, 1], [], []>} : vector<128x128xbf16>, vector<128x128xbf16>, vector<128x128xf32> -> vector<128x128xf32>
    %7 = arith.addf %3, %6 : vector<128x128xf32>
    %c0_6 = arith.constant 0 : index
    %c0_7 = arith.constant 0 : index
    %8 = vector.load %arg8[%c0_6, %c0_7] : memref<128x128xf32, #tpu.memory_space<vmem>>, vector<128x128xf32>
    tpu.vector_store %arg8[%c0_6, %c0_7], %7 {strides = array<i32>} : memref<128x128xf32, #tpu.memory_space<vmem>>, vector<128x128xf32>,
    %c4_i32 = arith.constant 4 : i32
    %9 = arith.cmpi eq, %arg2, %c4_i32 : i32
    %10 = arith.extui %9 : i1 to i32
    %c0_i32_8 = arith.constant 0 : i32
    %11 = arith.cmpi ne, %10, %c0_i32_8 : i32
    scf.if %11 {
      %c0_9 = arith.constant 0 : index
      %c0_10 = arith.constant 0 : index
      %12 = vector.load %arg8[%c0_9, %c0_10] : memref<128x128xf32, #tpu.memory_space<vmem>>, vector<128x128xf32>
      %c0_11 = arith.constant 0 : index
      %c0_12 = arith.constant 0 : index
      %13 = vector.load %arg5[%c0_11, %c0_12] : memref<128x128xf32, #tpu.memory_space<vmem>>, vector<128x128xf32>
      tpu.vector_store %arg5[%c0_11, %c0_12], %12 {strides = array<i32>} : memref<128x128xf32, #tpu.memory_space<vmem>>, vector<128x128xf32>,
      %cst_13 = arith.constant dense<0.000000e+00> : vector<128xf32>
      %14 = vector.multi_reduction <add>, %12, %cst_13 [0] : vector<128x128xf32> to vector<128xf32>
      %15 = vector.shape_cast %14 : vector<128xf32> to vector<1x128xf32>
      %16 = vector.shape_cast %15 : vector<1x128xf32> to vector<1x1x128xf32>
      %c0_14 = arith.constant 0 : index
      %c0_15 = arith.constant 0 : index
      %c0_16 = arith.constant 0 : index
      %17 = vector.load %arg6[%c0_14, %c0_15, %c0_16] : memref<1x1x128xf32, #tpu.memory_space<vmem>>, vector<1x1x128xf32>
      tpu.vector_store %arg6[%c0_14, %c0_15, %c0_16], %16 {strides = array<i32>} : memref<1x1x128xf32, #tpu.memory_space<vmem>>, vector<1x1x128xf32>,
      %18 = arith.mulf %12, %12 : vector<128x128xf32>
      %cst_17 = arith.constant dense<0.000000e+00> : vector<128xf32>
      %19 = vector.multi_reduction <add>, %18, %cst_17 [0] : vector<128x128xf32> to vector<128xf32>
      %20 = vector.shape_cast %19 : vector<128xf32> to vector<1x128xf32>
      %21 = vector.shape_cast %20 : vector<1x128xf32> to vector<1x1x128xf32>
      %c0_18 = arith.constant 0 : index
      %c0_19 = arith.constant 0 : index
      %c0_20 = arith.constant 0 : index
      %22 = vector.load %arg7[%c0_18, %c0_19, %c0_20] : memref<1x1x128xf32, #tpu.memory_space<vmem>>, vector<1x1x128xf32>
      tpu.vector_store %arg7[%c0_18, %c0_19, %c0_20], %21 {strides = array<i32>} : memref<1x1x128xf32, #tpu.memory_space<vmem>>, vector<1x1x128xf32>,
    } else {
    }
    return
  }
  func.func @transform_0(%arg0: i32, %arg1: i32, %arg2: i32) -> (i32, i32) {
    %c0_i32 = arith.constant 0 : i32
    return %arg0, %arg2 : i32, i32
  }
  func.func @transform_1(%arg0: i32, %arg1: i32, %arg2: i32) -> (i32, i32) {
    %c0_i32 = arith.constant 0 : i32
    return %arg2, %arg1 : i32, i32
  }
  func.func @transform_2(%arg0: i32, %arg1: i32, %arg2: i32) -> (i32, i32) {
    %c0_i32 = arith.constant 0 : i32
    return %arg0, %arg1 : i32, i32
  }
  func.func @transform_3(%arg0: i32, %arg1: i32, %arg2: i32) -> (i32, i32, i32) {
    %c0_i32 = arith.constant 0 : i32
    %c0_i32_0 = arith.constant 0 : i32
    return %arg0, %c0_i32, %arg1 : i32, i32, i32
  }
  func.func @transform_4(%arg0: i32, %arg1: i32, %arg2: i32) -> (i32, i32, i32) {
    %c0_i32 = arith.constant 0 : i32
    %c0_i32_0 = arith.constant 0 : i32
    return %arg0, %c0_i32, %arg1 : i32, i32, i32
  }
}

module attributes {stable_mosaic.version = 11 : i64} {
  func.func @_bn_relu_kernel(%arg0: i32, %arg1: i32, %arg2: memref<128x128xf32, #tpu.memory_space<vmem>>, %arg3: memref<1x128xf32, #tpu.memory_space<vmem>>, %arg4: memref<1x128xf32, #tpu.memory_space<vmem>>, %arg5: memref<128x128xf32, #tpu.memory_space<vmem>>) attributes {dimension_semantics = [#tpu.dimension_semantics<parallel>, #tpu.dimension_semantics<parallel>], iteration_bounds = array<i64: 1, 1>, scalar_prefetch = 0 : i64, scratch_operands = 0 : i64, tpu.core_type = #tpu.core_type<tc>, window_params = [{transform_indices = @transform_0, window_bounds = array<i64: 128, 128>}, {transform_indices = @transform_1, window_bounds = array<i64: 1, 128>}, {transform_indices = @transform_2, window_bounds = array<i64: 1, 128>}, {transform_indices = @transform_3, window_bounds = array<i64: 128, 128>}]} {
    %c0 = arith.constant 0 : index
    %c0_0 = arith.constant 0 : index
    %0 = vector.load %arg2[%c0, %c0_0] : memref<128x128xf32, #tpu.memory_space<vmem>>, vector<128x128xf32>
    %c0_1 = arith.constant 0 : index
    %c0_2 = arith.constant 0 : index
    %1 = vector.load %arg3[%c0_1, %c0_2] : memref<1x128xf32, #tpu.memory_space<vmem>>, vector<1x128xf32>
    %2 = vector.broadcast %1 : vector<1x128xf32> to vector<128x128xf32>
    %3 = arith.mulf %0, %2 : vector<128x128xf32>
    %c0_3 = arith.constant 0 : index
    %c0_4 = arith.constant 0 : index
    %4 = vector.load %arg4[%c0_3, %c0_4] : memref<1x128xf32, #tpu.memory_space<vmem>>, vector<1x128xf32>
    %5 = vector.broadcast %4 : vector<1x128xf32> to vector<128x128xf32>
    %6 = arith.addf %3, %5 : vector<128x128xf32>
    %cst = arith.constant 0.000000e+00 : f32
    %7 = vector.broadcast %cst : f32 to vector<128x128xf32>
    %8 = arith.maximumf %6, %7 : vector<128x128xf32>
    %c0_5 = arith.constant 0 : index
    %c0_6 = arith.constant 0 : index
    %9 = vector.load %arg5[%c0_5, %c0_6] : memref<128x128xf32, #tpu.memory_space<vmem>>, vector<128x128xf32>
    tpu.vector_store %arg5[%c0_5, %c0_6], %8 {strides = array<i32>} : memref<128x128xf32, #tpu.memory_space<vmem>>, vector<128x128xf32>,
    return
  }
  func.func @transform_0(%arg0: i32, %arg1: i32) -> (i32, i32) {
    %c0_i32 = arith.constant 0 : i32
    return %arg0, %arg1 : i32, i32
  }
  func.func @transform_1(%arg0: i32, %arg1: i32) -> (i32, i32) {
    %c0_i32 = arith.constant 0 : i32
    %c0_i32_0 = arith.constant 0 : i32
    return %c0_i32, %arg1 : i32, i32
  }
  func.func @transform_2(%arg0: i32, %arg1: i32) -> (i32, i32) {
    %c0_i32 = arith.constant 0 : i32
    %c0_i32_0 = arith.constant 0 : i32
    return %c0_i32, %arg1 : i32, i32
  }
  func.func @transform_3(%arg0: i32, %arg1: i32) -> (i32, i32) {
    %c0_i32 = arith.constant 0 : i32
    return %arg0, %arg1 : i32, i32
  }
}

module attributes {stable_mosaic.version = 11 : i64} {
  func.func @_bn_add_relu_kernel(%arg0: i32, %arg1: i32, %arg2: memref<128x128xf32, #tpu.memory_space<vmem>>, %arg3: memref<1x128xf32, #tpu.memory_space<vmem>>, %arg4: memref<1x128xf32, #tpu.memory_space<vmem>>, %arg5: memref<128x128xf32, #tpu.memory_space<vmem>>, %arg6: memref<128x128xf32, #tpu.memory_space<vmem>>) attributes {dimension_semantics = [#tpu.dimension_semantics<parallel>, #tpu.dimension_semantics<parallel>], iteration_bounds = array<i64: 1, 1>, scalar_prefetch = 0 : i64, scratch_operands = 0 : i64, tpu.core_type = #tpu.core_type<tc>, window_params = [{transform_indices = @transform_0, window_bounds = array<i64: 128, 128>}, {transform_indices = @transform_1, window_bounds = array<i64: 1, 128>}, {transform_indices = @transform_2, window_bounds = array<i64: 1, 128>}, {transform_indices = @transform_3, window_bounds = array<i64: 128, 128>}, {transform_indices = @transform_4, window_bounds = array<i64: 128, 128>}]} {
    %c0 = arith.constant 0 : index
    %c0_0 = arith.constant 0 : index
    %0 = vector.load %arg2[%c0, %c0_0] : memref<128x128xf32, #tpu.memory_space<vmem>>, vector<128x128xf32>
    %c0_1 = arith.constant 0 : index
    %c0_2 = arith.constant 0 : index
    %1 = vector.load %arg3[%c0_1, %c0_2] : memref<1x128xf32, #tpu.memory_space<vmem>>, vector<1x128xf32>
    %2 = vector.broadcast %1 : vector<1x128xf32> to vector<128x128xf32>
    %3 = arith.mulf %0, %2 : vector<128x128xf32>
    %c0_3 = arith.constant 0 : index
    %c0_4 = arith.constant 0 : index
    %4 = vector.load %arg4[%c0_3, %c0_4] : memref<1x128xf32, #tpu.memory_space<vmem>>, vector<1x128xf32>
    %5 = vector.broadcast %4 : vector<1x128xf32> to vector<128x128xf32>
    %6 = arith.addf %3, %5 : vector<128x128xf32>
    %c0_5 = arith.constant 0 : index
    %c0_6 = arith.constant 0 : index
    %7 = vector.load %arg5[%c0_5, %c0_6] : memref<128x128xf32, #tpu.memory_space<vmem>>, vector<128x128xf32>
    %8 = arith.addf %6, %7 : vector<128x128xf32>
    %cst = arith.constant 0.000000e+00 : f32
    %9 = vector.broadcast %cst : f32 to vector<128x128xf32>
    %10 = arith.maximumf %8, %9 : vector<128x128xf32>
    %c0_7 = arith.constant 0 : index
    %c0_8 = arith.constant 0 : index
    %11 = vector.load %arg6[%c0_7, %c0_8] : memref<128x128xf32, #tpu.memory_space<vmem>>, vector<128x128xf32>
    tpu.vector_store %arg6[%c0_7, %c0_8], %10 {strides = array<i32>} : memref<128x128xf32, #tpu.memory_space<vmem>>, vector<128x128xf32>,
    return
  }
  func.func @transform_0(%arg0: i32, %arg1: i32) -> (i32, i32) {
    %c0_i32 = arith.constant 0 : i32
    return %arg0, %arg1 : i32, i32
  }
  func.func @transform_1(%arg0: i32, %arg1: i32) -> (i32, i32) {
    %c0_i32 = arith.constant 0 : i32
    %c0_i32_0 = arith.constant 0 : i32
    return %c0_i32, %arg1 : i32, i32
  }
  func.func @transform_2(%arg0: i32, %arg1: i32) -> (i32, i32) {
    %c0_i32 = arith.constant 0 : i32
    %c0_i32_0 = arith.constant 0 : i32
    return %c0_i32, %arg1 : i32, i32
  }
  func.func @transform_3(%arg0: i32, %arg1: i32) -> (i32, i32) {
    %c0_i32 = arith.constant 0 : i32
    return %arg0, %arg1 : i32, i32
  }
  func.func @transform_4(%arg0: i32, %arg1: i32) -> (i32, i32) {
    %c0_i32 = arith.constant 0 : i32
    return %arg0, %arg1 : i32, i32
  }
}

module attributes {stable_mosaic.version = 11 : i64} {
  func.func @_matmul_stats_kernel(%arg0: i32, %arg1: i32, %arg2: i32, %arg3: memref<32x128xbf16, #tpu.memory_space<vmem>>, %arg4: memref<128x128xbf16, #tpu.memory_space<vmem>>, %arg5: memref<32x128xf32, #tpu.memory_space<vmem>>, %arg6: memref<1x1x128xf32, #tpu.memory_space<vmem>>, %arg7: memref<1x1x128xf32, #tpu.memory_space<vmem>>, %arg8: memref<32x128xf32, #tpu.memory_space<vmem>>) attributes {dimension_semantics = [#tpu.dimension_semantics<parallel>, #tpu.dimension_semantics<parallel>, #tpu.dimension_semantics<arbitrary>], iteration_bounds = array<i64: 1, 1, 1>, scalar_prefetch = 0 : i64, scratch_operands = 1 : i64, tpu.core_type = #tpu.core_type<tc>, window_params = [{transform_indices = @transform_0, window_bounds = array<i64: 32, 128>}, {transform_indices = @transform_1, window_bounds = array<i64: 128, 128>}, {transform_indices = @transform_2, window_bounds = array<i64: 32, 128>}, {transform_indices = @transform_3, window_bounds = array<i64: 1, 1, 128>}, {transform_indices = @transform_4, window_bounds = array<i64: 1, 1, 128>}]} {
    %c0_i32 = arith.constant 0 : i32
    %0 = arith.cmpi eq, %arg2, %c0_i32 : i32
    %1 = arith.extui %0 : i1 to i32
    %c0_i32_0 = arith.constant 0 : i32
    %2 = arith.cmpi ne, %1, %c0_i32_0 : i32
    scf.if %2 {
      %cst_10 = arith.constant 0.000000e+00 : f32
      %12 = vector.broadcast %cst_10 : f32 to vector<32x128xf32>
      %c0_11 = arith.constant 0 : index
      %c0_12 = arith.constant 0 : index
      %13 = vector.load %arg8[%c0_11, %c0_12] : memref<32x128xf32, #tpu.memory_space<vmem>>, vector<32x128xf32>
      tpu.vector_store %arg8[%c0_11, %c0_12], %12 {strides = array<i32>} : memref<32x128xf32, #tpu.memory_space<vmem>>, vector<32x128xf32>,
    } else {
    }
    %c0 = arith.constant 0 : index
    %c0_1 = arith.constant 0 : index
    %3 = vector.load %arg8[%c0, %c0_1] : memref<32x128xf32, #tpu.memory_space<vmem>>, vector<32x128xf32>
    %c0_2 = arith.constant 0 : index
    %c0_3 = arith.constant 0 : index
    %4 = vector.load %arg3[%c0_2, %c0_3] : memref<32x128xbf16, #tpu.memory_space<vmem>>, vector<32x128xbf16>
    %c0_4 = arith.constant 0 : index
    %c0_5 = arith.constant 0 : index
    %5 = vector.load %arg4[%c0_4, %c0_5] : memref<128x128xbf16, #tpu.memory_space<vmem>>, vector<128x128xbf16>
    %cst = arith.constant dense<0.000000e+00> : vector<32x128xf32>
    %6 = tpu.matmul %4, %5, %cst {dimension_numbers = #tpu.dot_dimension_numbers<[1], [0], [0], [1], [0, 0, 1, 1], [], []>} : vector<32x128xbf16>, vector<128x128xbf16>, vector<32x128xf32> -> vector<32x128xf32>
    %7 = arith.addf %3, %6 : vector<32x128xf32>
    %c0_6 = arith.constant 0 : index
    %c0_7 = arith.constant 0 : index
    %8 = vector.load %arg8[%c0_6, %c0_7] : memref<32x128xf32, #tpu.memory_space<vmem>>, vector<32x128xf32>
    tpu.vector_store %arg8[%c0_6, %c0_7], %7 {strides = array<i32>} : memref<32x128xf32, #tpu.memory_space<vmem>>, vector<32x128xf32>,
    %c0_i32_8 = arith.constant 0 : i32
    %9 = arith.cmpi eq, %arg2, %c0_i32_8 : i32
    %10 = arith.extui %9 : i1 to i32
    %c0_i32_9 = arith.constant 0 : i32
    %11 = arith.cmpi ne, %10, %c0_i32_9 : i32
    scf.if %11 {
      %c0_10 = arith.constant 0 : index
      %c0_11 = arith.constant 0 : index
      %12 = vector.load %arg8[%c0_10, %c0_11] : memref<32x128xf32, #tpu.memory_space<vmem>>, vector<32x128xf32>
      %c0_12 = arith.constant 0 : index
      %c0_13 = arith.constant 0 : index
      %13 = vector.load %arg5[%c0_12, %c0_13] : memref<32x128xf32, #tpu.memory_space<vmem>>, vector<32x128xf32>
      tpu.vector_store %arg5[%c0_12, %c0_13], %12 {strides = array<i32>} : memref<32x128xf32, #tpu.memory_space<vmem>>, vector<32x128xf32>,
      %cst_14 = arith.constant dense<0.000000e+00> : vector<128xf32>
      %14 = vector.multi_reduction <add>, %12, %cst_14 [0] : vector<32x128xf32> to vector<128xf32>
      %15 = vector.shape_cast %14 : vector<128xf32> to vector<1x128xf32>
      %16 = vector.shape_cast %15 : vector<1x128xf32> to vector<1x1x128xf32>
      %c0_15 = arith.constant 0 : index
      %c0_16 = arith.constant 0 : index
      %c0_17 = arith.constant 0 : index
      %17 = vector.load %arg6[%c0_15, %c0_16, %c0_17] : memref<1x1x128xf32, #tpu.memory_space<vmem>>, vector<1x1x128xf32>
      tpu.vector_store %arg6[%c0_15, %c0_16, %c0_17], %16 {strides = array<i32>} : memref<1x1x128xf32, #tpu.memory_space<vmem>>, vector<1x1x128xf32>,
      %18 = arith.mulf %12, %12 : vector<32x128xf32>
      %cst_18 = arith.constant dense<0.000000e+00> : vector<128xf32>
      %19 = vector.multi_reduction <add>, %18, %cst_18 [0] : vector<32x128xf32> to vector<128xf32>
      %20 = vector.shape_cast %19 : vector<128xf32> to vector<1x128xf32>
      %21 = vector.shape_cast %20 : vector<1x128xf32> to vector<1x1x128xf32>
      %c0_19 = arith.constant 0 : index
      %c0_20 = arith.constant 0 : index
      %c0_21 = arith.constant 0 : index
      %22 = vector.load %arg7[%c0_19, %c0_20, %c0_21] : memref<1x1x128xf32, #tpu.memory_space<vmem>>, vector<1x1x128xf32>
      tpu.vector_store %arg7[%c0_19, %c0_20, %c0_21], %21 {strides = array<i32>} : memref<1x1x128xf32, #tpu.memory_space<vmem>>, vector<1x1x128xf32>,
    } else {
    }
    return
  }
  func.func @transform_0(%arg0: i32, %arg1: i32, %arg2: i32) -> (i32, i32) {
    %c0_i32 = arith.constant 0 : i32
    return %arg0, %arg2 : i32, i32
  }
  func.func @transform_1(%arg0: i32, %arg1: i32, %arg2: i32) -> (i32, i32) {
    %c0_i32 = arith.constant 0 : i32
    return %arg2, %arg1 : i32, i32
  }
  func.func @transform_2(%arg0: i32, %arg1: i32, %arg2: i32) -> (i32, i32) {
    %c0_i32 = arith.constant 0 : i32
    return %arg0, %arg1 : i32, i32
  }
  func.func @transform_3(%arg0: i32, %arg1: i32, %arg2: i32) -> (i32, i32, i32) {
    %c0_i32 = arith.constant 0 : i32
    %c0_i32_0 = arith.constant 0 : i32
    return %arg0, %c0_i32, %arg1 : i32, i32, i32
  }
  func.func @transform_4(%arg0: i32, %arg1: i32, %arg2: i32) -> (i32, i32, i32) {
    %c0_i32 = arith.constant 0 : i32
    %c0_i32_0 = arith.constant 0 : i32
    return %arg0, %c0_i32, %arg1 : i32, i32, i32
  }
}

module attributes {stable_mosaic.version = 11 : i64} {
  func.func @_bn_kernel(%arg0: i32, %arg1: i32, %arg2: memref<32x128xf32, #tpu.memory_space<vmem>>, %arg3: memref<1x128xf32, #tpu.memory_space<vmem>>, %arg4: memref<1x128xf32, #tpu.memory_space<vmem>>, %arg5: memref<32x128xf32, #tpu.memory_space<vmem>>) attributes {dimension_semantics = [#tpu.dimension_semantics<parallel>, #tpu.dimension_semantics<parallel>], iteration_bounds = array<i64: 1, 1>, scalar_prefetch = 0 : i64, scratch_operands = 0 : i64, tpu.core_type = #tpu.core_type<tc>, window_params = [{transform_indices = @transform_0, window_bounds = array<i64: 32, 128>}, {transform_indices = @transform_1, window_bounds = array<i64: 1, 128>}, {transform_indices = @transform_2, window_bounds = array<i64: 1, 128>}, {transform_indices = @transform_3, window_bounds = array<i64: 32, 128>}]} {
    %c0 = arith.constant 0 : index
    %c0_0 = arith.constant 0 : index
    %0 = vector.load %arg2[%c0, %c0_0] : memref<32x128xf32, #tpu.memory_space<vmem>>, vector<32x128xf32>
    %c0_1 = arith.constant 0 : index
    %c0_2 = arith.constant 0 : index
    %1 = vector.load %arg3[%c0_1, %c0_2] : memref<1x128xf32, #tpu.memory_space<vmem>>, vector<1x128xf32>
    %2 = vector.broadcast %1 : vector<1x128xf32> to vector<32x128xf32>
    %3 = arith.mulf %0, %2 : vector<32x128xf32>
    %c0_3 = arith.constant 0 : index
    %c0_4 = arith.constant 0 : index
    %4 = vector.load %arg4[%c0_3, %c0_4] : memref<1x128xf32, #tpu.memory_space<vmem>>, vector<1x128xf32>
    %5 = vector.broadcast %4 : vector<1x128xf32> to vector<32x128xf32>
    %6 = arith.addf %3, %5 : vector<32x128xf32>
    %c0_5 = arith.constant 0 : index
    %c0_6 = arith.constant 0 : index
    %7 = vector.load %arg5[%c0_5, %c0_6] : memref<32x128xf32, #tpu.memory_space<vmem>>, vector<32x128xf32>
    tpu.vector_store %arg5[%c0_5, %c0_6], %6 {strides = array<i32>} : memref<32x128xf32, #tpu.memory_space<vmem>>, vector<32x128xf32>,
    return
  }
  func.func @transform_0(%arg0: i32, %arg1: i32) -> (i32, i32) {
    %c0_i32 = arith.constant 0 : i32
    return %arg0, %arg1 : i32, i32
  }
  func.func @transform_1(%arg0: i32, %arg1: i32) -> (i32, i32) {
    %c0_i32 = arith.constant 0 : i32
    %c0_i32_0 = arith.constant 0 : i32
    return %c0_i32, %arg1 : i32, i32
  }
  func.func @transform_2(%arg0: i32, %arg1: i32) -> (i32, i32) {
    %c0_i32 = arith.constant 0 : i32
    %c0_i32_0 = arith.constant 0 : i32
    return %c0_i32, %arg1 : i32, i32
  }
  func.func @transform_3(%arg0: i32, %arg1: i32) -> (i32, i32) {
    %c0_i32 = arith.constant 0 : i32
    return %arg0, %arg1 : i32, i32
  }
}

module attributes {stable_mosaic.version = 11 : i64} {
  func.func @_bn_relu_kernel(%arg0: i32, %arg1: i32, %arg2: memref<32x128xf32, #tpu.memory_space<vmem>>, %arg3: memref<1x128xf32, #tpu.memory_space<vmem>>, %arg4: memref<1x128xf32, #tpu.memory_space<vmem>>, %arg5: memref<32x128xf32, #tpu.memory_space<vmem>>) attributes {dimension_semantics = [#tpu.dimension_semantics<parallel>, #tpu.dimension_semantics<parallel>], iteration_bounds = array<i64: 1, 1>, scalar_prefetch = 0 : i64, scratch_operands = 0 : i64, tpu.core_type = #tpu.core_type<tc>, window_params = [{transform_indices = @transform_0, window_bounds = array<i64: 32, 128>}, {transform_indices = @transform_1, window_bounds = array<i64: 1, 128>}, {transform_indices = @transform_2, window_bounds = array<i64: 1, 128>}, {transform_indices = @transform_3, window_bounds = array<i64: 32, 128>}]} {
    %c0 = arith.constant 0 : index
    %c0_0 = arith.constant 0 : index
    %0 = vector.load %arg2[%c0, %c0_0] : memref<32x128xf32, #tpu.memory_space<vmem>>, vector<32x128xf32>
    %c0_1 = arith.constant 0 : index
    %c0_2 = arith.constant 0 : index
    %1 = vector.load %arg3[%c0_1, %c0_2] : memref<1x128xf32, #tpu.memory_space<vmem>>, vector<1x128xf32>
    %2 = vector.broadcast %1 : vector<1x128xf32> to vector<32x128xf32>
    %3 = arith.mulf %0, %2 : vector<32x128xf32>
    %c0_3 = arith.constant 0 : index
    %c0_4 = arith.constant 0 : index
    %4 = vector.load %arg4[%c0_3, %c0_4] : memref<1x128xf32, #tpu.memory_space<vmem>>, vector<1x128xf32>
    %5 = vector.broadcast %4 : vector<1x128xf32> to vector<32x128xf32>
    %6 = arith.addf %3, %5 : vector<32x128xf32>
    %cst = arith.constant 0.000000e+00 : f32
    %7 = vector.broadcast %cst : f32 to vector<32x128xf32>
    %8 = arith.maximumf %6, %7 : vector<32x128xf32>
    %c0_5 = arith.constant 0 : index
    %c0_6 = arith.constant 0 : index
    %9 = vector.load %arg5[%c0_5, %c0_6] : memref<32x128xf32, #tpu.memory_space<vmem>>, vector<32x128xf32>
    tpu.vector_store %arg5[%c0_5, %c0_6], %8 {strides = array<i32>} : memref<32x128xf32, #tpu.memory_space<vmem>>, vector<32x128xf32>,
    return
  }
  func.func @transform_0(%arg0: i32, %arg1: i32) -> (i32, i32) {
    %c0_i32 = arith.constant 0 : i32
    return %arg0, %arg1 : i32, i32
  }
  func.func @transform_1(%arg0: i32, %arg1: i32) -> (i32, i32) {
    %c0_i32 = arith.constant 0 : i32
    %c0_i32_0 = arith.constant 0 : i32
    return %c0_i32, %arg1 : i32, i32
  }
  func.func @transform_2(%arg0: i32, %arg1: i32) -> (i32, i32) {
    %c0_i32 = arith.constant 0 : i32
    %c0_i32_0 = arith.constant 0 : i32
    return %c0_i32, %arg1 : i32, i32
  }
  func.func @transform_3(%arg0: i32, %arg1: i32) -> (i32, i32) {
    %c0_i32 = arith.constant 0 : i32
    return %arg0, %arg1 : i32, i32
  }
}

module attributes {stable_mosaic.version = 11 : i64} {
  func.func @_matmul_stats_kernel(%arg0: i32, %arg1: i32, %arg2: i32, %arg3: memref<32x128xbf16, #tpu.memory_space<vmem>>, %arg4: memref<128x128xbf16, #tpu.memory_space<vmem>>, %arg5: memref<32x128xf32, #tpu.memory_space<vmem>>, %arg6: memref<1x1x128xf32, #tpu.memory_space<vmem>>, %arg7: memref<1x1x128xf32, #tpu.memory_space<vmem>>, %arg8: memref<32x128xf32, #tpu.memory_space<vmem>>) attributes {dimension_semantics = [#tpu.dimension_semantics<parallel>, #tpu.dimension_semantics<parallel>, #tpu.dimension_semantics<arbitrary>], iteration_bounds = array<i64: 1, 1, 5>, scalar_prefetch = 0 : i64, scratch_operands = 1 : i64, tpu.core_type = #tpu.core_type<tc>, window_params = [{transform_indices = @transform_0, window_bounds = array<i64: 32, 128>}, {transform_indices = @transform_1, window_bounds = array<i64: 128, 128>}, {transform_indices = @transform_2, window_bounds = array<i64: 32, 128>}, {transform_indices = @transform_3, window_bounds = array<i64: 1, 1, 128>}, {transform_indices = @transform_4, window_bounds = array<i64: 1, 1, 128>}]} {
    %c0_i32 = arith.constant 0 : i32
    %0 = arith.cmpi eq, %arg2, %c0_i32 : i32
    %1 = arith.extui %0 : i1 to i32
    %c0_i32_0 = arith.constant 0 : i32
    %2 = arith.cmpi ne, %1, %c0_i32_0 : i32
    scf.if %2 {
      %cst_9 = arith.constant 0.000000e+00 : f32
      %12 = vector.broadcast %cst_9 : f32 to vector<32x128xf32>
      %c0_10 = arith.constant 0 : index
      %c0_11 = arith.constant 0 : index
      %13 = vector.load %arg8[%c0_10, %c0_11] : memref<32x128xf32, #tpu.memory_space<vmem>>, vector<32x128xf32>
      tpu.vector_store %arg8[%c0_10, %c0_11], %12 {strides = array<i32>} : memref<32x128xf32, #tpu.memory_space<vmem>>, vector<32x128xf32>,
    } else {
    }
    %c0 = arith.constant 0 : index
    %c0_1 = arith.constant 0 : index
    %3 = vector.load %arg8[%c0, %c0_1] : memref<32x128xf32, #tpu.memory_space<vmem>>, vector<32x128xf32>
    %c0_2 = arith.constant 0 : index
    %c0_3 = arith.constant 0 : index
    %4 = vector.load %arg3[%c0_2, %c0_3] : memref<32x128xbf16, #tpu.memory_space<vmem>>, vector<32x128xbf16>
    %c0_4 = arith.constant 0 : index
    %c0_5 = arith.constant 0 : index
    %5 = vector.load %arg4[%c0_4, %c0_5] : memref<128x128xbf16, #tpu.memory_space<vmem>>, vector<128x128xbf16>
    %cst = arith.constant dense<0.000000e+00> : vector<32x128xf32>
    %6 = tpu.matmul %4, %5, %cst {dimension_numbers = #tpu.dot_dimension_numbers<[1], [0], [0], [1], [0, 0, 1, 1], [], []>} : vector<32x128xbf16>, vector<128x128xbf16>, vector<32x128xf32> -> vector<32x128xf32>
    %7 = arith.addf %3, %6 : vector<32x128xf32>
    %c0_6 = arith.constant 0 : index
    %c0_7 = arith.constant 0 : index
    %8 = vector.load %arg8[%c0_6, %c0_7] : memref<32x128xf32, #tpu.memory_space<vmem>>, vector<32x128xf32>
    tpu.vector_store %arg8[%c0_6, %c0_7], %7 {strides = array<i32>} : memref<32x128xf32, #tpu.memory_space<vmem>>, vector<32x128xf32>,
    %c4_i32 = arith.constant 4 : i32
    %9 = arith.cmpi eq, %arg2, %c4_i32 : i32
    %10 = arith.extui %9 : i1 to i32
    %c0_i32_8 = arith.constant 0 : i32
    %11 = arith.cmpi ne, %10, %c0_i32_8 : i32
    scf.if %11 {
      %c0_9 = arith.constant 0 : index
      %c0_10 = arith.constant 0 : index
      %12 = vector.load %arg8[%c0_9, %c0_10] : memref<32x128xf32, #tpu.memory_space<vmem>>, vector<32x128xf32>
      %c0_11 = arith.constant 0 : index
      %c0_12 = arith.constant 0 : index
      %13 = vector.load %arg5[%c0_11, %c0_12] : memref<32x128xf32, #tpu.memory_space<vmem>>, vector<32x128xf32>
      tpu.vector_store %arg5[%c0_11, %c0_12], %12 {strides = array<i32>} : memref<32x128xf32, #tpu.memory_space<vmem>>, vector<32x128xf32>,
      %cst_13 = arith.constant dense<0.000000e+00> : vector<128xf32>
      %14 = vector.multi_reduction <add>, %12, %cst_13 [0] : vector<32x128xf32> to vector<128xf32>
      %15 = vector.shape_cast %14 : vector<128xf32> to vector<1x128xf32>
      %16 = vector.shape_cast %15 : vector<1x128xf32> to vector<1x1x128xf32>
      %c0_14 = arith.constant 0 : index
      %c0_15 = arith.constant 0 : index
      %c0_16 = arith.constant 0 : index
      %17 = vector.load %arg6[%c0_14, %c0_15, %c0_16] : memref<1x1x128xf32, #tpu.memory_space<vmem>>, vector<1x1x128xf32>
      tpu.vector_store %arg6[%c0_14, %c0_15, %c0_16], %16 {strides = array<i32>} : memref<1x1x128xf32, #tpu.memory_space<vmem>>, vector<1x1x128xf32>,
      %18 = arith.mulf %12, %12 : vector<32x128xf32>
      %cst_17 = arith.constant dense<0.000000e+00> : vector<128xf32>
      %19 = vector.multi_reduction <add>, %18, %cst_17 [0] : vector<32x128xf32> to vector<128xf32>
      %20 = vector.shape_cast %19 : vector<128xf32> to vector<1x128xf32>
      %21 = vector.shape_cast %20 : vector<1x128xf32> to vector<1x1x128xf32>
      %c0_18 = arith.constant 0 : index
      %c0_19 = arith.constant 0 : index
      %c0_20 = arith.constant 0 : index
      %22 = vector.load %arg7[%c0_18, %c0_19, %c0_20] : memref<1x1x128xf32, #tpu.memory_space<vmem>>, vector<1x1x128xf32>
      tpu.vector_store %arg7[%c0_18, %c0_19, %c0_20], %21 {strides = array<i32>} : memref<1x1x128xf32, #tpu.memory_space<vmem>>, vector<1x1x128xf32>,
    } else {
    }
    return
  }
  func.func @transform_0(%arg0: i32, %arg1: i32, %arg2: i32) -> (i32, i32) {
    %c0_i32 = arith.constant 0 : i32
    return %arg0, %arg2 : i32, i32
  }
  func.func @transform_1(%arg0: i32, %arg1: i32, %arg2: i32) -> (i32, i32) {
    %c0_i32 = arith.constant 0 : i32
    return %arg2, %arg1 : i32, i32
  }
  func.func @transform_2(%arg0: i32, %arg1: i32, %arg2: i32) -> (i32, i32) {
    %c0_i32 = arith.constant 0 : i32
    return %arg0, %arg1 : i32, i32
  }
  func.func @transform_3(%arg0: i32, %arg1: i32, %arg2: i32) -> (i32, i32, i32) {
    %c0_i32 = arith.constant 0 : i32
    %c0_i32_0 = arith.constant 0 : i32
    return %arg0, %c0_i32, %arg1 : i32, i32, i32
  }
  func.func @transform_4(%arg0: i32, %arg1: i32, %arg2: i32) -> (i32, i32, i32) {
    %c0_i32 = arith.constant 0 : i32
    %c0_i32_0 = arith.constant 0 : i32
    return %arg0, %c0_i32, %arg1 : i32, i32, i32
  }
}

module attributes {stable_mosaic.version = 11 : i64} {
  func.func @_matmul_stats_kernel(%arg0: i32, %arg1: i32, %arg2: i32, %arg3: memref<32x128xbf16, #tpu.memory_space<vmem>>, %arg4: memref<128x128xbf16, #tpu.memory_space<vmem>>, %arg5: memref<32x128xf32, #tpu.memory_space<vmem>>, %arg6: memref<1x1x128xf32, #tpu.memory_space<vmem>>, %arg7: memref<1x1x128xf32, #tpu.memory_space<vmem>>, %arg8: memref<32x128xf32, #tpu.memory_space<vmem>>) attributes {dimension_semantics = [#tpu.dimension_semantics<parallel>, #tpu.dimension_semantics<parallel>, #tpu.dimension_semantics<arbitrary>], iteration_bounds = array<i64: 1, 1, 9>, scalar_prefetch = 0 : i64, scratch_operands = 1 : i64, tpu.core_type = #tpu.core_type<tc>, window_params = [{transform_indices = @transform_0, window_bounds = array<i64: 32, 128>}, {transform_indices = @transform_1, window_bounds = array<i64: 128, 128>}, {transform_indices = @transform_2, window_bounds = array<i64: 32, 128>}, {transform_indices = @transform_3, window_bounds = array<i64: 1, 1, 128>}, {transform_indices = @transform_4, window_bounds = array<i64: 1, 1, 128>}]} {
    %c0_i32 = arith.constant 0 : i32
    %0 = arith.cmpi eq, %arg2, %c0_i32 : i32
    %1 = arith.extui %0 : i1 to i32
    %c0_i32_0 = arith.constant 0 : i32
    %2 = arith.cmpi ne, %1, %c0_i32_0 : i32
    scf.if %2 {
      %cst_9 = arith.constant 0.000000e+00 : f32
      %12 = vector.broadcast %cst_9 : f32 to vector<32x128xf32>
      %c0_10 = arith.constant 0 : index
      %c0_11 = arith.constant 0 : index
      %13 = vector.load %arg8[%c0_10, %c0_11] : memref<32x128xf32, #tpu.memory_space<vmem>>, vector<32x128xf32>
      tpu.vector_store %arg8[%c0_10, %c0_11], %12 {strides = array<i32>} : memref<32x128xf32, #tpu.memory_space<vmem>>, vector<32x128xf32>,
    } else {
    }
    %c0 = arith.constant 0 : index
    %c0_1 = arith.constant 0 : index
    %3 = vector.load %arg8[%c0, %c0_1] : memref<32x128xf32, #tpu.memory_space<vmem>>, vector<32x128xf32>
    %c0_2 = arith.constant 0 : index
    %c0_3 = arith.constant 0 : index
    %4 = vector.load %arg3[%c0_2, %c0_3] : memref<32x128xbf16, #tpu.memory_space<vmem>>, vector<32x128xbf16>
    %c0_4 = arith.constant 0 : index
    %c0_5 = arith.constant 0 : index
    %5 = vector.load %arg4[%c0_4, %c0_5] : memref<128x128xbf16, #tpu.memory_space<vmem>>, vector<128x128xbf16>
    %cst = arith.constant dense<0.000000e+00> : vector<32x128xf32>
    %6 = tpu.matmul %4, %5, %cst {dimension_numbers = #tpu.dot_dimension_numbers<[1], [0], [0], [1], [0, 0, 1, 1], [], []>} : vector<32x128xbf16>, vector<128x128xbf16>, vector<32x128xf32> -> vector<32x128xf32>
    %7 = arith.addf %3, %6 : vector<32x128xf32>
    %c0_6 = arith.constant 0 : index
    %c0_7 = arith.constant 0 : index
    %8 = vector.load %arg8[%c0_6, %c0_7] : memref<32x128xf32, #tpu.memory_space<vmem>>, vector<32x128xf32>
    tpu.vector_store %arg8[%c0_6, %c0_7], %7 {strides = array<i32>} : memref<32x128xf32, #tpu.memory_space<vmem>>, vector<32x128xf32>,
    %c8_i32 = arith.constant 8 : i32
    %9 = arith.cmpi eq, %arg2, %c8_i32 : i32
    %10 = arith.extui %9 : i1 to i32
    %c0_i32_8 = arith.constant 0 : i32
    %11 = arith.cmpi ne, %10, %c0_i32_8 : i32
    scf.if %11 {
      %c0_9 = arith.constant 0 : index
      %c0_10 = arith.constant 0 : index
      %12 = vector.load %arg8[%c0_9, %c0_10] : memref<32x128xf32, #tpu.memory_space<vmem>>, vector<32x128xf32>
      %c0_11 = arith.constant 0 : index
      %c0_12 = arith.constant 0 : index
      %13 = vector.load %arg5[%c0_11, %c0_12] : memref<32x128xf32, #tpu.memory_space<vmem>>, vector<32x128xf32>
      tpu.vector_store %arg5[%c0_11, %c0_12], %12 {strides = array<i32>} : memref<32x128xf32, #tpu.memory_space<vmem>>, vector<32x128xf32>,
      %cst_13 = arith.constant dense<0.000000e+00> : vector<128xf32>
      %14 = vector.multi_reduction <add>, %12, %cst_13 [0] : vector<32x128xf32> to vector<128xf32>
      %15 = vector.shape_cast %14 : vector<128xf32> to vector<1x128xf32>
      %16 = vector.shape_cast %15 : vector<1x128xf32> to vector<1x1x128xf32>
      %c0_14 = arith.constant 0 : index
      %c0_15 = arith.constant 0 : index
      %c0_16 = arith.constant 0 : index
      %17 = vector.load %arg6[%c0_14, %c0_15, %c0_16] : memref<1x1x128xf32, #tpu.memory_space<vmem>>, vector<1x1x128xf32>
      tpu.vector_store %arg6[%c0_14, %c0_15, %c0_16], %16 {strides = array<i32>} : memref<1x1x128xf32, #tpu.memory_space<vmem>>, vector<1x1x128xf32>,
      %18 = arith.mulf %12, %12 : vector<32x128xf32>
      %cst_17 = arith.constant dense<0.000000e+00> : vector<128xf32>
      %19 = vector.multi_reduction <add>, %18, %cst_17 [0] : vector<32x128xf32> to vector<128xf32>
      %20 = vector.shape_cast %19 : vector<128xf32> to vector<1x128xf32>
      %21 = vector.shape_cast %20 : vector<1x128xf32> to vector<1x1x128xf32>
      %c0_18 = arith.constant 0 : index
      %c0_19 = arith.constant 0 : index
      %c0_20 = arith.constant 0 : index
      %22 = vector.load %arg7[%c0_18, %c0_19, %c0_20] : memref<1x1x128xf32, #tpu.memory_space<vmem>>, vector<1x1x128xf32>
      tpu.vector_store %arg7[%c0_18, %c0_19, %c0_20], %21 {strides = array<i32>} : memref<1x1x128xf32, #tpu.memory_space<vmem>>, vector<1x1x128xf32>,
    } else {
    }
    return
  }
  func.func @transform_0(%arg0: i32, %arg1: i32, %arg2: i32) -> (i32, i32) {
    %c0_i32 = arith.constant 0 : i32
    return %arg0, %arg2 : i32, i32
  }
  func.func @transform_1(%arg0: i32, %arg1: i32, %arg2: i32) -> (i32, i32) {
    %c0_i32 = arith.constant 0 : i32
    return %arg2, %arg1 : i32, i32
  }
  func.func @transform_2(%arg0: i32, %arg1: i32, %arg2: i32) -> (i32, i32) {
    %c0_i32 = arith.constant 0 : i32
    return %arg0, %arg1 : i32, i32
  }
  func.func @transform_3(%arg0: i32, %arg1: i32, %arg2: i32) -> (i32, i32, i32) {
    %c0_i32 = arith.constant 0 : i32
    %c0_i32_0 = arith.constant 0 : i32
    return %arg0, %c0_i32, %arg1 : i32, i32, i32
  }
  func.func @transform_4(%arg0: i32, %arg1: i32, %arg2: i32) -> (i32, i32, i32) {
    %c0_i32 = arith.constant 0 : i32
    %c0_i32_0 = arith.constant 0 : i32
    return %arg0, %c0_i32, %arg1 : i32, i32, i32
  }
}

module attributes {stable_mosaic.version = 11 : i64} {
  func.func @_bn_add_relu_kernel(%arg0: i32, %arg1: i32, %arg2: memref<32x128xf32, #tpu.memory_space<vmem>>, %arg3: memref<1x128xf32, #tpu.memory_space<vmem>>, %arg4: memref<1x128xf32, #tpu.memory_space<vmem>>, %arg5: memref<32x128xf32, #tpu.memory_space<vmem>>, %arg6: memref<32x128xf32, #tpu.memory_space<vmem>>) attributes {dimension_semantics = [#tpu.dimension_semantics<parallel>, #tpu.dimension_semantics<parallel>], iteration_bounds = array<i64: 1, 1>, scalar_prefetch = 0 : i64, scratch_operands = 0 : i64, tpu.core_type = #tpu.core_type<tc>, window_params = [{transform_indices = @transform_0, window_bounds = array<i64: 32, 128>}, {transform_indices = @transform_1, window_bounds = array<i64: 1, 128>}, {transform_indices = @transform_2, window_bounds = array<i64: 1, 128>}, {transform_indices = @transform_3, window_bounds = array<i64: 32, 128>}, {transform_indices = @transform_4, window_bounds = array<i64: 32, 128>}]} {
    %c0 = arith.constant 0 : index
    %c0_0 = arith.constant 0 : index
    %0 = vector.load %arg2[%c0, %c0_0] : memref<32x128xf32, #tpu.memory_space<vmem>>, vector<32x128xf32>
    %c0_1 = arith.constant 0 : index
    %c0_2 = arith.constant 0 : index
    %1 = vector.load %arg3[%c0_1, %c0_2] : memref<1x128xf32, #tpu.memory_space<vmem>>, vector<1x128xf32>
    %2 = vector.broadcast %1 : vector<1x128xf32> to vector<32x128xf32>
    %3 = arith.mulf %0, %2 : vector<32x128xf32>
    %c0_3 = arith.constant 0 : index
    %c0_4 = arith.constant 0 : index
    %4 = vector.load %arg4[%c0_3, %c0_4] : memref<1x128xf32, #tpu.memory_space<vmem>>, vector<1x128xf32>
    %5 = vector.broadcast %4 : vector<1x128xf32> to vector<32x128xf32>
    %6 = arith.addf %3, %5 : vector<32x128xf32>
    %c0_5 = arith.constant 0 : index
    %c0_6 = arith.constant 0 : index
    %7 = vector.load %arg5[%c0_5, %c0_6] : memref<32x128xf32, #tpu.memory_space<vmem>>, vector<32x128xf32>
    %8 = arith.addf %6, %7 : vector<32x128xf32>
    %cst = arith.constant 0.000000e+00 : f32
    %9 = vector.broadcast %cst : f32 to vector<32x128xf32>
    %10 = arith.maximumf %8, %9 : vector<32x128xf32>
    %c0_7 = arith.constant 0 : index
    %c0_8 = arith.constant 0 : index
    %11 = vector.load %arg6[%c0_7, %c0_8] : memref<32x128xf32, #tpu.memory_space<vmem>>, vector<32x128xf32>
    tpu.vector_store %arg6[%c0_7, %c0_8], %10 {strides = array<i32>} : memref<32x128xf32, #tpu.memory_space<vmem>>, vector<32x128xf32>,
    return
  }
  func.func @transform_0(%arg0: i32, %arg1: i32) -> (i32, i32) {
    %c0_i32 = arith.constant 0 : i32
    return %arg0, %arg1 : i32, i32
  }
  func.func @transform_1(%arg0: i32, %arg1: i32) -> (i32, i32) {
    %c0_i32 = arith.constant 0 : i32
    %c0_i32_0 = arith.constant 0 : i32
    return %c0_i32, %arg1 : i32, i32
  }
  func.func @transform_2(%arg0: i32, %arg1: i32) -> (i32, i32) {
    %c0_i32 = arith.constant 0 : i32
    %c0_i32_0 = arith.constant 0 : i32
    return %c0_i32, %arg1 : i32, i32
  }
  func.func @transform_3(%arg0: i32, %arg1: i32) -> (i32, i32) {
    %c0_i32 = arith.constant 0 : i32
    return %arg0, %arg1 : i32, i32
  }
  func.func @transform_4(%arg0: i32, %arg1: i32) -> (i32, i32) {
    %c0_i32 = arith.constant 0 : i32
    return %arg0, %arg1 : i32, i32
  }
}

module attributes {stable_mosaic.version = 11 : i64} {
  func.func @_bn_kernel(%arg0: i32, %arg1: i32, %arg2: memref<8x256xf32, #tpu.memory_space<vmem>>, %arg3: memref<1x256xf32, #tpu.memory_space<vmem>>, %arg4: memref<1x256xf32, #tpu.memory_space<vmem>>, %arg5: memref<8x256xf32, #tpu.memory_space<vmem>>) attributes {dimension_semantics = [#tpu.dimension_semantics<parallel>, #tpu.dimension_semantics<parallel>], iteration_bounds = array<i64: 1, 1>, scalar_prefetch = 0 : i64, scratch_operands = 0 : i64, tpu.core_type = #tpu.core_type<tc>, window_params = [{transform_indices = @transform_0, window_bounds = array<i64: 8, 256>}, {transform_indices = @transform_1, window_bounds = array<i64: 1, 256>}, {transform_indices = @transform_2, window_bounds = array<i64: 1, 256>}, {transform_indices = @transform_3, window_bounds = array<i64: 8, 256>}]} {
    %c0 = arith.constant 0 : index
    %c0_0 = arith.constant 0 : index
    %0 = vector.load %arg2[%c0, %c0_0] : memref<8x256xf32, #tpu.memory_space<vmem>>, vector<8x256xf32>
    %c0_1 = arith.constant 0 : index
    %c0_2 = arith.constant 0 : index
    %1 = vector.load %arg3[%c0_1, %c0_2] : memref<1x256xf32, #tpu.memory_space<vmem>>, vector<1x256xf32>
    %2 = vector.broadcast %1 : vector<1x256xf32> to vector<8x256xf32>
    %3 = arith.mulf %0, %2 : vector<8x256xf32>
    %c0_3 = arith.constant 0 : index
    %c0_4 = arith.constant 0 : index
    %4 = vector.load %arg4[%c0_3, %c0_4] : memref<1x256xf32, #tpu.memory_space<vmem>>, vector<1x256xf32>
    %5 = vector.broadcast %4 : vector<1x256xf32> to vector<8x256xf32>
    %6 = arith.addf %3, %5 : vector<8x256xf32>
    %c0_5 = arith.constant 0 : index
    %c0_6 = arith.constant 0 : index
    %7 = vector.load %arg5[%c0_5, %c0_6] : memref<8x256xf32, #tpu.memory_space<vmem>>, vector<8x256xf32>
    tpu.vector_store %arg5[%c0_5, %c0_6], %6 {strides = array<i32>} : memref<8x256xf32, #tpu.memory_space<vmem>>, vector<8x256xf32>,
    return
  }
  func.func @transform_0(%arg0: i32, %arg1: i32) -> (i32, i32) {
    %c0_i32 = arith.constant 0 : i32
    return %arg0, %arg1 : i32, i32
  }
  func.func @transform_1(%arg0: i32, %arg1: i32) -> (i32, i32) {
    %c0_i32 = arith.constant 0 : i32
    %c0_i32_0 = arith.constant 0 : i32
    return %c0_i32, %arg1 : i32, i32
  }
  func.func @transform_2(%arg0: i32, %arg1: i32) -> (i32, i32) {
    %c0_i32 = arith.constant 0 : i32
    %c0_i32_0 = arith.constant 0 : i32
    return %c0_i32, %arg1 : i32, i32
  }
  func.func @transform_3(%arg0: i32, %arg1: i32) -> (i32, i32) {
    %c0_i32 = arith.constant 0 : i32
    return %arg0, %arg1 : i32, i32
  }
}

module attributes {stable_mosaic.version = 11 : i64} {
  func.func @_matmul_stats_kernel(%arg0: i32, %arg1: i32, %arg2: i32, %arg3: memref<8x128xbf16, #tpu.memory_space<vmem>>, %arg4: memref<128x256xbf16, #tpu.memory_space<vmem>>, %arg5: memref<8x256xf32, #tpu.memory_space<vmem>>, %arg6: memref<1x1x256xf32, #tpu.memory_space<vmem>>, %arg7: memref<1x1x256xf32, #tpu.memory_space<vmem>>, %arg8: memref<8x256xf32, #tpu.memory_space<vmem>>) attributes {dimension_semantics = [#tpu.dimension_semantics<parallel>, #tpu.dimension_semantics<parallel>, #tpu.dimension_semantics<arbitrary>], iteration_bounds = array<i64: 1, 1, 1>, scalar_prefetch = 0 : i64, scratch_operands = 1 : i64, tpu.core_type = #tpu.core_type<tc>, window_params = [{transform_indices = @transform_0, window_bounds = array<i64: 8, 128>}, {transform_indices = @transform_1, window_bounds = array<i64: 128, 256>}, {transform_indices = @transform_2, window_bounds = array<i64: 8, 256>}, {transform_indices = @transform_3, window_bounds = array<i64: 1, 1, 256>}, {transform_indices = @transform_4, window_bounds = array<i64: 1, 1, 256>}]} {
    %c0_i32 = arith.constant 0 : i32
    %0 = arith.cmpi eq, %arg2, %c0_i32 : i32
    %1 = arith.extui %0 : i1 to i32
    %c0_i32_0 = arith.constant 0 : i32
    %2 = arith.cmpi ne, %1, %c0_i32_0 : i32
    scf.if %2 {
      %cst_10 = arith.constant 0.000000e+00 : f32
      %12 = vector.broadcast %cst_10 : f32 to vector<8x256xf32>
      %c0_11 = arith.constant 0 : index
      %c0_12 = arith.constant 0 : index
      %13 = vector.load %arg8[%c0_11, %c0_12] : memref<8x256xf32, #tpu.memory_space<vmem>>, vector<8x256xf32>
      tpu.vector_store %arg8[%c0_11, %c0_12], %12 {strides = array<i32>} : memref<8x256xf32, #tpu.memory_space<vmem>>, vector<8x256xf32>,
    } else {
    }
    %c0 = arith.constant 0 : index
    %c0_1 = arith.constant 0 : index
    %3 = vector.load %arg8[%c0, %c0_1] : memref<8x256xf32, #tpu.memory_space<vmem>>, vector<8x256xf32>
    %c0_2 = arith.constant 0 : index
    %c0_3 = arith.constant 0 : index
    %4 = vector.load %arg3[%c0_2, %c0_3] : memref<8x128xbf16, #tpu.memory_space<vmem>>, vector<8x128xbf16>
    %c0_4 = arith.constant 0 : index
    %c0_5 = arith.constant 0 : index
    %5 = vector.load %arg4[%c0_4, %c0_5] : memref<128x256xbf16, #tpu.memory_space<vmem>>, vector<128x256xbf16>
    %cst = arith.constant dense<0.000000e+00> : vector<8x256xf32>
    %6 = tpu.matmul %4, %5, %cst {dimension_numbers = #tpu.dot_dimension_numbers<[1], [0], [0], [1], [0, 0, 1, 1], [], []>} : vector<8x128xbf16>, vector<128x256xbf16>, vector<8x256xf32> -> vector<8x256xf32>
    %7 = arith.addf %3, %6 : vector<8x256xf32>
    %c0_6 = arith.constant 0 : index
    %c0_7 = arith.constant 0 : index
    %8 = vector.load %arg8[%c0_6, %c0_7] : memref<8x256xf32, #tpu.memory_space<vmem>>, vector<8x256xf32>
    tpu.vector_store %arg8[%c0_6, %c0_7], %7 {strides = array<i32>} : memref<8x256xf32, #tpu.memory_space<vmem>>, vector<8x256xf32>,
    %c0_i32_8 = arith.constant 0 : i32
    %9 = arith.cmpi eq, %arg2, %c0_i32_8 : i32
    %10 = arith.extui %9 : i1 to i32
    %c0_i32_9 = arith.constant 0 : i32
    %11 = arith.cmpi ne, %10, %c0_i32_9 : i32
    scf.if %11 {
      %c0_10 = arith.constant 0 : index
      %c0_11 = arith.constant 0 : index
      %12 = vector.load %arg8[%c0_10, %c0_11] : memref<8x256xf32, #tpu.memory_space<vmem>>, vector<8x256xf32>
      %c0_12 = arith.constant 0 : index
      %c0_13 = arith.constant 0 : index
      %13 = vector.load %arg5[%c0_12, %c0_13] : memref<8x256xf32, #tpu.memory_space<vmem>>, vector<8x256xf32>
      tpu.vector_store %arg5[%c0_12, %c0_13], %12 {strides = array<i32>} : memref<8x256xf32, #tpu.memory_space<vmem>>, vector<8x256xf32>,
      %cst_14 = arith.constant dense<0.000000e+00> : vector<256xf32>
      %14 = vector.multi_reduction <add>, %12, %cst_14 [0] : vector<8x256xf32> to vector<256xf32>
      %15 = vector.shape_cast %14 : vector<256xf32> to vector<1x256xf32>
      %16 = vector.shape_cast %15 : vector<1x256xf32> to vector<1x1x256xf32>
      %c0_15 = arith.constant 0 : index
      %c0_16 = arith.constant 0 : index
      %c0_17 = arith.constant 0 : index
      %17 = vector.load %arg6[%c0_15, %c0_16, %c0_17] : memref<1x1x256xf32, #tpu.memory_space<vmem>>, vector<1x1x256xf32>
      tpu.vector_store %arg6[%c0_15, %c0_16, %c0_17], %16 {strides = array<i32>} : memref<1x1x256xf32, #tpu.memory_space<vmem>>, vector<1x1x256xf32>,
      %18 = arith.mulf %12, %12 : vector<8x256xf32>
      %cst_18 = arith.constant dense<0.000000e+00> : vector<256xf32>
      %19 = vector.multi_reduction <add>, %18, %cst_18 [0] : vector<8x256xf32> to vector<256xf32>
      %20 = vector.shape_cast %19 : vector<256xf32> to vector<1x256xf32>
      %21 = vector.shape_cast %20 : vector<1x256xf32> to vector<1x1x256xf32>
      %c0_19 = arith.constant 0 : index
      %c0_20 = arith.constant 0 : index
      %c0_21 = arith.constant 0 : index
      %22 = vector.load %arg7[%c0_19, %c0_20, %c0_21] : memref<1x1x256xf32, #tpu.memory_space<vmem>>, vector<1x1x256xf32>
      tpu.vector_store %arg7[%c0_19, %c0_20, %c0_21], %21 {strides = array<i32>} : memref<1x1x256xf32, #tpu.memory_space<vmem>>, vector<1x1x256xf32>,
    } else {
    }
    return
  }
  func.func @transform_0(%arg0: i32, %arg1: i32, %arg2: i32) -> (i32, i32) {
    %c0_i32 = arith.constant 0 : i32
    return %arg0, %arg2 : i32, i32
  }
  func.func @transform_1(%arg0: i32, %arg1: i32, %arg2: i32) -> (i32, i32) {
    %c0_i32 = arith.constant 0 : i32
    return %arg2, %arg1 : i32, i32
  }
  func.func @transform_2(%arg0: i32, %arg1: i32, %arg2: i32) -> (i32, i32) {
    %c0_i32 = arith.constant 0 : i32
    return %arg0, %arg1 : i32, i32
  }
  func.func @transform_3(%arg0: i32, %arg1: i32, %arg2: i32) -> (i32, i32, i32) {
    %c0_i32 = arith.constant 0 : i32
    %c0_i32_0 = arith.constant 0 : i32
    return %arg0, %c0_i32, %arg1 : i32, i32, i32
  }
  func.func @transform_4(%arg0: i32, %arg1: i32, %arg2: i32) -> (i32, i32, i32) {
    %c0_i32 = arith.constant 0 : i32
    %c0_i32_0 = arith.constant 0 : i32
    return %arg0, %c0_i32, %arg1 : i32, i32, i32
  }
}

module attributes {stable_mosaic.version = 11 : i64} {
  func.func @_matmul_stats_kernel(%arg0: i32, %arg1: i32, %arg2: i32, %arg3: memref<8x128xbf16, #tpu.memory_space<vmem>>, %arg4: memref<128x256xbf16, #tpu.memory_space<vmem>>, %arg5: memref<8x256xf32, #tpu.memory_space<vmem>>, %arg6: memref<1x1x256xf32, #tpu.memory_space<vmem>>, %arg7: memref<1x1x256xf32, #tpu.memory_space<vmem>>, %arg8: memref<8x256xf32, #tpu.memory_space<vmem>>) attributes {dimension_semantics = [#tpu.dimension_semantics<parallel>, #tpu.dimension_semantics<parallel>, #tpu.dimension_semantics<arbitrary>], iteration_bounds = array<i64: 1, 1, 9>, scalar_prefetch = 0 : i64, scratch_operands = 1 : i64, tpu.core_type = #tpu.core_type<tc>, window_params = [{transform_indices = @transform_0, window_bounds = array<i64: 8, 128>}, {transform_indices = @transform_1, window_bounds = array<i64: 128, 256>}, {transform_indices = @transform_2, window_bounds = array<i64: 8, 256>}, {transform_indices = @transform_3, window_bounds = array<i64: 1, 1, 256>}, {transform_indices = @transform_4, window_bounds = array<i64: 1, 1, 256>}]} {
    %c0_i32 = arith.constant 0 : i32
    %0 = arith.cmpi eq, %arg2, %c0_i32 : i32
    %1 = arith.extui %0 : i1 to i32
    %c0_i32_0 = arith.constant 0 : i32
    %2 = arith.cmpi ne, %1, %c0_i32_0 : i32
    scf.if %2 {
      %cst_9 = arith.constant 0.000000e+00 : f32
      %12 = vector.broadcast %cst_9 : f32 to vector<8x256xf32>
      %c0_10 = arith.constant 0 : index
      %c0_11 = arith.constant 0 : index
      %13 = vector.load %arg8[%c0_10, %c0_11] : memref<8x256xf32, #tpu.memory_space<vmem>>, vector<8x256xf32>
      tpu.vector_store %arg8[%c0_10, %c0_11], %12 {strides = array<i32>} : memref<8x256xf32, #tpu.memory_space<vmem>>, vector<8x256xf32>,
    } else {
    }
    %c0 = arith.constant 0 : index
    %c0_1 = arith.constant 0 : index
    %3 = vector.load %arg8[%c0, %c0_1] : memref<8x256xf32, #tpu.memory_space<vmem>>, vector<8x256xf32>
    %c0_2 = arith.constant 0 : index
    %c0_3 = arith.constant 0 : index
    %4 = vector.load %arg3[%c0_2, %c0_3] : memref<8x128xbf16, #tpu.memory_space<vmem>>, vector<8x128xbf16>
    %c0_4 = arith.constant 0 : index
    %c0_5 = arith.constant 0 : index
    %5 = vector.load %arg4[%c0_4, %c0_5] : memref<128x256xbf16, #tpu.memory_space<vmem>>, vector<128x256xbf16>
    %cst = arith.constant dense<0.000000e+00> : vector<8x256xf32>
    %6 = tpu.matmul %4, %5, %cst {dimension_numbers = #tpu.dot_dimension_numbers<[1], [0], [0], [1], [0, 0, 1, 1], [], []>} : vector<8x128xbf16>, vector<128x256xbf16>, vector<8x256xf32> -> vector<8x256xf32>
    %7 = arith.addf %3, %6 : vector<8x256xf32>
    %c0_6 = arith.constant 0 : index
    %c0_7 = arith.constant 0 : index
    %8 = vector.load %arg8[%c0_6, %c0_7] : memref<8x256xf32, #tpu.memory_space<vmem>>, vector<8x256xf32>
    tpu.vector_store %arg8[%c0_6, %c0_7], %7 {strides = array<i32>} : memref<8x256xf32, #tpu.memory_space<vmem>>, vector<8x256xf32>,
    %c8_i32 = arith.constant 8 : i32
    %9 = arith.cmpi eq, %arg2, %c8_i32 : i32
    %10 = arith.extui %9 : i1 to i32
    %c0_i32_8 = arith.constant 0 : i32
    %11 = arith.cmpi ne, %10, %c0_i32_8 : i32
    scf.if %11 {
      %c0_9 = arith.constant 0 : index
      %c0_10 = arith.constant 0 : index
      %12 = vector.load %arg8[%c0_9, %c0_10] : memref<8x256xf32, #tpu.memory_space<vmem>>, vector<8x256xf32>
      %c0_11 = arith.constant 0 : index
      %c0_12 = arith.constant 0 : index
      %13 = vector.load %arg5[%c0_11, %c0_12] : memref<8x256xf32, #tpu.memory_space<vmem>>, vector<8x256xf32>
      tpu.vector_store %arg5[%c0_11, %c0_12], %12 {strides = array<i32>} : memref<8x256xf32, #tpu.memory_space<vmem>>, vector<8x256xf32>,
      %cst_13 = arith.constant dense<0.000000e+00> : vector<256xf32>
      %14 = vector.multi_reduction <add>, %12, %cst_13 [0] : vector<8x256xf32> to vector<256xf32>
      %15 = vector.shape_cast %14 : vector<256xf32> to vector<1x256xf32>
      %16 = vector.shape_cast %15 : vector<1x256xf32> to vector<1x1x256xf32>
      %c0_14 = arith.constant 0 : index
      %c0_15 = arith.constant 0 : index
      %c0_16 = arith.constant 0 : index
      %17 = vector.load %arg6[%c0_14, %c0_15, %c0_16] : memref<1x1x256xf32, #tpu.memory_space<vmem>>, vector<1x1x256xf32>
      tpu.vector_store %arg6[%c0_14, %c0_15, %c0_16], %16 {strides = array<i32>} : memref<1x1x256xf32, #tpu.memory_space<vmem>>, vector<1x1x256xf32>,
      %18 = arith.mulf %12, %12 : vector<8x256xf32>
      %cst_17 = arith.constant dense<0.000000e+00> : vector<256xf32>
      %19 = vector.multi_reduction <add>, %18, %cst_17 [0] : vector<8x256xf32> to vector<256xf32>
      %20 = vector.shape_cast %19 : vector<256xf32> to vector<1x256xf32>
      %21 = vector.shape_cast %20 : vector<1x256xf32> to vector<1x1x256xf32>
      %c0_18 = arith.constant 0 : index
      %c0_19 = arith.constant 0 : index
      %c0_20 = arith.constant 0 : index
      %22 = vector.load %arg7[%c0_18, %c0_19, %c0_20] : memref<1x1x256xf32, #tpu.memory_space<vmem>>, vector<1x1x256xf32>
      tpu.vector_store %arg7[%c0_18, %c0_19, %c0_20], %21 {strides = array<i32>} : memref<1x1x256xf32, #tpu.memory_space<vmem>>, vector<1x1x256xf32>,
    } else {
    }
    return
  }
  func.func @transform_0(%arg0: i32, %arg1: i32, %arg2: i32) -> (i32, i32) {
    %c0_i32 = arith.constant 0 : i32
    return %arg0, %arg2 : i32, i32
  }
  func.func @transform_1(%arg0: i32, %arg1: i32, %arg2: i32) -> (i32, i32) {
    %c0_i32 = arith.constant 0 : i32
    return %arg2, %arg1 : i32, i32
  }
  func.func @transform_2(%arg0: i32, %arg1: i32, %arg2: i32) -> (i32, i32) {
    %c0_i32 = arith.constant 0 : i32
    return %arg0, %arg1 : i32, i32
  }
  func.func @transform_3(%arg0: i32, %arg1: i32, %arg2: i32) -> (i32, i32, i32) {
    %c0_i32 = arith.constant 0 : i32
    %c0_i32_0 = arith.constant 0 : i32
    return %arg0, %c0_i32, %arg1 : i32, i32, i32
  }
  func.func @transform_4(%arg0: i32, %arg1: i32, %arg2: i32) -> (i32, i32, i32) {
    %c0_i32 = arith.constant 0 : i32
    %c0_i32_0 = arith.constant 0 : i32
    return %arg0, %c0_i32, %arg1 : i32, i32, i32
  }
}

module attributes {stable_mosaic.version = 11 : i64} {
  func.func @_bn_relu_kernel(%arg0: i32, %arg1: i32, %arg2: memref<8x256xf32, #tpu.memory_space<vmem>>, %arg3: memref<1x256xf32, #tpu.memory_space<vmem>>, %arg4: memref<1x256xf32, #tpu.memory_space<vmem>>, %arg5: memref<8x256xf32, #tpu.memory_space<vmem>>) attributes {dimension_semantics = [#tpu.dimension_semantics<parallel>, #tpu.dimension_semantics<parallel>], iteration_bounds = array<i64: 1, 1>, scalar_prefetch = 0 : i64, scratch_operands = 0 : i64, tpu.core_type = #tpu.core_type<tc>, window_params = [{transform_indices = @transform_0, window_bounds = array<i64: 8, 256>}, {transform_indices = @transform_1, window_bounds = array<i64: 1, 256>}, {transform_indices = @transform_2, window_bounds = array<i64: 1, 256>}, {transform_indices = @transform_3, window_bounds = array<i64: 8, 256>}]} {
    %c0 = arith.constant 0 : index
    %c0_0 = arith.constant 0 : index
    %0 = vector.load %arg2[%c0, %c0_0] : memref<8x256xf32, #tpu.memory_space<vmem>>, vector<8x256xf32>
    %c0_1 = arith.constant 0 : index
    %c0_2 = arith.constant 0 : index
    %1 = vector.load %arg3[%c0_1, %c0_2] : memref<1x256xf32, #tpu.memory_space<vmem>>, vector<1x256xf32>
    %2 = vector.broadcast %1 : vector<1x256xf32> to vector<8x256xf32>
    %3 = arith.mulf %0, %2 : vector<8x256xf32>
    %c0_3 = arith.constant 0 : index
    %c0_4 = arith.constant 0 : index
    %4 = vector.load %arg4[%c0_3, %c0_4] : memref<1x256xf32, #tpu.memory_space<vmem>>, vector<1x256xf32>
    %5 = vector.broadcast %4 : vector<1x256xf32> to vector<8x256xf32>
    %6 = arith.addf %3, %5 : vector<8x256xf32>
    %cst = arith.constant 0.000000e+00 : f32
    %7 = vector.broadcast %cst : f32 to vector<8x256xf32>
    %8 = arith.maximumf %6, %7 : vector<8x256xf32>
    %c0_5 = arith.constant 0 : index
    %c0_6 = arith.constant 0 : index
    %9 = vector.load %arg5[%c0_5, %c0_6] : memref<8x256xf32, #tpu.memory_space<vmem>>, vector<8x256xf32>
    tpu.vector_store %arg5[%c0_5, %c0_6], %8 {strides = array<i32>} : memref<8x256xf32, #tpu.memory_space<vmem>>, vector<8x256xf32>,
    return
  }
  func.func @transform_0(%arg0: i32, %arg1: i32) -> (i32, i32) {
    %c0_i32 = arith.constant 0 : i32
    return %arg0, %arg1 : i32, i32
  }
  func.func @transform_1(%arg0: i32, %arg1: i32) -> (i32, i32) {
    %c0_i32 = arith.constant 0 : i32
    %c0_i32_0 = arith.constant 0 : i32
    return %c0_i32, %arg1 : i32, i32
  }
  func.func @transform_2(%arg0: i32, %arg1: i32) -> (i32, i32) {
    %c0_i32 = arith.constant 0 : i32
    %c0_i32_0 = arith.constant 0 : i32
    return %c0_i32, %arg1 : i32, i32
  }
  func.func @transform_3(%arg0: i32, %arg1: i32) -> (i32, i32) {
    %c0_i32 = arith.constant 0 : i32
    return %arg0, %arg1 : i32, i32
  }
}

module attributes {stable_mosaic.version = 11 : i64} {
  func.func @_matmul_stats_kernel(%arg0: i32, %arg1: i32, %arg2: i32, %arg3: memref<8x256xbf16, #tpu.memory_space<vmem>>, %arg4: memref<256x256xbf16, #tpu.memory_space<vmem>>, %arg5: memref<8x256xf32, #tpu.memory_space<vmem>>, %arg6: memref<1x1x256xf32, #tpu.memory_space<vmem>>, %arg7: memref<1x1x256xf32, #tpu.memory_space<vmem>>, %arg8: memref<8x256xf32, #tpu.memory_space<vmem>>) attributes {dimension_semantics = [#tpu.dimension_semantics<parallel>, #tpu.dimension_semantics<parallel>, #tpu.dimension_semantics<arbitrary>], iteration_bounds = array<i64: 1, 1, 9>, scalar_prefetch = 0 : i64, scratch_operands = 1 : i64, tpu.core_type = #tpu.core_type<tc>, window_params = [{transform_indices = @transform_0, window_bounds = array<i64: 8, 256>}, {transform_indices = @transform_1, window_bounds = array<i64: 256, 256>}, {transform_indices = @transform_2, window_bounds = array<i64: 8, 256>}, {transform_indices = @transform_3, window_bounds = array<i64: 1, 1, 256>}, {transform_indices = @transform_4, window_bounds = array<i64: 1, 1, 256>}]} {
    %c0_i32 = arith.constant 0 : i32
    %0 = arith.cmpi eq, %arg2, %c0_i32 : i32
    %1 = arith.extui %0 : i1 to i32
    %c0_i32_0 = arith.constant 0 : i32
    %2 = arith.cmpi ne, %1, %c0_i32_0 : i32
    scf.if %2 {
      %cst_9 = arith.constant 0.000000e+00 : f32
      %12 = vector.broadcast %cst_9 : f32 to vector<8x256xf32>
      %c0_10 = arith.constant 0 : index
      %c0_11 = arith.constant 0 : index
      %13 = vector.load %arg8[%c0_10, %c0_11] : memref<8x256xf32, #tpu.memory_space<vmem>>, vector<8x256xf32>
      tpu.vector_store %arg8[%c0_10, %c0_11], %12 {strides = array<i32>} : memref<8x256xf32, #tpu.memory_space<vmem>>, vector<8x256xf32>,
    } else {
    }
    %c0 = arith.constant 0 : index
    %c0_1 = arith.constant 0 : index
    %3 = vector.load %arg8[%c0, %c0_1] : memref<8x256xf32, #tpu.memory_space<vmem>>, vector<8x256xf32>
    %c0_2 = arith.constant 0 : index
    %c0_3 = arith.constant 0 : index
    %4 = vector.load %arg3[%c0_2, %c0_3] : memref<8x256xbf16, #tpu.memory_space<vmem>>, vector<8x256xbf16>
    %c0_4 = arith.constant 0 : index
    %c0_5 = arith.constant 0 : index
    %5 = vector.load %arg4[%c0_4, %c0_5] : memref<256x256xbf16, #tpu.memory_space<vmem>>, vector<256x256xbf16>
    %cst = arith.constant dense<0.000000e+00> : vector<8x256xf32>
    %6 = tpu.matmul %4, %5, %cst {dimension_numbers = #tpu.dot_dimension_numbers<[1], [0], [0], [1], [0, 0, 1, 1], [], []>} : vector<8x256xbf16>, vector<256x256xbf16>, vector<8x256xf32> -> vector<8x256xf32>
    %7 = arith.addf %3, %6 : vector<8x256xf32>
    %c0_6 = arith.constant 0 : index
    %c0_7 = arith.constant 0 : index
    %8 = vector.load %arg8[%c0_6, %c0_7] : memref<8x256xf32, #tpu.memory_space<vmem>>, vector<8x256xf32>
    tpu.vector_store %arg8[%c0_6, %c0_7], %7 {strides = array<i32>} : memref<8x256xf32, #tpu.memory_space<vmem>>, vector<8x256xf32>,
    %c8_i32 = arith.constant 8 : i32
    %9 = arith.cmpi eq, %arg2, %c8_i32 : i32
    %10 = arith.extui %9 : i1 to i32
    %c0_i32_8 = arith.constant 0 : i32
    %11 = arith.cmpi ne, %10, %c0_i32_8 : i32
    scf.if %11 {
      %c0_9 = arith.constant 0 : index
      %c0_10 = arith.constant 0 : index
      %12 = vector.load %arg8[%c0_9, %c0_10] : memref<8x256xf32, #tpu.memory_space<vmem>>, vector<8x256xf32>
      %c0_11 = arith.constant 0 : index
      %c0_12 = arith.constant 0 : index
      %13 = vector.load %arg5[%c0_11, %c0_12] : memref<8x256xf32, #tpu.memory_space<vmem>>, vector<8x256xf32>
      tpu.vector_store %arg5[%c0_11, %c0_12], %12 {strides = array<i32>} : memref<8x256xf32, #tpu.memory_space<vmem>>, vector<8x256xf32>,
      %cst_13 = arith.constant dense<0.000000e+00> : vector<256xf32>
      %14 = vector.multi_reduction <add>, %12, %cst_13 [0] : vector<8x256xf32> to vector<256xf32>
      %15 = vector.shape_cast %14 : vector<256xf32> to vector<1x256xf32>
      %16 = vector.shape_cast %15 : vector<1x256xf32> to vector<1x1x256xf32>
      %c0_14 = arith.constant 0 : index
      %c0_15 = arith.constant 0 : index
      %c0_16 = arith.constant 0 : index
      %17 = vector.load %arg6[%c0_14, %c0_15, %c0_16] : memref<1x1x256xf32, #tpu.memory_space<vmem>>, vector<1x1x256xf32>
      tpu.vector_store %arg6[%c0_14, %c0_15, %c0_16], %16 {strides = array<i32>} : memref<1x1x256xf32, #tpu.memory_space<vmem>>, vector<1x1x256xf32>,
      %18 = arith.mulf %12, %12 : vector<8x256xf32>
      %cst_17 = arith.constant dense<0.000000e+00> : vector<256xf32>
      %19 = vector.multi_reduction <add>, %18, %cst_17 [0] : vector<8x256xf32> to vector<256xf32>
      %20 = vector.shape_cast %19 : vector<256xf32> to vector<1x256xf32>
      %21 = vector.shape_cast %20 : vector<1x256xf32> to vector<1x1x256xf32>
      %c0_18 = arith.constant 0 : index
      %c0_19 = arith.constant 0 : index
      %c0_20 = arith.constant 0 : index
      %22 = vector.load %arg7[%c0_18, %c0_19, %c0_20] : memref<1x1x256xf32, #tpu.memory_space<vmem>>, vector<1x1x256xf32>
      tpu.vector_store %arg7[%c0_18, %c0_19, %c0_20], %21 {strides = array<i32>} : memref<1x1x256xf32, #tpu.memory_space<vmem>>, vector<1x1x256xf32>,
    } else {
    }
    return
  }
  func.func @transform_0(%arg0: i32, %arg1: i32, %arg2: i32) -> (i32, i32) {
    %c0_i32 = arith.constant 0 : i32
    return %arg0, %arg2 : i32, i32
  }
  func.func @transform_1(%arg0: i32, %arg1: i32, %arg2: i32) -> (i32, i32) {
    %c0_i32 = arith.constant 0 : i32
    return %arg2, %arg1 : i32, i32
  }
  func.func @transform_2(%arg0: i32, %arg1: i32, %arg2: i32) -> (i32, i32) {
    %c0_i32 = arith.constant 0 : i32
    return %arg0, %arg1 : i32, i32
  }
  func.func @transform_3(%arg0: i32, %arg1: i32, %arg2: i32) -> (i32, i32, i32) {
    %c0_i32 = arith.constant 0 : i32
    %c0_i32_0 = arith.constant 0 : i32
    return %arg0, %c0_i32, %arg1 : i32, i32, i32
  }
  func.func @transform_4(%arg0: i32, %arg1: i32, %arg2: i32) -> (i32, i32, i32) {
    %c0_i32 = arith.constant 0 : i32
    %c0_i32_0 = arith.constant 0 : i32
    return %arg0, %c0_i32, %arg1 : i32, i32, i32
  }
}

module attributes {stable_mosaic.version = 11 : i64} {
  func.func @_bn_add_relu_kernel(%arg0: i32, %arg1: i32, %arg2: memref<8x256xf32, #tpu.memory_space<vmem>>, %arg3: memref<1x256xf32, #tpu.memory_space<vmem>>, %arg4: memref<1x256xf32, #tpu.memory_space<vmem>>, %arg5: memref<8x256xf32, #tpu.memory_space<vmem>>, %arg6: memref<8x256xf32, #tpu.memory_space<vmem>>) attributes {dimension_semantics = [#tpu.dimension_semantics<parallel>, #tpu.dimension_semantics<parallel>], iteration_bounds = array<i64: 1, 1>, scalar_prefetch = 0 : i64, scratch_operands = 0 : i64, tpu.core_type = #tpu.core_type<tc>, window_params = [{transform_indices = @transform_0, window_bounds = array<i64: 8, 256>}, {transform_indices = @transform_1, window_bounds = array<i64: 1, 256>}, {transform_indices = @transform_2, window_bounds = array<i64: 1, 256>}, {transform_indices = @transform_3, window_bounds = array<i64: 8, 256>}, {transform_indices = @transform_4, window_bounds = array<i64: 8, 256>}]} {
    %c0 = arith.constant 0 : index
    %c0_0 = arith.constant 0 : index
    %0 = vector.load %arg2[%c0, %c0_0] : memref<8x256xf32, #tpu.memory_space<vmem>>, vector<8x256xf32>
    %c0_1 = arith.constant 0 : index
    %c0_2 = arith.constant 0 : index
    %1 = vector.load %arg3[%c0_1, %c0_2] : memref<1x256xf32, #tpu.memory_space<vmem>>, vector<1x256xf32>
    %2 = vector.broadcast %1 : vector<1x256xf32> to vector<8x256xf32>
    %3 = arith.mulf %0, %2 : vector<8x256xf32>
    %c0_3 = arith.constant 0 : index
    %c0_4 = arith.constant 0 : index
    %4 = vector.load %arg4[%c0_3, %c0_4] : memref<1x256xf32, #tpu.memory_space<vmem>>, vector<1x256xf32>
    %5 = vector.broadcast %4 : vector<1x256xf32> to vector<8x256xf32>
    %6 = arith.addf %3, %5 : vector<8x256xf32>
    %c0_5 = arith.constant 0 : index
    %c0_6 = arith.constant 0 : index
    %7 = vector.load %arg5[%c0_5, %c0_6] : memref<8x256xf32, #tpu.memory_space<vmem>>, vector<8x256xf32>
    %8 = arith.addf %6, %7 : vector<8x256xf32>
    %cst = arith.constant 0.000000e+00 : f32
    %9 = vector.broadcast %cst : f32 to vector<8x256xf32>
    %10 = arith.maximumf %8, %9 : vector<8x256xf32>
    %c0_7 = arith.constant 0 : index
    %c0_8 = arith.constant 0 : index
    %11 = vector.load %arg6[%c0_7, %c0_8] : memref<8x256xf32, #tpu.memory_space<vmem>>, vector<8x256xf32>
    tpu.vector_store %arg6[%c0_7, %c0_8], %10 {strides = array<i32>} : memref<8x256xf32, #tpu.memory_space<vmem>>, vector<8x256xf32>,
    return
  }
  func.func @transform_0(%arg0: i32, %arg1: i32) -> (i32, i32) {
    %c0_i32 = arith.constant 0 : i32
    return %arg0, %arg1 : i32, i32
  }
  func.func @transform_1(%arg0: i32, %arg1: i32) -> (i32, i32) {
    %c0_i32 = arith.constant 0 : i32
    %c0_i32_0 = arith.constant 0 : i32
    return %c0_i32, %arg1 : i32, i32
  }
  func.func @transform_2(%arg0: i32, %arg1: i32) -> (i32, i32) {
    %c0_i32 = arith.constant 0 : i32
    %c0_i32_0 = arith.constant 0 : i32
    return %c0_i32, %arg1 : i32, i32
  }
  func.func @transform_3(%arg0: i32, %arg1: i32) -> (i32, i32) {
    %c0_i32 = arith.constant 0 : i32
    return %arg0, %arg1 : i32, i32
  }
  func.func @transform_4(%arg0: i32, %arg1: i32) -> (i32, i32) {
    %c0_i32 = arith.constant 0 : i32
    return %arg0, %arg1 : i32, i32
  }
}

module attributes {stable_mosaic.version = 11 : i64} {
  func.func @_matmul_stats_kernel(%arg0: i32, %arg1: i32, %arg2: i32, %arg3: memref<8x256xbf16, #tpu.memory_space<vmem>>, %arg4: memref<256x256xbf16, #tpu.memory_space<vmem>>, %arg5: memref<8x256xf32, #tpu.memory_space<vmem>>, %arg6: memref<1x1x256xf32, #tpu.memory_space<vmem>>, %arg7: memref<1x1x256xf32, #tpu.memory_space<vmem>>, %arg8: memref<8x256xf32, #tpu.memory_space<vmem>>) attributes {dimension_semantics = [#tpu.dimension_semantics<parallel>, #tpu.dimension_semantics<parallel>, #tpu.dimension_semantics<arbitrary>], iteration_bounds = array<i64: 1, 2, 1>, scalar_prefetch = 0 : i64, scratch_operands = 1 : i64, tpu.core_type = #tpu.core_type<tc>, window_params = [{transform_indices = @transform_0, window_bounds = array<i64: 8, 256>}, {transform_indices = @transform_1, window_bounds = array<i64: 256, 256>}, {transform_indices = @transform_2, window_bounds = array<i64: 8, 256>}, {transform_indices = @transform_3, window_bounds = array<i64: 1, 1, 256>}, {transform_indices = @transform_4, window_bounds = array<i64: 1, 1, 256>}]} {
    %c0_i32 = arith.constant 0 : i32
    %0 = arith.cmpi eq, %arg2, %c0_i32 : i32
    %1 = arith.extui %0 : i1 to i32
    %c0_i32_0 = arith.constant 0 : i32
    %2 = arith.cmpi ne, %1, %c0_i32_0 : i32
    scf.if %2 {
      %cst_10 = arith.constant 0.000000e+00 : f32
      %12 = vector.broadcast %cst_10 : f32 to vector<8x256xf32>
      %c0_11 = arith.constant 0 : index
      %c0_12 = arith.constant 0 : index
      %13 = vector.load %arg8[%c0_11, %c0_12] : memref<8x256xf32, #tpu.memory_space<vmem>>, vector<8x256xf32>
      tpu.vector_store %arg8[%c0_11, %c0_12], %12 {strides = array<i32>} : memref<8x256xf32, #tpu.memory_space<vmem>>, vector<8x256xf32>,
    } else {
    }
    %c0 = arith.constant 0 : index
    %c0_1 = arith.constant 0 : index
    %3 = vector.load %arg8[%c0, %c0_1] : memref<8x256xf32, #tpu.memory_space<vmem>>, vector<8x256xf32>
    %c0_2 = arith.constant 0 : index
    %c0_3 = arith.constant 0 : index
    %4 = vector.load %arg3[%c0_2, %c0_3] : memref<8x256xbf16, #tpu.memory_space<vmem>>, vector<8x256xbf16>
    %c0_4 = arith.constant 0 : index
    %c0_5 = arith.constant 0 : index
    %5 = vector.load %arg4[%c0_4, %c0_5] : memref<256x256xbf16, #tpu.memory_space<vmem>>, vector<256x256xbf16>
    %cst = arith.constant dense<0.000000e+00> : vector<8x256xf32>
    %6 = tpu.matmul %4, %5, %cst {dimension_numbers = #tpu.dot_dimension_numbers<[1], [0], [0], [1], [0, 0, 1, 1], [], []>} : vector<8x256xbf16>, vector<256x256xbf16>, vector<8x256xf32> -> vector<8x256xf32>
    %7 = arith.addf %3, %6 : vector<8x256xf32>
    %c0_6 = arith.constant 0 : index
    %c0_7 = arith.constant 0 : index
    %8 = vector.load %arg8[%c0_6, %c0_7] : memref<8x256xf32, #tpu.memory_space<vmem>>, vector<8x256xf32>
    tpu.vector_store %arg8[%c0_6, %c0_7], %7 {strides = array<i32>} : memref<8x256xf32, #tpu.memory_space<vmem>>, vector<8x256xf32>,
    %c0_i32_8 = arith.constant 0 : i32
    %9 = arith.cmpi eq, %arg2, %c0_i32_8 : i32
    %10 = arith.extui %9 : i1 to i32
    %c0_i32_9 = arith.constant 0 : i32
    %11 = arith.cmpi ne, %10, %c0_i32_9 : i32
    scf.if %11 {
      %c0_10 = arith.constant 0 : index
      %c0_11 = arith.constant 0 : index
      %12 = vector.load %arg8[%c0_10, %c0_11] : memref<8x256xf32, #tpu.memory_space<vmem>>, vector<8x256xf32>
      %c0_12 = arith.constant 0 : index
      %c0_13 = arith.constant 0 : index
      %13 = vector.load %arg5[%c0_12, %c0_13] : memref<8x256xf32, #tpu.memory_space<vmem>>, vector<8x256xf32>
      tpu.vector_store %arg5[%c0_12, %c0_13], %12 {strides = array<i32>} : memref<8x256xf32, #tpu.memory_space<vmem>>, vector<8x256xf32>,
      %cst_14 = arith.constant dense<0.000000e+00> : vector<256xf32>
      %14 = vector.multi_reduction <add>, %12, %cst_14 [0] : vector<8x256xf32> to vector<256xf32>
      %15 = vector.shape_cast %14 : vector<256xf32> to vector<1x256xf32>
      %16 = vector.shape_cast %15 : vector<1x256xf32> to vector<1x1x256xf32>
      %c0_15 = arith.constant 0 : index
      %c0_16 = arith.constant 0 : index
      %c0_17 = arith.constant 0 : index
      %17 = vector.load %arg6[%c0_15, %c0_16, %c0_17] : memref<1x1x256xf32, #tpu.memory_space<vmem>>, vector<1x1x256xf32>
      tpu.vector_store %arg6[%c0_15, %c0_16, %c0_17], %16 {strides = array<i32>} : memref<1x1x256xf32, #tpu.memory_space<vmem>>, vector<1x1x256xf32>,
      %18 = arith.mulf %12, %12 : vector<8x256xf32>
      %cst_18 = arith.constant dense<0.000000e+00> : vector<256xf32>
      %19 = vector.multi_reduction <add>, %18, %cst_18 [0] : vector<8x256xf32> to vector<256xf32>
      %20 = vector.shape_cast %19 : vector<256xf32> to vector<1x256xf32>
      %21 = vector.shape_cast %20 : vector<1x256xf32> to vector<1x1x256xf32>
      %c0_19 = arith.constant 0 : index
      %c0_20 = arith.constant 0 : index
      %c0_21 = arith.constant 0 : index
      %22 = vector.load %arg7[%c0_19, %c0_20, %c0_21] : memref<1x1x256xf32, #tpu.memory_space<vmem>>, vector<1x1x256xf32>
      tpu.vector_store %arg7[%c0_19, %c0_20, %c0_21], %21 {strides = array<i32>} : memref<1x1x256xf32, #tpu.memory_space<vmem>>, vector<1x1x256xf32>,
    } else {
    }
    return
  }
  func.func @transform_0(%arg0: i32, %arg1: i32, %arg2: i32) -> (i32, i32) {
    %c0_i32 = arith.constant 0 : i32
    return %arg0, %arg2 : i32, i32
  }
  func.func @transform_1(%arg0: i32, %arg1: i32, %arg2: i32) -> (i32, i32) {
    %c0_i32 = arith.constant 0 : i32
    return %arg2, %arg1 : i32, i32
  }
  func.func @transform_2(%arg0: i32, %arg1: i32, %arg2: i32) -> (i32, i32) {
    %c0_i32 = arith.constant 0 : i32
    return %arg0, %arg1 : i32, i32
  }
  func.func @transform_3(%arg0: i32, %arg1: i32, %arg2: i32) -> (i32, i32, i32) {
    %c0_i32 = arith.constant 0 : i32
    %c0_i32_0 = arith.constant 0 : i32
    return %arg0, %c0_i32, %arg1 : i32, i32, i32
  }
  func.func @transform_4(%arg0: i32, %arg1: i32, %arg2: i32) -> (i32, i32, i32) {
    %c0_i32 = arith.constant 0 : i32
    %c0_i32_0 = arith.constant 0 : i32
    return %arg0, %c0_i32, %arg1 : i32, i32, i32
  }
}

module attributes {stable_mosaic.version = 11 : i64} {
  func.func @_bn_kernel(%arg0: i32, %arg1: i32, %arg2: memref<8x256xf32, #tpu.memory_space<vmem>>, %arg3: memref<1x256xf32, #tpu.memory_space<vmem>>, %arg4: memref<1x256xf32, #tpu.memory_space<vmem>>, %arg5: memref<8x256xf32, #tpu.memory_space<vmem>>) attributes {dimension_semantics = [#tpu.dimension_semantics<parallel>, #tpu.dimension_semantics<parallel>], iteration_bounds = array<i64: 1, 2>, scalar_prefetch = 0 : i64, scratch_operands = 0 : i64, tpu.core_type = #tpu.core_type<tc>, window_params = [{transform_indices = @transform_0, window_bounds = array<i64: 8, 256>}, {transform_indices = @transform_1, window_bounds = array<i64: 1, 256>}, {transform_indices = @transform_2, window_bounds = array<i64: 1, 256>}, {transform_indices = @transform_3, window_bounds = array<i64: 8, 256>}]} {
    %c0 = arith.constant 0 : index
    %c0_0 = arith.constant 0 : index
    %0 = vector.load %arg2[%c0, %c0_0] : memref<8x256xf32, #tpu.memory_space<vmem>>, vector<8x256xf32>
    %c0_1 = arith.constant 0 : index
    %c0_2 = arith.constant 0 : index
    %1 = vector.load %arg3[%c0_1, %c0_2] : memref<1x256xf32, #tpu.memory_space<vmem>>, vector<1x256xf32>
    %2 = vector.broadcast %1 : vector<1x256xf32> to vector<8x256xf32>
    %3 = arith.mulf %0, %2 : vector<8x256xf32>
    %c0_3 = arith.constant 0 : index
    %c0_4 = arith.constant 0 : index
    %4 = vector.load %arg4[%c0_3, %c0_4] : memref<1x256xf32, #tpu.memory_space<vmem>>, vector<1x256xf32>
    %5 = vector.broadcast %4 : vector<1x256xf32> to vector<8x256xf32>
    %6 = arith.addf %3, %5 : vector<8x256xf32>
    %c0_5 = arith.constant 0 : index
    %c0_6 = arith.constant 0 : index
    %7 = vector.load %arg5[%c0_5, %c0_6] : memref<8x256xf32, #tpu.memory_space<vmem>>, vector<8x256xf32>
    tpu.vector_store %arg5[%c0_5, %c0_6], %6 {strides = array<i32>} : memref<8x256xf32, #tpu.memory_space<vmem>>, vector<8x256xf32>,
    return
  }
  func.func @transform_0(%arg0: i32, %arg1: i32) -> (i32, i32) {
    %c0_i32 = arith.constant 0 : i32
    return %arg0, %arg1 : i32, i32
  }
  func.func @transform_1(%arg0: i32, %arg1: i32) -> (i32, i32) {
    %c0_i32 = arith.constant 0 : i32
    %c0_i32_0 = arith.constant 0 : i32
    return %c0_i32, %arg1 : i32, i32
  }
  func.func @transform_2(%arg0: i32, %arg1: i32) -> (i32, i32) {
    %c0_i32 = arith.constant 0 : i32
    %c0_i32_0 = arith.constant 0 : i32
    return %c0_i32, %arg1 : i32, i32
  }
  func.func @transform_3(%arg0: i32, %arg1: i32) -> (i32, i32) {
    %c0_i32 = arith.constant 0 : i32
    return %arg0, %arg1 : i32, i32
  }
}

module attributes {stable_mosaic.version = 11 : i64} {
  func.func @_matmul_stats_kernel(%arg0: i32, %arg1: i32, %arg2: i32, %arg3: memref<8x256xbf16, #tpu.memory_space<vmem>>, %arg4: memref<256x256xbf16, #tpu.memory_space<vmem>>, %arg5: memref<8x256xf32, #tpu.memory_space<vmem>>, %arg6: memref<1x1x256xf32, #tpu.memory_space<vmem>>, %arg7: memref<1x1x256xf32, #tpu.memory_space<vmem>>, %arg8: memref<8x256xf32, #tpu.memory_space<vmem>>) attributes {dimension_semantics = [#tpu.dimension_semantics<parallel>, #tpu.dimension_semantics<parallel>, #tpu.dimension_semantics<arbitrary>], iteration_bounds = array<i64: 1, 2, 9>, scalar_prefetch = 0 : i64, scratch_operands = 1 : i64, tpu.core_type = #tpu.core_type<tc>, window_params = [{transform_indices = @transform_0, window_bounds = array<i64: 8, 256>}, {transform_indices = @transform_1, window_bounds = array<i64: 256, 256>}, {transform_indices = @transform_2, window_bounds = array<i64: 8, 256>}, {transform_indices = @transform_3, window_bounds = array<i64: 1, 1, 256>}, {transform_indices = @transform_4, window_bounds = array<i64: 1, 1, 256>}]} {
    %c0_i32 = arith.constant 0 : i32
    %0 = arith.cmpi eq, %arg2, %c0_i32 : i32
    %1 = arith.extui %0 : i1 to i32
    %c0_i32_0 = arith.constant 0 : i32
    %2 = arith.cmpi ne, %1, %c0_i32_0 : i32
    scf.if %2 {
      %cst_9 = arith.constant 0.000000e+00 : f32
      %12 = vector.broadcast %cst_9 : f32 to vector<8x256xf32>
      %c0_10 = arith.constant 0 : index
      %c0_11 = arith.constant 0 : index
      %13 = vector.load %arg8[%c0_10, %c0_11] : memref<8x256xf32, #tpu.memory_space<vmem>>, vector<8x256xf32>
      tpu.vector_store %arg8[%c0_10, %c0_11], %12 {strides = array<i32>} : memref<8x256xf32, #tpu.memory_space<vmem>>, vector<8x256xf32>,
    } else {
    }
    %c0 = arith.constant 0 : index
    %c0_1 = arith.constant 0 : index
    %3 = vector.load %arg8[%c0, %c0_1] : memref<8x256xf32, #tpu.memory_space<vmem>>, vector<8x256xf32>
    %c0_2 = arith.constant 0 : index
    %c0_3 = arith.constant 0 : index
    %4 = vector.load %arg3[%c0_2, %c0_3] : memref<8x256xbf16, #tpu.memory_space<vmem>>, vector<8x256xbf16>
    %c0_4 = arith.constant 0 : index
    %c0_5 = arith.constant 0 : index
    %5 = vector.load %arg4[%c0_4, %c0_5] : memref<256x256xbf16, #tpu.memory_space<vmem>>, vector<256x256xbf16>
    %cst = arith.constant dense<0.000000e+00> : vector<8x256xf32>
    %6 = tpu.matmul %4, %5, %cst {dimension_numbers = #tpu.dot_dimension_numbers<[1], [0], [0], [1], [0, 0, 1, 1], [], []>} : vector<8x256xbf16>, vector<256x256xbf16>, vector<8x256xf32> -> vector<8x256xf32>
    %7 = arith.addf %3, %6 : vector<8x256xf32>
    %c0_6 = arith.constant 0 : index
    %c0_7 = arith.constant 0 : index
    %8 = vector.load %arg8[%c0_6, %c0_7] : memref<8x256xf32, #tpu.memory_space<vmem>>, vector<8x256xf32>
    tpu.vector_store %arg8[%c0_6, %c0_7], %7 {strides = array<i32>} : memref<8x256xf32, #tpu.memory_space<vmem>>, vector<8x256xf32>,
    %c8_i32 = arith.constant 8 : i32
    %9 = arith.cmpi eq, %arg2, %c8_i32 : i32
    %10 = arith.extui %9 : i1 to i32
    %c0_i32_8 = arith.constant 0 : i32
    %11 = arith.cmpi ne, %10, %c0_i32_8 : i32
    scf.if %11 {
      %c0_9 = arith.constant 0 : index
      %c0_10 = arith.constant 0 : index
      %12 = vector.load %arg8[%c0_9, %c0_10] : memref<8x256xf32, #tpu.memory_space<vmem>>, vector<8x256xf32>
      %c0_11 = arith.constant 0 : index
      %c0_12 = arith.constant 0 : index
      %13 = vector.load %arg5[%c0_11, %c0_12] : memref<8x256xf32, #tpu.memory_space<vmem>>, vector<8x256xf32>
      tpu.vector_store %arg5[%c0_11, %c0_12], %12 {strides = array<i32>} : memref<8x256xf32, #tpu.memory_space<vmem>>, vector<8x256xf32>,
      %cst_13 = arith.constant dense<0.000000e+00> : vector<256xf32>
      %14 = vector.multi_reduction <add>, %12, %cst_13 [0] : vector<8x256xf32> to vector<256xf32>
      %15 = vector.shape_cast %14 : vector<256xf32> to vector<1x256xf32>
      %16 = vector.shape_cast %15 : vector<1x256xf32> to vector<1x1x256xf32>
      %c0_14 = arith.constant 0 : index
      %c0_15 = arith.constant 0 : index
      %c0_16 = arith.constant 0 : index
      %17 = vector.load %arg6[%c0_14, %c0_15, %c0_16] : memref<1x1x256xf32, #tpu.memory_space<vmem>>, vector<1x1x256xf32>
      tpu.vector_store %arg6[%c0_14, %c0_15, %c0_16], %16 {strides = array<i32>} : memref<1x1x256xf32, #tpu.memory_space<vmem>>, vector<1x1x256xf32>,
      %18 = arith.mulf %12, %12 : vector<8x256xf32>
      %cst_17 = arith.constant dense<0.000000e+00> : vector<256xf32>
      %19 = vector.multi_reduction <add>, %18, %cst_17 [0] : vector<8x256xf32> to vector<256xf32>
      %20 = vector.shape_cast %19 : vector<256xf32> to vector<1x256xf32>
      %21 = vector.shape_cast %20 : vector<1x256xf32> to vector<1x1x256xf32>
      %c0_18 = arith.constant 0 : index
      %c0_19 = arith.constant 0 : index
      %c0_20 = arith.constant 0 : index
      %22 = vector.load %arg7[%c0_18, %c0_19, %c0_20] : memref<1x1x256xf32, #tpu.memory_space<vmem>>, vector<1x1x256xf32>
      tpu.vector_store %arg7[%c0_18, %c0_19, %c0_20], %21 {strides = array<i32>} : memref<1x1x256xf32, #tpu.memory_space<vmem>>, vector<1x1x256xf32>,
    } else {
    }
    return
  }
  func.func @transform_0(%arg0: i32, %arg1: i32, %arg2: i32) -> (i32, i32) {
    %c0_i32 = arith.constant 0 : i32
    return %arg0, %arg2 : i32, i32
  }
  func.func @transform_1(%arg0: i32, %arg1: i32, %arg2: i32) -> (i32, i32) {
    %c0_i32 = arith.constant 0 : i32
    return %arg2, %arg1 : i32, i32
  }
  func.func @transform_2(%arg0: i32, %arg1: i32, %arg2: i32) -> (i32, i32) {
    %c0_i32 = arith.constant 0 : i32
    return %arg0, %arg1 : i32, i32
  }
  func.func @transform_3(%arg0: i32, %arg1: i32, %arg2: i32) -> (i32, i32, i32) {
    %c0_i32 = arith.constant 0 : i32
    %c0_i32_0 = arith.constant 0 : i32
    return %arg0, %c0_i32, %arg1 : i32, i32, i32
  }
  func.func @transform_4(%arg0: i32, %arg1: i32, %arg2: i32) -> (i32, i32, i32) {
    %c0_i32 = arith.constant 0 : i32
    %c0_i32_0 = arith.constant 0 : i32
    return %arg0, %c0_i32, %arg1 : i32, i32, i32
  }
}

module attributes {stable_mosaic.version = 11 : i64} {
  func.func @_bn_relu_kernel(%arg0: i32, %arg1: i32, %arg2: memref<8x256xf32, #tpu.memory_space<vmem>>, %arg3: memref<1x256xf32, #tpu.memory_space<vmem>>, %arg4: memref<1x256xf32, #tpu.memory_space<vmem>>, %arg5: memref<8x256xf32, #tpu.memory_space<vmem>>) attributes {dimension_semantics = [#tpu.dimension_semantics<parallel>, #tpu.dimension_semantics<parallel>], iteration_bounds = array<i64: 1, 2>, scalar_prefetch = 0 : i64, scratch_operands = 0 : i64, tpu.core_type = #tpu.core_type<tc>, window_params = [{transform_indices = @transform_0, window_bounds = array<i64: 8, 256>}, {transform_indices = @transform_1, window_bounds = array<i64: 1, 256>}, {transform_indices = @transform_2, window_bounds = array<i64: 1, 256>}, {transform_indices = @transform_3, window_bounds = array<i64: 8, 256>}]} {
    %c0 = arith.constant 0 : index
    %c0_0 = arith.constant 0 : index
    %0 = vector.load %arg2[%c0, %c0_0] : memref<8x256xf32, #tpu.memory_space<vmem>>, vector<8x256xf32>
    %c0_1 = arith.constant 0 : index
    %c0_2 = arith.constant 0 : index
    %1 = vector.load %arg3[%c0_1, %c0_2] : memref<1x256xf32, #tpu.memory_space<vmem>>, vector<1x256xf32>
    %2 = vector.broadcast %1 : vector<1x256xf32> to vector<8x256xf32>
    %3 = arith.mulf %0, %2 : vector<8x256xf32>
    %c0_3 = arith.constant 0 : index
    %c0_4 = arith.constant 0 : index
    %4 = vector.load %arg4[%c0_3, %c0_4] : memref<1x256xf32, #tpu.memory_space<vmem>>, vector<1x256xf32>
    %5 = vector.broadcast %4 : vector<1x256xf32> to vector<8x256xf32>
    %6 = arith.addf %3, %5 : vector<8x256xf32>
    %cst = arith.constant 0.000000e+00 : f32
    %7 = vector.broadcast %cst : f32 to vector<8x256xf32>
    %8 = arith.maximumf %6, %7 : vector<8x256xf32>
    %c0_5 = arith.constant 0 : index
    %c0_6 = arith.constant 0 : index
    %9 = vector.load %arg5[%c0_5, %c0_6] : memref<8x256xf32, #tpu.memory_space<vmem>>, vector<8x256xf32>
    tpu.vector_store %arg5[%c0_5, %c0_6], %8 {strides = array<i32>} : memref<8x256xf32, #tpu.memory_space<vmem>>, vector<8x256xf32>,
    return
  }
  func.func @transform_0(%arg0: i32, %arg1: i32) -> (i32, i32) {
    %c0_i32 = arith.constant 0 : i32
    return %arg0, %arg1 : i32, i32
  }
  func.func @transform_1(%arg0: i32, %arg1: i32) -> (i32, i32) {
    %c0_i32 = arith.constant 0 : i32
    %c0_i32_0 = arith.constant 0 : i32
    return %c0_i32, %arg1 : i32, i32
  }
  func.func @transform_2(%arg0: i32, %arg1: i32) -> (i32, i32) {
    %c0_i32 = arith.constant 0 : i32
    %c0_i32_0 = arith.constant 0 : i32
    return %c0_i32, %arg1 : i32, i32
  }
  func.func @transform_3(%arg0: i32, %arg1: i32) -> (i32, i32) {
    %c0_i32 = arith.constant 0 : i32
    return %arg0, %arg1 : i32, i32
  }
}

module attributes {stable_mosaic.version = 11 : i64} {
  func.func @_matmul_stats_kernel(%arg0: i32, %arg1: i32, %arg2: i32, %arg3: memref<8x512xbf16, #tpu.memory_space<vmem>>, %arg4: memref<512x256xbf16, #tpu.memory_space<vmem>>, %arg5: memref<8x256xf32, #tpu.memory_space<vmem>>, %arg6: memref<1x1x256xf32, #tpu.memory_space<vmem>>, %arg7: memref<1x1x256xf32, #tpu.memory_space<vmem>>, %arg8: memref<8x256xf32, #tpu.memory_space<vmem>>) attributes {dimension_semantics = [#tpu.dimension_semantics<parallel>, #tpu.dimension_semantics<parallel>, #tpu.dimension_semantics<arbitrary>], iteration_bounds = array<i64: 1, 2, 9>, scalar_prefetch = 0 : i64, scratch_operands = 1 : i64, tpu.core_type = #tpu.core_type<tc>, window_params = [{transform_indices = @transform_0, window_bounds = array<i64: 8, 512>}, {transform_indices = @transform_1, window_bounds = array<i64: 512, 256>}, {transform_indices = @transform_2, window_bounds = array<i64: 8, 256>}, {transform_indices = @transform_3, window_bounds = array<i64: 1, 1, 256>}, {transform_indices = @transform_4, window_bounds = array<i64: 1, 1, 256>}]} {
    %c0_i32 = arith.constant 0 : i32
    %0 = arith.cmpi eq, %arg2, %c0_i32 : i32
    %1 = arith.extui %0 : i1 to i32
    %c0_i32_0 = arith.constant 0 : i32
    %2 = arith.cmpi ne, %1, %c0_i32_0 : i32
    scf.if %2 {
      %cst_9 = arith.constant 0.000000e+00 : f32
      %12 = vector.broadcast %cst_9 : f32 to vector<8x256xf32>
      %c0_10 = arith.constant 0 : index
      %c0_11 = arith.constant 0 : index
      %13 = vector.load %arg8[%c0_10, %c0_11] : memref<8x256xf32, #tpu.memory_space<vmem>>, vector<8x256xf32>
      tpu.vector_store %arg8[%c0_10, %c0_11], %12 {strides = array<i32>} : memref<8x256xf32, #tpu.memory_space<vmem>>, vector<8x256xf32>,
    } else {
    }
    %c0 = arith.constant 0 : index
    %c0_1 = arith.constant 0 : index
    %3 = vector.load %arg8[%c0, %c0_1] : memref<8x256xf32, #tpu.memory_space<vmem>>, vector<8x256xf32>
    %c0_2 = arith.constant 0 : index
    %c0_3 = arith.constant 0 : index
    %4 = vector.load %arg3[%c0_2, %c0_3] : memref<8x512xbf16, #tpu.memory_space<vmem>>, vector<8x512xbf16>
    %c0_4 = arith.constant 0 : index
    %c0_5 = arith.constant 0 : index
    %5 = vector.load %arg4[%c0_4, %c0_5] : memref<512x256xbf16, #tpu.memory_space<vmem>>, vector<512x256xbf16>
    %cst = arith.constant dense<0.000000e+00> : vector<8x256xf32>
    %6 = tpu.matmul %4, %5, %cst {dimension_numbers = #tpu.dot_dimension_numbers<[1], [0], [0], [1], [0, 0, 1, 1], [], []>} : vector<8x512xbf16>, vector<512x256xbf16>, vector<8x256xf32> -> vector<8x256xf32>
    %7 = arith.addf %3, %6 : vector<8x256xf32>
    %c0_6 = arith.constant 0 : index
    %c0_7 = arith.constant 0 : index
    %8 = vector.load %arg8[%c0_6, %c0_7] : memref<8x256xf32, #tpu.memory_space<vmem>>, vector<8x256xf32>
    tpu.vector_store %arg8[%c0_6, %c0_7], %7 {strides = array<i32>} : memref<8x256xf32, #tpu.memory_space<vmem>>, vector<8x256xf32>,
    %c8_i32 = arith.constant 8 : i32
    %9 = arith.cmpi eq, %arg2, %c8_i32 : i32
    %10 = arith.extui %9 : i1 to i32
    %c0_i32_8 = arith.constant 0 : i32
    %11 = arith.cmpi ne, %10, %c0_i32_8 : i32
    scf.if %11 {
      %c0_9 = arith.constant 0 : index
      %c0_10 = arith.constant 0 : index
      %12 = vector.load %arg8[%c0_9, %c0_10] : memref<8x256xf32, #tpu.memory_space<vmem>>, vector<8x256xf32>
      %c0_11 = arith.constant 0 : index
      %c0_12 = arith.constant 0 : index
      %13 = vector.load %arg5[%c0_11, %c0_12] : memref<8x256xf32, #tpu.memory_space<vmem>>, vector<8x256xf32>
      tpu.vector_store %arg5[%c0_11, %c0_12], %12 {strides = array<i32>} : memref<8x256xf32, #tpu.memory_space<vmem>>, vector<8x256xf32>,
      %cst_13 = arith.constant dense<0.000000e+00> : vector<256xf32>
      %14 = vector.multi_reduction <add>, %12, %cst_13 [0] : vector<8x256xf32> to vector<256xf32>
      %15 = vector.shape_cast %14 : vector<256xf32> to vector<1x256xf32>
      %16 = vector.shape_cast %15 : vector<1x256xf32> to vector<1x1x256xf32>
      %c0_14 = arith.constant 0 : index
      %c0_15 = arith.constant 0 : index
      %c0_16 = arith.constant 0 : index
      %17 = vector.load %arg6[%c0_14, %c0_15, %c0_16] : memref<1x1x256xf32, #tpu.memory_space<vmem>>, vector<1x1x256xf32>
      tpu.vector_store %arg6[%c0_14, %c0_15, %c0_16], %16 {strides = array<i32>} : memref<1x1x256xf32, #tpu.memory_space<vmem>>, vector<1x1x256xf32>,
      %18 = arith.mulf %12, %12 : vector<8x256xf32>
      %cst_17 = arith.constant dense<0.000000e+00> : vector<256xf32>
      %19 = vector.multi_reduction <add>, %18, %cst_17 [0] : vector<8x256xf32> to vector<256xf32>
      %20 = vector.shape_cast %19 : vector<256xf32> to vector<1x256xf32>
      %21 = vector.shape_cast %20 : vector<1x256xf32> to vector<1x1x256xf32>
      %c0_18 = arith.constant 0 : index
      %c0_19 = arith.constant 0 : index
      %c0_20 = arith.constant 0 : index
      %22 = vector.load %arg7[%c0_18, %c0_19, %c0_20] : memref<1x1x256xf32, #tpu.memory_space<vmem>>, vector<1x1x256xf32>
      tpu.vector_store %arg7[%c0_18, %c0_19, %c0_20], %21 {strides = array<i32>} : memref<1x1x256xf32, #tpu.memory_space<vmem>>, vector<1x1x256xf32>,
    } else {
    }
    return
  }
  func.func @transform_0(%arg0: i32, %arg1: i32, %arg2: i32) -> (i32, i32) {
    %c0_i32 = arith.constant 0 : i32
    return %arg0, %arg2 : i32, i32
  }
  func.func @transform_1(%arg0: i32, %arg1: i32, %arg2: i32) -> (i32, i32) {
    %c0_i32 = arith.constant 0 : i32
    return %arg2, %arg1 : i32, i32
  }
  func.func @transform_2(%arg0: i32, %arg1: i32, %arg2: i32) -> (i32, i32) {
    %c0_i32 = arith.constant 0 : i32
    return %arg0, %arg1 : i32, i32
  }
  func.func @transform_3(%arg0: i32, %arg1: i32, %arg2: i32) -> (i32, i32, i32) {
    %c0_i32 = arith.constant 0 : i32
    %c0_i32_0 = arith.constant 0 : i32
    return %arg0, %c0_i32, %arg1 : i32, i32, i32
  }
  func.func @transform_4(%arg0: i32, %arg1: i32, %arg2: i32) -> (i32, i32, i32) {
    %c0_i32 = arith.constant 0 : i32
    %c0_i32_0 = arith.constant 0 : i32
    return %arg0, %c0_i32, %arg1 : i32, i32, i32
  }
}

module attributes {stable_mosaic.version = 11 : i64} {
  func.func @_bn_add_relu_kernel(%arg0: i32, %arg1: i32, %arg2: memref<8x256xf32, #tpu.memory_space<vmem>>, %arg3: memref<1x256xf32, #tpu.memory_space<vmem>>, %arg4: memref<1x256xf32, #tpu.memory_space<vmem>>, %arg5: memref<8x256xf32, #tpu.memory_space<vmem>>, %arg6: memref<8x256xf32, #tpu.memory_space<vmem>>) attributes {dimension_semantics = [#tpu.dimension_semantics<parallel>, #tpu.dimension_semantics<parallel>], iteration_bounds = array<i64: 1, 2>, scalar_prefetch = 0 : i64, scratch_operands = 0 : i64, tpu.core_type = #tpu.core_type<tc>, window_params = [{transform_indices = @transform_0, window_bounds = array<i64: 8, 256>}, {transform_indices = @transform_1, window_bounds = array<i64: 1, 256>}, {transform_indices = @transform_2, window_bounds = array<i64: 1, 256>}, {transform_indices = @transform_3, window_bounds = array<i64: 8, 256>}, {transform_indices = @transform_4, window_bounds = array<i64: 8, 256>}]} {
    %c0 = arith.constant 0 : index
    %c0_0 = arith.constant 0 : index
    %0 = vector.load %arg2[%c0, %c0_0] : memref<8x256xf32, #tpu.memory_space<vmem>>, vector<8x256xf32>
    %c0_1 = arith.constant 0 : index
    %c0_2 = arith.constant 0 : index
    %1 = vector.load %arg3[%c0_1, %c0_2] : memref<1x256xf32, #tpu.memory_space<vmem>>, vector<1x256xf32>
    %2 = vector.broadcast %1 : vector<1x256xf32> to vector<8x256xf32>
    %3 = arith.mulf %0, %2 : vector<8x256xf32>
    %c0_3 = arith.constant 0 : index
    %c0_4 = arith.constant 0 : index
    %4 = vector.load %arg4[%c0_3, %c0_4] : memref<1x256xf32, #tpu.memory_space<vmem>>, vector<1x256xf32>
    %5 = vector.broadcast %4 : vector<1x256xf32> to vector<8x256xf32>
    %6 = arith.addf %3, %5 : vector<8x256xf32>
    %c0_5 = arith.constant 0 : index
    %c0_6 = arith.constant 0 : index
    %7 = vector.load %arg5[%c0_5, %c0_6] : memref<8x256xf32, #tpu.memory_space<vmem>>, vector<8x256xf32>
    %8 = arith.addf %6, %7 : vector<8x256xf32>
    %cst = arith.constant 0.000000e+00 : f32
    %9 = vector.broadcast %cst : f32 to vector<8x256xf32>
    %10 = arith.maximumf %8, %9 : vector<8x256xf32>
    %c0_7 = arith.constant 0 : index
    %c0_8 = arith.constant 0 : index
    %11 = vector.load %arg6[%c0_7, %c0_8] : memref<8x256xf32, #tpu.memory_space<vmem>>, vector<8x256xf32>
    tpu.vector_store %arg6[%c0_7, %c0_8], %10 {strides = array<i32>} : memref<8x256xf32, #tpu.memory_space<vmem>>, vector<8x256xf32>,
    return
  }
  func.func @transform_0(%arg0: i32, %arg1: i32) -> (i32, i32) {
    %c0_i32 = arith.constant 0 : i32
    return %arg0, %arg1 : i32, i32
  }
  func.func @transform_1(%arg0: i32, %arg1: i32) -> (i32, i32) {
    %c0_i32 = arith.constant 0 : i32
    %c0_i32_0 = arith.constant 0 : i32
    return %c0_i32, %arg1 : i32, i32
  }
  func.func @transform_2(%arg0: i32, %arg1: i32) -> (i32, i32) {
    %c0_i32 = arith.constant 0 : i32
    %c0_i32_0 = arith.constant 0 : i32
    return %c0_i32, %arg1 : i32, i32
  }
  func.func @transform_3(%arg0: i32, %arg1: i32) -> (i32, i32) {
    %c0_i32 = arith.constant 0 : i32
    return %arg0, %arg1 : i32, i32
  }
  func.func @transform_4(%arg0: i32, %arg1: i32) -> (i32, i32) {
    %c0_i32 = arith.constant 0 : i32
    return %arg0, %arg1 : i32, i32
  }
}

</mosaic_0001>

<bundles_post_ra>
// kernel: _lambda_.25
= control target key start
LH: loop header
LB: loop body
LE: loop exit
PB: predicated region body
PF: predicated region fallthrough
CT: control target
= control target key end

     0   :  { %s586_s12 = smov 0   ;;  %s588_s13 = smov 0   ;;  %s795_s0 = inlined_call_operand.vmem [shape: f32[512,128], index: 0, kind: input, shape index: {}, may-alias: {0,3}]   ;;  %s796_s1 = inlined_call_operand.vmem [shape: f32[1,128], index: 1, kind: input, shape index: {}]   ;;  %s797_s2 = inlined_call_operand.vmem [shape: f32[1,128], index: 2, kind: input, shape index: {}]   ;;  %s798_s3 = inlined_call_operand.vmem [shape: f32[512,128], index: 3, kind: output, shape index: {}, may-alias: {0,3}]  }
   0x1   :  { %s590_s14 = smov 0  }
   0x2 LB: > { %s25_s15 = sadd.s32 1, %s560_s13  ;;  %p509_p0 = scmp.ge.s32.totalorder %s564_s14, 1  ;;  %s564_s14 = sphi %s590_s14, %s13_s14   ;;  %s560_s13 = sphi %s588_s13, %s800_s13   ;;  %s556_s12 = sphi %s586_s12, %s799_s12  }
   0x3   : > { %p27_p1 = scmp.ge.s32.totalorder %s25_s15, 2  ;;  %p173_p2 = scmp.lt.s32.totalorder %s564_s14, 3 }
   0x5   : > { %s802_s15 = smov (%p27_p1, %s25_s15), 0  ;;  %p174_p3 = pnand %p509_p0, %p173_p2 }
   0x6   : > { %s510_s16 = sshll.u32 (!%p174_p3), %s556_s12, 5 }
   0x7   : > { %177 = sbr.rel (%p174_p3) target bundleno = 58 (0x3a), region = 32  ;;  %p210_p4 = scmp.lt.s32.totalorder (!%p174_p3), %s510_s16, 63 }
   0xc   : > { %s804_s16 = smov (!%p210_p4, %s510_s16), 63  ;;  %v609_v0 = vld [vmem:[%s796_s1] ss:$0 sm:$0xff] }
   0xd   : > { %s511_s19 = sshll.u32 %s804_s16, 3  ;;  %v622_v1 = vld [vmem:[%s797_s2] ss:$0 sm:$0xff] }
   0xe   : > { %s617_s22 = scalar_lea.vmem %s795_s0, %s511_s19  ;;  %s657_s27 = scalar_lea.vmem %s798_s3, %s511_s19 }
   0xf   : > { %v233_v2 = vld [vmem:[%s617_s22] sm:$0xff]  ;;  %v234_v3 = vld [vmem:[%s617_s22 + $0x8] sm:$0xff]  ;;  %v235_v4 = vld [vmem:[%s617_s22 + $0x10] sm:$0xff] }
  0x10   : > { %v236_v5 = vld [vmem:[%s617_s22 + $0x18] sm:$0xff]  ;;  %v237_v6 = vld [vmem:[%s617_s22 + $0x20] sm:$0xff]  ;;  %v238_v7 = vld [vmem:[%s617_s22 + $0x28] sm:$0xff]  ;;  %v269_v8 = vmul.f32 %v609_v0, %v233_v2  ;;  %v270_v9 = vmul.f32 %v609_v0, %v234_v3  ;;  %v271_v10 = vmul.f32 %v609_v0, %v235_v4 }
  0x11   : > { %v239_v11 = vld [vmem:[%s617_s22 + $0x30] sm:$0xff]  ;;  %v272_v12 = vmul.f32 %v609_v0, %v236_v5  ;;  %v240_v13 = vld [vmem:[%s617_s22 + $0x38] sm:$0xff]  ;;  %v273_v15 = vmul.f32 %v609_v0, %v237_v6  ;;  %v241_v16 = vld [vmem:[%s617_s22 + $0x40] sm:$0xff]  ;;  %v274_v18 = vmul.f32 %v609_v0, %v238_v7 }
  0x12   : > { %v305_v14 = vadd.f32 %v622_v1, %v269_v8  ;;  %v306_v17 = vadd.f32 %v622_v1, %v270_v9  ;;  %v242_v19 = vld [vmem:[%s617_s22 + $0x48] sm:$0xff]  ;;  %v307_v20 = vadd.f32 %v622_v1, %v271_v10  ;;  %v275_v21 = vmul.f32 %v609_v0, %v239_v11  ;;  %v243_v22 = vld [vmem:[%s617_s22 + $0x50] sm:$0xff]  ;;  %v244_v25 = vld [vmem:[%s617_s22 + $0x58] sm:$0xff] }
  0x13   : > { %v308_v23 = vadd.f32 %v622_v1, %v272_v12  ;;  %v276_v24 = vmul.f32 %v609_v0, %v240_v13  ;;  %v245_v26 = vld [vmem:[%s617_s22 + $0x60] sm:$0xff]  ;;  %v246_v27 = vld [vmem:[%s617_s22 + $0x68] sm:$0xff]  ;;  %v309_v29 = vadd.f32 %v622_v1, %v273_v15  ;;  %v277_v30 = vmul.f32 %v609_v0, %v241_v16  ;;  %v247_v31 = vld [vmem:[%s617_s22 + $0x70] sm:$0xff] }
  0x14   : > { %v337_v28 = vmax.f32 %v305_v14, 0.0  ;;  %v248_v32 = vld [vmem:[%s617_s22 + $0x78] sm:$0xff]  ;;  %v249_v33 = vld [vmem:[%s617_s22 + $0x80] sm:$0xff]  ;;  %v250_v34 = vld [vmem:[%s617_s22 + $0x88] sm:$0xff]  ;;  %v338_v43 = vmax.f32 %v306_v17, 0.0  ;;  %v310_v44 = vadd.f32 %v622_v1, %v274_v18  ;;  %v278_v45 = vmul.f32 %v609_v0, %v242_v19 }
  0x15   : > { %v251_v35 = vld [vmem:[%s617_s22 + $0x90] sm:$0xff]  ;;  %v252_v36 = vld [vmem:[%s617_s22 + $0x98] sm:$0xff]  ;;  %v253_v37 = vld [vmem:[%s617_s22 + $0xa0] sm:$0xff]  ;;  %v339_v49 = vmax.f32 %v307_v20, 0.0  ;;  %v311_v50 = vadd.f32 %v622_v1, %v275_v21  ;;  %v279_v51 = vmul.f32 %v609_v0, %v243_v22  ;;  %v340_v55 = vmax.f32 %v308_v23, 0.0 }
  0x16   : > { %v254_v38 = vld [vmem:[%s617_s22 + $0xa8] sm:$0xff]  ;;  %v255_v39 = vld [vmem:[%s617_s22 + $0xb0] sm:$0xff]  ;;  %v669_v40 = vld [vmem:[%s617_s22 + $0xb8] sm:$0xff]  ;;  %v312_v56 = vadd.f32 %v622_v1, %v276_v24  ;;  %v280_v57 = vmul.f32 %v609_v0, %v244_v25  ;;  %v341_v58 = vmax.f32 %v309_v29, 0.0  ;;  %v313_v59 = vadd.f32 %v622_v1, %v277_v30 }
  0x17   : > { %v672_v41 = vld [vmem:[%s617_s22 + $0xc0] sm:$0xff]  ;;  %v675_v42 = vld [vmem:[%s617_s22 + $0xc8] sm:$0xff]  ;;  %v680_v46 = vld [vmem:[%s617_s22 + $0xd0] sm:$0xff]  ;;  %v281_v60 = vmul.f32 %v609_v0, %v245_v26  ;;  %v342_v61 = vmax.f32 %v310_v44, 0.0  ;;  %v314_v62 = vadd.f32 %v622_v1, %v278_v45  ;;  %v282_v63 = vmul.f32 %v609_v0, %v246_v27 }
  0x18   : > { %v683_v47 = vld [vmem:[%s617_s22 + $0xd8] sm:$0xff]  ;;  %v686_v48 = vld [vmem:[%s617_s22 + $0xe0] sm:$0xff]  ;;  %v691_v52 = vld [vmem:[%s617_s22 + $0xe8] sm:$0xff]  ;;  %v343_v2 = vmax.f32 %v311_v50, 0.0  ;;  %v315_v3 = vadd.f32 %v622_v1, %v279_v51  ;;  %v283_v4 = vmul.f32 %v609_v0, %v247_v31  ;;  %v344_v5 = vmax.f32 %v312_v56, 0.0 }
  0x19   : > { %v694_v53 = vld [vmem:[%s617_s22 + $0xf0] sm:$0xff]  ;;  %v697_v54 = vld [vmem:[%s617_s22 + $0xf8] sm:$0xff]  ;;  %v316_v6 = vadd.f32 %v622_v1, %v280_v57  ;;  %v284_v7 = vmul.f32 %v609_v0, %v248_v32  ;;  %v345_v8 = vmax.f32 %v313_v59, 0.0  ;;  %v317_v9 = vadd.f32 %v622_v1, %v281_v60 }
  0x1a   : > { %369 = vst [vmem:[%s657_s27] sm:$0xff] %v337_v28  ;;  %v285_v10 = vmul.f32 %v609_v0, %v249_v33  ;;  %v346_v11 = vmax.f32 %v314_v62, 0.0  ;;  %v318_v12 = vadd.f32 %v622_v1, %v282_v63  ;;  %v286_v13 = vmul.f32 %v609_v0, %v250_v34 }
  0x1b   : > { %370 = vst [vmem:[%s657_s27 + $0x8] sm:$0xff] %v338_v43  ;;  %v347_v14 = vmax.f32 %v315_v3, 0.0  ;;  %v319_v15 = vadd.f32 %v622_v1, %v283_v4  ;;  %v287_v16 = vmul.f32 %v609_v0, %v251_v35  ;;  %v348_v17 = vmax.f32 %v316_v6, 0.0 }
  0x1c   : > { %371 = vst [vmem:[%s657_s27 + $0x10] sm:$0xff] %v339_v49  ;;  %v320_v18 = vadd.f32 %v622_v1, %v284_v7  ;;  %v288_v19 = vmul.f32 %v609_v0, %v252_v36  ;;  %v349_v20 = vmax.f32 %v317_v9, 0.0  ;;  %v321_v21 = vadd.f32 %v622_v1, %v285_v10 }
  0x1d   : > { %372 = vst [vmem:[%s657_s27 + $0x18] sm:$0xff] %v340_v55  ;;  %v289_v22 = vmul.f32 %v609_v0, %v253_v37  ;;  %v350_v23 = vmax.f32 %v318_v12, 0.0  ;;  %v322_v24 = vadd.f32 %v622_v1, %v286_v13  ;;  %v290_v25 = vmul.f32 %v609_v0, %v254_v38 }
  0x1e   : > { %373 = vst [vmem:[%s657_s27 + $0x20] sm:$0xff] %v341_v58  ;;  %v351_v26 = vmax.f32 %v319_v15, 0.0  ;;  %v323_v27 = vadd.f32 %v622_v1, %v287_v16  ;;  %v291_v28 = vmul.f32 %v609_v0, %v255_v39  ;;  %v352_v29 = vmax.f32 %v320_v18, 0.0 }
  0x1f   : > { %374 = vst [vmem:[%s657_s27 + $0x28] sm:$0xff] %v342_v61  ;;  %v324_v30 = vadd.f32 %v622_v1, %v288_v19  ;;  %v292_v31 = vmul.f32 %v609_v0, %v669_v40  ;;  %v353_v32 = vmax.f32 %v321_v21, 0.0  ;;  %v325_v33 = vadd.f32 %v622_v1, %v289_v22 }
  0x20   : > { %375 = vst [vmem:[%s657_s27 + $0x30] sm:$0xff] %v343_v2  ;;  %v293_v34 = vmul.f32 %v609_v0, %v672_v41  ;;  %v354_v35 = vmax.f32 %v322_v24, 0.0  ;;  %v326_v36 = vadd.f32 %v622_v1, %v290_v25  ;;  %v294_v37 = vmul.f32 %v609_v0, %v675_v42 }
  0x21   : > { %376 = vst [vmem:[%s657_s27 + $0x38] sm:$0xff] %v344_v5  ;;  %v355_v38 = vmax.f32 %v323_v27, 0.0  ;;  %v327_v39 = vadd.f32 %v622_v1, %v291_v28  ;;  %v295_v40 = vmul.f32 %v609_v0, %v680_v46  ;;  %v356_v43 = vmax.f32 %v324_v30, 0.0 }
  0x22   : > { %377 = vst [vmem:[%s657_s27 + $0x40] sm:$0xff] %v345_v8  ;;  %v328_v41 = vadd.f32 %v622_v1, %v292_v31  ;;  %v296_v44 = vmul.f32 %v609_v0, %v683_v47  ;;  %v357_v45 = vmax.f32 %v325_v33, 0.0  ;;  %v329_v42 = vadd.f32 %v622_v1, %v293_v34 }
  0x23   : > { %378 = vst [vmem:[%s657_s27 + $0x48] sm:$0xff] %v346_v11  ;;  %v297_v49 = vmul.f32 %v609_v0, %v686_v48  ;;  %v358_v50 = vmax.f32 %v326_v36, 0.0  ;;  %v330_v46 = vadd.f32 %v622_v1, %v294_v37  ;;  %v298_v51 = vmul.f32 %v609_v0, %v691_v52 }
  0x24   : > { %379 = vst [vmem:[%s657_s27 + $0x50] sm:$0xff] %v347_v14  ;;  %v359_v55 = vmax.f32 %v327_v39, 0.0  ;;  %v331_v47 = vadd.f32 %v622_v1, %v295_v40  ;;  %v299_v56 = vmul.f32 %v609_v0, %v694_v53  ;;  %v360_v48 = vmax.f32 %v328_v41, 0.0 }
  0x25   : > { %380 = vst [vmem:[%s657_s27 + $0x58] sm:$0xff] %v348_v17  ;;  %v332_v57 = vadd.f32 %v622_v1, %v296_v44  ;;  %v300_v58 = vmul.f32 %v609_v0, %v697_v54  ;;  %v361_v52 = vmax.f32 %v329_v42, 0.0  ;;  %v333_v59 = vadd.f32 %v622_v1, %v297_v49 }
  0x26   : > { %381 = vst [vmem:[%s657_s27 + $0x60] sm:$0xff] %v349_v20  ;;  %v362_v60 = vmax.f32 %v330_v46, 0.0  ;;  %v334_v53 = vadd.f32 %v622_v1, %v298_v51  ;;  %v363_v61 = vmax.f32 %v331_v47, 0.0  ;;  %v335_v62 = vadd.f32 %v622_v1, %v299_v56 }
  0x27   : > { %382 = vst [vmem:[%s657_s27 + $0x68] sm:$0xff] %v350_v23  ;;  %v364_v0 = vmax.f32 %v332_v57, 0.0  ;;  %v336_v54 = vadd.f32 %v622_v1, %v300_v58  ;;  %v365_v63 = vmax.f32 %v333_v59, 0.0 }
  0x28   : > { %383 = vst [vmem:[%s657_s27 + $0x70] sm:$0xff] %v351_v26  ;;  %v366_v2 = vmax.f32 %v334_v53, 0.0  ;;  %v367_v3 = vmax.f32 %v335_v62, 0.0 }
  0x29   : > { %384 = vst [vmem:[%s657_s27 + $0x78] sm:$0xff] %v352_v29  ;;  %v368_v4 = vmax.f32 %v336_v54, 0.0 }
  0x2a   : > { %385 = vst [vmem:[%s657_s27 + $0x80] sm:$0xff] %v353_v32 }
  0x2b   : > { %386 = vst [vmem:[%s657_s27 + $0x88] sm:$0xff] %v354_v35 }
  0x2c   : > { %387 = vst [vmem:[%s657_s27 + $0x90] sm:$0xff] %v355_v38 }
  0x2d   : > { %388 = vst [vmem:[%s657_s27 + $0x98] sm:$0xff] %v356_v43 }
  0x2e   : > { %389 = vst [vmem:[%s657_s27 + $0xa0] sm:$0xff] %v357_v45 }
  0x2f   : > { %390 = vst [vmem:[%s657_s27 + $0xa8] sm:$0xff] %v358_v50 }
  0x30   : > { %391 = vst [vmem:[%s657_s27 + $0xb0] sm:$0xff] %v359_v55 }
  0x31   : > { %392 = vst [vmem:[%s657_s27 + $0xb8] sm:$0xff] %v360_v48 }
  0x32   : > { %393 = vst [vmem:[%s657_s27 + $0xc0] sm:$0xff] %v361_v52 }
  0x33   : > { %394 = vst [vmem:[%s657_s27 + $0xc8] sm:$0xff] %v362_v60 }
  0x34   : > { %395 = vst [vmem:[%s657_s27 + $0xd0] sm:$0xff] %v363_v61 }
  0x35   : > { %396 = vst [vmem:[%s657_s27 + $0xd8] sm:$0xff] %v364_v0 }
  0x36   : > { %397 = vst [vmem:[%s657_s27 + $0xe0] sm:$0xff] %v365_v63 }
  0x37   : > { %398 = vst [vmem:[%s657_s27 + $0xe8] sm:$0xff] %v366_v2 }
  0x38   : > { %399 = vst [vmem:[%s657_s27 + $0xf0] sm:$0xff] %v367_v3 }
  0x39   : > { %400 = vst [vmem:[%s657_s27 + $0xf8] sm:$0xff] %v368_v4 }
  0x3a PF: > { %s13_s14 = sadd.s32 1, %s564_s14   ;;  %s799_s12 = smov %s560_s13 }
  0x3b   : > { %p10_p5 = scmp.ge.s32.totalorder %s13_s14, 4   ;;  %s800_s13 = smov %s802_s15 }
  0x3d   :  { %12 = sbr.rel (!%p10_p5) target bundleno = 2 (0x2), region = 68 }

// kernel: _lambda_.24
= control target key start
LH: loop header
LB: loop body
LE: loop exit
PB: predicated region body
PF: predicated region fallthrough
CT: control target
= control target key end

     0   :  { %s1633_s15 = smov 0   ;;  %s1635_s16 = smov 0   ;;  %s1922_s0 = inlined_call_operand.vmem [shape: bf16[512,256], index: 0, kind: input, shape index: {}]   ;;  %s1923_s1 = inlined_call_operand.vmem [shape: bf16[256,128], index: 1, kind: input, shape index: {}]   ;;  %s1924_s2 = inlined_call_operand.vmem [shape: f32[512,128], index: 2, kind: output, shape index: {0}]   ;;  %s1925_s3 = inlined_call_operand.vmem [shape: f32[2,1,128], index: 3, kind: output, shape index: {1}]   ;;  %s1926_s4 = inlined_call_operand.vmem [shape: f32[2,1,128], index: 4, kind: output, shape index: {2}]  }
   0x1   :  { %s1637_s17 = smov 0  }
   0x2 LB: > { %s34_s18 = sadd.s32 1, %s1602_s16  ;;  %p1295_p0 = scmp.ge.s32.totalorder %s1606_s17, 1  ;;  %s1606_s17 = sphi %s1637_s17, %s15_s17   ;;  %s1602_s16 = sphi %s1635_s16, %s1928_s16   ;;  %s1598_s15 = sphi %s1633_s15, %s1927_s15  }
   0x3   : > { %p36_p1 = scmp.ge.s32.totalorder %s34_s18, 2  ;;  %p217_p2 = scmp.lt.s32.totalorder %s1606_s17, 3 }
   0x5   : > { %s1930_s18 = smov (%p36_p1, %s34_s18), 0  ;;  %p218_p3 = pnand %p1295_p0, %p217_p2 }
   0x6   : > { %s1296_s5 = sshll.u32 (!%p218_p3), %s1598_s15, 5  ;;  %p301_p5 = scmp.lt.s32.totalorder (!%p218_p3), %s1598_s15, 1 }
   0x7   : > { %221 = sbr.rel (%p218_p3) target bundleno = 342 (0x156), region = 28  ;;  %p273_p4 = scmp.lt.s32.totalorder (!%p218_p3), %s1296_s5, 63 }
   0xc   : > { %v1535_v0 = vld [vmem:[%s1923_s1 + $0x38] sm:$0xff]  ;;  %v1534_v2 = vld [vmem:[%s1923_s1 + $0x30] sm:$0xff]  ;;  %v1533_v4 = vld [vmem:[%s1923_s1 + $0x28] sm:$0xff]  ;;  %s1932_s5 = smov (!%p273_p4, %s1296_s5), 63  ;;  %s1934_s15 = smov (!%p301_p5, %s1598_s15), 1 }
   0xd   : > { %v1543_v1 = vld [vmem:[%s1923_s1 + $0x78] sm:$0xff]  ;;  %701 = vmatpush.bf16.msra.mxu0 %v1535_v0  ;;  %v1542_v3 = vld [vmem:[%s1923_s1 + $0x70] sm:$0xff]  ;;  %1544 = vmatpush.bf16.msra.mxu2 %v1535_v0  ;;  %v1541_v5 = vld [vmem:[%s1923_s1 + $0x68] sm:$0xff]  ;;  %s1495_s22 = sshll.u32 %s1932_s5, 3  ;;  %s306_s13 = scalar_lea.vmem %s1925_s3, %s1934_s15 }
   0xe   : > { %790 = vmatpush.bf16.msra.mxu1 %v1543_v1  ;;  %1552 = vmatpush.bf16.msra.mxu3 %v1543_v1  ;;  %v1532_v6 = vld [vmem:[%s1923_s1 + $0x20] sm:$0xff]  ;;  %v1531_v8 = vld [vmem:[%s1923_s1 + $0x18] sm:$0xff]  ;;  %v1530_v10 = vld [vmem:[%s1923_s1 + $0x10] sm:$0xff]  ;;  %s1704_s29 = scalar_lea.vmem %s1922_s0, %s1495_s22  ;;  %s1781_s11 = scalar_lea.vmem %s1924_s2, %s1495_s22 }
   0xf   : > { %v1540_v7 = vld [vmem:[%s1923_s1 + $0x60] sm:$0xff]  ;;  %v1539_v9 = vld [vmem:[%s1923_s1 + $0x58] sm:$0xff]  ;;  %v1538_v11 = vld [vmem:[%s1923_s1 + $0x50] sm:$0xff]  ;;  %s312_s20 = scalar_lea.vmem %s1926_s4, %s1934_s15 }
  0x10   : > { %v1529_v12 = vld [vmem:[%s1923_s1 + $0x8] sm:$0xff]  ;;  %v1528_v14 = vld [vmem:[%s1923_s1] sm:$0xff]  ;;  %v1311_v28 = vld [vmem:[%s1704_s29 + $0x10] sm:$0xf] }
  0x11   : > { %702 = vmatpush.bf16.msra.mxu0 %v1534_v2  ;;  %1545 = vmatpush.bf16.msra.mxu2 %v1534_v2  ;;  %v1537_v13 = vld [vmem:[%s1923_s1 + $0x48] sm:$0xff]  ;;  %v1536_v15 = vld [vmem:[%s1923_s1 + $0x40] sm:$0xff]  ;;  %v1499_v29 = vld [vmem:[%s1704_s29 + $0x14] sm:$0xf0] }
  0x12   : > { %791 = vmatpush.bf16.msra.mxu1 %v1542_v3  ;;  %1553 = vmatpush.bf16.msra.mxu3 %v1542_v3  ;;  %v1303_v16 = vld [vmem:[%s1704_s29] sm:$0xf]  ;;  %v1497_v17 = vld [vmem:[%s1704_s29 + $0x4] sm:$0xf0]  ;;  %v1496_v18 = vld [vmem:[%s1704_s29 + $0x4] sm:$0xf]  ;;  %v1312_v36 = vor.u32 %v1499_v29, %v1311_v28 }
  0x13   : > { %v1305_v19 = vld [vmem:[%s1704_s29 + $0x8] sm:$0xf0]  ;;  %v1367_v20 = vld [vmem:[%s1704_s29 + $0x80] sm:$0xf]  ;;  %v1513_v21 = vld [vmem:[%s1704_s29 + $0x84] sm:$0xf0]  ;;  %v1304_v24 = vor.u32 %v1497_v17, %v1303_v16 }
  0x14   : > { %v1512_v22 = vld [vmem:[%s1704_s29 + $0x84] sm:$0xf]  ;;  %v1369_v23 = vld [vmem:[%s1704_s29 + $0x88] sm:$0xf0]  ;;  %v1308_v25 = vor.u32 %v1496_v18, %v1305_v19  ;;  %v1368_v26 = vor.u32 %v1513_v21, %v1367_v20  ;;  %v1498_v30 = vld [vmem:[%s1704_s29 + $0x14] sm:$0xf] }
  0x15   : > { %703 = vmatpush.bf16.msra.mxu0 %v1533_v4  ;;  %1546 = vmatpush.bf16.msra.mxu2 %v1533_v4  ;;  %v1372_v27 = vor.u32 %v1512_v22, %v1369_v23  ;;  %v1313_v31 = vld [vmem:[%s1704_s29 + $0x18] sm:$0xf0]  ;;  %v1375_v32 = vld [vmem:[%s1704_s29 + $0x90] sm:$0xf]  ;;  %v1515_v33 = vld [vmem:[%s1704_s29 + $0x94] sm:$0xf0] }
  0x16   : > { %792 = vmatpush.bf16.msra.mxu1 %v1541_v5  ;;  %1554 = vmatpush.bf16.msra.mxu3 %v1541_v5  ;;  %v1514_v34 = vld [vmem:[%s1704_s29 + $0x94] sm:$0xf]  ;;  %v1377_v35 = vld [vmem:[%s1704_s29 + $0x98] sm:$0xf0]  ;;  %v1316_v37 = vor.u32 %v1498_v30, %v1313_v31  ;;  %v1376_v38 = vor.u32 %v1515_v33, %v1375_v32  ;;  %v1319_v40 = vld [vmem:[%s1704_s29 + $0x20] sm:$0xf] }
  0x17   : > { %v1380_v39 = vor.u32 %v1514_v34, %v1377_v35  ;;  %v1501_v41 = vld [vmem:[%s1704_s29 + $0x24] sm:$0xf0]  ;;  %v1500_v42 = vld [vmem:[%s1704_s29 + $0x24] sm:$0xf]  ;;  %v1321_v43 = vld [vmem:[%s1704_s29 + $0x28] sm:$0xf0] }
  0x18   : > { %v1383_v44 = vld [vmem:[%s1704_s29 + $0xa0] sm:$0xf]  ;;  %v1517_v45 = vld [vmem:[%s1704_s29 + $0xa4] sm:$0xf0]  ;;  %v1516_v46 = vld [vmem:[%s1704_s29 + $0xa4] sm:$0xf]  ;;  %v1320_v48 = vor.u32 %v1501_v41, %v1319_v40  ;;  %v1324_v49 = vor.u32 %v1500_v42, %v1321_v43 }
  0x19   : > { %704 = vmatpush.bf16.msra.mxu0 %v1532_v6  ;;  %1547 = vmatpush.bf16.msra.mxu2 %v1532_v6  ;;  %v1385_v47 = vld [vmem:[%s1704_s29 + $0xa8] sm:$0xf0]  ;;  %v1384_v50 = vor.u32 %v1517_v45, %v1383_v44  ;;  %v1327_v52 = vld [vmem:[%s1704_s29 + $0x30] sm:$0xf]  ;;  %v1503_v53 = vld [vmem:[%s1704_s29 + $0x34] sm:$0xf0] }
  0x1a   : > { %793 = vmatpush.bf16.msra.mxu1 %v1540_v7  ;;  %1555 = vmatpush.bf16.msra.mxu3 %v1540_v7  ;;  %v1388_v51 = vor.u32 %v1516_v46, %v1385_v47  ;;  %v1502_v54 = vld [vmem:[%s1704_s29 + $0x34] sm:$0xf]  ;;  %v1329_v55 = vld [vmem:[%s1704_s29 + $0x38] sm:$0xf0]  ;;  %v1391_v56 = vld [vmem:[%s1704_s29 + $0xb0] sm:$0xf]  ;;  %v1328_v60 = vor.u32 %v1503_v53, %v1327_v52 }
  0x1b   : > { %v1519_v57 = vld [vmem:[%s1704_s29 + $0xb4] sm:$0xf0]  ;;  %v1518_v58 = vld [vmem:[%s1704_s29 + $0xb4] sm:$0xf]  ;;  %v1393_v59 = vld [vmem:[%s1704_s29 + $0xb8] sm:$0xf0]  ;;  %v1332_v61 = vor.u32 %v1502_v54, %v1329_v55 }
  0x1c   : > { %v1392_v62 = vor.u32 %v1519_v57, %v1391_v56  ;;  %v1396_v63 = vor.u32 %v1518_v58, %v1393_v59  ;;  %v1335_v0 = vld [vmem:[%s1704_s29 + $0x40] sm:$0xf]  ;;  %v1505_v1 = vld [vmem:[%s1704_s29 + $0x44] sm:$0xf0]  ;;  %v1504_v2 = vld [vmem:[%s1704_s29 + $0x44] sm:$0xf] }
  0x1d   : > { %705 = vmatpush.bf16.msra.mxu0 %v1531_v8  ;;  %1548 = vmatpush.bf16.msra.mxu2 %v1531_v8  ;;  %v1337_v3 = vld [vmem:[%s1704_s29 + $0x48] sm:$0xf0]  ;;  %v1399_v4 = vld [vmem:[%s1704_s29 + $0xc0] sm:$0xf]  ;;  %v1521_v5 = vld [vmem:[%s1704_s29 + $0xc4] sm:$0xf0]  ;;  %v1336_v8 = vor.u32 %v1505_v1, %v1335_v0 }
  0x1e   : > { %794 = vmatpush.bf16.msra.mxu1 %v1539_v9  ;;  %1556 = vmatpush.bf16.msra.mxu3 %v1539_v9  ;;  %v1520_v6 = vld [vmem:[%s1704_s29 + $0xc4] sm:$0xf]  ;;  %v1401_v7 = vld [vmem:[%s1704_s29 + $0xc8] sm:$0xf0]  ;;  %v1340_v9 = vor.u32 %v1504_v2, %v1337_v3  ;;  %v1407_v16 = vld [vmem:[%s1704_s29 + $0xd0] sm:$0xf] }
  0x1f   : > { %v1523_v17 = vld [vmem:[%s1704_s29 + $0xd4] sm:$0xf0]  ;;  %v1522_v18 = vld [vmem:[%s1704_s29 + $0xd4] sm:$0xf]  ;;  %v1409_v19 = vld [vmem:[%s1704_s29 + $0xd8] sm:$0xf0] }
  0x20   : > { %v1408_v22 = vor.u32 %v1523_v17, %v1407_v16  ;;  %v1412_v23 = vor.u32 %v1522_v18, %v1409_v19  ;;  %v1415_v28 = vld [vmem:[%s1704_s29 + $0xe0] sm:$0xf]  ;;  %v1525_v29 = vld [vmem:[%s1704_s29 + $0xe4] sm:$0xf0]  ;;  %v1524_v30 = vld [vmem:[%s1704_s29 + $0xe4] sm:$0xf] }
  0x21   : > { %706 = vmatpush.bf16.msra.mxu0 %v1530_v10  ;;  %1549 = vmatpush.bf16.msra.mxu2 %v1530_v10  ;;  %v1400_v10 = vor.u32 %v1521_v5, %v1399_v4  ;;  %v1417_v31 = vld [vmem:[%s1704_s29 + $0xe8] sm:$0xf0]  ;;  %v1416_v34 = vor.u32 %v1525_v29, %v1415_v28  ;;  %v1423_v40 = vld [vmem:[%s1704_s29 + $0xf0] sm:$0xf]  ;;  %v1527_v41 = vld [vmem:[%s1704_s29 + $0xf4] sm:$0xf0] }
  0x22   : > { %795 = vmatpush.bf16.msra.mxu1 %v1538_v11  ;;  %1557 = vmatpush.bf16.msra.mxu3 %v1538_v11  ;;  %v1404_v11 = vor.u32 %v1520_v6, %v1401_v7  ;;  %v1420_v35 = vor.u32 %v1524_v30, %v1417_v31  ;;  %v1526_v42 = vld [vmem:[%s1704_s29 + $0xf4] sm:$0xf]  ;;  %v1425_v43 = vld [vmem:[%s1704_s29 + $0xf8] sm:$0xf0]  ;;  %v1424_v46 = vor.u32 %v1527_v41, %v1423_v40 }
  0x23   : > { %v1428_v47 = vor.u32 %v1526_v42, %v1425_v43 }
  0x25   : > { %707 = vmatpush.bf16.msra.mxu0 %v1529_v12  ;;  %1550 = vmatpush.bf16.msra.mxu2 %v1529_v12  ;;  %v1343_v12 = vld [vmem:[%s1704_s29 + $0x50] sm:$0xf] }
  0x26   : > { %796 = vmatpush.bf16.msra.mxu1 %v1537_v13  ;;  %1558 = vmatpush.bf16.msra.mxu3 %v1537_v13  ;;  %v1507_v13 = vld [vmem:[%s1704_s29 + $0x54] sm:$0xf0] }
  0x27   : > { %v1344_v20 = vor.u32 %v1507_v13, %v1343_v12 }
  0x29   : > { %708 = vmatpush.bf16.msra.mxu0 %v1528_v14  ;;  %1551 = vmatpush.bf16.msra.mxu2 %v1528_v14  ;;  %v1506_v14 = vld [vmem:[%s1704_s29 + $0x54] sm:$0xf] }
  0x2a   : > { %797 = vmatpush.bf16.msra.mxu1 %v1536_v15  ;;  %1559 = vmatpush.bf16.msra.mxu3 %v1536_v15  ;;  %v1345_v15 = vld [vmem:[%s1704_s29 + $0x58] sm:$0xf0] }
  0x2b   : > { %v1348_v21 = vor.u32 %v1506_v14, %v1345_v15 }
  0x2c   : > { %709 = vmatmul.bf16.vlgmr.msra.gmra.mxu0 %v1304_v24  ;;  %749 = vmatmul.bf16.vlgmr.msra.gmra.mxu2 %v1368_v26  ;;  %v1351_v24 = vld [vmem:[%s1704_s29 + $0x60] sm:$0xf]  ;;  %v1508_v26 = vld [vmem:[%s1704_s29 + $0x64] sm:$0xf] }
  0x2d   : > { %798 = vmatmul.bf16.vlgmr.msra.gmra.mxu1 %v1308_v25  ;;  %838 = vmatmul.bf16.vlgmr.msra.gmra.mxu3 %v1372_v27  ;;  %v1509_v25 = vld [vmem:[%s1704_s29 + $0x64] sm:$0xf0]  ;;  %v1353_v27 = vld [vmem:[%s1704_s29 + $0x68] sm:$0xf0] }
  0x2e   : > { %v1352_v32 = vor.u32 %v1509_v25, %v1351_v24  ;;  %v1356_v33 = vor.u32 %v1508_v26, %v1353_v27 }
  0x3c   : > { %714 = vmatmul.bf16.gmra.mxu0 %v1312_v36  ;;  %754 = vmatmul.bf16.gmra.mxu2 %v1376_v38  ;;  %v1359_v36 = vld [vmem:[%s1704_s29 + $0x70] sm:$0xf]  ;;  %v1510_v38 = vld [vmem:[%s1704_s29 + $0x74] sm:$0xf] }
  0x3d   : > { %803 = vmatmul.bf16.gmra.mxu1 %v1316_v37  ;;  %843 = vmatmul.bf16.gmra.mxu3 %v1380_v39  ;;  %v1511_v37 = vld [vmem:[%s1704_s29 + $0x74] sm:$0xf0]  ;;  %v1361_v39 = vld [vmem:[%s1704_s29 + $0x78] sm:$0xf0] }
  0x3e   : > { %v1360_v44 = vor.u32 %v1511_v37, %v1359_v36  ;;  %v1364_v45 = vor.u32 %v1510_v38, %v1361_v39 }
  0x4c   : > { %719 = vmatmul.bf16.gmra.mxu0 %v1320_v48  ;;  %759 = vmatmul.bf16.gmra.mxu2 %v1384_v50 }
  0x4d   : > { %808 = vmatmul.bf16.gmra.mxu1 %v1324_v49  ;;  %848 = vmatmul.bf16.gmra.mxu3 %v1388_v51 }
  0x5c   : > { %724 = vmatmul.bf16.gmra.mxu0 %v1328_v60  ;;  %764 = vmatmul.bf16.gmra.mxu2 %v1392_v62 }
  0x5d   : > { %813 = vmatmul.bf16.gmra.mxu1 %v1332_v61  ;;  %853 = vmatmul.bf16.gmra.mxu3 %v1396_v63 }
  0x6c   : > { %729 = vmatmul.bf16.gmra.mxu0 %v1336_v8  ;;  %769 = vmatmul.bf16.gmra.mxu2 %v1400_v10 }
  0x6d   : > { %818 = vmatmul.bf16.gmra.mxu1 %v1340_v9  ;;  %858 = vmatmul.bf16.gmra.mxu3 %v1404_v11 }
  0x7c   : > { %734 = vmatmul.bf16.gmra.mxu0 %v1344_v20  ;;  %774 = vmatmul.bf16.gmra.mxu2 %v1408_v22 }
  0x7d   : > { %823 = vmatmul.bf16.gmra.mxu1 %v1348_v21  ;;  %863 = vmatmul.bf16.gmra.mxu3 %v1412_v23 }
  0x8c   : > { %739 = vmatmul.bf16.gmra.mxu0 %v1352_v32  ;;  %779 = vmatmul.bf16.gmra.mxu2 %v1416_v34 }
  0x8d   : > { %828 = vmatmul.bf16.gmra.mxu1 %v1356_v33  ;;  %868 = vmatmul.bf16.gmra.mxu3 %v1420_v35 }
  0x9c   : > { %744 = vmatmul.bf16.gmra.mxu0 %v1360_v44  ;;  %784 = vmatmul.bf16.gmra.mxu2 %v1424_v46 }
  0x9d   : > { %833 = vmatmul.bf16.gmra.mxu1 %v1364_v45  ;;  %873 = vmatmul.bf16.gmra.mxu3 %v1428_v47 }
  0xa9   : > { %v710_v48 = vpop.f32.mrf.mxu0 }
  0xaa   : > { %v799_v49 = vpop.f32.mrf.mxu1 }
  0xab   : > { %v800_v50 = vadd.f32 %v799_v49, %v710_v48 }
  0xad   : > { %978 = vst [vmem:[%s1781_s11] sm:$0xff] %v800_v50  ;;  %v1048_v57 = vmul.f32 %v800_v50, %v800_v50 }
  0xaf   : > { %v750_v51 = vpop.f32.mrf.mxu2 }
  0xb0   : > { %v839_v52 = vpop.f32.mrf.mxu3 }
  0xb1   : > { %v712_v53 = vpop.f32.mrf.mxu0  ;;  %v1784_v55 = vadd.f32 %v839_v52, %v750_v51 }
  0xb2   : > { %v801_v54 = vpop.f32.mrf.mxu1 }
  0xb3   : > { %v802_v56 = vadd.f32 %v801_v54, %v712_v53  ;;  %994 = vst [vmem:[%s1781_s11 + $0x80] sm:$0xff] %v1784_v55 }
  0xb5   : > { %979 = vst [vmem:[%s1781_s11 + $0x8] sm:$0xff] %v802_v56  ;;  %v1010_v58 = vadd.f32 %v802_v56, %v800_v50  ;;  %v1049_v59 = vmul.f32 %v802_v56, %v802_v56 }
  0xb7   : > { %v1080_v60 = vadd.f32 %v1049_v59, %v1048_v57  ;;  %v752_v61 = vpop.f32.mrf.mxu2 }
  0xb8   : > { %v841_v62 = vpop.f32.mrf.mxu3 }
  0xb9   : > { %v715_v63 = vpop.f32.mrf.mxu0  ;;  %v1789_v1 = vadd.f32 %v841_v62, %v752_v61 }
  0xba   : > { %v804_v0 = vpop.f32.mrf.mxu1 }
  0xbb   : > { %v805_v2 = vadd.f32 %v804_v0, %v715_v63  ;;  %995 = vst [vmem:[%s1781_s11 + $0x88] sm:$0xff] %v1789_v1 }
  0xbd   : > { %980 = vst [vmem:[%s1781_s11 + $0x10] sm:$0xff] %v805_v2  ;;  %v1011_v3 = vadd.f32 %v1010_v58, %v805_v2  ;;  %v1050_v4 = vmul.f32 %v805_v2, %v805_v2 }
  0xbf   : > { %v1081_v5 = vadd.f32 %v1080_v60, %v1050_v4  ;;  %v755_v6 = vpop.f32.mrf.mxu2 }
  0xc0   : > { %v844_v7 = vpop.f32.mrf.mxu3 }
  0xc1   : > { %v717_v8 = vpop.f32.mrf.mxu0  ;;  %v1794_v10 = vadd.f32 %v844_v7, %v755_v6 }
  0xc2   : > { %v806_v9 = vpop.f32.mrf.mxu1 }
  0xc3   : > { %v807_v11 = vadd.f32 %v806_v9, %v717_v8  ;;  %996 = vst [vmem:[%s1781_s11 + $0x90] sm:$0xff] %v1794_v10 }
  0xc5   : > { %981 = vst [vmem:[%s1781_s11 + $0x18] sm:$0xff] %v807_v11  ;;  %v1012_v12 = vadd.f32 %v1011_v3, %v807_v11  ;;  %v1051_v13 = vmul.f32 %v807_v11, %v807_v11 }
  0xc7   : > { %v1082_v14 = vadd.f32 %v1081_v5, %v1051_v13  ;;  %v757_v15 = vpop.f32.mrf.mxu2 }
  0xc8   : > { %v846_v16 = vpop.f32.mrf.mxu3 }
  0xc9   : > { %v720_v17 = vpop.f32.mrf.mxu0  ;;  %v1799_v19 = vadd.f32 %v846_v16, %v757_v15 }
  0xca   : > { %v809_v18 = vpop.f32.mrf.mxu1 }
  0xcb   : > { %v810_v20 = vadd.f32 %v809_v18, %v720_v17  ;;  %997 = vst [vmem:[%s1781_s11 + $0x98] sm:$0xff] %v1799_v19 }
  0xcd   : > { %982 = vst [vmem:[%s1781_s11 + $0x20] sm:$0xff] %v810_v20  ;;  %v1804_v21 = vadd.f32 %v1012_v12, %v810_v20  ;;  %v1052_v22 = vmul.f32 %v810_v20, %v810_v20 }
  0xcf   : > { %v1806_v23 = vadd.f32 %v1082_v14, %v1052_v22  ;;  %v760_v24 = vpop.f32.mrf.mxu2 }
  0xd0   : > { %v849_v25 = vpop.f32.mrf.mxu3 }
  0xd1   : > { %v722_v26 = vpop.f32.mrf.mxu0  ;;  %v1808_v28 = vadd.f32 %v849_v25, %v760_v24 }
  0xd2   : > { %v811_v27 = vpop.f32.mrf.mxu1 }
  0xd3   : > { %v812_v29 = vadd.f32 %v811_v27, %v722_v26  ;;  %998 = vst [vmem:[%s1781_s11 + $0xa0] sm:$0xff] %v1808_v28 }
  0xd5   : > { %983 = vst [vmem:[%s1781_s11 + $0x28] sm:$0xff] %v812_v29  ;;  %v1053_v11 = vmul.f32 %v812_v29, %v812_v29  ;;  %v1014_v12 = vadd.f32 %v1804_v21, %v812_v29 }
  0xd7   : > { %v762_v30 = vpop.f32.mrf.mxu2  ;;  %v1084_v20 = vadd.f32 %v1806_v23, %v1053_v11 }
  0xd8   : > { %v851_v31 = vpop.f32.mrf.mxu3 }
  0xd9   : > { %v725_v32 = vpop.f32.mrf.mxu0  ;;  %v1813_v34 = vadd.f32 %v851_v31, %v762_v30 }
  0xda   : > { %v814_v33 = vpop.f32.mrf.mxu1 }
  0xdb   : > { %v815_v35 = vadd.f32 %v814_v33, %v725_v32  ;;  %999 = vst [vmem:[%s1781_s11 + $0xa8] sm:$0xff] %v1813_v34 }
  0xdd   : > { %984 = vst [vmem:[%s1781_s11 + $0x30] sm:$0xff] %v815_v35  ;;  %v1054_v13 = vmul.f32 %v815_v35, %v815_v35  ;;  %v1015_v22 = vadd.f32 %v1014_v12, %v815_v35  ;;  %v1065_v12 = vmul.f32 %v1789_v1, %v1789_v1 }
  0xdf   : > { %v765_v36 = vpop.f32.mrf.mxu2  ;;  %v1085_v26 = vadd.f32 %v1084_v20, %v1054_v13  ;;  %v1066_v20 = vmul.f32 %v1794_v10, %v1794_v10 }
  0xe0   : > { %v854_v37 = vpop.f32.mrf.mxu3 }
  0xe1   : > { %v727_v38 = vpop.f32.mrf.mxu0  ;;  %v1818_v40 = vadd.f32 %v854_v37, %v765_v36 }
  0xe2   : > { %v816_v39 = vpop.f32.mrf.mxu1 }
  0xe3   : > { %v817_v41 = vadd.f32 %v816_v39, %v727_v38  ;;  %1000 = vst [vmem:[%s1781_s11 + $0xb0] sm:$0xff] %v1818_v40 }
  0xe5   : > { %985 = vst [vmem:[%s1781_s11 + $0x38] sm:$0xff] %v817_v41  ;;  %v1055_v24 = vmul.f32 %v817_v41, %v817_v41  ;;  %v1016_v27 = vadd.f32 %v1015_v22, %v817_v41 }
  0xe7   : > { %v767_v42 = vpop.f32.mrf.mxu2  ;;  %v1086_v21 = vadd.f32 %v1085_v26, %v1055_v24 }
  0xe8   : > { %v856_v43 = vpop.f32.mrf.mxu3 }
  0xe9   : > { %v730_v44 = vpop.f32.mrf.mxu0  ;;  %v1823_v46 = vadd.f32 %v856_v43, %v767_v42 }
  0xea   : > { %v819_v45 = vpop.f32.mrf.mxu1 }
  0xeb   : > { %v820_v47 = vadd.f32 %v819_v45, %v730_v44  ;;  %1001 = vst [vmem:[%s1781_s11 + $0xb8] sm:$0xff] %v1823_v46 }
  0xed   : > { %986 = vst [vmem:[%s1781_s11 + $0x40] sm:$0xff] %v820_v47  ;;  %v1056_v30 = vmul.f32 %v820_v47, %v820_v47  ;;  %v1017_v29 = vadd.f32 %v1016_v27, %v820_v47 }
  0xef   : > { %v770_v48 = vpop.f32.mrf.mxu2  ;;  %v1087_v32 = vadd.f32 %v1086_v21, %v1056_v30  ;;  %v1069_v21 = vmul.f32 %v1813_v34, %v1813_v34 }
  0xf0   : > { %v859_v49 = vpop.f32.mrf.mxu3 }
  0xf1   : > { %v732_v50 = vpop.f32.mrf.mxu0  ;;  %v1828_v52 = vadd.f32 %v859_v49, %v770_v48 }
  0xf2   : > { %v821_v51 = vpop.f32.mrf.mxu1 }
  0xf3   : > { %v822_v53 = vadd.f32 %v821_v51, %v732_v50  ;;  %1002 = vst [vmem:[%s1781_s11 + $0xc0] sm:$0xff] %v1828_v52 }
  0xf5   : > { %987 = vst [vmem:[%s1781_s11 + $0x48] sm:$0xff] %v822_v53  ;;  %v1057_v31 = vmul.f32 %v822_v53, %v822_v53  ;;  %v1018_v33 = vadd.f32 %v1017_v29, %v822_v53 }
  0xf7   : > { %v772_v54 = vpop.f32.mrf.mxu2  ;;  %v1088_v42 = vadd.f32 %v1087_v32, %v1057_v31  ;;  %v1070_v31 = vmul.f32 %v1818_v40, %v1818_v40 }
  0xf8   : > { %v861_v56 = vpop.f32.mrf.mxu3 }
  0xf9   : > { %v735_v57 = vpop.f32.mrf.mxu0  ;;  %v1833_v59 = vadd.f32 %v861_v56, %v772_v54 }
  0xfa   : > { %v824_v58 = vpop.f32.mrf.mxu1 }
  0xfb   : > { %v825_v60 = vadd.f32 %v824_v58, %v735_v57  ;;  %1003 = vst [vmem:[%s1781_s11 + $0xc8] sm:$0xff] %v1833_v59 }
  0xfd   : > { %988 = vst [vmem:[%s1781_s11 + $0x50] sm:$0xff] %v825_v60  ;;  %v1058_v36 = vmul.f32 %v825_v60, %v825_v60  ;;  %v1019_v43 = vadd.f32 %v1018_v33, %v825_v60 }
  0xff   : > { %v775_v61 = vpop.f32.mrf.mxu2  ;;  %v1089_v45 = vadd.f32 %v1088_v42, %v1058_v36 }
 0x100   : > { %v864_v62 = vpop.f32.mrf.mxu3 }
 0x101   : > { %v737_v63 = vpop.f32.mrf.mxu0  ;;  %v1838_v2 = vadd.f32 %v864_v62, %v775_v61 }
 0x102   : > { %v826_v0 = vpop.f32.mrf.mxu1 }
 0x103   : > { %v827_v3 = vadd.f32 %v826_v0, %v737_v63  ;;  %1004 = vst [vmem:[%s1781_s11 + $0xd0] sm:$0xff] %v1838_v2 }
 0x105   : > { %989 = vst [vmem:[%s1781_s11 + $0x58] sm:$0xff] %v827_v3  ;;  %v1059_v44 = vmul.f32 %v827_v3, %v827_v3  ;;  %v1020_v48 = vadd.f32 %v1019_v43, %v827_v3 }
 0x107   : > { %v777_v4 = vpop.f32.mrf.mxu2  ;;  %v1090_v49 = vadd.f32 %v1089_v45, %v1059_v44 }
 0x108   : > { %v866_v5 = vpop.f32.mrf.mxu3 }
 0x109   : > { %v740_v6 = vpop.f32.mrf.mxu0  ;;  %v1843_v8 = vadd.f32 %v866_v5, %v777_v4 }
 0x10a   : > { %v829_v7 = vpop.f32.mrf.mxu1 }
 0x10b   : > { %v830_v9 = vadd.f32 %v829_v7, %v740_v6  ;;  %1005 = vst [vmem:[%s1781_s11 + $0xd8] sm:$0xff] %v1843_v8  ;;  %v1064_v7 = vmul.f32 %v1784_v55, %v1784_v55 }
 0x10d   : > { %990 = vst [vmem:[%s1781_s11 + $0x60] sm:$0xff] %v830_v9  ;;  %v1060_v47 = vmul.f32 %v830_v9, %v830_v9  ;;  %v1021_v50 = vadd.f32 %v1020_v48, %v830_v9 }
 0x10f   : > { %v780_v14 = vpop.f32.mrf.mxu2  ;;  %v1091_v53 = vadd.f32 %v1090_v49, %v1060_v47 }
 0x110   : > { %v869_v15 = vpop.f32.mrf.mxu3 }
 0x111   : > { %v742_v16 = vpop.f32.mrf.mxu0  ;;  %v1849_v18 = vadd.f32 %v869_v15, %v780_v14 }
 0x112   : > { %v831_v17 = vpop.f32.mrf.mxu1 }
 0x113   : > { %v832_v25 = vadd.f32 %v831_v17, %v742_v16  ;;  %1006 = vst [vmem:[%s1781_s11 + $0xe0] sm:$0xff] %v1849_v18  ;;  %v1076_v48 = vmul.f32 %v1849_v18, %v1849_v18 }
 0x115   : > { %991 = vst [vmem:[%s1781_s11 + $0x68] sm:$0xff] %v832_v25  ;;  %v1061_v51 = vmul.f32 %v832_v25, %v832_v25  ;;  %v1022_v54 = vadd.f32 %v1021_v50, %v832_v25 }
 0x117   : > { %v782_v37 = vpop.f32.mrf.mxu2  ;;  %v1092_v63 = vadd.f32 %v1091_v53, %v1061_v51 }
 0x118   : > { %v871_v38 = vpop.f32.mrf.mxu3 }
 0x119   : > { %v745_v23 = vpop.f32.mrf.mxu0  ;;  %v1855_v39 = vadd.f32 %v871_v38, %v782_v37 }
 0x11a   : > { %v834_v35 = vpop.f32.mrf.mxu1 }
 0x11b   : > { %v835_v41 = vadd.f32 %v834_v35, %v745_v23  ;;  %1007 = vst [vmem:[%s1781_s11 + $0xe8] sm:$0xff] %v1855_v39 }
 0x11d   : > { %992 = vst [vmem:[%s1781_s11 + $0x70] sm:$0xff] %v835_v41  ;;  %v1062_v56 = vmul.f32 %v835_v41, %v835_v41  ;;  %v1023_v0 = vadd.f32 %v1022_v54, %v835_v41 }
 0x11f   : > { %v785_v57 = vpop.f32.mrf.mxu2  ;;  %v1093_v3 = vadd.f32 %v1092_v63, %v1062_v56 }
 0x120   : > { %v874_v58 = vpop.f32.mrf.mxu3 }
 0x121   : > { %v747_v61 = vpop.f32.mrf.mxu0  ;;  %v875_v62 = vadd.f32 %v874_v58, %v785_v57 }
 0x122   : > { %v836_v60 = vpop.f32.mrf.mxu1 }
 0x123   : > { %v837_v4 = vadd.f32 %v836_v60, %v747_v61  ;;  %1008 = vst [vmem:[%s1781_s11 + $0xf0] sm:$0xff] %v875_v62  ;;  %v1078_v53 = vmul.f32 %v875_v62, %v875_v62 }
 0x125   : > { %993 = vst [vmem:[%s1781_s11 + $0x78] sm:$0xff] %v837_v4  ;;  %v1024_v5 = vadd.f32 %v1023_v0, %v837_v4  ;;  %v1063_v6 = vmul.f32 %v837_v4, %v837_v4 }
 0x127   : > { %v1025_v9 = vadd.f32 %v1024_v5, %v1784_v55  ;;  %v1094_v11 = vadd.f32 %v1093_v3, %v1063_v6  ;;  %v787_v15 = vpop.f32.mrf.mxu2  ;;  %v1067_v55 = vmul.f32 %v1799_v19, %v1799_v19 }
 0x128   : > { %v876_v16 = vpop.f32.mrf.mxu3 }
 0x129   : > { %v1026_v13 = vadd.f32 %v1025_v9, %v1789_v1  ;;  %v1095_v14 = vadd.f32 %v1094_v11, %v1064_v7  ;;  %v877_v17 = vadd.f32 %v876_v16, %v787_v15  ;;  %v1068_v1 = vmul.f32 %v1808_v28, %v1808_v28 }
 0x12b   : > { %v1027_v22 = vadd.f32 %v1026_v13, %v1794_v10  ;;  %v1096_v24 = vadd.f32 %v1095_v14, %v1065_v12  ;;  %1009 = vst [vmem:[%s1781_s11 + $0xf8] sm:$0xff] %v877_v17  ;;  %v1079_v56 = vmul.f32 %v877_v17, %v877_v17 }
 0x12d   : > { %v1028_v25 = vadd.f32 %v1027_v22, %v1799_v19  ;;  %v1097_v26 = vadd.f32 %v1096_v24, %v1066_v20  ;;  %v1071_v19 = vmul.f32 %v1823_v46, %v1823_v46 }
 0x12f   : > { %v1029_v27 = vadd.f32 %v1028_v25, %v1808_v28  ;;  %v1098_v30 = vadd.f32 %v1097_v26, %v1067_v55  ;;  %v1072_v28 = vmul.f32 %v1828_v52, %v1828_v52 }
 0x131   : > { %v1030_v29 = vadd.f32 %v1029_v27, %v1813_v34  ;;  %v1099_v10 = vadd.f32 %v1098_v30, %v1068_v1  ;;  %v1073_v34 = vmul.f32 %v1833_v59, %v1833_v59 }
 0x133   : > { %v1100_v32 = vadd.f32 %v1099_v10, %v1069_v21  ;;  %v1031_v33 = vadd.f32 %v1030_v29, %v1818_v40  ;;  %v1074_v40 = vmul.f32 %v1838_v2, %v1838_v2 }
 0x135   : > { %v1032_v36 = vadd.f32 %v1031_v33, %v1823_v46  ;;  %v1101_v37 = vadd.f32 %v1100_v32, %v1070_v31  ;;  %v1075_v46 = vmul.f32 %v1843_v8, %v1843_v8 }
 0x137   : > { %v1033_v38 = vadd.f32 %v1032_v36, %v1828_v52  ;;  %v1102_v23 = vadd.f32 %v1101_v37, %v1071_v19 }
 0x139   : > { %v1034_v35 = vadd.f32 %v1033_v38, %v1833_v59  ;;  %v1103_v42 = vadd.f32 %v1102_v23, %v1072_v28 }
 0x13b   : > { %v1035_v43 = vadd.f32 %v1034_v35, %v1838_v2  ;;  %v1104_v44 = vadd.f32 %v1103_v42, %v1073_v34  ;;  %v1077_v2 = vmul.f32 %v1855_v39, %v1855_v39 }
 0x13d   : > { %v1036_v41 = vadd.f32 %v1035_v43, %v1843_v8  ;;  %v1105_v52 = vadd.f32 %v1104_v44, %v1074_v40 }
 0x13f   : > { %v1037_v45 = vadd.f32 %v1036_v41, %v1849_v18  ;;  %v1106_v59 = vadd.f32 %v1105_v52, %v1075_v46 }
 0x141   : > { %v1107_v47 = vadd.f32 %v1106_v59, %v1076_v48  ;;  %v1038_v49 = vadd.f32 %v1037_v45, %v1855_v39 }
 0x143   : > { %v1108_v50 = vadd.f32 %v1107_v47, %v1077_v2  ;;  %v1039_v51 = vadd.f32 %v1038_v49, %v875_v62 }
 0x145   : > { %v1109_v54 = vadd.f32 %v1108_v50, %v1078_v53  ;;  %v1040_v8 = vadd.f32 %v1039_v51, %v877_v17 }
 0x147   : > { %v1041_v57 = vrot.slane %v1040_v8, 4  ;;  %v1110_v58 = vadd.f32 %v1109_v54, %v1079_v56 }
 0x149   : > { %v1042_v61 = vadd.f32 %v1041_v57, %v1040_v8  ;;  %v1111_v60 = vrot.slane %v1110_v58, 4 }
 0x14b   : > { %v1043_v18 = vrot.slane %v1042_v61, 2  ;;  %v1112_v63 = vadd.f32 %v1111_v60, %v1110_v58 }
 0x14d   : > { %v1044_v0 = vadd.f32 %v1043_v18, %v1042_v61  ;;  %v1113_v4 = vrot.slane %v1112_v63, 2 }
 0x14f   : > { %v1045_v3 = vrot.slane %v1044_v0, 1  ;;  %v1114_v5 = vadd.f32 %v1113_v4, %v1112_v63 }
 0x151   : > { %v1046_v39 = vadd.f32 %v1045_v3, %v1044_v0  ;;  %v1115_v62 = vrot.slane %v1114_v5, 1 }
 0x153   : > { %1047 = vst [vmem:[%s306_s13] sm:$0x1] %v1046_v39  ;;  %v1116_v6 = vadd.f32 %v1115_v62, %v1114_v5 }
 0x155   : > { %1117 = vst [vmem:[%s312_s20] sm:$0x1] %v1116_v6 }
 0x156 PF: > { %s15_s17 = sadd.s32 1, %s1606_s17   ;;  %s1927_s15 = smov %s1602_s16 }
 0x157   : > { %p12_p6 = scmp.ge.s32.totalorder %s15_s17, 4   ;;  %s1928_s16 = smov %s1930_s18 }
 0x159   :  { %14 = sbr.rel (!%p12_p6) target bundleno = 2 (0x2), region = 93 }

// kernel: _lambda_.27
= control target key start
LH: loop header
LB: loop body
LE: loop exit
PB: predicated region body
PF: predicated region fallthrough
CT: control target
= control target key end

     0   :  { %s248_s0 = inlined_call_operand.vmem [shape: f32[128,128], index: 0, kind: input, shape index: {}, may-alias: {0,3}]   ;;  %s249_s1 = inlined_call_operand.vmem [shape: f32[1,128], index: 1, kind: input, shape index: {}]   ;;  %s250_s2 = inlined_call_operand.vmem [shape: f32[1,128], index: 2, kind: input, shape index: {}]   ;;  %s251_s3 = inlined_call_operand.vmem [shape: f32[128,128], index: 3, kind: output, shape index: {}, may-alias: {0,3}]  }
   0x1   :  { %v14_v0 = vld [vmem:[%s248_s0] sm:$0xff]  ;;  %v15_v3 = vld [vmem:[%s248_s0 + $0x8] sm:$0xff]  ;;  %v16_v6 = vld [vmem:[%s248_s0 + $0x10] sm:$0xff] }
   0x2   :  { %v106_v1 = vld [vmem:[%s249_s1] ss:$0 sm:$0xff]  ;;  %v17_v7 = vld [vmem:[%s248_s0 + $0x18] sm:$0xff]  ;;  %v19_v12 = vld [vmem:[%s248_s0 + $0x28] sm:$0xff] }
   0x3   :  { %v137_v2 = vld [vmem:[%s250_s2] ss:$0 sm:$0xff]  ;;  %v34_v4 = vmul.f32 %v106_v1, %v14_v0  ;;  %v35_v5 = vmul.f32 %v106_v1, %v15_v3  ;;  %v36_v9 = vmul.f32 %v106_v1, %v16_v6  ;;  %v37_v10 = vmul.f32 %v106_v1, %v17_v7  ;;  %v20_v13 = vld [vmem:[%s248_s0 + $0x30] sm:$0xff]  ;;  %v21_v14 = vld [vmem:[%s248_s0 + $0x38] sm:$0xff] }
   0x4   :  { %v18_v8 = vld [vmem:[%s248_s0 + $0x20] sm:$0xff]  ;;  %v39_v17 = vmul.f32 %v106_v1, %v19_v12  ;;  %v40_v18 = vmul.f32 %v106_v1, %v20_v13  ;;  %v41_v22 = vmul.f32 %v106_v1, %v21_v14  ;;  %v23_v24 = vld [vmem:[%s248_s0 + $0x48] sm:$0xff]  ;;  %v24_v29 = vld [vmem:[%s248_s0 + $0x50] sm:$0xff] }
   0x5   :  { %v38_v11 = vmul.f32 %v106_v1, %v18_v8  ;;  %v54_v15 = vadd.f32 %v137_v2, %v34_v4  ;;  %v55_v16 = vadd.f32 %v137_v2, %v35_v5  ;;  %v56_v19 = vadd.f32 %v137_v2, %v36_v9  ;;  %v22_v23 = vld [vmem:[%s248_s0 + $0x40] sm:$0xff]  ;;  %v25_v30 = vld [vmem:[%s248_s0 + $0x58] sm:$0xff]  ;;  %v27_v35 = vld [vmem:[%s248_s0 + $0x68] sm:$0xff] }
   0x6   :  { %v57_v20 = vadd.f32 %v137_v2, %v37_v10  ;;  %v59_v27 = vadd.f32 %v137_v2, %v39_v17  ;;  %v60_v28 = vadd.f32 %v137_v2, %v40_v18  ;;  %v26_v31 = vld [vmem:[%s248_s0 + $0x60] sm:$0xff]  ;;  %v61_v34 = vadd.f32 %v137_v2, %v41_v22  ;;  %v28_v36 = vld [vmem:[%s248_s0 + $0x70] sm:$0xff] }
   0x7   :  { %v58_v21 = vadd.f32 %v137_v2, %v38_v11  ;;  %v70_v25 = vmax.f32 %v54_v15, 0.0  ;;  %v71_v26 = vmax.f32 %v55_v16, 0.0  ;;  %v72_v32 = vmax.f32 %v56_v19, 0.0 }
   0x8   :  { %v73_v33 = vmax.f32 %v57_v20, 0.0  ;;  %v75_v38 = vmax.f32 %v59_v27, 0.0  ;;  %v42_v39 = vmul.f32 %v106_v1, %v22_v23  ;;  %v43_v40 = vmul.f32 %v106_v1, %v23_v24 }
   0x9   :  { %86 = vst [vmem:[%s251_s3] sm:$0xff] %v70_v25  ;;  %v74_v37 = vmax.f32 %v58_v21, 0.0  ;;  %v76_v42 = vmax.f32 %v60_v28, 0.0  ;;  %v44_v43 = vmul.f32 %v106_v1, %v24_v29  ;;  %v45_v44 = vmul.f32 %v106_v1, %v25_v30 }
   0xa   :  { %v46_v45 = vmul.f32 %v106_v1, %v26_v31  ;;  %v62_v46 = vadd.f32 %v137_v2, %v42_v39  ;;  %v63_v47 = vadd.f32 %v137_v2, %v43_v40  ;;  %v47_v48 = vmul.f32 %v106_v1, %v27_v35 }
   0xb   :  { %v48_v49 = vmul.f32 %v106_v1, %v28_v36  ;;  %v77_v50 = vmax.f32 %v61_v34, 0.0  ;;  %v64_v51 = vadd.f32 %v137_v2, %v44_v43  ;;  %v65_v52 = vadd.f32 %v137_v2, %v45_v44 }
   0xc   :  { %v78_v54 = vmax.f32 %v62_v46, 0.0  ;;  %v66_v55 = vadd.f32 %v137_v2, %v46_v45  ;;  %v79_v56 = vmax.f32 %v63_v47, 0.0  ;;  %v67_v57 = vadd.f32 %v137_v2, %v47_v48 }
   0xd   :  { %v80_v58 = vmax.f32 %v64_v51, 0.0  ;;  %v68_v59 = vadd.f32 %v137_v2, %v48_v49  ;;  %v81_v60 = vmax.f32 %v65_v52, 0.0 }
   0xe   :  { %v82_v62 = vmax.f32 %v66_v55, 0.0  ;;  %v83_v63 = vmax.f32 %v67_v57, 0.0 }
   0xf   :  { %v84_v0 = vmax.f32 %v68_v59, 0.0 }
  0x10   :  { %v29_v41 = vld [vmem:[%s248_s0 + $0x78] sm:$0xff] }
  0x11   :  { %87 = vst [vmem:[%s251_s3 + $0x8] sm:$0xff] %v71_v26  ;;  %v49_v53 = vmul.f32 %v106_v1, %v29_v41 }
  0x12   :  { %88 = vst [vmem:[%s251_s3 + $0x10] sm:$0xff] %v72_v32 }
  0x13   :  { %89 = vst [vmem:[%s251_s3 + $0x18] sm:$0xff] %v73_v33  ;;  %v69_v61 = vadd.f32 %v137_v2, %v49_v53 }
  0x14   :  { %90 = vst [vmem:[%s251_s3 + $0x20] sm:$0xff] %v74_v37 }
  0x15   :  { %91 = vst [vmem:[%s251_s3 + $0x28] sm:$0xff] %v75_v38  ;;  %v85_v1 = vmax.f32 %v69_v61, 0.0 }
  0x16   :  { %92 = vst [vmem:[%s251_s3 + $0x30] sm:$0xff] %v76_v42 }
  0x17   :  { %93 = vst [vmem:[%s251_s3 + $0x38] sm:$0xff] %v77_v50 }
  0x18   :  { %94 = vst [vmem:[%s251_s3 + $0x40] sm:$0xff] %v78_v54 }
  0x19   :  { %95 = vst [vmem:[%s251_s3 + $0x48] sm:$0xff] %v79_v56 }
  0x1a   :  { %96 = vst [vmem:[%s251_s3 + $0x50] sm:$0xff] %v80_v58 }
  0x1b   :  { %97 = vst [vmem:[%s251_s3 + $0x58] sm:$0xff] %v81_v60 }
  0x1c   :  { %98 = vst [vmem:[%s251_s3 + $0x60] sm:$0xff] %v82_v62 }
  0x1d   :  { %99 = vst [vmem:[%s251_s3 + $0x68] sm:$0xff] %v83_v63 }
  0x1e   :  { %100 = vst [vmem:[%s251_s3 + $0x70] sm:$0xff] %v84_v0 }
  0x1f   :  { %101 = vst [vmem:[%s251_s3 + $0x78] sm:$0xff] %v85_v1 }

// kernel: _lambda_.26
= control target key start
LH: loop header
LB: loop body
LE: loop exit
PB: predicated region body
PF: predicated region fallthrough
CT: control target
= control target key end

     0   :  { %s1132_s15 = smov 0   ;;  %s1134_s16 = smov 0   ;;  %s1291_s0 = inlined_call_operand.vmem [shape: bf16[128,640], index: 0, kind: input, shape index: {}]   ;;  %s1292_s1 = inlined_call_operand.vmem [shape: bf16[640,128], index: 1, kind: input, shape index: {}]   ;;  %s1293_s2 = inlined_call_operand.vmem [shape: f32[128,128], index: 2, kind: output, shape index: {0}]   ;;  %s1294_s3 = inlined_call_operand.vmem [shape: f32[1,1,128], index: 3, kind: output, shape index: {1}]   ;;  %s1295_s4 = inlined_call_operand.vmem [shape: f32[1,1,128], index: 4, kind: output, shape index: {2}]  }
   0x1   :  { %s1136_s17 = smov 0   ;;  %s1138_s18 = smov 0  }
   0x2   :  { %s1140_s19 = smov 0  }
   0x3 LB: > { %s27_s20 = sadd.s32 1, %s1100_s18  ;;  %p50_p1 = scmp.ne.s32.totalorder %s1092_s16, %s1088_s15  ;;  %s1104_s19 = sphi %s1140_s19, %s15_s19   ;;  %s1100_s18 = sphi %s1138_s18, %s1299_s18   ;;  %s1096_s17 = sphi %s1136_s17, %s1298_s17   ;;  %s1092_s16 = sphi %s1134_s16, %s1297_s16   ;;  %s1088_s15 = sphi %s1132_s15, %s1296_s15  }
   0x4   : > { %p28_p0 = scmp.ge.s32.totalorder %s27_s20, 5  ;;  %p51_p2 = scmp.eq.s32.totalorder %s1104_s19, 0 }
   0x5   : > { %s43_s22 = sadd.s32 1, %s1092_s16  ;;  %p906_p5 = scmp.ge.s32.totalorder %s1104_s19, 5 }
   0x6   : > { %s1301_s20 = smov (%p28_p0, %s27_s20), 0  ;;  %p52_p3 = por %p51_p2, %p50_p1 }
   0x7   : > { %s39_s21 = ssub.s32 %s1100_s18, %s1301_s20  ;;  %188 = sbr.rel (%p906_p5) target bundleno = 32 (0x20), region = 16 }
   0x8   : > { %p41_p4 = scmp.eq.s32.totalorder %s39_s21, 0 }
   0xa   : > { %s1167_s23 = scalar_select %p41_p4, %s1092_s16, %s43_s22  }
   0xc   : > { %191 = sbr.rel (!%p52_p3) target bundleno = 32 (0x20), region = 20  ;;  %s193_s24 = sand.u32 (%p52_p3), 1, %s1092_s16  }
   0xd   : > { %s908_s25 = sshll.u32 (%p52_p3), %s1100_s18, 2  ;;  %s907_s26 = sshll.u32 (%p52_p3), %s193_s24, 6 }
   0xe   : > { %s1175_s29 = scalar_lea.vmem (%p52_p3), %s1291_s0, %s908_s25  ;;  %s195_s30 = scalar_lea.vmem (%p52_p3), [#allocation3], %s907_s26 }
   0xf   : > { %v217_v0 = vld [vmem:[%s1175_s29] sm:$0xf] (%p52_p3)  ;;  %v219_v1 = vld [vmem:[%s1175_s29 + $0x14] sm:$0xf] (%p52_p3)  ;;  %v221_v2 = vld [vmem:[%s1175_s29 + $0x28] sm:$0xf] (%p52_p3) }
  0x10   : > { %218 = vst [vmem:[%s195_s30] sm:$0xf] (%p52_p3), %v217_v0  ;;  %v223_v3 = vld [vmem:[%s1175_s29 + $0x3c] sm:$0xf] (%p52_p3)  ;;  %v225_v4 = vld [vmem:[%s1175_s29 + $0x50] sm:$0xf] (%p52_p3) }
  0x11   : > { %220 = vst [vmem:[%s195_s30 + $0x4] sm:$0xf] %v219_v1  ;;  %v227_v5 = vld [vmem:[%s1175_s29 + $0x64] sm:$0xf]  ;;  %v229_v6 = vld [vmem:[%s1175_s29 + $0x78] sm:$0xf] }
  0x12   : > { %222 = vst [vmem:[%s195_s30 + $0x8] sm:$0xf] %v221_v2  ;;  %v231_v7 = vld [vmem:[%s1175_s29 + $0x8c] sm:$0xf]  ;;  %v233_v8 = vld [vmem:[%s1175_s29 + $0xa0] sm:$0xf] }
  0x13   : > { %224 = vst [vmem:[%s195_s30 + $0xc] sm:$0xf] %v223_v3  ;;  %v235_v9 = vld [vmem:[%s1175_s29 + $0xb4] sm:$0xf]  ;;  %v237_v10 = vld [vmem:[%s1175_s29 + $0xc8] sm:$0xf] }
  0x14   : > { %226 = vst [vmem:[%s195_s30 + $0x10] sm:$0xf] %v225_v4  ;;  %v239_v11 = vld [vmem:[%s1175_s29 + $0xdc] sm:$0xf]  ;;  %v241_v12 = vld [vmem:[%s1175_s29 + $0xf0] sm:$0xf] }
  0x15   : > { %228 = vst [vmem:[%s195_s30 + $0x14] sm:$0xf] %v227_v5  ;;  %v243_v13 = vld [vmem:[%s1175_s29 + $0x104] sm:$0xf]  ;;  %v245_v14 = vld [vmem:[%s1175_s29 + $0x118] sm:$0xf] }
  0x16   : > { %230 = vst [vmem:[%s195_s30 + $0x18] sm:$0xf] %v229_v6  ;;  %v247_v15 = vld [vmem:[%s1175_s29 + $0x12c] sm:$0xf] }
  0x17   : > { %232 = vst [vmem:[%s195_s30 + $0x1c] sm:$0xf] %v231_v7 }
  0x18   : > { %234 = vst [vmem:[%s195_s30 + $0x20] sm:$0xf] %v233_v8 }
  0x19   : > { %236 = vst [vmem:[%s195_s30 + $0x24] sm:$0xf] %v235_v9 }
  0x1a   : > { %238 = vst [vmem:[%s195_s30 + $0x28] sm:$0xf] %v237_v10 }
  0x1b   : > { %240 = vst [vmem:[%s195_s30 + $0x2c] sm:$0xf] %v239_v11 }
  0x1c   : > { %242 = vst [vmem:[%s195_s30 + $0x30] sm:$0xf] %v241_v12 }
  0x1d   : > { %244 = vst [vmem:[%s195_s30 + $0x34] sm:$0xf] %v243_v13 }
  0x1e   : > { %246 = vst [vmem:[%s195_s30 + $0x38] sm:$0xf] %v245_v14 }
  0x1f   : > { %248 = vst [vmem:[%s195_s30 + $0x3c] sm:$0xf] %v247_v15 }
  0x20 PF: > { %p909_p6 = scmp.ge.s32.totalorder %s1104_s19, 1  ;;  %p315_p7 = scmp.lt.s32.totalorder %s1104_s19, 6 }
  0x22   : > { %p316_p8 = pnand %p909_p6, %p315_p7 }
  0x23   : > { %s322_s5 = sand.u32 (!%p316_p8), 1, %s1088_s15   ;;  %s911_s6 = sshll.u32 (!%p316_p8), %s1096_s17, 4 }
  0x24   : > { %319 = sbr.rel (%p316_p8) target bundleno = 302 (0x12e), region = 65  ;;  %s910_s7 = sshll.u32 (!%p316_p8), %s322_s5, 6 }
  0x25   : > { %p372_p9 = scmp.lt.s32.totalorder (!%p316_p8), %s911_s6, 79  ;;  %s1202_s12 = scalar_lea.vmem (!%p316_p8), [#allocation3], %s910_s7 }
  0x26   : > { %p913_p10 = scmp.ne.s32.totalorder (!%p316_p8), %s1096_s17, 0 }
  0x29   : > { %s1303_s6 = smov (!%p372_p9, %s911_s6), 79  ;;  %404 = sbr.rel (%p913_p10) target bundleno = 63 (0x3f), region = 73 }
  0x2a   : > { %s912_s8 = sshll.u32 %s1303_s6, 2 }
  0x2b   : > { %s1200_s11 = scalar_lea.vmem %s1292_s1, %s912_s8 }
  0x2e   : > { %v1106_v16 = vmov 0.0  }
  0x2f   : > { %405 = vst [vmem:[#allocation2 + $0x30] sm:$0xff] %v1106_v16 }
  0x30   : > { %406 = vst [vmem:[#allocation2] sm:$0xff] %v1106_v16 }
  0x31   : > { %407 = vst [vmem:[#allocation2 + $0x58] sm:$0xff] %v1106_v16 }
  0x32   : > { %408 = vst [vmem:[#allocation2 + $0x18] sm:$0xff] %v1106_v16 }
  0x33   : > { %409 = vst [vmem:[#allocation2 + $0x50] sm:$0xff] %v1106_v16 }
  0x34   : > { %410 = vst [vmem:[#allocation2 + $0x68] sm:$0xff] %v1106_v16 }
  0x35   : > { %411 = vst [vmem:[#allocation2 + $0x8] sm:$0xff] %v1106_v16 }
  0x36   : > { %412 = vst [vmem:[#allocation2 + $0x48] sm:$0xff] %v1106_v16 }
  0x37   : > { %413 = vst [vmem:[#allocation2 + $0x40] sm:$0xff] %v1106_v16 }
  0x38   : > { %414 = vst [vmem:[#allocation2 + $0x20] sm:$0xff] %v1106_v16 }
  0x39   : > { %415 = vst [vmem:[#allocation2 + $0x10] sm:$0xff] %v1106_v16 }
  0x3a   : > { %416 = vst [vmem:[#allocation2 + $0x38] sm:$0xff] %v1106_v16 }
  0x3b   : > { %417 = vst [vmem:[#allocation2 + $0x60] sm:$0xff] %v1106_v16 }
  0x3c   : > { %418 = vst [vmem:[#allocation2 + $0x70] sm:$0xff] %v1106_v16 }
  0x3d   : > { %419 = vst [vmem:[#allocation2 + $0x78] sm:$0xff] %v1106_v16 }
  0x3e   : > { %420 = vst [vmem:[#allocation2 + $0x28] sm:$0xff] %v1106_v16 }
  0x3f PF: > { %v1000_v17 = vld [vmem:[%s1200_s11 + $0x38] sm:$0xff]  ;;  %v999_v18 = vld [vmem:[%s1200_s11 + $0x30] sm:$0xff]  ;;  %v998_v19 = vld [vmem:[%s1200_s11 + $0x28] sm:$0xff]  ;;  %p978_p11 = scmp.ne.s32.totalorder %s1096_s17, 4 }
  0x40   : > { %565 = vmatpush.bf16.msra.mxu0 %v1000_v17  ;;  %1001 = vmatpush.bf16.msra.mxu1 %v1000_v17  ;;  %v997_v20 = vld [vmem:[%s1200_s11 + $0x20] sm:$0xff]  ;;  %v996_v21 = vld [vmem:[%s1200_s11 + $0x18] sm:$0xff]  ;;  %v995_v22 = vld [vmem:[%s1200_s11 + $0x10] sm:$0xff] }
  0x41   : > { %1002 = vmatpush.bf16.msra.mxu2 %v1000_v17  ;;  %1003 = vmatpush.bf16.msra.mxu3 %v1000_v17  ;;  %v994_v23 = vld [vmem:[%s1200_s11 + $0x8] sm:$0xff]  ;;  %v993_v24 = vld [vmem:[%s1200_s11] sm:$0xff]  ;;  %v987_v26 = vld [vmem:[%s1202_s12 + $0x10] sm:$0xff] }
  0x42   : > { %v985_v25 = vld [vmem:[%s1202_s12] sm:$0xff]  ;;  %v991_v28 = vld [vmem:[%s1202_s12 + $0x30] sm:$0xff]  ;;  %v986_v29 = vld [vmem:[%s1202_s12 + $0x8] sm:$0xff] }
  0x43   : > { %v989_v27 = vld [vmem:[%s1202_s12 + $0x20] sm:$0xff]  ;;  %v988_v30 = vld [vmem:[%s1202_s12 + $0x18] sm:$0xff]  ;;  %v990_v31 = vld [vmem:[%s1202_s12 + $0x28] sm:$0xff] }
  0x44   : > { %566 = vmatpush.bf16.msra.mxu0 %v999_v18  ;;  %1004 = vmatpush.bf16.msra.mxu1 %v999_v18  ;;  %v992_v32 = vld [vmem:[%s1202_s12 + $0x38] sm:$0xff]  ;;  %v421_v33 = vld [vmem:[#allocation2 + $0x30] sm:$0xff]  ;;  %v429_v39 = vld [vmem:[#allocation2 + $0x40] sm:$0xff] }
  0x45   : > { %1005 = vmatpush.bf16.msra.mxu2 %v999_v18  ;;  %1006 = vmatpush.bf16.msra.mxu3 %v999_v18  ;;  %v425_v34 = vld [vmem:[#allocation2 + $0x50] sm:$0xff]  ;;  %v433_v40 = vld [vmem:[#allocation2 + $0x60] sm:$0xff]  ;;  %v426_v42 = vld [vmem:[#allocation2 + $0x68] sm:$0xff] }
  0x46   : > { %v422_v41 = vld [vmem:[#allocation2] sm:$0xff]  ;;  %v434_v52 = vld [vmem:[#allocation2 + $0x70] sm:$0xff]  ;;  %v423_v53 = vld [vmem:[#allocation2 + $0x58] sm:$0xff] }
  0x47   : > { %v430_v51 = vld [vmem:[#allocation2 + $0x20] sm:$0xff]  ;;  %v427_v54 = vld [vmem:[#allocation2 + $0x8] sm:$0xff]  ;;  %v431_v63 = vld [vmem:[#allocation2 + $0x10] sm:$0xff] }
  0x48   : > { %567 = vmatpush.bf16.msra.mxu0 %v998_v19  ;;  %1007 = vmatpush.bf16.msra.mxu1 %v998_v19  ;;  %v435_v0 = vld [vmem:[#allocation2 + $0x78] sm:$0xff]  ;;  %v428_v2 = vld [vmem:[#allocation2 + $0x48] sm:$0xff] }
  0x49   : > { %1008 = vmatpush.bf16.msra.mxu2 %v998_v19  ;;  %1009 = vmatpush.bf16.msra.mxu3 %v998_v19  ;;  %v424_v1 = vld [vmem:[#allocation2 + $0x18] sm:$0xff]  ;;  %v436_v12 = vld [vmem:[#allocation2 + $0x28] sm:$0xff] }
  0x4a   : > { %v432_v11 = vld [vmem:[#allocation2 + $0x38] sm:$0xff] }
  0x4c   : > { %568 = vmatpush.bf16.msra.mxu0 %v997_v20  ;;  %1010 = vmatpush.bf16.msra.mxu1 %v997_v20 }
  0x4d   : > { %1011 = vmatpush.bf16.msra.mxu2 %v997_v20  ;;  %1012 = vmatpush.bf16.msra.mxu3 %v997_v20 }
  0x50   : > { %569 = vmatpush.bf16.msra.mxu0 %v996_v21  ;;  %1013 = vmatpush.bf16.msra.mxu1 %v996_v21 }
  0x51   : > { %1014 = vmatpush.bf16.msra.mxu2 %v996_v21  ;;  %1015 = vmatpush.bf16.msra.mxu3 %v996_v21 }
  0x54   : > { %570 = vmatpush.bf16.msra.mxu0 %v995_v22  ;;  %1016 = vmatpush.bf16.msra.mxu1 %v995_v22 }
  0x55   : > { %1017 = vmatpush.bf16.msra.mxu2 %v995_v22  ;;  %1018 = vmatpush.bf16.msra.mxu3 %v995_v22 }
  0x58   : > { %571 = vmatpush.bf16.msra.mxu0 %v994_v23  ;;  %1019 = vmatpush.bf16.msra.mxu1 %v994_v23 }
  0x59   : > { %1020 = vmatpush.bf16.msra.mxu2 %v994_v23  ;;  %1021 = vmatpush.bf16.msra.mxu3 %v994_v23 }
  0x5c   : > { %572 = vmatpush.bf16.msra.mxu0 %v993_v24  ;;  %1022 = vmatpush.bf16.msra.mxu1 %v993_v24 }
  0x5d   : > { %1023 = vmatpush.bf16.msra.mxu2 %v993_v24  ;;  %1024 = vmatpush.bf16.msra.mxu3 %v993_v24 }
  0x5f   : > { %573 = vmatmul.bf16.vlgmr.msra.gmra.mxu0 %v985_v25  ;;  %583 = vmatmul.bf16.vlgmr.msra.gmra.mxu1 %v987_v26 }
  0x60   : > { %593 = vmatmul.bf16.vlgmr.msra.gmra.mxu2 %v989_v27  ;;  %603 = vmatmul.bf16.vlgmr.msra.gmra.mxu3 %v991_v28 }
  0x6f   : > { %578 = vmatmul.bf16.gmra.mxu0 %v986_v29  ;;  %588 = vmatmul.bf16.gmra.mxu1 %v988_v30 }
  0x70   : > { %598 = vmatmul.bf16.gmra.mxu2 %v990_v31  ;;  %608 = vmatmul.bf16.gmra.mxu3 %v992_v32 }
  0xdc   : > { %v574_v35 = vpop.f32.mrf.mxu0  ;;  %v584_v36 = vpop.f32.mrf.mxu1 }
  0xdd   : > { %v614_v37 = vadd.f32 %v574_v35, %v421_v33  ;;  %v618_v38 = vadd.f32 %v584_v36, %v425_v34 }
  0xdf   : > { %630 = vst [vmem:[#allocation2 + $0x30] sm:$0xff] %v614_v37 }
  0xe0   : > { %634 = vst [vmem:[#allocation2 + $0x50] sm:$0xff] %v618_v38 }
  0xe3   : > { %v594_v43 = vpop.f32.mrf.mxu2  ;;  %v604_v44 = vpop.f32.mrf.mxu3 }
  0xe4   : > { %v622_v45 = vadd.f32 %v594_v43, %v429_v39  ;;  %v626_v46 = vadd.f32 %v604_v44, %v433_v40  ;;  %v576_v47 = vpop.f32.mrf.mxu0  ;;  %v586_v48 = vpop.f32.mrf.mxu1 }
  0xe5   : > { %v615_v49 = vadd.f32 %v576_v47, %v422_v41  ;;  %v619_v50 = vadd.f32 %v586_v48, %v426_v42 }
  0xe6   : > { %638 = vst [vmem:[#allocation2 + $0x40] sm:$0xff] %v622_v45 }
  0xe7   : > { %642 = vst [vmem:[#allocation2 + $0x60] sm:$0xff] %v626_v46 }
  0xe8   : > { %631 = vst [vmem:[#allocation2] sm:$0xff] %v615_v49 }
  0xe9   : > { %635 = vst [vmem:[#allocation2 + $0x68] sm:$0xff] %v619_v50 }
  0xeb   : > { %v596_v55 = vpop.f32.mrf.mxu2  ;;  %v606_v56 = vpop.f32.mrf.mxu3 }
  0xec   : > { %v623_v57 = vadd.f32 %v596_v55, %v430_v51  ;;  %v627_v58 = vadd.f32 %v606_v56, %v434_v52  ;;  %v579_v59 = vpop.f32.mrf.mxu0  ;;  %v589_v60 = vpop.f32.mrf.mxu1 }
  0xed   : > { %v616_v61 = vadd.f32 %v579_v59, %v423_v53  ;;  %v620_v62 = vadd.f32 %v589_v60, %v427_v54 }
  0xee   : > { %639 = vst [vmem:[#allocation2 + $0x20] sm:$0xff] %v623_v57 }
  0xef   : > { %643 = vst [vmem:[#allocation2 + $0x70] sm:$0xff] %v627_v58 }
  0xf0   : > { %632 = vst [vmem:[#allocation2 + $0x58] sm:$0xff] %v616_v61 }
  0xf1   : > { %636 = vst [vmem:[#allocation2 + $0x8] sm:$0xff] %v620_v62 }
  0xf3   : > { %v599_v3 = vpop.f32.mrf.mxu2  ;;  %v609_v4 = vpop.f32.mrf.mxu3 }
  0xf4   : > { %v624_v5 = vadd.f32 %v599_v3, %v431_v63  ;;  %v628_v6 = vadd.f32 %v609_v4, %v435_v0  ;;  %v581_v7 = vpop.f32.mrf.mxu0  ;;  %v591_v8 = vpop.f32.mrf.mxu1 }
  0xf5   : > { %v617_v9 = vadd.f32 %v581_v7, %v424_v1  ;;  %v621_v10 = vadd.f32 %v591_v8, %v428_v2 }
  0xf6   : > { %640 = vst [vmem:[#allocation2 + $0x10] sm:$0xff] %v624_v5 }
  0xf7   : > { %644 = vst [vmem:[#allocation2 + $0x78] sm:$0xff] %v628_v6 }
  0xf8   : > { %633 = vst [vmem:[#allocation2 + $0x18] sm:$0xff] %v617_v9 }
  0xf9   : > { %637 = vst [vmem:[#allocation2 + $0x48] sm:$0xff] %v621_v10 }
  0xfb   : > { %v601_v13 = vpop.f32.mrf.mxu2  ;;  %v611_v14 = vpop.f32.mrf.mxu3  ;;  %649 = sbr.rel (%p978_p11) target bundleno = 302 (0x12e), region = 77 }
  0xfc   : > { %v625_v15 = vadd.f32 %v601_v13, %v432_v11  ;;  %v629_v16 = vadd.f32 %v611_v14, %v436_v12 }
  0xfe   : > { %641 = vst [vmem:[#allocation2 + $0x38] sm:$0xff] %v625_v15 }
  0xff   : > { %645 = vst [vmem:[#allocation2 + $0x28] sm:$0xff] %v629_v16 }
 0x100   : > { %v650_v17 = vld [vmem:[#allocation2 + $0x30] sm:$0xff]  ;;  %v651_v18 = vld [vmem:[#allocation2] sm:$0xff]  ;;  %v652_v19 = vld [vmem:[#allocation2 + $0x58] sm:$0xff] }
 0x101   : > { %666 = vst [vmem:[%s1293_s2] sm:$0xff] %v650_v17  ;;  %v704_v20 = vmul.f32 %v650_v17, %v650_v17  ;;  %v682_v21 = vadd.f32 %v651_v18, %v650_v17  ;;  %v705_v22 = vmul.f32 %v651_v18, %v651_v18  ;;  %v706_v23 = vmul.f32 %v652_v19, %v652_v19  ;;  %v653_v24 = vld [vmem:[#allocation2 + $0x18] sm:$0xff]  ;;  %v654_v25 = vld [vmem:[#allocation2 + $0x50] sm:$0xff]  ;;  %v655_v29 = vld [vmem:[#allocation2 + $0x68] sm:$0xff] }
 0x102   : > { %667 = vst [vmem:[%s1293_s2 + $0x8] sm:$0xff] %v651_v18  ;;  %v707_v28 = vmul.f32 %v653_v24, %v653_v24  ;;  %v708_v32 = vmul.f32 %v654_v25, %v654_v25  ;;  %v656_v33 = vld [vmem:[#allocation2 + $0x8] sm:$0xff]  ;;  %v709_v36 = vmul.f32 %v655_v29, %v655_v29  ;;  %v658_v38 = vld [vmem:[#allocation2 + $0x40] sm:$0xff]  ;;  %v660_v43 = vld [vmem:[#allocation2 + $0x10] sm:$0xff] }
 0x103   : > { %v720_v26 = vadd.f32 %v705_v22, %v704_v20  ;;  %668 = vst [vmem:[%s1293_s2 + $0x10] sm:$0xff] %v652_v19  ;;  %v683_v27 = vadd.f32 %v682_v21, %v652_v19  ;;  %v657_v37 = vld [vmem:[#allocation2 + $0x48] sm:$0xff]  ;;  %v710_v41 = vmul.f32 %v656_v33, %v656_v33  ;;  %v659_v42 = vld [vmem:[#allocation2 + $0x20] sm:$0xff]  ;;  %v712_v51 = vmul.f32 %v658_v38, %v658_v38  ;;  %v663_v52 = vld [vmem:[#allocation2 + $0x70] sm:$0xff] }
 0x104   : > { %669 = vst [vmem:[%s1293_s2 + $0x18] sm:$0xff] %v653_v24  ;;  %v711_v46 = vmul.f32 %v657_v37, %v657_v37  ;;  %v662_v48 = vld [vmem:[#allocation2 + $0x60] sm:$0xff]  ;;  %v664_v53 = vld [vmem:[#allocation2 + $0x78] sm:$0xff]  ;;  %v713_v56 = vmul.f32 %v659_v42, %v659_v42  ;;  %v714_v60 = vmul.f32 %v660_v43, %v660_v43  ;;  %v717_v5 = vmul.f32 %v663_v52, %v663_v52 }
 0x105   : > { %v721_v30 = vadd.f32 %v720_v26, %v706_v23  ;;  %v684_v31 = vadd.f32 %v683_v27, %v653_v24  ;;  %670 = vst [vmem:[%s1293_s2 + $0x20] sm:$0xff] %v654_v25  ;;  %v661_v47 = vld [vmem:[#allocation2 + $0x38] sm:$0xff]  ;;  %v716_v2 = vmul.f32 %v662_v48, %v662_v48  ;;  %v718_v8 = vmul.f32 %v664_v53, %v664_v53 }
 0x106   : > { %671 = vst [vmem:[%s1293_s2 + $0x28] sm:$0xff] %v655_v29  ;;  %v665_v57 = vld [vmem:[#allocation2 + $0x28] sm:$0xff]  ;;  %v715_v63 = vmul.f32 %v661_v47, %v661_v47 }
 0x107   : > { %v722_v34 = vadd.f32 %v721_v30, %v707_v28  ;;  %v685_v35 = vadd.f32 %v684_v31, %v654_v25  ;;  %672 = vst [vmem:[%s1293_s2 + $0x30] sm:$0xff] %v656_v33  ;;  %v719_v11 = vmul.f32 %v665_v57, %v665_v57 }
 0x108   : > { %673 = vst [vmem:[%s1293_s2 + $0x38] sm:$0xff] %v657_v37 }
 0x109   : > { %v723_v39 = vadd.f32 %v722_v34, %v708_v32  ;;  %v686_v40 = vadd.f32 %v685_v35, %v655_v29  ;;  %674 = vst [vmem:[%s1293_s2 + $0x40] sm:$0xff] %v658_v38 }
 0x10a   : > { %675 = vst [vmem:[%s1293_s2 + $0x48] sm:$0xff] %v659_v42 }
 0x10b   : > { %v724_v44 = vadd.f32 %v723_v39, %v709_v36  ;;  %v687_v45 = vadd.f32 %v686_v40, %v656_v33  ;;  %676 = vst [vmem:[%s1293_s2 + $0x50] sm:$0xff] %v660_v43 }
 0x10c   : > { %677 = vst [vmem:[%s1293_s2 + $0x58] sm:$0xff] %v661_v47 }
 0x10d   : > { %v725_v49 = vadd.f32 %v724_v44, %v710_v41  ;;  %v688_v50 = vadd.f32 %v687_v45, %v657_v37  ;;  %678 = vst [vmem:[%s1293_s2 + $0x60] sm:$0xff] %v662_v48 }
 0x10e   : > { %679 = vst [vmem:[%s1293_s2 + $0x68] sm:$0xff] %v663_v52 }
 0x10f   : > { %v726_v54 = vadd.f32 %v725_v49, %v711_v46  ;;  %v689_v55 = vadd.f32 %v688_v50, %v658_v38  ;;  %680 = vst [vmem:[%s1293_s2 + $0x70] sm:$0xff] %v664_v53 }
 0x110   : > { %681 = vst [vmem:[%s1293_s2 + $0x78] sm:$0xff] %v665_v57 }
 0x111   : > { %v727_v58 = vadd.f32 %v726_v54, %v712_v51  ;;  %v690_v59 = vadd.f32 %v689_v55, %v659_v42 }
 0x113   : > { %v728_v61 = vadd.f32 %v727_v58, %v713_v56  ;;  %v691_v62 = vadd.f32 %v690_v59, %v660_v43 }
 0x115   : > { %v729_v0 = vadd.f32 %v728_v61, %v714_v60  ;;  %v692_v1 = vadd.f32 %v691_v62, %v661_v47 }
 0x117   : > { %v730_v3 = vadd.f32 %v729_v0, %v715_v63  ;;  %v693_v4 = vadd.f32 %v692_v1, %v662_v48 }
 0x119   : > { %v731_v6 = vadd.f32 %v730_v3, %v716_v2  ;;  %v694_v7 = vadd.f32 %v693_v4, %v663_v52 }
 0x11b   : > { %v732_v9 = vadd.f32 %v731_v6, %v717_v5  ;;  %v695_v10 = vadd.f32 %v694_v7, %v664_v53 }
 0x11d   : > { %v733_v12 = vadd.f32 %v732_v9, %v718_v8  ;;  %v696_v13 = vadd.f32 %v695_v10, %v665_v57 }
 0x11f   : > { %v697_v14 = vrot.slane %v696_v13, 4  ;;  %v734_v15 = vadd.f32 %v733_v12, %v719_v11 }
 0x121   : > { %v698_v16 = vadd.f32 %v697_v14, %v696_v13  ;;  %v735_v17 = vrot.slane %v734_v15, 4 }
 0x123   : > { %v699_v18 = vrot.slane %v698_v16, 2  ;;  %v736_v19 = vadd.f32 %v735_v17, %v734_v15 }
 0x125   : > { %v700_v20 = vadd.f32 %v699_v18, %v698_v16  ;;  %v737_v21 = vrot.slane %v736_v19, 2 }
 0x127   : > { %v701_v22 = vrot.slane %v700_v20, 1  ;;  %v738_v23 = vadd.f32 %v737_v21, %v736_v19 }
 0x129   : > { %v702_v24 = vadd.f32 %v701_v22, %v700_v20  ;;  %v739_v25 = vrot.slane %v738_v23, 1 }
 0x12b   : > { %703 = vst [vmem:[%s1294_s3] sm:$0x1] %v702_v24  ;;  %v740_v26 = vadd.f32 %v739_v25, %v738_v23 }
 0x12d   : > { %741 = vst [vmem:[%s1295_s4] sm:$0x1] %v740_v26 }
 0x12e PF: > { %s15_s19 = sadd.s32 1, %s1104_s19   ;;  %s1296_s15 = smov %s1092_s16 }
 0x12f   : > { %p12_p12 = scmp.ge.s32.totalorder %s15_s19, 7   ;;  %s1297_s16 = smov %s1167_s23 }
 0x130   : > { %s1298_s17 = smov %s1100_s18  ;;  %s1299_s18 = smov %s1301_s20 }
 0x131   :  { %14 = sbr.rel (!%p12_p12) target bundleno = 3 (0x3), region = 139 }

// kernel: _lambda_.33
= control target key start
LH: loop header
LB: loop body
LE: loop exit
PB: predicated region body
PF: predicated region fallthrough
CT: control target
= control target key end

     0   :  { %s94_s0 = inlined_call_operand.vmem [shape: f32[32,128], index: 0, kind: input, shape index: {}, may-alias: {0,3}]   ;;  %s95_s1 = inlined_call_operand.vmem [shape: f32[1,128], index: 1, kind: input, shape index: {}]   ;;  %s96_s2 = inlined_call_operand.vmem [shape: f32[1,128], index: 2, kind: input, shape index: {}]   ;;  %s97_s3 = inlined_call_operand.vmem [shape: f32[32,128], index: 3, kind: output, shape index: {}, may-alias: {0,3}]  }
   0x1   :  { %v14_v0 = vld [vmem:[%s94_s0] sm:$0xff]  ;;  %v15_v3 = vld [vmem:[%s94_s0 + $0x8] sm:$0xff]  ;;  %v16_v6 = vld [vmem:[%s94_s0 + $0x10] sm:$0xff] }
   0x2   :  { %v42_v1 = vld [vmem:[%s95_s1] ss:$0 sm:$0xff]  ;;  %v17_v7 = vld [vmem:[%s94_s0 + $0x18] sm:$0xff] }
   0x3   :  { %v43_v2 = vld [vmem:[%s96_s2] ss:$0 sm:$0xff]  ;;  %v22_v4 = vmul.f32 %v42_v1, %v14_v0  ;;  %v23_v5 = vmul.f32 %v42_v1, %v15_v3  ;;  %v24_v8 = vmul.f32 %v42_v1, %v16_v6  ;;  %v25_v9 = vmul.f32 %v42_v1, %v17_v7 }
   0x5   :  { %v30_v10 = vadd.f32 %v43_v2, %v22_v4  ;;  %v31_v11 = vadd.f32 %v43_v2, %v23_v5  ;;  %v32_v12 = vadd.f32 %v43_v2, %v24_v8  ;;  %v33_v13 = vadd.f32 %v43_v2, %v25_v9 }
   0x7   :  { %34 = vst [vmem:[%s97_s3] sm:$0xff] %v30_v10 }
   0x8   :  { %35 = vst [vmem:[%s97_s3 + $0x8] sm:$0xff] %v31_v11 }
   0x9   :  { %36 = vst [vmem:[%s97_s3 + $0x10] sm:$0xff] %v32_v12 }
   0xa   :  { %37 = vst [vmem:[%s97_s3 + $0x18] sm:$0xff] %v33_v13 }

// kernel: _lambda_.29
= control target key start
LH: loop header
LB: loop body
LE: loop exit
PB: predicated region body
PF: predicated region fallthrough
CT: control target
= control target key end

     0   :  { %s354_s0 = inlined_call_operand.vmem [shape: f32[128,128], index: 0, kind: input, shape index: {}, may-alias: {0,4}]   ;;  %s355_s1 = inlined_call_operand.vmem [shape: f32[1,128], index: 1, kind: input, shape index: {}]   ;;  %s356_s2 = inlined_call_operand.vmem [shape: f32[1,128], index: 2, kind: input, shape index: {}]   ;;  %s357_s3 = inlined_call_operand.vmem [shape: f32[128,128], index: 3, kind: input, shape index: {}]   ;;  %s358_s4 = inlined_call_operand.vmem [shape: f32[128,128], index: 4, kind: output, shape index: {}, may-alias: {0,4}]  }
   0x1   :  { %v17_v0 = vld [vmem:[%s354_s0] sm:$0xff]  ;;  %v18_v4 = vld [vmem:[%s354_s0 + $0x8] sm:$0xff]  ;;  %v19_v5 = vld [vmem:[%s354_s0 + $0x10] sm:$0xff] }
   0x2   :  { %v174_v1 = vld [vmem:[%s355_s1] ss:$0 sm:$0xff]  ;;  %v74_v8 = vld [vmem:[%s357_s3 + $0x8] sm:$0xff]  ;;  %v20_v10 = vld [vmem:[%s354_s0 + $0x18] sm:$0xff] }
   0x3   :  { %v179_v2 = vld [vmem:[%s356_s2] ss:$0 sm:$0xff]  ;;  %v37_v3 = vmul.f32 %v174_v1, %v17_v0  ;;  %v38_v7 = vmul.f32 %v174_v1, %v18_v4  ;;  %v39_v9 = vmul.f32 %v174_v1, %v19_v5  ;;  %v75_v12 = vld [vmem:[%s357_s3 + $0x10] sm:$0xff]  ;;  %v40_v13 = vmul.f32 %v174_v1, %v20_v10  ;;  %v22_v15 = vld [vmem:[%s354_s0 + $0x28] sm:$0xff] }
   0x4   :  { %v73_v6 = vld [vmem:[%s357_s3] sm:$0xff]  ;;  %v76_v18 = vld [vmem:[%s357_s3 + $0x18] sm:$0xff]  ;;  %v42_v20 = vmul.f32 %v174_v1, %v22_v15  ;;  %v23_v21 = vld [vmem:[%s354_s0 + $0x30] sm:$0xff] }
   0x5   :  { %v57_v11 = vadd.f32 %v179_v2, %v37_v3  ;;  %v21_v14 = vld [vmem:[%s354_s0 + $0x20] sm:$0xff]  ;;  %v58_v16 = vadd.f32 %v179_v2, %v38_v7  ;;  %v59_v17 = vadd.f32 %v179_v2, %v39_v9  ;;  %v60_v23 = vadd.f32 %v179_v2, %v40_v13  ;;  %v78_v25 = vld [vmem:[%s357_s3 + $0x28] sm:$0xff]  ;;  %v24_v27 = vld [vmem:[%s354_s0 + $0x38] sm:$0xff] }
   0x6   :  { %v41_v19 = vmul.f32 %v174_v1, %v21_v14  ;;  %v77_v24 = vld [vmem:[%s357_s3 + $0x20] sm:$0xff]  ;;  %v43_v26 = vmul.f32 %v174_v1, %v23_v21  ;;  %v62_v31 = vadd.f32 %v179_v2, %v42_v20  ;;  %v79_v32 = vld [vmem:[%s357_s3 + $0x30] sm:$0xff]  ;;  %v44_v37 = vmul.f32 %v174_v1, %v24_v27  ;;  %v26_v38 = vld [vmem:[%s354_s0 + $0x48] sm:$0xff] }
   0x7   :  { %v89_v22 = vadd.f32 %v73_v6, %v57_v11  ;;  %v90_v28 = vadd.f32 %v74_v8, %v58_v16  ;;  %v91_v29 = vadd.f32 %v75_v12, %v59_v17  ;;  %v25_v33 = vld [vmem:[%s354_s0 + $0x40] sm:$0xff]  ;;  %v92_v35 = vadd.f32 %v76_v18, %v60_v23  ;;  %v27_v39 = vld [vmem:[%s354_s0 + $0x50] sm:$0xff]  ;;  %v80_v44 = vld [vmem:[%s357_s3 + $0x38] sm:$0xff] }
   0x8   :  { %v61_v30 = vadd.f32 %v179_v2, %v41_v19  ;;  %v63_v36 = vadd.f32 %v179_v2, %v43_v26  ;;  %v94_v43 = vadd.f32 %v78_v25, %v62_v31  ;;  %v28_v45 = vld [vmem:[%s354_s0 + $0x58] sm:$0xff]  ;;  %v64_v48 = vadd.f32 %v179_v2, %v44_v37  ;;  %v81_v54 = vld [vmem:[%s357_s3 + $0x40] sm:$0xff]  ;;  %v82_v61 = vld [vmem:[%s357_s3 + $0x48] sm:$0xff] }
   0x9   :  { %v105_v34 = vmax.f32 %v89_v22, 0.0  ;;  %v106_v40 = vmax.f32 %v90_v28, 0.0  ;;  %v107_v41 = vmax.f32 %v91_v29, 0.0  ;;  %v108_v46 = vmax.f32 %v92_v35, 0.0  ;;  %v83_v62 = vld [vmem:[%s357_s3 + $0x50] sm:$0xff]  ;;  %v84_v4 = vld [vmem:[%s357_s3 + $0x58] sm:$0xff] }
   0xa   :  { %v93_v42 = vadd.f32 %v77_v24, %v61_v30  ;;  %v95_v47 = vadd.f32 %v79_v32, %v63_v36  ;;  %v45_v49 = vmul.f32 %v174_v1, %v25_v33  ;;  %v110_v53 = vmax.f32 %v94_v43, 0.0  ;;  %v85_v11 = vld [vmem:[%s357_s3 + $0x60] sm:$0xff]  ;;  %v86_v12 = vld [vmem:[%s357_s3 + $0x68] sm:$0xff]  ;;  %v87_v18 = vld [vmem:[%s357_s3 + $0x70] sm:$0xff] }
   0xb   :  { %121 = vst [vmem:[%s358_s4] sm:$0xff] %v105_v34  ;;  %v46_v55 = vmul.f32 %v174_v1, %v26_v38  ;;  %v47_v56 = vmul.f32 %v174_v1, %v27_v39  ;;  %v96_v59 = vadd.f32 %v80_v44, %v64_v48  ;;  %v48_v63 = vmul.f32 %v174_v1, %v28_v45  ;;  %v88_v27 = vld [vmem:[%s357_s3 + $0x78] sm:$0xff] }
   0xc   :  { %v109_v52 = vmax.f32 %v93_v42, 0.0  ;;  %v111_v58 = vmax.f32 %v95_v47, 0.0  ;;  %v65_v60 = vadd.f32 %v179_v2, %v45_v49 }
   0xd   :  { %v66_v0 = vadd.f32 %v179_v2, %v46_v55  ;;  %v67_v3 = vadd.f32 %v179_v2, %v47_v56  ;;  %v112_v8 = vmax.f32 %v96_v59, 0.0  ;;  %v68_v10 = vadd.f32 %v179_v2, %v48_v63 }
   0xe   :  { %v97_v9 = vadd.f32 %v81_v54, %v65_v60 }
   0xf   :  { %v98_v14 = vadd.f32 %v82_v61, %v66_v0  ;;  %v99_v15 = vadd.f32 %v83_v62, %v67_v3  ;;  %v100_v20 = vadd.f32 %v84_v4, %v68_v10 }
  0x10   :  { %v113_v19 = vmax.f32 %v97_v9, 0.0 }
  0x11   :  { %v114_v23 = vmax.f32 %v98_v14, 0.0  ;;  %v115_v24 = vmax.f32 %v99_v15, 0.0  ;;  %v116_v28 = vmax.f32 %v100_v20, 0.0 }
  0x12   :  { %v29_v50 = vld [vmem:[%s354_s0 + $0x60] sm:$0xff]  ;;  %v30_v51 = vld [vmem:[%s354_s0 + $0x68] sm:$0xff] }
  0x13   :  { %122 = vst [vmem:[%s358_s4 + $0x8] sm:$0xff] %v106_v40  ;;  %v49_v5 = vmul.f32 %v174_v1, %v29_v50  ;;  %v50_v6 = vmul.f32 %v174_v1, %v30_v51 }
  0x15   :  { %v69_v16 = vadd.f32 %v179_v2, %v49_v5  ;;  %v70_v17 = vadd.f32 %v179_v2, %v50_v6 }
  0x17   :  { %v101_v25 = vadd.f32 %v85_v11, %v69_v16  ;;  %v102_v26 = vadd.f32 %v86_v12, %v70_v17 }
  0x19   :  { %v117_v30 = vmax.f32 %v101_v25, 0.0  ;;  %v118_v31 = vmax.f32 %v102_v26, 0.0 }
  0x1a   :  { %v31_v57 = vld [vmem:[%s354_s0 + $0x70] sm:$0xff] }
  0x1b   :  { %123 = vst [vmem:[%s358_s4 + $0x10] sm:$0xff] %v107_v41  ;;  %v51_v13 = vmul.f32 %v174_v1, %v31_v57 }
  0x1c   :  { %124 = vst [vmem:[%s358_s4 + $0x18] sm:$0xff] %v108_v46 }
  0x1d   :  { %v71_v21 = vadd.f32 %v179_v2, %v51_v13 }
  0x1f   :  { %v103_v29 = vadd.f32 %v87_v18, %v71_v21 }
  0x21   :  { %v119_v32 = vmax.f32 %v103_v29, 0.0 }
  0x23   :  { %v32_v7 = vld [vmem:[%s354_s0 + $0x78] sm:$0xff] }
  0x24   :  { %125 = vst [vmem:[%s358_s4 + $0x20] sm:$0xff] %v109_v52  ;;  %v52_v22 = vmul.f32 %v174_v1, %v32_v7 }
  0x25   :  { %126 = vst [vmem:[%s358_s4 + $0x28] sm:$0xff] %v110_v53 }
  0x26   :  { %127 = vst [vmem:[%s358_s4 + $0x30] sm:$0xff] %v111_v58  ;;  %v72_v1 = vadd.f32 %v179_v2, %v52_v22 }
  0x27   :  { %128 = vst [vmem:[%s358_s4 + $0x38] sm:$0xff] %v112_v8 }
  0x28   :  { %129 = vst [vmem:[%s358_s4 + $0x40] sm:$0xff] %v113_v19  ;;  %v104_v33 = vadd.f32 %v88_v27, %v72_v1 }
  0x29   :  { %130 = vst [vmem:[%s358_s4 + $0x48] sm:$0xff] %v114_v23 }
  0x2a   :  { %131 = vst [vmem:[%s358_s4 + $0x50] sm:$0xff] %v115_v24  ;;  %v120_v2 = vmax.f32 %v104_v33, 0.0 }
  0x2b   :  { %132 = vst [vmem:[%s358_s4 + $0x58] sm:$0xff] %v116_v28 }
  0x2c   :  { %133 = vst [vmem:[%s358_s4 + $0x60] sm:$0xff] %v117_v30 }
  0x2d   :  { %134 = vst [vmem:[%s358_s4 + $0x68] sm:$0xff] %v118_v31 }
  0x2e   :  { %135 = vst [vmem:[%s358_s4 + $0x70] sm:$0xff] %v119_v32 }
  0x2f   :  { %136 = vst [vmem:[%s358_s4 + $0x78] sm:$0xff] %v120_v2 }

// kernel: _lambda_.32
= control target key start
LH: loop header
LB: loop body
LE: loop exit
PB: predicated region body
PF: predicated region fallthrough
CT: control target
= control target key end

     0   :  { %s311_s1 = inlined_call_operand.vmem [shape: bf16[128,128], index: 1, kind: input, shape index: {}]   ;;  %s312_s0 = inlined_call_operand.vmem [shape: bf16[32,128], index: 0, kind: input, shape index: {}]   ;;  %s313_s2 = inlined_call_operand.vmem [shape: f32[32,128], index: 2, kind: output, shape index: {0}]   ;;  %s314_s3 = inlined_call_operand.vmem [shape: f32[1,1,128], index: 3, kind: output, shape index: {1}]   ;;  %s315_s4 = inlined_call_operand.vmem [shape: f32[1,1,128], index: 4, kind: output, shape index: {2}]  }
   0x1   :  { %v229_v0 = vld [vmem:[%s311_s1 + $0x38] sm:$0xff]  ;;  %v228_v1 = vld [vmem:[%s311_s1 + $0x30] sm:$0xff]  ;;  %v227_v2 = vld [vmem:[%s311_s1 + $0x28] sm:$0xff] }
   0x2   :  { %106 = vmatpush.bf16.msra.mxu0 %v229_v0  ;;  %230 = vmatpush.bf16.msra.mxu1 %v229_v0  ;;  %v226_v3 = vld [vmem:[%s311_s1 + $0x20] sm:$0xff]  ;;  %v225_v4 = vld [vmem:[%s311_s1 + $0x18] sm:$0xff]  ;;  %v224_v5 = vld [vmem:[%s311_s1 + $0x10] sm:$0xff] }
   0x3   :  { %v223_v6 = vld [vmem:[%s311_s1 + $0x8] sm:$0xff]  ;;  %v222_v7 = vld [vmem:[%s311_s1] sm:$0xff] }
   0x4   :  { %v220_v8 = vld [vmem:[%s312_s0] sm:$0xff]  ;;  %v221_v9 = vld [vmem:[%s312_s0 + $0x8] sm:$0xff] }
   0x6   :  { %107 = vmatpush.bf16.msra.mxu0 %v228_v1  ;;  %231 = vmatpush.bf16.msra.mxu1 %v228_v1 }
   0xa   :  { %108 = vmatpush.bf16.msra.mxu0 %v227_v2  ;;  %232 = vmatpush.bf16.msra.mxu1 %v227_v2 }
   0xe   :  { %109 = vmatpush.bf16.msra.mxu0 %v226_v3  ;;  %233 = vmatpush.bf16.msra.mxu1 %v226_v3 }
  0x12   :  { %110 = vmatpush.bf16.msra.mxu0 %v225_v4  ;;  %234 = vmatpush.bf16.msra.mxu1 %v225_v4 }
  0x16   :  { %111 = vmatpush.bf16.msra.mxu0 %v224_v5  ;;  %235 = vmatpush.bf16.msra.mxu1 %v224_v5 }
  0x1a   :  { %112 = vmatpush.bf16.msra.mxu0 %v223_v6  ;;  %236 = vmatpush.bf16.msra.mxu1 %v223_v6 }
  0x1e   :  { %113 = vmatpush.bf16.msra.mxu0 %v222_v7  ;;  %237 = vmatpush.bf16.msra.mxu1 %v222_v7 }
  0x21   :  { %114 = vmatmul.bf16.vlgmr.msra.gmra.mxu0 %v220_v8  ;;  %119 = vmatmul.bf16.vlgmr.msra.gmra.mxu1 %v221_v9 }
  0x9e   :  { %v115_v10 = vpop.f32.mrf.mxu0  ;;  %v120_v11 = vpop.f32.mrf.mxu1 }
  0x9f   :  { %140 = vst [vmem:[%s313_s2] sm:$0xff] %v115_v10  ;;  %v154_v14 = vmul.f32 %v115_v10, %v115_v10  ;;  %v156_v17 = vmul.f32 %v120_v11, %v120_v11 }
  0xa0   :  { %142 = vst [vmem:[%s313_s2 + $0x10] sm:$0xff] %v120_v11 }
  0xa6   :  { %v117_v12 = vpop.f32.mrf.mxu0  ;;  %v122_v13 = vpop.f32.mrf.mxu1 }
  0xa7   :  { %141 = vst [vmem:[%s313_s2 + $0x8] sm:$0xff] %v117_v12  ;;  %v144_v15 = vadd.f32 %v117_v12, %v115_v10  ;;  %v155_v16 = vmul.f32 %v117_v12, %v117_v12  ;;  %v157_v21 = vmul.f32 %v122_v13, %v122_v13 }
  0xa8   :  { %143 = vst [vmem:[%s313_s2 + $0x18] sm:$0xff] %v122_v13 }
  0xa9   :  { %v158_v18 = vadd.f32 %v155_v16, %v154_v14  ;;  %v145_v19 = vadd.f32 %v144_v15, %v120_v11 }
  0xab   :  { %v146_v20 = vadd.f32 %v145_v19, %v122_v13  ;;  %v159_v22 = vadd.f32 %v158_v18, %v156_v17 }
  0xad   :  { %v147_v23 = vrot.slane %v146_v20, 4  ;;  %v160_v24 = vadd.f32 %v159_v22, %v157_v21 }
  0xaf   :  { %v148_v25 = vadd.f32 %v147_v23, %v146_v20  ;;  %v161_v26 = vrot.slane %v160_v24, 4 }
  0xb1   :  { %v149_v27 = vrot.slane %v148_v25, 2  ;;  %v162_v28 = vadd.f32 %v161_v26, %v160_v24 }
  0xb3   :  { %v150_v29 = vadd.f32 %v149_v27, %v148_v25  ;;  %v163_v30 = vrot.slane %v162_v28, 2 }
  0xb5   :  { %v151_v31 = vrot.slane %v150_v29, 1  ;;  %v164_v32 = vadd.f32 %v163_v30, %v162_v28 }
  0xb7   :  { %v152_v33 = vadd.f32 %v151_v31, %v150_v29  ;;  %v165_v34 = vrot.slane %v164_v32, 1 }
  0xb9   :  { %153 = vst [vmem:[%s314_s3] sm:$0x1] %v152_v33  ;;  %v166_v35 = vadd.f32 %v165_v34, %v164_v32 }
  0xbb   :  { %167 = vst [vmem:[%s315_s4] sm:$0x1] %v166_v35 }

// kernel: _lambda_.31
= control target key start
LH: loop header
LB: loop body
LE: loop exit
PB: predicated region body
PF: predicated region fallthrough
CT: control target
= control target key end

     0   :  { %s98_s0 = inlined_call_operand.vmem [shape: f32[32,128], index: 0, kind: input, shape index: {}, may-alias: {0,3}]   ;;  %s99_s1 = inlined_call_operand.vmem [shape: f32[1,128], index: 1, kind: input, shape index: {}]   ;;  %s100_s2 = inlined_call_operand.vmem [shape: f32[1,128], index: 2, kind: input, shape index: {}]   ;;  %s101_s3 = inlined_call_operand.vmem [shape: f32[32,128], index: 3, kind: output, shape index: {}, may-alias: {0,3}]  }
   0x1   :  { %v14_v0 = vld [vmem:[%s98_s0] sm:$0xff]  ;;  %v15_v3 = vld [vmem:[%s98_s0 + $0x8] sm:$0xff]  ;;  %v16_v6 = vld [vmem:[%s98_s0 + $0x10] sm:$0xff] }
   0x2   :  { %v46_v1 = vld [vmem:[%s99_s1] ss:$0 sm:$0xff]  ;;  %v17_v7 = vld [vmem:[%s98_s0 + $0x18] sm:$0xff] }
   0x3   :  { %v47_v2 = vld [vmem:[%s100_s2] ss:$0 sm:$0xff]  ;;  %v22_v4 = vmul.f32 %v46_v1, %v14_v0  ;;  %v23_v5 = vmul.f32 %v46_v1, %v15_v3  ;;  %v24_v8 = vmul.f32 %v46_v1, %v16_v6  ;;  %v25_v9 = vmul.f32 %v46_v1, %v17_v7 }
   0x5   :  { %v30_v10 = vadd.f32 %v47_v2, %v22_v4  ;;  %v31_v11 = vadd.f32 %v47_v2, %v23_v5  ;;  %v32_v12 = vadd.f32 %v47_v2, %v24_v8  ;;  %v33_v13 = vadd.f32 %v47_v2, %v25_v9 }
   0x7   :  { %v34_v14 = vmax.f32 %v30_v10, 0.0  ;;  %v35_v15 = vmax.f32 %v31_v11, 0.0  ;;  %v36_v16 = vmax.f32 %v32_v12, 0.0  ;;  %v37_v17 = vmax.f32 %v33_v13, 0.0 }
   0x9   :  { %38 = vst [vmem:[%s101_s3] sm:$0xff] %v34_v14 }
   0xa   :  { %39 = vst [vmem:[%s101_s3 + $0x8] sm:$0xff] %v35_v15 }
   0xb   :  { %40 = vst [vmem:[%s101_s3 + $0x10] sm:$0xff] %v36_v16 }
   0xc   :  { %41 = vst [vmem:[%s101_s3 + $0x18] sm:$0xff] %v37_v17 }

// kernel: _lambda_.30
= control target key start
LH: loop header
LB: loop body
LE: loop exit
PB: predicated region body
PF: predicated region fallthrough
CT: control target
= control target key end

     0   :  { %s852_s15 = smov 0   ;;  %s854_s16 = smov 0   ;;  %s954_s0 = inlined_call_operand.vmem [shape: bf16[32,640], index: 0, kind: input, shape index: {}]   ;;  %s955_s1 = inlined_call_operand.vmem [shape: bf16[640,128], index: 1, kind: input, shape index: {}]   ;;  %s956_s2 = inlined_call_operand.vmem [shape: f32[32,128], index: 2, kind: output, shape index: {0}]   ;;  %s957_s3 = inlined_call_operand.vmem [shape: f32[1,1,128], index: 3, kind: output, shape index: {1}]   ;;  %s958_s4 = inlined_call_operand.vmem [shape: f32[1,1,128], index: 4, kind: output, shape index: {2}]  }
   0x1   :  { %s856_s17 = smov 0   ;;  %s858_s18 = smov 0  }
   0x2   :  { %s860_s19 = smov 0  }
   0x3 LB: > { %s27_s20 = sadd.s32 1, %s820_s18  ;;  %p50_p1 = scmp.ne.s32.totalorder %s812_s16, %s808_s15  ;;  %s824_s19 = sphi %s860_s19, %s15_s19   ;;  %s820_s18 = sphi %s858_s18, %s962_s18   ;;  %s816_s17 = sphi %s856_s17, %s961_s17   ;;  %s812_s16 = sphi %s854_s16, %s960_s16   ;;  %s808_s15 = sphi %s852_s15, %s959_s15  }
   0x4   : > { %p28_p0 = scmp.ge.s32.totalorder %s27_s20, 5  ;;  %p51_p2 = scmp.eq.s32.totalorder %s824_s19, 0 }
   0x5   : > { %s43_s22 = sadd.s32 1, %s812_s16  ;;  %p672_p5 = scmp.ge.s32.totalorder %s824_s19, 5 }
   0x6   : > { %s964_s20 = smov (%p28_p0, %s27_s20), 0  ;;  %p52_p3 = por %p51_p2, %p50_p1 }
   0x7   : > { %s39_s21 = ssub.s32 %s820_s18, %s964_s20  ;;  %188 = sbr.rel (%p672_p5) target bundleno = 20 (0x14), region = 16 }
   0x8   : > { %p41_p4 = scmp.eq.s32.totalorder %s39_s21, 0 }
   0xa   : > { %s887_s23 = scalar_select %p41_p4, %s812_s16, %s43_s22  }
   0xc   : > { %191 = sbr.rel (!%p52_p3) target bundleno = 20 (0x14), region = 20  ;;  %s193_s24 = sand.u32 (%p52_p3), 1, %s812_s16  }
   0xd   : > { %s674_s25 = sshll.u32 (%p52_p3), %s820_s18, 2  ;;  %s673_s26 = sshll.u32 (%p52_p3), %s193_s24, 4 }
   0xe   : > { %s200_s29 = scalar_lea.vmem (%p52_p3), %s954_s0, %s674_s25  ;;  %s195_s30 = scalar_lea.vmem (%p52_p3), [#allocation3], %s673_s26 }
   0xf   : > { %v217_v0 = vld [vmem:[%s200_s29] sm:$0xf] (%p52_p3)  ;;  %v219_v1 = vld [vmem:[%s200_s29 + $0x14] sm:$0xf] (%p52_p3)  ;;  %v221_v2 = vld [vmem:[%s200_s29 + $0x28] sm:$0xf] (%p52_p3) }
  0x10   : > { %218 = vst [vmem:[%s195_s30] sm:$0xf] (%p52_p3), %v217_v0  ;;  %v223_v3 = vld [vmem:[%s200_s29 + $0x3c] sm:$0xf] (%p52_p3) }
  0x11   : > { %220 = vst [vmem:[%s195_s30 + $0x4] sm:$0xf] %v219_v1 }
  0x12   : > { %222 = vst [vmem:[%s195_s30 + $0x8] sm:$0xf] %v221_v2 }
  0x13   : > { %224 = vst [vmem:[%s195_s30 + $0xc] sm:$0xf] %v223_v3 }
  0x14 PF: > { %p675_p6 = scmp.ge.s32.totalorder %s824_s19, 1  ;;  %p267_p7 = scmp.lt.s32.totalorder %s824_s19, 6 }
  0x16   : > { %p268_p8 = pnand %p675_p6, %p267_p7 }
  0x17   : > { %s274_s5 = sand.u32 (!%p268_p8), 1, %s808_s15   ;;  %s677_s6 = sshll.u32 (!%p268_p8), %s816_s17, 4 }
  0x18   : > { %271 = sbr.rel (%p268_p8) target bundleno = 236 (0xec), region = 65  ;;  %s899_s7 = sshll.u32 (!%p268_p8), %s274_s5, 4 }
  0x19   : > { %p324_p9 = scmp.lt.s32.totalorder (!%p268_p8), %s677_s6, 79  ;;  %s276_s12 = scalar_lea.vmem (!%p268_p8), [#allocation3], %s899_s7 }
  0x1a   : > { %p679_p10 = scmp.ne.s32.totalorder (!%p268_p8), %s816_s17, 0 }
  0x1d   : > { %s966_s6 = smov (!%p324_p9, %s677_s6), 79  ;;  %356 = sbr.rel (%p679_p10) target bundleno = 39 (0x27), region = 73 }
  0x1e   : > { %s678_s8 = sshll.u32 %s966_s6, 2 }
  0x1f   : > { %s904_s11 = scalar_lea.vmem %s955_s1, %s678_s8 }
  0x22   : > { %v826_v4 = vmov 0.0  }
  0x23   : > { %357 = vst [vmem:[#allocation2 + $0x10] sm:$0xff] %v826_v4 }
  0x24   : > { %358 = vst [vmem:[#allocation2] sm:$0xff] %v826_v4 }
  0x25   : > { %359 = vst [vmem:[#allocation2 + $0x18] sm:$0xff] %v826_v4 }
  0x26   : > { %360 = vst [vmem:[#allocation2 + $0x8] sm:$0xff] %v826_v4 }
  0x27 PF: > { %v736_v5 = vld [vmem:[%s904_s11 + $0x38] sm:$0xff]  ;;  %v735_v6 = vld [vmem:[%s904_s11 + $0x30] sm:$0xff]  ;;  %v734_v7 = vld [vmem:[%s904_s11 + $0x28] sm:$0xff]  ;;  %p720_p11 = scmp.ne.s32.totalorder %s816_s17, 4 }
  0x28   : > { %445 = vmatpush.bf16.msra.mxu0 %v736_v5  ;;  %737 = vmatpush.bf16.msra.mxu1 %v736_v5  ;;  %v733_v8 = vld [vmem:[%s904_s11 + $0x20] sm:$0xff]  ;;  %v732_v9 = vld [vmem:[%s904_s11 + $0x18] sm:$0xff]  ;;  %v731_v10 = vld [vmem:[%s904_s11 + $0x10] sm:$0xff] }
  0x29   : > { %v730_v11 = vld [vmem:[%s904_s11 + $0x8] sm:$0xff]  ;;  %v729_v12 = vld [vmem:[%s904_s11] sm:$0xff] }
  0x2a   : > { %v727_v13 = vld [vmem:[%s276_s12] sm:$0xff]  ;;  %v728_v14 = vld [vmem:[%s276_s12 + $0x8] sm:$0xff] }
  0x2b   : > { %v361_v15 = vld [vmem:[#allocation2 + $0x10] sm:$0xff]  ;;  %v362_v21 = vld [vmem:[#allocation2] sm:$0xff] }
  0x2c   : > { %446 = vmatpush.bf16.msra.mxu0 %v735_v6  ;;  %738 = vmatpush.bf16.msra.mxu1 %v735_v6  ;;  %v363_v16 = vld [vmem:[#allocation2 + $0x18] sm:$0xff] }
  0x2d   : > { %v364_v22 = vld [vmem:[#allocation2 + $0x8] sm:$0xff] }
  0x30   : > { %447 = vmatpush.bf16.msra.mxu0 %v734_v7  ;;  %739 = vmatpush.bf16.msra.mxu1 %v734_v7 }
  0x34   : > { %448 = vmatpush.bf16.msra.mxu0 %v733_v8  ;;  %740 = vmatpush.bf16.msra.mxu1 %v733_v8 }
  0x38   : > { %449 = vmatpush.bf16.msra.mxu0 %v732_v9  ;;  %741 = vmatpush.bf16.msra.mxu1 %v732_v9 }
  0x3c   : > { %450 = vmatpush.bf16.msra.mxu0 %v731_v10  ;;  %742 = vmatpush.bf16.msra.mxu1 %v731_v10 }
  0x40   : > { %451 = vmatpush.bf16.msra.mxu0 %v730_v11  ;;  %743 = vmatpush.bf16.msra.mxu1 %v730_v11 }
  0x44   : > { %452 = vmatpush.bf16.msra.mxu0 %v729_v12  ;;  %744 = vmatpush.bf16.msra.mxu1 %v729_v12 }
  0x47   : > { %453 = vmatmul.bf16.vlgmr.msra.gmra.mxu0 %v727_v13  ;;  %458 = vmatmul.bf16.vlgmr.msra.gmra.mxu1 %v728_v14 }
  0xc4   : > { %v454_v17 = vpop.f32.mrf.mxu0  ;;  %v459_v18 = vpop.f32.mrf.mxu1 }
  0xc5   : > { %v464_v19 = vadd.f32 %v454_v17, %v361_v15  ;;  %v466_v20 = vadd.f32 %v459_v18, %v363_v16 }
  0xc7   : > { %468 = vst [vmem:[#allocation2 + $0x10] sm:$0xff] %v464_v19 }
  0xc8   : > { %470 = vst [vmem:[#allocation2 + $0x18] sm:$0xff] %v466_v20 }
  0xcc   : > { %v456_v23 = vpop.f32.mrf.mxu0  ;;  %v461_v24 = vpop.f32.mrf.mxu1  ;;  %475 = sbr.rel (%p720_p11) target bundleno = 236 (0xec), region = 77 }
  0xcd   : > { %v465_v25 = vadd.f32 %v456_v23, %v362_v21  ;;  %v467_v26 = vadd.f32 %v461_v24, %v364_v22 }
  0xcf   : > { %469 = vst [vmem:[#allocation2] sm:$0xff] %v465_v25 }
  0xd0   : > { %471 = vst [vmem:[#allocation2 + $0x8] sm:$0xff] %v467_v26 }
  0xd1   : > { %v476_v27 = vld [vmem:[#allocation2 + $0x10] sm:$0xff]  ;;  %v478_v29 = vld [vmem:[#allocation2 + $0x18] sm:$0xff] }
  0xd2   : > { %480 = vst [vmem:[%s956_s2] sm:$0xff] %v476_v27  ;;  %v494_v30 = vmul.f32 %v476_v27, %v476_v27  ;;  %v496_v33 = vmul.f32 %v478_v29, %v478_v29 }
  0xd3   : > { %482 = vst [vmem:[%s956_s2 + $0x10] sm:$0xff] %v478_v29 }
  0xd6   : > { %v477_v28 = vld [vmem:[#allocation2] sm:$0xff] }
  0xd7   : > { %v484_v31 = vadd.f32 %v477_v28, %v476_v27  ;;  %v495_v32 = vmul.f32 %v477_v28, %v477_v28  ;;  %v479_v34 = vld [vmem:[#allocation2 + $0x8] sm:$0xff]  ;;  %481 = vst [vmem:[%s956_s2 + $0x8] sm:$0xff] %v477_v28 }
  0xd8   : > { %v497_v37 = vmul.f32 %v479_v34, %v479_v34  ;;  %483 = vst [vmem:[%s956_s2 + $0x18] sm:$0xff] %v479_v34 }
  0xd9   : > { %v498_v35 = vadd.f32 %v495_v32, %v494_v30  ;;  %v485_v36 = vadd.f32 %v484_v31, %v478_v29 }
  0xdb   : > { %v499_v38 = vadd.f32 %v498_v35, %v496_v33  ;;  %v486_v39 = vadd.f32 %v485_v36, %v479_v34 }
  0xdd   : > { %v487_v40 = vrot.slane %v486_v39, 4  ;;  %v500_v41 = vadd.f32 %v499_v38, %v497_v37 }
  0xdf   : > { %v488_v42 = vadd.f32 %v487_v40, %v486_v39  ;;  %v501_v43 = vrot.slane %v500_v41, 4 }
  0xe1   : > { %v489_v44 = vrot.slane %v488_v42, 2  ;;  %v502_v45 = vadd.f32 %v501_v43, %v500_v41 }
  0xe3   : > { %v490_v46 = vadd.f32 %v489_v44, %v488_v42  ;;  %v503_v47 = vrot.slane %v502_v45, 2 }
  0xe5   : > { %v491_v48 = vrot.slane %v490_v46, 1  ;;  %v504_v49 = vadd.f32 %v503_v47, %v502_v45 }
  0xe7   : > { %v492_v50 = vadd.f32 %v491_v48, %v490_v46  ;;  %v505_v51 = vrot.slane %v504_v49, 1 }
  0xe9   : > { %493 = vst [vmem:[%s957_s3] sm:$0x1] %v492_v50  ;;  %v506_v52 = vadd.f32 %v505_v51, %v504_v49 }
  0xeb   : > { %507 = vst [vmem:[%s958_s4] sm:$0x1] %v506_v52 }
  0xec PF: > { %s15_s19 = sadd.s32 1, %s824_s19   ;;  %s959_s15 = smov %s812_s16 }
  0xed   : > { %p12_p12 = scmp.ge.s32.totalorder %s15_s19, 7   ;;  %s960_s16 = smov %s887_s23 }
  0xee   : > { %s961_s17 = smov %s820_s18  ;;  %s962_s18 = smov %s964_s20 }
  0xef   :  { %14 = sbr.rel (!%p12_p12) target bundleno = 3 (0x3), region = 139 }

// kernel: _lambda_.35
= control target key start
LH: loop header
LB: loop body
LE: loop exit
PB: predicated region body
PF: predicated region fallthrough
CT: control target
= control target key end

     0   :  { %s126_s0 = inlined_call_operand.vmem [shape: f32[32,128], index: 0, kind: input, shape index: {}, may-alias: {0,4}]   ;;  %s127_s1 = inlined_call_operand.vmem [shape: f32[1,128], index: 1, kind: input, shape index: {}]   ;;  %s128_s2 = inlined_call_operand.vmem [shape: f32[1,128], index: 2, kind: input, shape index: {}]   ;;  %s129_s3 = inlined_call_operand.vmem [shape: f32[32,128], index: 3, kind: input, shape index: {}]   ;;  %s130_s4 = inlined_call_operand.vmem [shape: f32[32,128], index: 4, kind: output, shape index: {}, may-alias: {0,4}]  }
   0x1   :  { %v17_v0 = vld [vmem:[%s126_s0] sm:$0xff]  ;;  %v18_v4 = vld [vmem:[%s126_s0 + $0x8] sm:$0xff]  ;;  %v19_v5 = vld [vmem:[%s126_s0 + $0x10] sm:$0xff] }
   0x2   :  { %v57_v1 = vld [vmem:[%s127_s1] ss:$0 sm:$0xff]  ;;  %v20_v9 = vld [vmem:[%s126_s0 + $0x18] sm:$0xff]  ;;  %v38_v11 = vld [vmem:[%s129_s3 + $0x8] sm:$0xff] }
   0x3   :  { %v58_v2 = vld [vmem:[%s128_s2] ss:$0 sm:$0xff]  ;;  %v25_v3 = vmul.f32 %v57_v1, %v17_v0  ;;  %v26_v7 = vmul.f32 %v57_v1, %v18_v4  ;;  %v27_v8 = vmul.f32 %v57_v1, %v19_v5  ;;  %v39_v12 = vld [vmem:[%s129_s3 + $0x10] sm:$0xff]  ;;  %v28_v13 = vmul.f32 %v57_v1, %v20_v9  ;;  %v40_v16 = vld [vmem:[%s129_s3 + $0x18] sm:$0xff] }
   0x4   :  { %v37_v6 = vld [vmem:[%s129_s3] sm:$0xff] }
   0x5   :  { %v33_v10 = vadd.f32 %v58_v2, %v25_v3  ;;  %v34_v14 = vadd.f32 %v58_v2, %v26_v7  ;;  %v35_v15 = vadd.f32 %v58_v2, %v27_v8  ;;  %v36_v18 = vadd.f32 %v58_v2, %v28_v13 }
   0x7   :  { %v41_v17 = vadd.f32 %v37_v6, %v33_v10  ;;  %v42_v19 = vadd.f32 %v38_v11, %v34_v14  ;;  %v43_v20 = vadd.f32 %v39_v12, %v35_v15  ;;  %v44_v22 = vadd.f32 %v40_v16, %v36_v18 }
   0x9   :  { %v45_v21 = vmax.f32 %v41_v17, 0.0  ;;  %v46_v23 = vmax.f32 %v42_v19, 0.0  ;;  %v47_v24 = vmax.f32 %v43_v20, 0.0  ;;  %v48_v25 = vmax.f32 %v44_v22, 0.0 }
   0xb   :  { %49 = vst [vmem:[%s130_s4] sm:$0xff] %v45_v21 }
   0xc   :  { %50 = vst [vmem:[%s130_s4 + $0x8] sm:$0xff] %v46_v23 }
   0xd   :  { %51 = vst [vmem:[%s130_s4 + $0x10] sm:$0xff] %v47_v24 }
   0xe   :  { %52 = vst [vmem:[%s130_s4 + $0x18] sm:$0xff] %v48_v25 }

// kernel: _lambda_.34
= control target key start
LH: loop header
LB: loop body
LE: loop exit
PB: predicated region body
PF: predicated region fallthrough
CT: control target
= control target key end

     0   :  { %s852_s15 = smov 0   ;;  %s854_s16 = smov 0   ;;  %s954_s0 = inlined_call_operand.vmem [shape: bf16[32,1152], index: 0, kind: input, shape index: {}]   ;;  %s955_s1 = inlined_call_operand.vmem [shape: bf16[1152,128], index: 1, kind: input, shape index: {}]   ;;  %s956_s2 = inlined_call_operand.vmem [shape: f32[32,128], index: 2, kind: output, shape index: {0}]   ;;  %s957_s3 = inlined_call_operand.vmem [shape: f32[1,1,128], index: 3, kind: output, shape index: {1}]   ;;  %s958_s4 = inlined_call_operand.vmem [shape: f32[1,1,128], index: 4, kind: output, shape index: {2}]  }
   0x1   :  { %s856_s17 = smov 0   ;;  %s858_s18 = smov 0  }
   0x2   :  { %s860_s19 = smov 0  }
   0x3 LB: > { %s27_s20 = sadd.s32 1, %s820_s18  ;;  %p50_p1 = scmp.ne.s32.totalorder %s812_s16, %s808_s15  ;;  %s824_s19 = sphi %s860_s19, %s15_s19   ;;  %s820_s18 = sphi %s858_s18, %s962_s18   ;;  %s816_s17 = sphi %s856_s17, %s961_s17   ;;  %s812_s16 = sphi %s854_s16, %s960_s16   ;;  %s808_s15 = sphi %s852_s15, %s959_s15  }
   0x4   : > { %p28_p0 = scmp.ge.s32.totalorder %s27_s20, 9  ;;  %p51_p2 = scmp.eq.s32.totalorder %s824_s19, 0 }
   0x5   : > { %s43_s22 = sadd.s32 1, %s812_s16  ;;  %p672_p5 = scmp.ge.s32.totalorder %s824_s19, 9 }
   0x6   : > { %s964_s20 = smov (%p28_p0, %s27_s20), 0  ;;  %p52_p3 = por %p51_p2, %p50_p1 }
   0x7   : > { %s39_s21 = ssub.s32 %s820_s18, %s964_s20  ;;  %188 = sbr.rel (%p672_p5) target bundleno = 20 (0x14), region = 16 }
   0x8   : > { %p41_p4 = scmp.eq.s32.totalorder %s39_s21, 0 }
   0xa   : > { %s887_s23 = scalar_select %p41_p4, %s812_s16, %s43_s22  }
   0xc   : > { %191 = sbr.rel (!%p52_p3) target bundleno = 20 (0x14), region = 20  ;;  %s193_s24 = sand.u32 (%p52_p3), 1, %s812_s16  }
   0xd   : > { %s674_s25 = sshll.u32 (%p52_p3), %s820_s18, 2  ;;  %s673_s26 = sshll.u32 (%p52_p3), %s193_s24, 4 }
   0xe   : > { %s200_s29 = scalar_lea.vmem (%p52_p3), %s954_s0, %s674_s25  ;;  %s195_s30 = scalar_lea.vmem (%p52_p3), [#allocation3], %s673_s26 }
   0xf   : > { %v217_v0 = vld [vmem:[%s200_s29] sm:$0xf] (%p52_p3)  ;;  %v219_v1 = vld [vmem:[%s200_s29 + $0x24] sm:$0xf] (%p52_p3)  ;;  %v221_v2 = vld [vmem:[%s200_s29 + $0x48] sm:$0xf] (%p52_p3) }
  0x10   : > { %218 = vst [vmem:[%s195_s30] sm:$0xf] (%p52_p3), %v217_v0  ;;  %v223_v3 = vld [vmem:[%s200_s29 + $0x6c] sm:$0xf] (%p52_p3) }
  0x11   : > { %220 = vst [vmem:[%s195_s30 + $0x4] sm:$0xf] %v219_v1 }
  0x12   : > { %222 = vst [vmem:[%s195_s30 + $0x8] sm:$0xf] %v221_v2 }
  0x13   : > { %224 = vst [vmem:[%s195_s30 + $0xc] sm:$0xf] %v223_v3 }
  0x14 PF: > { %p675_p6 = scmp.ge.s32.totalorder %s824_s19, 1  ;;  %p267_p7 = scmp.lt.s32.totalorder %s824_s19, 10 }
  0x16   : > { %p268_p8 = pnand %p675_p6, %p267_p7 }
  0x17   : > { %s274_s5 = sand.u32 (!%p268_p8), 1, %s808_s15   ;;  %s677_s6 = sshll.u32 (!%p268_p8), %s816_s17, 4 }
  0x18   : > { %271 = sbr.rel (%p268_p8) target bundleno = 236 (0xec), region = 65  ;;  %s899_s7 = sshll.u32 (!%p268_p8), %s274_s5, 4 }
  0x19   : > { %p324_p9 = scmp.lt.s32.totalorder (!%p268_p8), %s677_s6, 143  ;;  %s276_s12 = scalar_lea.vmem (!%p268_p8), [#allocation3], %s899_s7 }
  0x1a   : > { %p679_p10 = scmp.ne.s32.totalorder (!%p268_p8), %s816_s17, 0 }
  0x1d   : > { %s966_s6 = smov (!%p324_p9, %s677_s6), 143  ;;  %356 = sbr.rel (%p679_p10) target bundleno = 39 (0x27), region = 73 }
  0x1e   : > { %s678_s8 = sshll.u32 %s966_s6, 2 }
  0x1f   : > { %s904_s11 = scalar_lea.vmem %s955_s1, %s678_s8 }
  0x22   : > { %v826_v4 = vmov 0.0  }
  0x23   : > { %357 = vst [vmem:[#allocation2 + $0x10] sm:$0xff] %v826_v4 }
  0x24   : > { %358 = vst [vmem:[#allocation2] sm:$0xff] %v826_v4 }
  0x25   : > { %359 = vst [vmem:[#allocation2 + $0x18] sm:$0xff] %v826_v4 }
  0x26   : > { %360 = vst [vmem:[#allocation2 + $0x8] sm:$0xff] %v826_v4 }
  0x27 PF: > { %v736_v5 = vld [vmem:[%s904_s11 + $0x38] sm:$0xff]  ;;  %v735_v6 = vld [vmem:[%s904_s11 + $0x30] sm:$0xff]  ;;  %v734_v7 = vld [vmem:[%s904_s11 + $0x28] sm:$0xff]  ;;  %p720_p11 = scmp.ne.s32.totalorder %s816_s17, 8 }
  0x28   : > { %445 = vmatpush.bf16.msra.mxu0 %v736_v5  ;;  %737 = vmatpush.bf16.msra.mxu1 %v736_v5  ;;  %v733_v8 = vld [vmem:[%s904_s11 + $0x20] sm:$0xff]  ;;  %v732_v9 = vld [vmem:[%s904_s11 + $0x18] sm:$0xff]  ;;  %v731_v10 = vld [vmem:[%s904_s11 + $0x10] sm:$0xff] }
  0x29   : > { %v730_v11 = vld [vmem:[%s904_s11 + $0x8] sm:$0xff]  ;;  %v729_v12 = vld [vmem:[%s904_s11] sm:$0xff] }
  0x2a   : > { %v727_v13 = vld [vmem:[%s276_s12] sm:$0xff]  ;;  %v728_v14 = vld [vmem:[%s276_s12 + $0x8] sm:$0xff] }
  0x2b   : > { %v361_v15 = vld [vmem:[#allocation2 + $0x10] sm:$0xff]  ;;  %v362_v21 = vld [vmem:[#allocation2] sm:$0xff] }
  0x2c   : > { %446 = vmatpush.bf16.msra.mxu0 %v735_v6  ;;  %738 = vmatpush.bf16.msra.mxu1 %v735_v6  ;;  %v363_v16 = vld [vmem:[#allocation2 + $0x18] sm:$0xff] }
  0x2d   : > { %v364_v22 = vld [vmem:[#allocation2 + $0x8] sm:$0xff] }
  0x30   : > { %447 = vmatpush.bf16.msra.mxu0 %v734_v7  ;;  %739 = vmatpush.bf16.msra.mxu1 %v734_v7 }
  0x34   : > { %448 = vmatpush.bf16.msra.mxu0 %v733_v8  ;;  %740 = vmatpush.bf16.msra.mxu1 %v733_v8 }
  0x38   : > { %449 = vmatpush.bf16.msra.mxu0 %v732_v9  ;;  %741 = vmatpush.bf16.msra.mxu1 %v732_v9 }
  0x3c   : > { %450 = vmatpush.bf16.msra.mxu0 %v731_v10  ;;  %742 = vmatpush.bf16.msra.mxu1 %v731_v10 }
  0x40   : > { %451 = vmatpush.bf16.msra.mxu0 %v730_v11  ;;  %743 = vmatpush.bf16.msra.mxu1 %v730_v11 }
  0x44   : > { %452 = vmatpush.bf16.msra.mxu0 %v729_v12  ;;  %744 = vmatpush.bf16.msra.mxu1 %v729_v12 }
  0x47   : > { %453 = vmatmul.bf16.vlgmr.msra.gmra.mxu0 %v727_v13  ;;  %458 = vmatmul.bf16.vlgmr.msra.gmra.mxu1 %v728_v14 }
  0xc4   : > { %v454_v17 = vpop.f32.mrf.mxu0  ;;  %v459_v18 = vpop.f32.mrf.mxu1 }
  0xc5   : > { %v464_v19 = vadd.f32 %v454_v17, %v361_v15  ;;  %v466_v20 = vadd.f32 %v459_v18, %v363_v16 }
  0xc7   : > { %468 = vst [vmem:[#allocation2 + $0x10] sm:$0xff] %v464_v19 }
  0xc8   : > { %470 = vst [vmem:[#allocation2 + $0x18] sm:$0xff] %v466_v20 }
  0xcc   : > { %v456_v23 = vpop.f32.mrf.mxu0  ;;  %v461_v24 = vpop.f32.mrf.mxu1  ;;  %475 = sbr.rel (%p720_p11) target bundleno = 236 (0xec), region = 77 }
  0xcd   : > { %v465_v25 = vadd.f32 %v456_v23, %v362_v21  ;;  %v467_v26 = vadd.f32 %v461_v24, %v364_v22 }
  0xcf   : > { %469 = vst [vmem:[#allocation2] sm:$0xff] %v465_v25 }
  0xd0   : > { %471 = vst [vmem:[#allocation2 + $0x8] sm:$0xff] %v467_v26 }
  0xd1   : > { %v476_v27 = vld [vmem:[#allocation2 + $0x10] sm:$0xff]  ;;  %v478_v29 = vld [vmem:[#allocation2 + $0x18] sm:$0xff] }
  0xd2   : > { %480 = vst [vmem:[%s956_s2] sm:$0xff] %v476_v27  ;;  %v494_v30 = vmul.f32 %v476_v27, %v476_v27  ;;  %v496_v33 = vmul.f32 %v478_v29, %v478_v29 }
  0xd3   : > { %482 = vst [vmem:[%s956_s2 + $0x10] sm:$0xff] %v478_v29 }
  0xd6   : > { %v477_v28 = vld [vmem:[#allocation2] sm:$0xff] }
  0xd7   : > { %v484_v31 = vadd.f32 %v477_v28, %v476_v27  ;;  %v495_v32 = vmul.f32 %v477_v28, %v477_v28  ;;  %v479_v34 = vld [vmem:[#allocation2 + $0x8] sm:$0xff]  ;;  %481 = vst [vmem:[%s956_s2 + $0x8] sm:$0xff] %v477_v28 }
  0xd8   : > { %v497_v37 = vmul.f32 %v479_v34, %v479_v34  ;;  %483 = vst [vmem:[%s956_s2 + $0x18] sm:$0xff] %v479_v34 }
  0xd9   : > { %v498_v35 = vadd.f32 %v495_v32, %v494_v30  ;;  %v485_v36 = vadd.f32 %v484_v31, %v478_v29 }
  0xdb   : > { %v499_v38 = vadd.f32 %v498_v35, %v496_v33  ;;  %v486_v39 = vadd.f32 %v485_v36, %v479_v34 }
  0xdd   : > { %v487_v40 = vrot.slane %v486_v39, 4  ;;  %v500_v41 = vadd.f32 %v499_v38, %v497_v37 }
  0xdf   : > { %v488_v42 = vadd.f32 %v487_v40, %v486_v39  ;;  %v501_v43 = vrot.slane %v500_v41, 4 }
  0xe1   : > { %v489_v44 = vrot.slane %v488_v42, 2  ;;  %v502_v45 = vadd.f32 %v501_v43, %v500_v41 }
  0xe3   : > { %v490_v46 = vadd.f32 %v489_v44, %v488_v42  ;;  %v503_v47 = vrot.slane %v502_v45, 2 }
  0xe5   : > { %v491_v48 = vrot.slane %v490_v46, 1  ;;  %v504_v49 = vadd.f32 %v503_v47, %v502_v45 }
  0xe7   : > { %v492_v50 = vadd.f32 %v491_v48, %v490_v46  ;;  %v505_v51 = vrot.slane %v504_v49, 1 }
  0xe9   : > { %493 = vst [vmem:[%s957_s3] sm:$0x1] %v492_v50  ;;  %v506_v52 = vadd.f32 %v505_v51, %v504_v49 }
  0xeb   : > { %507 = vst [vmem:[%s958_s4] sm:$0x1] %v506_v52 }
  0xec PF: > { %s15_s19 = sadd.s32 1, %s824_s19   ;;  %s959_s15 = smov %s812_s16 }
  0xed   : > { %p12_p12 = scmp.ge.s32.totalorder %s15_s19, 11   ;;  %s960_s16 = smov %s887_s23 }
  0xee   : > { %s961_s17 = smov %s820_s18  ;;  %s962_s18 = smov %s964_s20 }
  0xef   :  { %14 = sbr.rel (!%p12_p12) target bundleno = 3 (0x3), region = 139 }

// kernel: _lambda_.39
= control target key start
LH: loop header
LB: loop body
LE: loop exit
PB: predicated region body
PF: predicated region fallthrough
CT: control target
= control target key end

     0   :  { %s76_s0 = inlined_call_operand.vmem [shape: f32[8,256], index: 0, kind: input, shape index: {}, may-alias: {0,3}]   ;;  %s77_s1 = inlined_call_operand.vmem [shape: f32[1,256], index: 1, kind: input, shape index: {}]   ;;  %s78_s2 = inlined_call_operand.vmem [shape: f32[1,256], index: 2, kind: input, shape index: {}]   ;;  %s79_s3 = inlined_call_operand.vmem [shape: f32[8,256], index: 3, kind: output, shape index: {}, may-alias: {0,3}]  }
   0x1   :  { %v14_v0 = vld [vmem:[%s76_s0] sm:$0xff]  ;;  %v15_v5 = vld [vmem:[%s76_s0 + $0x8] sm:$0xff] }
   0x2   :  { %v16_v1 = vld [vmem:[%s77_s1] sm:$0x3] }
   0x3   :  { %v24_v2 = vld [vmem:[%s78_s2] sm:$0x3]  ;;  %v18_v3 = vperm.slane %v16_v1, 0  ;;  %v19_v6 = vperm.slane %v16_v1, 1 }
   0x4   :  { %v26_v4 = vperm.slane %v24_v2, 0  ;;  %v27_v7 = vperm.slane %v24_v2, 1 }
   0x5   :  { %v22_v8 = vmul.f32 %v18_v3, %v14_v0  ;;  %v23_v9 = vmul.f32 %v19_v6, %v15_v5 }
   0x7   :  { %v30_v10 = vadd.f32 %v26_v4, %v22_v8  ;;  %v31_v11 = vadd.f32 %v27_v7, %v23_v9 }
   0x9   :  { %32 = vst [vmem:[%s79_s3] sm:$0xff] %v30_v10 }
   0xa   :  { %33 = vst [vmem:[%s79_s3 + $0x8] sm:$0xff] %v31_v11 }

// kernel: _lambda_.38
= control target key start
LH: loop header
LB: loop body
LE: loop exit
PB: predicated region body
PF: predicated region fallthrough
CT: control target
= control target key end

     0   :  { %vm171_vm0 = vcmask 1040384   ;;  %s427_s1 = inlined_call_operand.vmem [shape: bf16[128,256], index: 1, kind: input, shape index: {}]   ;;  %s428_s0 = inlined_call_operand.vmem [shape: bf16[8,128], index: 0, kind: input, shape index: {}]   ;;  %s429_s2 = inlined_call_operand.vmem [shape: f32[8,256], index: 2, kind: output, shape index: {0}]   ;;  %s430_s3 = inlined_call_operand.vmem [shape: f32[1,1,256], index: 3, kind: output, shape index: {1}]   ;;  %s431_s4 = inlined_call_operand.vmem [shape: f32[1,1,256], index: 4, kind: output, shape index: {2}]  }
   0x1   :  { %v269_v0 = vld [vmem:[%s427_s1 + $0x70] sm:$0xf]  ;;  %v290_v1 = vld [vmem:[%s427_s1 + $0x74] sm:$0xf0]  ;;  %v289_v2 = vld [vmem:[%s427_s1 + $0x74] sm:$0xf] }
   0x2   :  { %v270_v3 = vor.u32 %v290_v1, %v269_v0  ;;  %v271_v4 = vld [vmem:[%s427_s1 + $0x78] sm:$0xf0]  ;;  %v261_v5 = vld [vmem:[%s427_s1 + $0x60] sm:$0xf]  ;;  %v288_v6 = vld [vmem:[%s427_s1 + $0x64] sm:$0xf0] }
   0x3   :  { %v274_v7 = vor.u32 %v289_v2, %v271_v4  ;;  %v287_v8 = vld [vmem:[%s427_s1 + $0x64] sm:$0xf]  ;;  %v263_v9 = vld [vmem:[%s427_s1 + $0x68] sm:$0xf0]  ;;  %v262_v10 = vor.u32 %v288_v6, %v261_v5  ;;  %v253_v12 = vld [vmem:[%s427_s1 + $0x50] sm:$0xf] }
   0x4   :  { %119 = vmatpush.bf16.msra.mxu0 %v270_v3  ;;  %v266_v11 = vor.u32 %v287_v8, %v263_v9  ;;  %v286_v13 = vld [vmem:[%s427_s1 + $0x54] sm:$0xf0]  ;;  %v285_v14 = vld [vmem:[%s427_s1 + $0x54] sm:$0xf]  ;;  %v255_v15 = vld [vmem:[%s427_s1 + $0x58] sm:$0xf0]  ;;  %v174_v8 = vlaneseq }
   0x5   :  { %132 = vmatpush.bf16.msra.mxu1 %v274_v7  ;;  %v254_v16 = vor.u32 %v286_v13, %v253_v12  ;;  %v258_v17 = vor.u32 %v285_v14, %v255_v15  ;;  %v245_v18 = vld [vmem:[%s427_s1 + $0x40] sm:$0xf]  ;;  %v284_v19 = vld [vmem:[%s427_s1 + $0x44] sm:$0xf0]  ;;  %v283_v20 = vld [vmem:[%s427_s1 + $0x44] sm:$0xf] }
   0x6   :  { %v247_v21 = vld [vmem:[%s427_s1 + $0x48] sm:$0xf0]  ;;  %v246_v22 = vor.u32 %v284_v19, %v245_v18  ;;  %v237_v24 = vld [vmem:[%s427_s1 + $0x30] sm:$0xf]  ;;  %v282_v25 = vld [vmem:[%s427_s1 + $0x34] sm:$0xf0] }
   0x7   :  { %v250_v23 = vor.u32 %v283_v20, %v247_v21  ;;  %v281_v26 = vld [vmem:[%s427_s1 + $0x34] sm:$0xf]  ;;  %v239_v27 = vld [vmem:[%s427_s1 + $0x38] sm:$0xf0]  ;;  %v238_v28 = vor.u32 %v282_v25, %v237_v24  ;;  %v229_v30 = vld [vmem:[%s427_s1 + $0x20] sm:$0xf] }
   0x8   :  { %120 = vmatpush.bf16.msra.mxu0 %v262_v10  ;;  %v242_v29 = vor.u32 %v281_v26, %v239_v27  ;;  %v280_v31 = vld [vmem:[%s427_s1 + $0x24] sm:$0xf0]  ;;  %v279_v32 = vld [vmem:[%s427_s1 + $0x24] sm:$0xf]  ;;  %v231_v33 = vld [vmem:[%s427_s1 + $0x28] sm:$0xf0] }
   0x9   :  { %133 = vmatpush.bf16.msra.mxu1 %v266_v11  ;;  %v230_v34 = vor.u32 %v280_v31, %v229_v30  ;;  %v234_v35 = vor.u32 %v279_v32, %v231_v33  ;;  %v221_v36 = vld [vmem:[%s427_s1 + $0x10] sm:$0xf]  ;;  %v278_v37 = vld [vmem:[%s427_s1 + $0x14] sm:$0xf0]  ;;  %v277_v38 = vld [vmem:[%s427_s1 + $0x14] sm:$0xf] }
   0xa   :  { %v223_v39 = vld [vmem:[%s427_s1 + $0x18] sm:$0xf0]  ;;  %v222_v40 = vor.u32 %v278_v37, %v221_v36  ;;  %v213_v42 = vld [vmem:[%s427_s1] sm:$0xf]  ;;  %v276_v43 = vld [vmem:[%s427_s1 + $0x4] sm:$0xf0] }
   0xb   :  { %v226_v41 = vor.u32 %v277_v38, %v223_v39  ;;  %v275_v44 = vld [vmem:[%s427_s1 + $0x4] sm:$0xf]  ;;  %v215_v45 = vld [vmem:[%s427_s1 + $0x8] sm:$0xf0]  ;;  %v214_v46 = vor.u32 %v276_v43, %v213_v42  ;;  %v22_v48 = vld [vmem:[%s428_s0] sm:$0xf] }
   0xc   :  { %121 = vmatpush.bf16.msra.mxu0 %v254_v16  ;;  %v218_v47 = vor.u32 %v275_v44, %v215_v45  ;;  %vm176_vm1 = vcmp.lt.s32.totalorder %v174_v8, 256 }
   0xd   :  { %134 = vmatpush.bf16.msra.mxu1 %v258_v17 }
  0x10   :  { %122 = vmatpush.bf16.msra.mxu0 %v246_v22 }
  0x11   :  { %135 = vmatpush.bf16.msra.mxu1 %v250_v23 }
  0x14   :  { %123 = vmatpush.bf16.msra.mxu0 %v238_v28 }
  0x15   :  { %136 = vmatpush.bf16.msra.mxu1 %v242_v29 }
  0x18   :  { %124 = vmatpush.bf16.msra.mxu0 %v230_v34 }
  0x19   :  { %137 = vmatpush.bf16.msra.mxu1 %v234_v35 }
  0x1c   :  { %125 = vmatpush.bf16.msra.mxu0 %v222_v40 }
  0x1d   :  { %138 = vmatpush.bf16.msra.mxu1 %v226_v41 }
  0x20   :  { %126 = vmatpush.bf16.msra.mxu0 %v214_v46 }
  0x21   :  { %139 = vmatpush.bf16.msra.mxu1 %v218_v47 }
  0x23   :  { %127 = vmatmul.bf16.vlgmr.msra.gmra.mxu0 %v22_v48 }
  0x24   :  { %140 = vmatmul.bf16.vlgmr.msra.gmra.mxu1 %v22_v48 }
  0xa0   :  { %v128_v49 = vpop.f32.mrf.mxu0 }
  0xa1   :  { %154 = vst [vmem:[%s429_s2] sm:$0xff] %v128_v49  ;;  %v156_v50 = vrot.slane %v128_v49, 4  ;;  %v179_v51 = vmul.f32 %v128_v49, %v128_v49  ;;  %v141_v52 = vpop.f32.mrf.mxu1 }
  0xa2   :  { %155 = vst [vmem:[%s429_s2 + $0x8] sm:$0xff] %v141_v52  ;;  %v162_v53 = vrot.slane %v141_v52, 4  ;;  %v180_v54 = vmul.f32 %v141_v52, %v141_v52 }
  0xa3   :  { %v157_v55 = vadd.f32 %v156_v50, %v128_v49  ;;  %v181_v56 = vrot.slane %v179_v51, 4 }
  0xa4   :  { %v163_v57 = vadd.f32 %v162_v53, %v141_v52  ;;  %v187_v58 = vrot.slane %v180_v54, 4 }
  0xa5   :  { %v158_v59 = vrot.slane %v157_v55, 2  ;;  %v182_v60 = vadd.f32 %v181_v56, %v179_v51 }
  0xa6   :  { %v164_v61 = vrot.slane %v163_v57, 2  ;;  %v188_v62 = vadd.f32 %v187_v58, %v180_v54 }
  0xa7   :  { %v159_v63 = vadd.f32 %v158_v59, %v157_v55  ;;  %v183_v0 = vrot.slane %v182_v60, 2 }
  0xa8   :  { %v165_v1 = vadd.f32 %v164_v61, %v163_v57  ;;  %v189_v2 = vrot.slane %v188_v62, 2  ;;  %v130_v3 = vpop.f32.mrf.mxu0 }
  0xa9   :  { %v184_v4 = vadd.f32 %v183_v0, %v182_v60  ;;  %v143_v5 = vpop.f32.mrf.mxu1  ;;  %v160_v6 = vrot.slane %v159_v63, 1 }
  0xaa   :  { %v166_v7 = vrot.slane %v165_v1, 1  ;;  %v190_v9 = vadd.f32 %v189_v2, %v188_v62 }
  0xab   :  { %v185_v10 = vrot.slane %v184_v4, 1  ;;  %v161_v13 = vadd.f32 %v160_v6, %v159_v63 }
  0xac   :  { %v167_v11 = vadd.f32 %v166_v7, %v165_v1  ;;  %v191_v12 = vrot.slane %v190_v9, 1 }
  0xad   :  { %v186_v16 = vadd.f32 %v185_v10, %v184_v4 }
  0xae   :  { %v170_v14 = vrot.slane %v167_v11, 7  ;;  %v192_v15 = vadd.f32 %v191_v12, %v190_v9 }
  0xb0   :  { %v172_v17 = vsel %vm171_vm0, %v161_v13, %v170_v14  ;;  %v195_v18 = vrot.slane %v192_v15, 7 }
  0xb1   :  { %178 = vst.msk [vmem:[%s430_s3] sm:$0x3] %vm176_vm1, %v172_v17 }
  0xb2   :  { %v196_v19 = vsel %vm171_vm0, %v186_v16, %v195_v18 }
  0xb3   :  { %198 = vst.msk [vmem:[%s431_s4] sm:$0x3] %vm176_vm1, %v196_v19 }

// kernel: _lambda_.37
= control target key start
LH: loop header
LB: loop body
LE: loop exit
PB: predicated region body
PF: predicated region fallthrough
CT: control target
= control target key end

     0   :  { %s78_s0 = inlined_call_operand.vmem [shape: f32[8,256], index: 0, kind: input, shape index: {}, may-alias: {0,3}]   ;;  %s79_s1 = inlined_call_operand.vmem [shape: f32[1,256], index: 1, kind: input, shape index: {}]   ;;  %s80_s2 = inlined_call_operand.vmem [shape: f32[1,256], index: 2, kind: input, shape index: {}]   ;;  %s81_s3 = inlined_call_operand.vmem [shape: f32[8,256], index: 3, kind: output, shape index: {}, may-alias: {0,3}]  }
   0x1   :  { %v14_v0 = vld [vmem:[%s78_s0] sm:$0xff]  ;;  %v15_v5 = vld [vmem:[%s78_s0 + $0x8] sm:$0xff] }
   0x2   :  { %v16_v1 = vld [vmem:[%s79_s1] sm:$0x3] }
   0x3   :  { %v24_v2 = vld [vmem:[%s80_s2] sm:$0x3]  ;;  %v18_v3 = vperm.slane %v16_v1, 0  ;;  %v19_v6 = vperm.slane %v16_v1, 1 }
   0x4   :  { %v26_v4 = vperm.slane %v24_v2, 0  ;;  %v27_v7 = vperm.slane %v24_v2, 1 }
   0x5   :  { %v22_v8 = vmul.f32 %v18_v3, %v14_v0  ;;  %v23_v9 = vmul.f32 %v19_v6, %v15_v5 }
   0x7   :  { %v30_v10 = vadd.f32 %v26_v4, %v22_v8  ;;  %v31_v11 = vadd.f32 %v27_v7, %v23_v9 }
   0x9   :  { %v32_v12 = vmax.f32 %v30_v10, 0.0  ;;  %v33_v13 = vmax.f32 %v31_v11, 0.0 }
   0xb   :  { %34 = vst [vmem:[%s81_s3] sm:$0xff] %v32_v12 }
   0xc   :  { %35 = vst [vmem:[%s81_s3 + $0x8] sm:$0xff] %v33_v13 }

// kernel: _lambda_.36
= control target key start
LH: loop header
LB: loop body
LE: loop exit
PB: predicated region body
PF: predicated region fallthrough
CT: control target
= control target key end

     0   :  { %s870_s15 = smov 0   ;;  %s872_s16 = smov 0   ;;  %s959_s0 = inlined_call_operand.vmem [shape: bf16[8,1152], index: 0, kind: input, shape index: {}]   ;;  %s960_s1 = inlined_call_operand.vmem [shape: bf16[1152,256], index: 1, kind: input, shape index: {}]   ;;  %s961_s2 = inlined_call_operand.vmem [shape: f32[8,256], index: 2, kind: output, shape index: {0}]   ;;  %s962_s3 = inlined_call_operand.vmem [shape: f32[1,1,256], index: 3, kind: output, shape index: {1}]   ;;  %s963_s4 = inlined_call_operand.vmem [shape: f32[1,1,256], index: 4, kind: output, shape index: {2}]  }
   0x1   :  { %s874_s17 = smov 0  }
   0x2 LB: > { %s27_s18 = sadd.s32 1, %s838_s16  ;;  %p699_p0 = scmp.ge.s32.totalorder %s842_s17, 1  ;;  %s842_s17 = sphi %s874_s17, %s15_s17   ;;  %s838_s16 = sphi %s872_s16, %s965_s16   ;;  %s834_s15 = sphi %s870_s15, %s964_s15  }
   0x3   : > { %p28_p1 = scmp.ge.s32.totalorder %s27_s18, 9  ;;  %p216_p2 = scmp.lt.s32.totalorder %s842_s17, 10 }
   0x5   : > { %s967_s18 = smov (%p28_p1, %s27_s18), 0  ;;  %p217_p3 = pnand %p699_p0, %p216_p2 }
   0x6   : > { %p277_p4 = scmp.lt.s32.totalorder (!%p217_p3), %s834_s15, 8  ;;  %s701_s19 = sshll.u32 (!%p217_p3), %s834_s15, 4 }
   0x7   : > { %220 = sbr.rel (%p217_p3) target bundleno = 210 (0xd2), region = 28  ;;  %p285_p5 = scmp.lt.s32.totalorder (!%p217_p3), %s701_s19, 143 }
   0x8   : > { %p704_p6 = scmp.ne.s32.totalorder (!%p217_p3), %s834_s15, 0 }
   0xc   : > { %s278_s20 = scalar_select %p277_p4, %s834_s15, 8 }
   0xd   : > { %s969_s19 = smov (!%p285_p5, %s701_s19), 143  ;;  %326 = sbr.rel (%p704_p6) target bundleno = 21 (0x15), region = 32 }
   0xe   : > { %s700_s21 = sshll.u32 %s278_s20, 2  ;;  %s778_s25 = sshll.u32 %s969_s19, 3 }
   0xf   : > { %s896_s24 = scalar_lea.vmem %s959_s0, %s700_s21  ;;  %s901_s28 = scalar_lea.vmem %s960_s1, %s778_s25 }
  0x12   : > { %v844_v0 = vmov 0.0  }
  0x13   : > { %327 = vst [vmem:[#allocation2] sm:$0xff] %v844_v0 }
  0x14   : > { %328 = vst [vmem:[#allocation2 + $0x8] sm:$0xff] %v844_v0 }
  0x15 PF: > { %v763_v1 = vld [vmem:[%s901_s28 + $0x70] sm:$0xf]  ;;  %v794_v2 = vld [vmem:[%s901_s28 + $0x74] sm:$0xf0]  ;;  %v793_v3 = vld [vmem:[%s901_s28 + $0x74] sm:$0xf] }
  0x16   : > { %v764_v4 = vor.u32 %v794_v2, %v763_v1  ;;  %v765_v5 = vld [vmem:[%s901_s28 + $0x78] sm:$0xf0]  ;;  %v755_v6 = vld [vmem:[%s901_s28 + $0x60] sm:$0xf]  ;;  %v792_v7 = vld [vmem:[%s901_s28 + $0x64] sm:$0xf0] }
  0x17   : > { %v768_v8 = vor.u32 %v793_v3, %v765_v5  ;;  %v791_v9 = vld [vmem:[%s901_s28 + $0x64] sm:$0xf]  ;;  %v757_v10 = vld [vmem:[%s901_s28 + $0x68] sm:$0xf0]  ;;  %v756_v11 = vor.u32 %v792_v7, %v755_v6  ;;  %v747_v13 = vld [vmem:[%s901_s28 + $0x50] sm:$0xf] }
  0x18   : > { %428 = vmatpush.bf16.msra.mxu0 %v764_v4  ;;  %v760_v12 = vor.u32 %v791_v9, %v757_v10  ;;  %v790_v14 = vld [vmem:[%s901_s28 + $0x54] sm:$0xf0]  ;;  %v789_v15 = vld [vmem:[%s901_s28 + $0x54] sm:$0xf]  ;;  %v749_v16 = vld [vmem:[%s901_s28 + $0x58] sm:$0xf0] }
  0x19   : > { %441 = vmatpush.bf16.msra.mxu1 %v768_v8  ;;  %v748_v17 = vor.u32 %v790_v14, %v747_v13  ;;  %v752_v18 = vor.u32 %v789_v15, %v749_v16  ;;  %v739_v19 = vld [vmem:[%s901_s28 + $0x40] sm:$0xf]  ;;  %v788_v20 = vld [vmem:[%s901_s28 + $0x44] sm:$0xf0]  ;;  %v787_v21 = vld [vmem:[%s901_s28 + $0x44] sm:$0xf] }
  0x1a   : > { %v741_v22 = vld [vmem:[%s901_s28 + $0x48] sm:$0xf0]  ;;  %v740_v23 = vor.u32 %v788_v20, %v739_v19  ;;  %v731_v25 = vld [vmem:[%s901_s28 + $0x30] sm:$0xf]  ;;  %v786_v26 = vld [vmem:[%s901_s28 + $0x34] sm:$0xf0] }
  0x1b   : > { %v744_v24 = vor.u32 %v787_v21, %v741_v22  ;;  %v785_v27 = vld [vmem:[%s901_s28 + $0x34] sm:$0xf]  ;;  %v733_v28 = vld [vmem:[%s901_s28 + $0x38] sm:$0xf0]  ;;  %v732_v29 = vor.u32 %v786_v26, %v731_v25  ;;  %v723_v31 = vld [vmem:[%s901_s28 + $0x20] sm:$0xf] }
  0x1c   : > { %429 = vmatpush.bf16.msra.mxu0 %v756_v11  ;;  %v736_v30 = vor.u32 %v785_v27, %v733_v28  ;;  %v784_v32 = vld [vmem:[%s901_s28 + $0x24] sm:$0xf0]  ;;  %v783_v33 = vld [vmem:[%s901_s28 + $0x24] sm:$0xf]  ;;  %v725_v34 = vld [vmem:[%s901_s28 + $0x28] sm:$0xf0] }
  0x1d   : > { %442 = vmatpush.bf16.msra.mxu1 %v760_v12  ;;  %v724_v35 = vor.u32 %v784_v32, %v723_v31  ;;  %v728_v36 = vor.u32 %v783_v33, %v725_v34  ;;  %v715_v37 = vld [vmem:[%s901_s28 + $0x10] sm:$0xf]  ;;  %v782_v38 = vld [vmem:[%s901_s28 + $0x14] sm:$0xf0]  ;;  %v781_v39 = vld [vmem:[%s901_s28 + $0x14] sm:$0xf] }
  0x1e   : > { %v717_v40 = vld [vmem:[%s901_s28 + $0x18] sm:$0xf0]  ;;  %v716_v41 = vor.u32 %v782_v38, %v715_v37  ;;  %v707_v43 = vld [vmem:[%s901_s28] sm:$0xf]  ;;  %v780_v44 = vld [vmem:[%s901_s28 + $0x4] sm:$0xf0] }
  0x1f   : > { %v720_v42 = vor.u32 %v781_v39, %v717_v40  ;;  %v779_v45 = vld [vmem:[%s901_s28 + $0x4] sm:$0xf]  ;;  %v709_v46 = vld [vmem:[%s901_s28 + $0x8] sm:$0xf0]  ;;  %v708_v47 = vor.u32 %v780_v44, %v707_v43  ;;  %v331_v49 = vld [vmem:[%s896_s24] sm:$0xf] }
  0x20   : > { %430 = vmatpush.bf16.msra.mxu0 %v748_v17  ;;  %v712_v48 = vor.u32 %v779_v45, %v709_v46  ;;  %v329_v50 = vld [vmem:[#allocation2] sm:$0xff]  ;;  %v330_v51 = vld [vmem:[#allocation2 + $0x8] sm:$0xff]  ;;  %p769_p7 = scmp.ne.s32.totalorder %s834_s15, 8 }
  0x21   : > { %443 = vmatpush.bf16.msra.mxu1 %v752_v18 }
  0x24   : > { %431 = vmatpush.bf16.msra.mxu0 %v740_v23 }
  0x25   : > { %444 = vmatpush.bf16.msra.mxu1 %v744_v24 }
  0x28   : > { %432 = vmatpush.bf16.msra.mxu0 %v732_v29 }
  0x29   : > { %445 = vmatpush.bf16.msra.mxu1 %v736_v30 }
  0x2c   : > { %433 = vmatpush.bf16.msra.mxu0 %v724_v35 }
  0x2d   : > { %446 = vmatpush.bf16.msra.mxu1 %v728_v36 }
  0x30   : > { %434 = vmatpush.bf16.msra.mxu0 %v716_v41 }
  0x31   : > { %447 = vmatpush.bf16.msra.mxu1 %v720_v42 }
  0x34   : > { %435 = vmatpush.bf16.msra.mxu0 %v708_v47 }
  0x35   : > { %448 = vmatpush.bf16.msra.mxu1 %v712_v48 }
  0x37   : > { %436 = vmatmul.bf16.vlgmr.msra.gmra.mxu0 %v331_v49 }
  0x38   : > { %449 = vmatmul.bf16.vlgmr.msra.gmra.mxu1 %v331_v49 }
  0xb4   : > { %v437_v52 = vpop.f32.mrf.mxu0 }
  0xb5   : > { %v454_v53 = vadd.f32 %v437_v52, %v329_v50  ;;  %v450_v54 = vpop.f32.mrf.mxu1 }
  0xb6   : > { %v455_v55 = vadd.f32 %v450_v54, %v330_v51 }
  0xb7   : > { %456 = vst [vmem:[#allocation2] sm:$0xff] %v454_v53 }
  0xb8   : > { %457 = vst [vmem:[#allocation2 + $0x8] sm:$0xff] %v455_v55 }
  0xb9   : > { %461 = sbr.rel (%p769_p7) target bundleno = 210 (0xd2), region = 36 }
  0xbc   : > { %v439_v56 = vpop.f32.mrf.mxu0 }
  0xbd   : > { %v452_v57 = vpop.f32.mrf.mxu1 }
  0xbe   : > { %v462_v58 = vld [vmem:[#allocation2] sm:$0xff]  ;;  %v484_v12 = vlaneseq  ;;  %vm481_vm0 = vcmask 1040384  }
  0xbf   : > { %v463_v59 = vld [vmem:[#allocation2 + $0x8] sm:$0xff]  ;;  %464 = vst [vmem:[%s961_s2] sm:$0xff] %v462_v58  ;;  %v466_v60 = vrot.slane %v462_v58, 4  ;;  %v489_v61 = vmul.f32 %v462_v58, %v462_v58 }
  0xc0   : > { %v472_v62 = vrot.slane %v463_v59, 4  ;;  %v490_v63 = vmul.f32 %v463_v59, %v463_v59  ;;  %465 = vst [vmem:[%s961_s2 + $0x8] sm:$0xff] %v463_v59  ;;  %vm486_vm1 = vcmp.lt.s32.totalorder %v484_v12, 256 }
  0xc1   : > { %v467_v0 = vadd.f32 %v466_v60, %v462_v58  ;;  %v491_v1 = vrot.slane %v489_v61, 4 }
  0xc2   : > { %v473_v2 = vadd.f32 %v472_v62, %v463_v59  ;;  %v497_v3 = vrot.slane %v490_v63, 4 }
  0xc3   : > { %v468_v4 = vrot.slane %v467_v0, 2  ;;  %v492_v6 = vadd.f32 %v491_v1, %v489_v61 }
  0xc4   : > { %v474_v5 = vrot.slane %v473_v2, 2  ;;  %v498_v7 = vadd.f32 %v497_v3, %v490_v63 }
  0xc5   : > { %v469_v8 = vadd.f32 %v468_v4, %v467_v0  ;;  %v493_v10 = vrot.slane %v492_v6, 2 }
  0xc6   : > { %v475_v9 = vadd.f32 %v474_v5, %v473_v2  ;;  %v499_v11 = vrot.slane %v498_v7, 2 }
  0xc7   : > { %v470_v13 = vrot.slane %v469_v8, 1  ;;  %v494_v15 = vadd.f32 %v493_v10, %v492_v6 }
  0xc8   : > { %v476_v14 = vrot.slane %v475_v9, 1  ;;  %v500_v16 = vadd.f32 %v499_v11, %v498_v7 }
  0xc9   : > { %v471_v17 = vadd.f32 %v470_v13, %v469_v8  ;;  %v495_v19 = vrot.slane %v494_v15, 1 }
  0xca   : > { %v477_v18 = vadd.f32 %v476_v14, %v475_v9  ;;  %v501_v20 = vrot.slane %v500_v16, 1 }
  0xcb   : > { %v496_v22 = vadd.f32 %v495_v19, %v494_v15 }
  0xcc   : > { %v480_v21 = vrot.slane %v477_v18, 7  ;;  %v502_v23 = vadd.f32 %v501_v20, %v500_v16 }
  0xce   : > { %v482_v24 = vsel %vm481_vm0, %v471_v17, %v480_v21  ;;  %v505_v25 = vrot.slane %v502_v23, 7 }
  0xcf   : > { %488 = vst.msk [vmem:[%s962_s3] sm:$0x3] %vm486_vm1, %v482_v24 }
  0xd0   : > { %v506_v26 = vsel %vm481_vm0, %v496_v22, %v505_v25 }
  0xd1   : > { %508 = vst.msk [vmem:[%s963_s4] sm:$0x3] %vm486_vm1, %v506_v26 }
  0xd2 PF: > { %s15_s17 = sadd.s32 1, %s842_s17   ;;  %s964_s15 = smov %s838_s16 }
  0xd3   : > { %p12_p8 = scmp.ge.s32.totalorder %s15_s17, 11   ;;  %s965_s16 = smov %s967_s18 }
  0xd5   :  { %14 = sbr.rel (!%p12_p8) target bundleno = 2 (0x2), region = 93 }

// kernel: _lambda_.41
= control target key start
LH: loop header
LB: loop body
LE: loop exit
PB: predicated region body
PF: predicated region fallthrough
CT: control target
= control target key end

     0   :  { %s96_s0 = inlined_call_operand.vmem [shape: f32[8,256], index: 0, kind: input, shape index: {}, may-alias: {0,4}]   ;;  %s97_s1 = inlined_call_operand.vmem [shape: f32[1,256], index: 1, kind: input, shape index: {}]   ;;  %s98_s2 = inlined_call_operand.vmem [shape: f32[1,256], index: 2, kind: input, shape index: {}]   ;;  %s99_s3 = inlined_call_operand.vmem [shape: f32[8,256], index: 3, kind: input, shape index: {}]   ;;  %s100_s4 = inlined_call_operand.vmem [shape: f32[8,256], index: 4, kind: output, shape index: {}, may-alias: {0,4}]  }
   0x1   :  { %v17_v0 = vld [vmem:[%s96_s0] sm:$0xff]  ;;  %v18_v5 = vld [vmem:[%s96_s0 + $0x8] sm:$0xff] }
   0x2   :  { %v19_v1 = vld [vmem:[%s97_s1] sm:$0x3]  ;;  %v36_v11 = vld [vmem:[%s99_s3 + $0x8] sm:$0xff] }
   0x3   :  { %v27_v2 = vld [vmem:[%s98_s2] sm:$0x3]  ;;  %v21_v3 = vperm.slane %v19_v1, 0  ;;  %v22_v6 = vperm.slane %v19_v1, 1 }
   0x4   :  { %v29_v4 = vperm.slane %v27_v2, 0  ;;  %v30_v7 = vperm.slane %v27_v2, 1  ;;  %v35_v10 = vld [vmem:[%s99_s3] sm:$0xff] }
   0x5   :  { %v25_v8 = vmul.f32 %v21_v3, %v17_v0  ;;  %v26_v9 = vmul.f32 %v22_v6, %v18_v5 }
   0x7   :  { %v33_v12 = vadd.f32 %v29_v4, %v25_v8  ;;  %v34_v13 = vadd.f32 %v30_v7, %v26_v9 }
   0x9   :  { %v37_v14 = vadd.f32 %v35_v10, %v33_v12  ;;  %v38_v15 = vadd.f32 %v36_v11, %v34_v13 }
   0xb   :  { %v39_v16 = vmax.f32 %v37_v14, 0.0  ;;  %v40_v17 = vmax.f32 %v38_v15, 0.0 }
   0xd   :  { %41 = vst [vmem:[%s100_s4] sm:$0xff] %v39_v16 }
   0xe   :  { %42 = vst [vmem:[%s100_s4 + $0x8] sm:$0xff] %v40_v17 }

// kernel: _lambda_.40
= control target key start
LH: loop header
LB: loop body
LE: loop exit
PB: predicated region body
PF: predicated region fallthrough
CT: control target
= control target key end

     0   :  { %s1085_s15 = smov 0   ;;  %s1087_s16 = smov 0   ;;  %s1205_s0 = inlined_call_operand.vmem [shape: bf16[8,2304], index: 0, kind: input, shape index: {}]   ;;  %s1206_s1 = inlined_call_operand.vmem [shape: bf16[2304,256], index: 1, kind: input, shape index: {}]   ;;  %s1207_s2 = inlined_call_operand.vmem [shape: f32[8,256], index: 2, kind: output, shape index: {0}]   ;;  %s1208_s3 = inlined_call_operand.vmem [shape: f32[1,1,256], index: 3, kind: output, shape index: {1}]   ;;  %s1209_s4 = inlined_call_operand.vmem [shape: f32[1,1,256], index: 4, kind: output, shape index: {2}]  }
   0x1   :  { %s1089_s17 = smov 0  }
   0x2 LB: > { %s27_s18 = sadd.s32 1, %s1053_s16  ;;  %p833_p0 = scmp.ge.s32.totalorder %s1057_s17, 1  ;;  %s1057_s17 = sphi %s1089_s17, %s15_s17   ;;  %s1053_s16 = sphi %s1087_s16, %s1211_s16   ;;  %s1049_s15 = sphi %s1085_s15, %s1210_s15  }
   0x3   : > { %p28_p1 = scmp.ge.s32.totalorder %s27_s18, 9  ;;  %p218_p2 = scmp.lt.s32.totalorder %s1057_s17, 10 }
   0x5   : > { %s1213_s18 = smov (%p28_p1, %s27_s18), 0  ;;  %p219_p3 = pnand %p833_p0, %p218_p2 }
   0x6   : > { %s834_s19 = sshll.u32 (!%p219_p3), %s1049_s15, 1  ;;  %s836_s20 = sshll.u32 (!%p219_p3), %s1049_s15, 5 }
   0x7   : > { %222 = sbr.rel (%p219_p3) target bundleno = 221 (0xdd), region = 28  ;;  %p281_p4 = scmp.lt.s32.totalorder (!%p219_p3), %s834_s19, 17 }
   0x8   : > { %p290_p5 = scmp.lt.s32.totalorder (!%p219_p3), %s836_s20, 287  ;;  %p839_p6 = scmp.ne.s32.totalorder (!%p219_p3), %s1049_s15, 0 }
   0xc   : > { %s1215_s19 = smov (!%p281_p4, %s834_s19), 17  ;;  %s1217_s20 = smov (!%p290_p5, %s836_s20), 287 }
   0xd   : > { %s835_s21 = sshll.u32 %s1215_s19, 2  ;;  %s977_s25 = sshll.u32 %s1217_s20, 3 }
   0xe   : > { %s1110_s24 = scalar_lea.vmem %s1205_s0, %s835_s21  ;;  %s1115_s28 = scalar_lea.vmem %s1206_s1, %s977_s25 }
   0xf   : > { %331 = sbr.rel (%p839_p6) target bundleno = 23 (0x17), region = 32 }
  0x14   : > { %v1059_v0 = vmov 0.0  }
  0x15   : > { %332 = vst [vmem:[#allocation2] sm:$0xff] %v1059_v0 }
  0x16   : > { %333 = vst [vmem:[#allocation2 + $0x8] sm:$0xff] %v1059_v0 }
  0x17 PF: > { %v898_v1 = vld [vmem:[%s1115_s28 + $0x70] sm:$0xf]  ;;  %v993_v2 = vld [vmem:[%s1115_s28 + $0x74] sm:$0xf0]  ;;  %v992_v6 = vld [vmem:[%s1115_s28 + $0x74] sm:$0xf] }
  0x18   : > { %v962_v3 = vld [vmem:[%s1115_s28 + $0xf0] sm:$0xf]  ;;  %v899_v4 = vor.u32 %v993_v2, %v898_v1  ;;  %v1009_v5 = vld [vmem:[%s1115_s28 + $0xf4] sm:$0xf0]  ;;  %v900_v7 = vld [vmem:[%s1115_s28 + $0x78] sm:$0xf0] }
  0x19   : > { %v963_v8 = vor.u32 %v1009_v5, %v962_v3  ;;  %v903_v9 = vor.u32 %v992_v6, %v900_v7  ;;  %v1008_v10 = vld [vmem:[%s1115_s28 + $0xf4] sm:$0xf]  ;;  %v964_v11 = vld [vmem:[%s1115_s28 + $0xf8] sm:$0xf0]  ;;  %v890_v12 = vld [vmem:[%s1115_s28 + $0x60] sm:$0xf] }
  0x1a   : > { %536 = vmatpush.bf16.msra.mxu0 %v899_v4  ;;  %v967_v13 = vor.u32 %v1008_v10, %v964_v11  ;;  %v991_v14 = vld [vmem:[%s1115_s28 + $0x64] sm:$0xf0]  ;;  %v954_v15 = vld [vmem:[%s1115_s28 + $0xe0] sm:$0xf]  ;;  %v990_v19 = vld [vmem:[%s1115_s28 + $0x64] sm:$0xf] }
  0x1b   : > { %v1007_v16 = vld [vmem:[%s1115_s28 + $0xe4] sm:$0xf0]  ;;  %549 = vmatpush.bf16.msra.mxu1 %v963_v8  ;;  %562 = vmatpush.bf16.msra.mxu2 %v903_v9  ;;  %v891_v17 = vor.u32 %v991_v14, %v890_v12  ;;  %v892_v20 = vld [vmem:[%s1115_s28 + $0x68] sm:$0xf0]  ;;  %v1006_v21 = vld [vmem:[%s1115_s28 + $0xe4] sm:$0xf] }
  0x1c   : > { %v955_v18 = vor.u32 %v1007_v16, %v954_v15  ;;  %575 = vmatpush.bf16.msra.mxu3 %v967_v13  ;;  %v895_v22 = vor.u32 %v990_v19, %v892_v20  ;;  %v956_v23 = vld [vmem:[%s1115_s28 + $0xe8] sm:$0xf0]  ;;  %v882_v24 = vld [vmem:[%s1115_s28 + $0x50] sm:$0xf]  ;;  %v989_v25 = vld [vmem:[%s1115_s28 + $0x54] sm:$0xf0] }
  0x1d   : > { %v959_v26 = vor.u32 %v1006_v21, %v956_v23  ;;  %v946_v27 = vld [vmem:[%s1115_s28 + $0xd0] sm:$0xf]  ;;  %v1005_v28 = vld [vmem:[%s1115_s28 + $0xd4] sm:$0xf0]  ;;  %v988_v29 = vld [vmem:[%s1115_s28 + $0x54] sm:$0xf]  ;;  %v883_v30 = vor.u32 %v989_v25, %v882_v24 }
  0x1e   : > { %537 = vmatpush.bf16.msra.mxu0 %v891_v17  ;;  %v884_v31 = vld [vmem:[%s1115_s28 + $0x58] sm:$0xf0]  ;;  %v1004_v32 = vld [vmem:[%s1115_s28 + $0xd4] sm:$0xf]  ;;  %v947_v34 = vor.u32 %v1005_v28, %v946_v27  ;;  %v874_v36 = vld [vmem:[%s1115_s28 + $0x40] sm:$0xf] }
  0x1f   : > { %v948_v33 = vld [vmem:[%s1115_s28 + $0xd8] sm:$0xf0]  ;;  %550 = vmatpush.bf16.msra.mxu1 %v955_v18  ;;  %563 = vmatpush.bf16.msra.mxu2 %v895_v22  ;;  %v887_v35 = vor.u32 %v988_v29, %v884_v31  ;;  %v987_v37 = vld [vmem:[%s1115_s28 + $0x44] sm:$0xf0]  ;;  %v938_v38 = vld [vmem:[%s1115_s28 + $0xc0] sm:$0xf] }
  0x20   : > { %576 = vmatpush.bf16.msra.mxu3 %v959_v26  ;;  %v951_v39 = vor.u32 %v1004_v32, %v948_v33  ;;  %v1003_v40 = vld [vmem:[%s1115_s28 + $0xc4] sm:$0xf0]  ;;  %v986_v41 = vld [vmem:[%s1115_s28 + $0x44] sm:$0xf]  ;;  %v876_v42 = vld [vmem:[%s1115_s28 + $0x48] sm:$0xf0]  ;;  %v875_v45 = vor.u32 %v987_v37, %v874_v36 }
  0x21   : > { %v1002_v43 = vld [vmem:[%s1115_s28 + $0xc4] sm:$0xf]  ;;  %v940_v44 = vld [vmem:[%s1115_s28 + $0xc8] sm:$0xf0]  ;;  %v939_v46 = vor.u32 %v1003_v40, %v938_v38  ;;  %v879_v47 = vor.u32 %v986_v41, %v876_v42  ;;  %v866_v48 = vld [vmem:[%s1115_s28 + $0x30] sm:$0xf] }
  0x22   : > { %538 = vmatpush.bf16.msra.mxu0 %v883_v30  ;;  %v985_v49 = vld [vmem:[%s1115_s28 + $0x34] sm:$0xf0]  ;;  %v930_v50 = vld [vmem:[%s1115_s28 + $0xb0] sm:$0xf]  ;;  %v943_v51 = vor.u32 %v1002_v43, %v940_v44  ;;  %v984_v53 = vld [vmem:[%s1115_s28 + $0x34] sm:$0xf] }
  0x23   : > { %551 = vmatpush.bf16.msra.mxu1 %v947_v34  ;;  %564 = vmatpush.bf16.msra.mxu2 %v887_v35  ;;  %v1001_v52 = vld [vmem:[%s1115_s28 + $0xb4] sm:$0xf0]  ;;  %v868_v54 = vld [vmem:[%s1115_s28 + $0x38] sm:$0xf0]  ;;  %v1000_v55 = vld [vmem:[%s1115_s28 + $0xb4] sm:$0xf]  ;;  %v867_v57 = vor.u32 %v985_v49, %v866_v48 }
  0x24   : > { %577 = vmatpush.bf16.msra.mxu3 %v951_v39  ;;  %v932_v56 = vld [vmem:[%s1115_s28 + $0xb8] sm:$0xf0]  ;;  %v931_v58 = vor.u32 %v1001_v52, %v930_v50  ;;  %v871_v59 = vor.u32 %v984_v53, %v868_v54  ;;  %v858_v60 = vld [vmem:[%s1115_s28 + $0x20] sm:$0xf]  ;;  %v983_v61 = vld [vmem:[%s1115_s28 + $0x24] sm:$0xf0] }
  0x25   : > { %v922_v62 = vld [vmem:[%s1115_s28 + $0xa0] sm:$0xf]  ;;  %v935_v63 = vor.u32 %v1000_v55, %v932_v56  ;;  %v999_v0 = vld [vmem:[%s1115_s28 + $0xa4] sm:$0xf0]  ;;  %v982_v1 = vld [vmem:[%s1115_s28 + $0x24] sm:$0xf]  ;;  %v859_v5 = vor.u32 %v983_v61, %v858_v60 }
  0x26   : > { %539 = vmatpush.bf16.msra.mxu0 %v875_v45  ;;  %v860_v2 = vld [vmem:[%s1115_s28 + $0x28] sm:$0xf0]  ;;  %v998_v3 = vld [vmem:[%s1115_s28 + $0xa4] sm:$0xf]  ;;  %v923_v6 = vor.u32 %v999_v0, %v922_v62  ;;  %v850_v8 = vld [vmem:[%s1115_s28 + $0x10] sm:$0xf] }
  0x27   : > { %552 = vmatpush.bf16.msra.mxu1 %v939_v46  ;;  %565 = vmatpush.bf16.msra.mxu2 %v879_v47  ;;  %v924_v4 = vld [vmem:[%s1115_s28 + $0xa8] sm:$0xf0]  ;;  %v863_v7 = vor.u32 %v982_v1, %v860_v2  ;;  %v981_v9 = vld [vmem:[%s1115_s28 + $0x14] sm:$0xf0]  ;;  %v914_v10 = vld [vmem:[%s1115_s28 + $0x90] sm:$0xf] }
  0x28   : > { %578 = vmatpush.bf16.msra.mxu3 %v943_v51  ;;  %v927_v11 = vor.u32 %v998_v3, %v924_v4  ;;  %v997_v12 = vld [vmem:[%s1115_s28 + $0x94] sm:$0xf0]  ;;  %v980_v13 = vld [vmem:[%s1115_s28 + $0x14] sm:$0xf]  ;;  %v852_v14 = vld [vmem:[%s1115_s28 + $0x18] sm:$0xf0]  ;;  %v851_v17 = vor.u32 %v981_v9, %v850_v8 }
  0x29   : > { %v996_v15 = vld [vmem:[%s1115_s28 + $0x94] sm:$0xf]  ;;  %v916_v16 = vld [vmem:[%s1115_s28 + $0x98] sm:$0xf0]  ;;  %v336_v18 = vld [vmem:[%s1110_s24] sm:$0xff]  ;;  %v915_v19 = vor.u32 %v997_v12, %v914_v10  ;;  %v855_v20 = vor.u32 %v980_v13, %v852_v14  ;;  %p968_p7 = scmp.ne.s32.totalorder %s1049_s15, 8 }
  0x2a   : > { %540 = vmatpush.bf16.msra.mxu0 %v867_v57  ;;  %v842_v21 = vld [vmem:[%s1115_s28] sm:$0xf]  ;;  %v979_v22 = vld [vmem:[%s1115_s28 + $0x4] sm:$0xf0]  ;;  %v919_v24 = vor.u32 %v996_v15, %v916_v16  ;;  %v978_v26 = vld [vmem:[%s1115_s28 + $0x4] sm:$0xf]  ;;  %v370_v30 = vunpack.c.l.b16 %v336_v18  ;;  %v371_v32 = vunpack.c.h.b16 %v336_v18 }
  0x2b   : > { %553 = vmatpush.bf16.msra.mxu1 %v931_v58  ;;  %566 = vmatpush.bf16.msra.mxu2 %v871_v59  ;;  %v906_v23 = vld [vmem:[%s1115_s28 + $0x80] sm:$0xf]  ;;  %v995_v25 = vld [vmem:[%s1115_s28 + $0x84] sm:$0xf0]  ;;  %v844_v27 = vld [vmem:[%s1115_s28 + $0x8] sm:$0xf0]  ;;  %v843_v31 = vor.u32 %v979_v22, %v842_v21 }
  0x2c   : > { %579 = vmatpush.bf16.msra.mxu3 %v935_v63  ;;  %v994_v28 = vld [vmem:[%s1115_s28 + $0x84] sm:$0xf]  ;;  %v908_v29 = vld [vmem:[%s1115_s28 + $0x88] sm:$0xf0]  ;;  %v907_v33 = vor.u32 %v995_v25, %v906_v23  ;;  %v847_v34 = vor.u32 %v978_v26, %v844_v27  ;;  %v372_v36 = vpack.c.b16 %v370_v30, %v370_v30  ;;  %v373_v37 = vpack.c.b16 %v371_v32, %v371_v32 }
  0x2d   : > { %v911_v35 = vor.u32 %v994_v28, %v908_v29  ;;  %v334_v39 = vld [vmem:[#allocation2] sm:$0xff]  ;;  %v335_v44 = vld [vmem:[#allocation2 + $0x8] sm:$0xff] }
  0x2e   : > { %541 = vmatpush.bf16.msra.mxu0 %v859_v5 }
  0x2f   : > { %554 = vmatpush.bf16.msra.mxu1 %v923_v6  ;;  %567 = vmatpush.bf16.msra.mxu2 %v863_v7 }
  0x30   : > { %580 = vmatpush.bf16.msra.mxu3 %v927_v11 }
  0x32   : > { %542 = vmatpush.bf16.msra.mxu0 %v851_v17 }
  0x33   : > { %555 = vmatpush.bf16.msra.mxu1 %v915_v19  ;;  %568 = vmatpush.bf16.msra.mxu2 %v855_v20 }
  0x34   : > { %581 = vmatpush.bf16.msra.mxu3 %v919_v24 }
  0x36   : > { %543 = vmatpush.bf16.msra.mxu0 %v843_v31 }
  0x37   : > { %556 = vmatpush.bf16.msra.mxu1 %v907_v33  ;;  %569 = vmatpush.bf16.msra.mxu2 %v847_v34 }
  0x38   : > { %582 = vmatpush.bf16.msra.mxu3 %v911_v35 }
  0x39   : > { %544 = vmatmul.bf16.vlgmr.msra.gmra.mxu0 %v372_v36 }
  0x3a   : > { %557 = vmatmul.bf16.vlgmr.msra.gmra.mxu1 %v373_v37  ;;  %570 = vmatmul.bf16.vlgmr.msra.gmra.mxu2 %v372_v36 }
  0x3b   : > { %583 = vmatmul.bf16.vlgmr.msra.gmra.mxu3 %v373_v37 }
  0xb6   : > { %v545_v38 = vpop.f32.mrf.mxu0 }
  0xb7   : > { %v558_v40 = vpop.f32.mrf.mxu1 }
  0xb8   : > { %v559_v41 = vadd.f32 %v558_v40, %v545_v38 }
  0xba   : > { %v588_v42 = vadd.f32 %v559_v41, %v334_v39 }
  0xbc   : > { %590 = vst [vmem:[#allocation2] sm:$0xff] %v588_v42 }
  0xbd   : > { %v571_v43 = vpop.f32.mrf.mxu2 }
  0xbe   : > { %v584_v45 = vpop.f32.mrf.mxu3  ;;  %v547_v46 = vpop.f32.mrf.mxu0 }
  0xbf   : > { %v585_v47 = vadd.f32 %v584_v45, %v571_v43  ;;  %v560_v48 = vpop.f32.mrf.mxu1 }
  0xc1   : > { %v589_v49 = vadd.f32 %v585_v47, %v335_v44 }
  0xc2   : > { %595 = sbr.rel (%p968_p7) target bundleno = 221 (0xdd), region = 36 }
  0xc3   : > { %591 = vst [vmem:[#allocation2 + $0x8] sm:$0xff] %v589_v49 }
  0xc5   : > { %v573_v50 = vpop.f32.mrf.mxu2 }
  0xc6   : > { %v586_v51 = vpop.f32.mrf.mxu3 }
  0xc7   : > { %v596_v52 = vld [vmem:[#allocation2] sm:$0xff]  ;;  %v618_v6 = vlaneseq  ;;  %vm615_vm0 = vcmask 1040384  }
  0xc8   : > { %598 = vst [vmem:[%s1207_s2] sm:$0xff] %v596_v52  ;;  %v600_v54 = vrot.slane %v596_v52, 4  ;;  %v623_v55 = vmul.f32 %v596_v52, %v596_v52 }
  0xc9   : > { %vm620_vm1 = vcmp.lt.s32.totalorder %v618_v6, 256 }
  0xca   : > { %v597_v53 = vld [vmem:[#allocation2 + $0x8] sm:$0xff]  ;;  %v601_v58 = vadd.f32 %v600_v54, %v596_v52  ;;  %v625_v59 = vrot.slane %v623_v55, 4 }
  0xcb   : > { %v606_v56 = vrot.slane %v597_v53, 4  ;;  %v624_v57 = vmul.f32 %v597_v53, %v597_v53  ;;  %599 = vst [vmem:[%s1207_s2 + $0x8] sm:$0xff] %v597_v53 }
  0xcc   : > { %v602_v62 = vrot.slane %v601_v58, 2  ;;  %v626_v0 = vadd.f32 %v625_v59, %v623_v55 }
  0xcd   : > { %v607_v60 = vadd.f32 %v606_v56, %v597_v53  ;;  %v631_v61 = vrot.slane %v624_v57, 4 }
  0xce   : > { %v603_v2 = vadd.f32 %v602_v62, %v601_v58  ;;  %v627_v4 = vrot.slane %v626_v0, 2 }
  0xcf   : > { %v608_v63 = vrot.slane %v607_v60, 2  ;;  %v632_v1 = vadd.f32 %v631_v61, %v624_v57 }
  0xd0   : > { %v604_v7 = vrot.slane %v603_v2, 1  ;;  %v628_v9 = vadd.f32 %v627_v4, %v626_v0 }
  0xd1   : > { %v609_v3 = vadd.f32 %v608_v63, %v607_v60  ;;  %v633_v5 = vrot.slane %v632_v1, 2 }
  0xd2   : > { %v605_v11 = vadd.f32 %v604_v7, %v603_v2  ;;  %v629_v13 = vrot.slane %v628_v9, 1 }
  0xd3   : > { %v610_v8 = vrot.slane %v609_v3, 1  ;;  %v634_v10 = vadd.f32 %v633_v5, %v632_v1 }
  0xd4   : > { %v630_v16 = vadd.f32 %v629_v13, %v628_v9 }
  0xd5   : > { %v611_v12 = vadd.f32 %v610_v8, %v609_v3  ;;  %v635_v14 = vrot.slane %v634_v10, 1 }
  0xd7   : > { %v614_v15 = vrot.slane %v611_v12, 7  ;;  %v636_v17 = vadd.f32 %v635_v14, %v634_v10 }
  0xd9   : > { %v616_v18 = vsel %vm615_vm0, %v605_v11, %v614_v15  ;;  %v639_v19 = vrot.slane %v636_v17, 7 }
  0xda   : > { %622 = vst.msk [vmem:[%s1208_s3] sm:$0x3] %vm620_vm1, %v616_v18 }
  0xdb   : > { %v640_v20 = vsel %vm615_vm0, %v630_v16, %v639_v19 }
  0xdc   : > { %642 = vst.msk [vmem:[%s1209_s4] sm:$0x3] %vm620_vm1, %v640_v20 }
  0xdd PF: > { %s15_s17 = sadd.s32 1, %s1057_s17   ;;  %s1210_s15 = smov %s1053_s16 }
  0xde   : > { %p12_p8 = scmp.ge.s32.totalorder %s15_s17, 11   ;;  %s1211_s16 = smov %s1213_s18 }
  0xe0   :  { %14 = sbr.rel (!%p12_p8) target bundleno = 2 (0x2), region = 93 }

// kernel: _lambda_.44
= control target key start
LH: loop header
LB: loop body
LE: loop exit
PB: predicated region body
PF: predicated region fallthrough
CT: control target
= control target key end

     0   :  { %s1272_s15 = smov 0   ;;  %s1274_s16 = smov 0   ;;  %s1485_s0 = inlined_call_operand.vmem [shape: bf16[8,256], index: 0, kind: input, shape index: {}]   ;;  %s1486_s1 = inlined_call_operand.vmem [shape: bf16[256,512], index: 1, kind: input, shape index: {}]   ;;  %s1487_s2 = inlined_call_operand.vmem [shape: f32[8,512], index: 2, kind: output, shape index: {0}]   ;;  %s1488_s3 = inlined_call_operand.vmem [shape: f32[1,1,512], index: 3, kind: output, shape index: {1}]   ;;  %s1489_s4 = inlined_call_operand.vmem [shape: f32[1,1,512], index: 4, kind: output, shape index: {2}]  }
   0x1   :  { %s1276_s17 = smov 0   ;;  %s1278_s18 = smov 0  }
   0x2   :  { %s1280_s19 = smov 0  }
   0x3 LB: > { %s30_s20 = sadd.s32 1, %s1241_s18  ;;  %p78_p1 = scmp.ne.s32.totalorder %s1233_s16, %s1229_s15  ;;  %s1245_s19 = sphi %s1280_s19, %s15_s19   ;;  %s1241_s18 = sphi %s1278_s18, %s1493_s18   ;;  %s1237_s17 = sphi %s1276_s17, %s1492_s17   ;;  %s1233_s16 = sphi %s1274_s16, %s1491_s16   ;;  %s1229_s15 = sphi %s1272_s15, %s1490_s15  }
   0x4   : > { %p32_p0 = scmp.ge.s32.totalorder %s30_s20, 2  ;;  %p79_p2 = scmp.eq.s32.totalorder %s1245_s19, 0 }
   0x5   : > { %s71_s22 = sadd.s32 1, %s1233_s16  ;;  %p994_p5 = scmp.ge.s32.totalorder %s1245_s19, 2 }
   0x6   : > { %s1495_s20 = smov (%p32_p0, %s30_s20), 0  ;;  %p80_p3 = por %p79_p2, %p78_p1 }
   0x7   : > { %s67_s21 = ssub.s32 %s1241_s18, %s1495_s20  ;;  %201 = sbr.rel (%p994_p5) target bundleno = 48 (0x30), region = 20 }
   0x8   : > { %p69_p4 = scmp.eq.s32.totalorder %s67_s21, 0 }
   0xa   : > { %s1307_s23 = scalar_select %p69_p4, %s1233_s16, %s71_s22  }
   0xc   : > { %204 = sbr.rel (!%p80_p3) target bundleno = 48 (0x30), region = 24  ;;  %s206_s24 = sand.u32 (%p80_p3), 1, %s1233_s16  }
   0xd   : > { %s1134_s25 = sshll.u32 (%p80_p3), %s1241_s18, 3  ;;  %s995_s26 = sshll.u32 (%p80_p3), %s206_s24, 8 }
   0xe   : > { %s1315_s29 = scalar_lea.vmem (%p80_p3), %s1486_s1, %s1134_s25  ;;  %s1320_s30 = scalar_lea.vmem (%p80_p3), [#allocation3], %s995_s26 }
   0xf   : > { %v305_v0 = vld [vmem:[%s1315_s29] sm:$0xff] (%p80_p3)  ;;  %v307_v1 = vld [vmem:[%s1315_s29 + $0x10] sm:$0xff] (%p80_p3) }
  0x10   : > { %v309_v2 = vld [vmem:[%s1315_s29 + $0x20] sm:$0xff] (%p80_p3)  ;;  %306 = vst [vmem:[%s1320_s30] sm:$0xff] (%p80_p3), %v305_v0  ;;  %v311_v3 = vld [vmem:[%s1315_s29 + $0x30] sm:$0xff] (%p80_p3) }
  0x11   : > { %308 = vst [vmem:[%s1320_s30 + $0x8] sm:$0xff] %v307_v1  ;;  %v313_v4 = vld [vmem:[%s1315_s29 + $0x40] sm:$0xff]  ;;  %v315_v5 = vld [vmem:[%s1315_s29 + $0x50] sm:$0xff] }
  0x12   : > { %310 = vst [vmem:[%s1320_s30 + $0x10] sm:$0xff] %v309_v2  ;;  %v317_v6 = vld [vmem:[%s1315_s29 + $0x60] sm:$0xff]  ;;  %v319_v7 = vld [vmem:[%s1315_s29 + $0x70] sm:$0xff] }
  0x13   : > { %312 = vst [vmem:[%s1320_s30 + $0x18] sm:$0xff] %v311_v3  ;;  %v321_v8 = vld [vmem:[%s1315_s29 + $0x80] sm:$0xff]  ;;  %v323_v9 = vld [vmem:[%s1315_s29 + $0x90] sm:$0xff] }
  0x14   : > { %314 = vst [vmem:[%s1320_s30 + $0x20] sm:$0xff] %v313_v4  ;;  %v325_v10 = vld [vmem:[%s1315_s29 + $0xa0] sm:$0xff]  ;;  %v327_v11 = vld [vmem:[%s1315_s29 + $0xb0] sm:$0xff] }
  0x15   : > { %316 = vst [vmem:[%s1320_s30 + $0x28] sm:$0xff] %v315_v5  ;;  %v329_v12 = vld [vmem:[%s1315_s29 + $0xc0] sm:$0xff]  ;;  %v331_v13 = vld [vmem:[%s1315_s29 + $0xd0] sm:$0xff] }
  0x16   : > { %318 = vst [vmem:[%s1320_s30 + $0x30] sm:$0xff] %v317_v6  ;;  %v333_v14 = vld [vmem:[%s1315_s29 + $0xe0] sm:$0xff]  ;;  %v335_v15 = vld [vmem:[%s1315_s29 + $0xf0] sm:$0xff] }
  0x17   : > { %320 = vst [vmem:[%s1320_s30 + $0x38] sm:$0xff] %v319_v7  ;;  %v337_v16 = vld [vmem:[%s1315_s29 + $0x100] sm:$0xff]  ;;  %v339_v17 = vld [vmem:[%s1315_s29 + $0x110] sm:$0xff] }
  0x18   : > { %322 = vst [vmem:[%s1320_s30 + $0x40] sm:$0xff] %v321_v8  ;;  %v341_v18 = vld [vmem:[%s1315_s29 + $0x120] sm:$0xff]  ;;  %v343_v19 = vld [vmem:[%s1315_s29 + $0x130] sm:$0xff] }
  0x19   : > { %324 = vst [vmem:[%s1320_s30 + $0x48] sm:$0xff] %v323_v9  ;;  %v345_v20 = vld [vmem:[%s1315_s29 + $0x140] sm:$0xff]  ;;  %v347_v21 = vld [vmem:[%s1315_s29 + $0x150] sm:$0xff] }
  0x1a   : > { %326 = vst [vmem:[%s1320_s30 + $0x50] sm:$0xff] %v325_v10  ;;  %v349_v22 = vld [vmem:[%s1315_s29 + $0x160] sm:$0xff]  ;;  %v351_v23 = vld [vmem:[%s1315_s29 + $0x170] sm:$0xff] }
  0x1b   : > { %328 = vst [vmem:[%s1320_s30 + $0x58] sm:$0xff] %v327_v11  ;;  %v353_v24 = vld [vmem:[%s1315_s29 + $0x180] sm:$0xff]  ;;  %v355_v25 = vld [vmem:[%s1315_s29 + $0x190] sm:$0xff] }
  0x1c   : > { %330 = vst [vmem:[%s1320_s30 + $0x60] sm:$0xff] %v329_v12  ;;  %v357_v26 = vld [vmem:[%s1315_s29 + $0x1a0] sm:$0xff]  ;;  %v359_v27 = vld [vmem:[%s1315_s29 + $0x1b0] sm:$0xff] }
  0x1d   : > { %332 = vst [vmem:[%s1320_s30 + $0x68] sm:$0xff] %v331_v13  ;;  %v361_v28 = vld [vmem:[%s1315_s29 + $0x1c0] sm:$0xff]  ;;  %v363_v29 = vld [vmem:[%s1315_s29 + $0x1d0] sm:$0xff] }
  0x1e   : > { %334 = vst [vmem:[%s1320_s30 + $0x70] sm:$0xff] %v333_v14  ;;  %v365_v30 = vld [vmem:[%s1315_s29 + $0x1e0] sm:$0xff]  ;;  %v367_v31 = vld [vmem:[%s1315_s29 + $0x1f0] sm:$0xff] }
  0x1f   : > { %336 = vst [vmem:[%s1320_s30 + $0x78] sm:$0xff] %v335_v15 }
  0x20   : > { %338 = vst [vmem:[%s1320_s30 + $0x80] sm:$0xff] %v337_v16 }
  0x21   : > { %340 = vst [vmem:[%s1320_s30 + $0x88] sm:$0xff] %v339_v17 }
  0x22   : > { %342 = vst [vmem:[%s1320_s30 + $0x90] sm:$0xff] %v341_v18 }
  0x23   : > { %344 = vst [vmem:[%s1320_s30 + $0x98] sm:$0xff] %v343_v19 }
  0x24   : > { %346 = vst [vmem:[%s1320_s30 + $0xa0] sm:$0xff] %v345_v20 }
  0x25   : > { %348 = vst [vmem:[%s1320_s30 + $0xa8] sm:$0xff] %v347_v21 }
  0x26   : > { %350 = vst [vmem:[%s1320_s30 + $0xb0] sm:$0xff] %v349_v22 }
  0x27   : > { %352 = vst [vmem:[%s1320_s30 + $0xb8] sm:$0xff] %v351_v23 }
  0x28   : > { %354 = vst [vmem:[%s1320_s30 + $0xc0] sm:$0xff] %v353_v24 }
  0x29   : > { %356 = vst [vmem:[%s1320_s30 + $0xc8] sm:$0xff] %v355_v25 }
  0x2a   : > { %358 = vst [vmem:[%s1320_s30 + $0xd0] sm:$0xff] %v357_v26 }
  0x2b   : > { %360 = vst [vmem:[%s1320_s30 + $0xd8] sm:$0xff] %v359_v27 }
  0x2c   : > { %362 = vst [vmem:[%s1320_s30 + $0xe0] sm:$0xff] %v361_v28 }
  0x2d   : > { %364 = vst [vmem:[%s1320_s30 + $0xe8] sm:$0xff] %v363_v29 }
  0x2e   : > { %366 = vst [vmem:[%s1320_s30 + $0xf0] sm:$0xff] %v365_v30 }
  0x2f   : > { %368 = vst [vmem:[%s1320_s30 + $0xf8] sm:$0xff] %v367_v31 }
  0x30 PF: > { %p998_p6 = scmp.ge.s32.totalorder %s1245_s19, 1  ;;  %p373_p7 = scmp.lt.s32.totalorder %s1245_s19, 3 }
  0x32   : > { %p374_p8 = pnand %p998_p6, %p373_p7 }
  0x33   : > { %s380_s5 = sand.u32 (!%p374_p8), 1, %s1229_s15   ;;  %s1000_s10 = sshll.u32 (!%p374_p8), %s1237_s17, 1 }
  0x34   : > { %377 = sbr.rel (%p374_p8) target bundleno = 245 (0xf5), region = 62  ;;  %s999_s6 = sshll.u32 (!%p374_p8), %s380_s5, 8 }
  0x35   : > { %s1386_s7 = scalar_lea.vmem (!%p374_p8), [#allocation3], %s999_s6  ;;  %p449_p9 = scmp.lt.s32.totalorder (!%p374_p8), %s1000_s10, 3 }
  0x39   : > { %v1062_v32 = vld [vmem:[%s1386_s7 + $0x70] sm:$0xf]  ;;  %v1150_v33 = vld [vmem:[%s1386_s7 + $0x74] sm:$0xf0]  ;;  %v1149_v37 = vld [vmem:[%s1386_s7 + $0x74] sm:$0xf] }
  0x3a   : > { %v1126_v34 = vld [vmem:[%s1386_s7 + $0xf0] sm:$0xf]  ;;  %v1063_v35 = vor.u32 %v1150_v33, %v1062_v32  ;;  %v1166_v36 = vld [vmem:[%s1386_s7 + $0xf4] sm:$0xf0]  ;;  %v1064_v38 = vld [vmem:[%s1386_s7 + $0x78] sm:$0xf0] }
  0x3b   : > { %v1127_v39 = vor.u32 %v1166_v36, %v1126_v34  ;;  %v1067_v40 = vor.u32 %v1149_v37, %v1064_v38  ;;  %v1165_v41 = vld [vmem:[%s1386_s7 + $0xf4] sm:$0xf]  ;;  %v1128_v42 = vld [vmem:[%s1386_s7 + $0xf8] sm:$0xf0]  ;;  %v1054_v43 = vld [vmem:[%s1386_s7 + $0x60] sm:$0xf] }
  0x3c   : > { %682 = vmatpush.bf16.msra.mxu0 %v1063_v35  ;;  %v1131_v44 = vor.u32 %v1165_v41, %v1128_v42  ;;  %v1148_v45 = vld [vmem:[%s1386_s7 + $0x64] sm:$0xf0]  ;;  %v1118_v46 = vld [vmem:[%s1386_s7 + $0xe0] sm:$0xf]  ;;  %v1147_v50 = vld [vmem:[%s1386_s7 + $0x64] sm:$0xf] }
  0x3d   : > { %v1164_v47 = vld [vmem:[%s1386_s7 + $0xe4] sm:$0xf0]  ;;  %695 = vmatpush.bf16.msra.mxu1 %v1127_v39  ;;  %708 = vmatpush.bf16.msra.mxu2 %v1067_v40  ;;  %v1055_v48 = vor.u32 %v1148_v45, %v1054_v43  ;;  %v1056_v51 = vld [vmem:[%s1386_s7 + $0x68] sm:$0xf0]  ;;  %v1163_v52 = vld [vmem:[%s1386_s7 + $0xe4] sm:$0xf] }
  0x3e   : > { %v1119_v49 = vor.u32 %v1164_v47, %v1118_v46  ;;  %721 = vmatpush.bf16.msra.mxu3 %v1131_v44  ;;  %v1059_v53 = vor.u32 %v1147_v50, %v1056_v51  ;;  %v1120_v54 = vld [vmem:[%s1386_s7 + $0xe8] sm:$0xf0]  ;;  %v1046_v55 = vld [vmem:[%s1386_s7 + $0x50] sm:$0xf]  ;;  %v1146_v56 = vld [vmem:[%s1386_s7 + $0x54] sm:$0xf0] }
  0x3f   : > { %v1123_v57 = vor.u32 %v1163_v52, %v1120_v54  ;;  %v1110_v58 = vld [vmem:[%s1386_s7 + $0xd0] sm:$0xf]  ;;  %v1162_v59 = vld [vmem:[%s1386_s7 + $0xd4] sm:$0xf0]  ;;  %v1145_v60 = vld [vmem:[%s1386_s7 + $0x54] sm:$0xf]  ;;  %v1047_v61 = vor.u32 %v1146_v56, %v1046_v55 }
  0x40   : > { %683 = vmatpush.bf16.msra.mxu0 %v1055_v48  ;;  %v1048_v62 = vld [vmem:[%s1386_s7 + $0x58] sm:$0xf0]  ;;  %v1161_v63 = vld [vmem:[%s1386_s7 + $0xd4] sm:$0xf]  ;;  %v1111_v1 = vor.u32 %v1162_v59, %v1110_v58  ;;  %v1038_v3 = vld [vmem:[%s1386_s7 + $0x40] sm:$0xf] }
  0x41   : > { %v1112_v0 = vld [vmem:[%s1386_s7 + $0xd8] sm:$0xf0]  ;;  %696 = vmatpush.bf16.msra.mxu1 %v1119_v49  ;;  %709 = vmatpush.bf16.msra.mxu2 %v1059_v53  ;;  %v1051_v2 = vor.u32 %v1145_v60, %v1048_v62  ;;  %v1144_v4 = vld [vmem:[%s1386_s7 + $0x44] sm:$0xf0]  ;;  %v1102_v5 = vld [vmem:[%s1386_s7 + $0xc0] sm:$0xf] }
  0x42   : > { %722 = vmatpush.bf16.msra.mxu3 %v1123_v57  ;;  %v1115_v6 = vor.u32 %v1161_v63, %v1112_v0  ;;  %v1160_v7 = vld [vmem:[%s1386_s7 + $0xc4] sm:$0xf0]  ;;  %v1143_v8 = vld [vmem:[%s1386_s7 + $0x44] sm:$0xf]  ;;  %v1040_v9 = vld [vmem:[%s1386_s7 + $0x48] sm:$0xf0]  ;;  %v1039_v12 = vor.u32 %v1144_v4, %v1038_v3 }
  0x43   : > { %v1159_v10 = vld [vmem:[%s1386_s7 + $0xc4] sm:$0xf]  ;;  %v1104_v11 = vld [vmem:[%s1386_s7 + $0xc8] sm:$0xf0]  ;;  %v1103_v13 = vor.u32 %v1160_v7, %v1102_v5  ;;  %v1043_v14 = vor.u32 %v1143_v8, %v1040_v9  ;;  %v1030_v15 = vld [vmem:[%s1386_s7 + $0x30] sm:$0xf] }
  0x44   : > { %684 = vmatpush.bf16.msra.mxu0 %v1047_v61  ;;  %v1142_v16 = vld [vmem:[%s1386_s7 + $0x34] sm:$0xf0]  ;;  %v1094_v17 = vld [vmem:[%s1386_s7 + $0xb0] sm:$0xf]  ;;  %v1107_v18 = vor.u32 %v1159_v10, %v1104_v11  ;;  %v1141_v20 = vld [vmem:[%s1386_s7 + $0x34] sm:$0xf] }
  0x45   : > { %697 = vmatpush.bf16.msra.mxu1 %v1111_v1  ;;  %710 = vmatpush.bf16.msra.mxu2 %v1051_v2  ;;  %v1158_v19 = vld [vmem:[%s1386_s7 + $0xb4] sm:$0xf0]  ;;  %v1032_v21 = vld [vmem:[%s1386_s7 + $0x38] sm:$0xf0]  ;;  %v1157_v22 = vld [vmem:[%s1386_s7 + $0xb4] sm:$0xf]  ;;  %v1031_v24 = vor.u32 %v1142_v16, %v1030_v15 }
  0x46   : > { %723 = vmatpush.bf16.msra.mxu3 %v1115_v6  ;;  %v1096_v23 = vld [vmem:[%s1386_s7 + $0xb8] sm:$0xf0]  ;;  %v1095_v25 = vor.u32 %v1158_v19, %v1094_v17  ;;  %v1035_v26 = vor.u32 %v1141_v20, %v1032_v21  ;;  %v1022_v27 = vld [vmem:[%s1386_s7 + $0x20] sm:$0xf]  ;;  %v1140_v28 = vld [vmem:[%s1386_s7 + $0x24] sm:$0xf0] }
  0x47   : > { %v1086_v29 = vld [vmem:[%s1386_s7 + $0xa0] sm:$0xf]  ;;  %v1099_v30 = vor.u32 %v1157_v22, %v1096_v23  ;;  %v1156_v31 = vld [vmem:[%s1386_s7 + $0xa4] sm:$0xf0]  ;;  %v1139_v32 = vld [vmem:[%s1386_s7 + $0x24] sm:$0xf]  ;;  %v1023_v36 = vor.u32 %v1140_v28, %v1022_v27 }
  0x48   : > { %685 = vmatpush.bf16.msra.mxu0 %v1039_v12  ;;  %v1024_v33 = vld [vmem:[%s1386_s7 + $0x28] sm:$0xf0]  ;;  %v1155_v34 = vld [vmem:[%s1386_s7 + $0xa4] sm:$0xf]  ;;  %v1087_v37 = vor.u32 %v1156_v31, %v1086_v29  ;;  %v1014_v39 = vld [vmem:[%s1386_s7 + $0x10] sm:$0xf] }
  0x49   : > { %698 = vmatpush.bf16.msra.mxu1 %v1103_v13  ;;  %711 = vmatpush.bf16.msra.mxu2 %v1043_v14  ;;  %v1088_v35 = vld [vmem:[%s1386_s7 + $0xa8] sm:$0xf0]  ;;  %v1027_v38 = vor.u32 %v1139_v32, %v1024_v33  ;;  %v1138_v40 = vld [vmem:[%s1386_s7 + $0x14] sm:$0xf0]  ;;  %v1078_v41 = vld [vmem:[%s1386_s7 + $0x90] sm:$0xf] }
  0x4a   : > { %724 = vmatpush.bf16.msra.mxu3 %v1107_v18  ;;  %v1091_v42 = vor.u32 %v1155_v34, %v1088_v35  ;;  %v1154_v43 = vld [vmem:[%s1386_s7 + $0x94] sm:$0xf0]  ;;  %v1137_v44 = vld [vmem:[%s1386_s7 + $0x14] sm:$0xf]  ;;  %v1016_v45 = vld [vmem:[%s1386_s7 + $0x18] sm:$0xf0]  ;;  %v1015_v48 = vor.u32 %v1138_v40, %v1014_v39  ;;  %v763_v34 = vlaneseq }
  0x4b   : > { %v1153_v46 = vld [vmem:[%s1386_s7 + $0x94] sm:$0xf]  ;;  %v1080_v47 = vld [vmem:[%s1386_s7 + $0x98] sm:$0xf0]  ;;  %v482_v49 = vld [vmem:[%s1485_s0] sm:$0xff]  ;;  %v1079_v50 = vor.u32 %v1154_v43, %v1078_v41  ;;  %v1019_v51 = vor.u32 %v1137_v44, %v1016_v45  ;;  %s1497_s10 = smov (!%p449_p9, %s1000_s10), 3 }
  0x4c   : > { %686 = vmatpush.bf16.msra.mxu0 %v1031_v24  ;;  %v1006_v52 = vld [vmem:[%s1386_s7] sm:$0xf]  ;;  %v1136_v53 = vld [vmem:[%s1386_s7 + $0x4] sm:$0xf0]  ;;  %v1083_v55 = vor.u32 %v1153_v46, %v1080_v47  ;;  %v1135_v57 = vld [vmem:[%s1386_s7 + $0x4] sm:$0xf]  ;;  %v516_v61 = vunpack.c.l.b16 %v482_v49  ;;  %v517_v63 = vunpack.c.h.b16 %v482_v49  ;;  %s463_s21 = scalar_lea.vmem %s1488_s3, %s1497_s10  ;;  %s472_s25 = scalar_lea.vmem %s1489_s4, %s1497_s10 }
  0x4d   : > { %699 = vmatpush.bf16.msra.mxu1 %v1095_v25  ;;  %712 = vmatpush.bf16.msra.mxu2 %v1035_v26  ;;  %v1070_v54 = vld [vmem:[%s1386_s7 + $0x80] sm:$0xf]  ;;  %v1152_v56 = vld [vmem:[%s1386_s7 + $0x84] sm:$0xf0]  ;;  %v1008_v58 = vld [vmem:[%s1386_s7 + $0x8] sm:$0xf0]  ;;  %v1007_v62 = vor.u32 %v1136_v53, %v1006_v52 }
  0x4e   : > { %725 = vmatpush.bf16.msra.mxu3 %v1099_v30  ;;  %v1151_v59 = vld [vmem:[%s1386_s7 + $0x84] sm:$0xf]  ;;  %v1072_v60 = vld [vmem:[%s1386_s7 + $0x88] sm:$0xf0]  ;;  %v1071_v0 = vor.u32 %v1152_v56, %v1070_v54  ;;  %v1011_v1 = vor.u32 %v1135_v57, %v1008_v58  ;;  %v518_v3 = vpack.c.b16 %v516_v61, %v516_v61  ;;  %v519_v4 = vpack.c.b16 %v517_v63, %v517_v63  ;;  %s1001_s11 = sshll.u32 %s1497_s10, 3 }
  0x4f   : > { %v1075_v2 = vor.u32 %v1151_v59, %v1072_v60  ;;  %s454_s14 = scalar_lea.vmem %s1487_s2, %s1001_s11  ;;  %vm760_vm0 = vcmask 1040384   ;;  %vm765_vm1 = vcmp.lt.s32.totalorder %v763_v34, 256 }
  0x50   : > { %687 = vmatpush.bf16.msra.mxu0 %v1023_v36 }
  0x51   : > { %700 = vmatpush.bf16.msra.mxu1 %v1087_v37  ;;  %713 = vmatpush.bf16.msra.mxu2 %v1027_v38 }
  0x52   : > { %726 = vmatpush.bf16.msra.mxu3 %v1091_v42 }
  0x54   : > { %688 = vmatpush.bf16.msra.mxu0 %v1015_v48 }
  0x55   : > { %701 = vmatpush.bf16.msra.mxu1 %v1079_v50  ;;  %714 = vmatpush.bf16.msra.mxu2 %v1019_v51 }
  0x56   : > { %727 = vmatpush.bf16.msra.mxu3 %v1083_v55 }
  0x58   : > { %689 = vmatpush.bf16.msra.mxu0 %v1007_v62 }
  0x59   : > { %702 = vmatpush.bf16.msra.mxu1 %v1071_v0  ;;  %715 = vmatpush.bf16.msra.mxu2 %v1011_v1 }
  0x5a   : > { %728 = vmatpush.bf16.msra.mxu3 %v1075_v2 }
  0x5b   : > { %690 = vmatmul.bf16.vlgmr.msra.gmra.mxu0 %v518_v3 }
  0x5c   : > { %703 = vmatmul.bf16.vlgmr.msra.gmra.mxu1 %v519_v4  ;;  %716 = vmatmul.bf16.vlgmr.msra.gmra.mxu2 %v518_v3 }
  0x5d   : > { %729 = vmatmul.bf16.vlgmr.msra.gmra.mxu3 %v519_v4 }
  0xd8   : > { %v691_v5 = vpop.f32.mrf.mxu0 }
  0xd9   : > { %v704_v6 = vpop.f32.mrf.mxu1 }
  0xda   : > { %v705_v7 = vadd.f32 %v704_v6, %v691_v5 }
  0xdc   : > { %743 = vst [vmem:[%s454_s14] sm:$0xff] %v705_v7  ;;  %v745_v8 = vrot.slane %v705_v7, 4  ;;  %v768_v9 = vmul.f32 %v705_v7, %v705_v7 }
  0xde   : > { %v770_v10 = vrot.slane %v768_v9, 4  ;;  %v746_v11 = vadd.f32 %v745_v8, %v705_v7 }
  0xdf   : > { %v717_v12 = vpop.f32.mrf.mxu2 }
  0xe0   : > { %v730_v13 = vpop.f32.mrf.mxu3  ;;  %v693_v14 = vpop.f32.mrf.mxu0  ;;  %v771_v15 = vadd.f32 %v770_v10, %v768_v9  ;;  %v747_v18 = vrot.slane %v746_v11, 2 }
  0xe1   : > { %v731_v16 = vadd.f32 %v730_v13, %v717_v12  ;;  %v706_v17 = vpop.f32.mrf.mxu1 }
  0xe2   : > { %v772_v21 = vrot.slane %v771_v15, 2  ;;  %v748_v24 = vadd.f32 %v747_v18, %v746_v11 }
  0xe3   : > { %744 = vst [vmem:[%s454_s14 + $0x8] sm:$0xff] %v731_v16  ;;  %v751_v19 = vrot.slane %v731_v16, 4  ;;  %v769_v20 = vmul.f32 %v731_v16, %v731_v16 }
  0xe4   : > { %v773_v29 = vadd.f32 %v772_v21, %v771_v15  ;;  %v749_v32 = vrot.slane %v748_v24, 1 }
  0xe5   : > { %v752_v22 = vadd.f32 %v751_v19, %v731_v16  ;;  %v776_v23 = vrot.slane %v769_v20, 4 }
  0xe6   : > { %v774_v36 = vrot.slane %v773_v29, 1  ;;  %v750_v39 = vadd.f32 %v749_v32, %v748_v24 }
  0xe7   : > { %v753_v25 = vrot.slane %v752_v22, 2  ;;  %v777_v26 = vadd.f32 %v776_v23, %v769_v20  ;;  %v719_v27 = vpop.f32.mrf.mxu2 }
  0xe8   : > { %v732_v28 = vpop.f32.mrf.mxu3  ;;  %v775_v42 = vadd.f32 %v774_v36, %v773_v29 }
  0xe9   : > { %v754_v30 = vadd.f32 %v753_v25, %v752_v22  ;;  %v778_v31 = vrot.slane %v777_v26, 2 }
  0xeb   : > { %v755_v33 = vrot.slane %v754_v30, 1  ;;  %v779_v35 = vadd.f32 %v778_v31, %v777_v26 }
  0xed   : > { %v756_v37 = vadd.f32 %v755_v33, %v754_v30  ;;  %v780_v38 = vrot.slane %v779_v35, 1 }
  0xef   : > { %v759_v40 = vrot.slane %v756_v37, 7  ;;  %v781_v41 = vadd.f32 %v780_v38, %v779_v35 }
  0xf1   : > { %v761_v43 = vsel %vm760_vm0, %v750_v39, %v759_v40  ;;  %v784_v44 = vrot.slane %v781_v41, 7 }
  0xf2   : > { %767 = vst.msk [vmem:[%s463_s21] sm:$0x3] %vm765_vm1, %v761_v43 }
  0xf3   : > { %v785_v45 = vsel %vm760_vm0, %v775_v42, %v784_v44 }
  0xf4   : > { %787 = vst.msk [vmem:[%s472_s25] sm:$0x3] %vm765_vm1, %v785_v45 }
  0xf5 PF: > { %s15_s19 = sadd.s32 1, %s1245_s19   ;;  %s1490_s15 = smov %s1233_s16 }
  0xf6   : > { %p12_p10 = scmp.ge.s32.totalorder %s15_s19, 4   ;;  %s1491_s16 = smov %s1307_s23 }
  0xf7   : > { %s1492_s17 = smov %s1241_s18  ;;  %s1493_s18 = smov %s1495_s20 }
  0xf8   :  { %14 = sbr.rel (!%p12_p10) target bundleno = 3 (0x3), region = 136 }

// kernel: _lambda_.45
= control target key start
LH: loop header
LB: loop body
LE: loop exit
PB: predicated region body
PF: predicated region fallthrough
CT: control target
= control target key end

     0   :  { %s454_s12 = smov 0   ;;  %s456_s13 = smov 0   ;;  %s490_s0 = inlined_call_operand.vmem [shape: f32[8,512], index: 0, kind: input, shape index: {}, may-alias: {0,3}]   ;;  %s491_s1 = inlined_call_operand.vmem [shape: f32[1,512], index: 1, kind: input, shape index: {}]   ;;  %s492_s2 = inlined_call_operand.vmem [shape: f32[1,512], index: 2, kind: input, shape index: {}]   ;;  %s493_s3 = inlined_call_operand.vmem [shape: f32[8,512], index: 3, kind: output, shape index: {}, may-alias: {0,3}]  }
   0x1   :  { %s458_s14 = smov 0  }
   0x2 LB: > { %s22_s15 = sadd.s32 1, %s428_s13  ;;  %p377_p0 = scmp.ge.s32.totalorder %s432_s14, 1  ;;  %s432_s14 = sphi %s458_s14, %s13_s14   ;;  %s428_s13 = sphi %s456_s13, %s495_s13   ;;  %s424_s12 = sphi %s454_s12, %s494_s12  }
   0x3   : > { %p23_p1 = scmp.ge.s32.totalorder %s22_s15, 2  ;;  %p178_p2 = scmp.lt.s32.totalorder %s432_s14, 3 }
   0x5   : > { %s497_s15 = smov (%p23_p1, %s22_s15), 0  ;;  %p179_p3 = pnand %p377_p0, %p178_p2 }
   0x6   : > { %s378_s16 = sshll.u32 (!%p179_p3), %s424_s12, 1 }
   0x7   : > { %182 = sbr.rel (%p179_p3) target bundleno = 23 (0x17), region = 32  ;;  %p221_p4 = scmp.lt.s32.totalorder (!%p179_p3), %s378_s16, 3 }
   0xc   : > { %s499_s16 = smov (!%p221_p4, %s378_s16), 3 }
   0xd   : > { %s379_s17 = sshll.u32 %s499_s16, 3  ;;  %s231_s20 = scalar_lea.vmem %s491_s1, %s499_s16 }
   0xe   : > { %s226_s23 = scalar_lea.vmem %s490_s0, %s379_s17  ;;  %s236_s26 = scalar_lea.vmem %s492_s2, %s499_s16  ;;  %v250_v0 = vld [vmem:[%s231_s20] sm:$0x3] }
   0xf   : > { %v248_v1 = vld [vmem:[%s226_s23] sm:$0xff]  ;;  %v249_v2 = vld [vmem:[%s226_s23 + $0x8] sm:$0xff]  ;;  %v252_v3 = vperm.slane %v250_v0, 0  ;;  %v253_v4 = vperm.slane %v250_v0, 1  ;;  %s246_s29 = scalar_lea.vmem %s493_s3, %s379_s17 }
  0x10   : > { %v258_v5 = vld [vmem:[%s236_s26] sm:$0x3] }
  0x11   : > { %v260_v6 = vperm.slane %v258_v5, 0  ;;  %v261_v7 = vperm.slane %v258_v5, 1  ;;  %v256_v8 = vmul.f32 %v252_v3, %v248_v1  ;;  %v257_v9 = vmul.f32 %v253_v4, %v249_v2 }
  0x13   : > { %v264_v10 = vadd.f32 %v260_v6, %v256_v8  ;;  %v265_v11 = vadd.f32 %v261_v7, %v257_v9 }
  0x15   : > { %266 = vst [vmem:[%s246_s29] sm:$0xff] %v264_v10 }
  0x16   : > { %267 = vst [vmem:[%s246_s29 + $0x8] sm:$0xff] %v265_v11 }
  0x17 PF: > { %s13_s14 = sadd.s32 1, %s432_s14   ;;  %s494_s12 = smov %s428_s13 }
  0x18   : > { %p10_p5 = scmp.ge.s32.totalorder %s13_s14, 4   ;;  %s495_s13 = smov %s497_s15 }
  0x1a   :  { %12 = sbr.rel (!%p10_p5) target bundleno = 2 (0x2), region = 68 }

// kernel: _lambda_.43
= control target key start
LH: loop header
LB: loop body
LE: loop exit
PB: predicated region body
PF: predicated region fallthrough
CT: control target
= control target key end

     0   :  { %s456_s12 = smov 0   ;;  %s458_s13 = smov 0   ;;  %s495_s0 = inlined_call_operand.vmem [shape: f32[8,512], index: 0, kind: input, shape index: {}, may-alias: {0,3}]   ;;  %s496_s1 = inlined_call_operand.vmem [shape: f32[1,512], index: 1, kind: input, shape index: {}]   ;;  %s497_s2 = inlined_call_operand.vmem [shape: f32[1,512], index: 2, kind: input, shape index: {}]   ;;  %s498_s3 = inlined_call_operand.vmem [shape: f32[8,512], index: 3, kind: output, shape index: {}, may-alias: {0,3}]  }
   0x1   :  { %s460_s14 = smov 0  }
   0x2 LB: > { %s22_s15 = sadd.s32 1, %s430_s13  ;;  %p379_p0 = scmp.ge.s32.totalorder %s434_s14, 1  ;;  %s434_s14 = sphi %s460_s14, %s13_s14   ;;  %s430_s13 = sphi %s458_s13, %s500_s13   ;;  %s426_s12 = sphi %s456_s12, %s499_s12  }
   0x3   : > { %p23_p1 = scmp.ge.s32.totalorder %s22_s15, 2  ;;  %p178_p2 = scmp.lt.s32.totalorder %s434_s14, 3 }
   0x5   : > { %s502_s15 = smov (%p23_p1, %s22_s15), 0  ;;  %p179_p3 = pnand %p379_p0, %p178_p2 }
   0x6   : > { %s380_s16 = sshll.u32 (!%p179_p3), %s426_s12, 1 }
   0x7   : > { %182 = sbr.rel (%p179_p3) target bundleno = 25 (0x19), region = 32  ;;  %p221_p4 = scmp.lt.s32.totalorder (!%p179_p3), %s380_s16, 3 }
   0xc   : > { %s504_s16 = smov (!%p221_p4, %s380_s16), 3 }
   0xd   : > { %s381_s17 = sshll.u32 %s504_s16, 3  ;;  %s231_s20 = scalar_lea.vmem %s496_s1, %s504_s16 }
   0xe   : > { %s226_s23 = scalar_lea.vmem %s495_s0, %s381_s17  ;;  %s236_s26 = scalar_lea.vmem %s497_s2, %s504_s16  ;;  %v250_v0 = vld [vmem:[%s231_s20] sm:$0x3] }
   0xf   : > { %v248_v1 = vld [vmem:[%s226_s23] sm:$0xff]  ;;  %v249_v2 = vld [vmem:[%s226_s23 + $0x8] sm:$0xff]  ;;  %v252_v3 = vperm.slane %v250_v0, 0  ;;  %v253_v4 = vperm.slane %v250_v0, 1  ;;  %s246_s29 = scalar_lea.vmem %s498_s3, %s381_s17 }
  0x10   : > { %v258_v5 = vld [vmem:[%s236_s26] sm:$0x3] }
  0x11   : > { %v260_v6 = vperm.slane %v258_v5, 0  ;;  %v261_v7 = vperm.slane %v258_v5, 1  ;;  %v256_v8 = vmul.f32 %v252_v3, %v248_v1  ;;  %v257_v9 = vmul.f32 %v253_v4, %v249_v2 }
  0x13   : > { %v264_v10 = vadd.f32 %v260_v6, %v256_v8  ;;  %v265_v11 = vadd.f32 %v261_v7, %v257_v9 }
  0x15   : > { %v266_v12 = vmax.f32 %v264_v10, 0.0  ;;  %v267_v13 = vmax.f32 %v265_v11, 0.0 }
  0x17   : > { %268 = vst [vmem:[%s246_s29] sm:$0xff] %v266_v12 }
  0x18   : > { %269 = vst [vmem:[%s246_s29 + $0x8] sm:$0xff] %v267_v13 }
  0x19 PF: > { %s13_s14 = sadd.s32 1, %s434_s14   ;;  %s499_s12 = smov %s430_s13 }
  0x1a   : > { %p10_p5 = scmp.ge.s32.totalorder %s13_s14, 4   ;;  %s500_s13 = smov %s502_s15 }
  0x1c   :  { %12 = sbr.rel (!%p10_p5) target bundleno = 2 (0x2), region = 68 }

// kernel: _lambda_.42
= control target key start
LH: loop header
LB: loop body
LE: loop exit
PB: predicated region body
PF: predicated region fallthrough
CT: control target
= control target key end

     0   :  { %s1312_s15 = smov 0   ;;  %s1314_s16 = smov 0   ;;  %s1568_s0 = inlined_call_operand.vmem [shape: bf16[8,2304], index: 0, kind: input, shape index: {}]   ;;  %s1569_s1 = inlined_call_operand.vmem [shape: bf16[2304,512], index: 1, kind: input, shape index: {}]   ;;  %s1570_s2 = inlined_call_operand.vmem [shape: f32[8,512], index: 2, kind: output, shape index: {0}]   ;;  %s1571_s3 = inlined_call_operand.vmem [shape: f32[1,1,512], index: 3, kind: output, shape index: {1}]   ;;  %s1572_s4 = inlined_call_operand.vmem [shape: f32[1,1,512], index: 4, kind: output, shape index: {2}]  }
   0x1   :  { %s1316_s17 = smov 0   ;;  %s1318_s18 = smov 0  }
   0x2   :  { %s1320_s19 = smov 0   ;;  %s1322_s20 = smov 0  }
   0x3   :  { %s1324_s21 = smov 0  }
   0x4 LB: > { %s27_s22 = sadd.s32 1, %s1276_s19  ;;  %s30_s23 = sadd.s32 1, %s1280_s20  ;;  %s1284_s21 = sphi %s1324_s21, %s15_s21   ;;  %s1280_s20 = sphi %s1322_s20, %s1578_s20   ;;  %s1276_s19 = sphi %s1320_s19, %s1577_s19   ;;  %s1272_s18 = sphi %s1318_s18, %s1576_s18   ;;  %s1268_s17 = sphi %s1316_s17, %s1575_s17   ;;  %s1264_s16 = sphi %s1314_s16, %s1574_s16   ;;  %s1260_s15 = sphi %s1312_s15, %s1573_s15  }
   0x5   : > { %p28_p0 = scmp.ge.s32.totalorder %s27_s22, 9  ;;  %p78_p1 = scmp.ne.s32.totalorder %s1264_s16, %s1260_s15 }
   0x6   : > { %p79_p2 = scmp.eq.s32.totalorder %s1284_s21, 0  ;;  %s71_s27 = sadd.s32 1, %s1264_s16 }
   0x7   : > { %s1580_s22 = smov (%p28_p0, %s27_s22), 0  ;;  %s1582_s23 = smov (!%p28_p0, %s30_s23), %s1280_s20 }
   0x8   : > { %p80_p3 = por %p79_p2, %p78_p1  ;;  %p32_p4 = scmp.ge.s32.totalorder %s1582_s23, 2 }
   0x9   : > { %s66_s24 = ssub.s32 %s1276_s19, %s1580_s22  ;;  %p994_p6 = scmp.ge.s32.totalorder %s1284_s21, 18 }
   0xa   : > { %s1584_s23 = smov (%p32_p4, %s1582_s23), 0 }
   0xb   : > { %s67_s25 = ssub.s32 %s1280_s20, %s1584_s23  ;;  %188 = sbr.rel (%p994_p6) target bundleno = 55 (0x37), region = 16 }
   0xc   : > { %s68_s26 = sor.u32 %s67_s25, %s66_s24 }
   0xd   : > { %p69_p5 = scmp.eq.s32.totalorder %s68_s26, 0 }
   0xf   : > { %s1363_s28 = scalar_select %p69_p5, %s1264_s16, %s71_s27  }
  0x10   : > { %204 = sbr.rel (!%p80_p3) target bundleno = 55 (0x37), region = 24  ;;  %s206_s29 = sand.u32 (%p80_p3), 1, %s1264_s16  }
  0x11   : > { %s997_s30 = sshll.u32 (%p80_p3), %s1280_s20, 1  ;;  %s995_s5 = sshll.u32 (%p80_p3), %s206_s29, 8 }
  0x12   : > { %s1140_s6 = sshll.u32 (%p80_p3), %s1276_s19, 7  ;;  %s1377_s12 = scalar_lea.vmem (%p80_p3), [#allocation3], %s995_s5 }
  0x13   : > { %s212_s7 = sadd.s32 (%p80_p3), %s1140_s6, %s997_s30 }
  0x14   : > { %s999_s8 = sshll.u32 (%p80_p3), %s212_s7, 2 }
  0x15   : > { %s1372_s11 = scalar_lea.vmem %s1569_s1, %s999_s8 }
  0x16   : > { %v305_v0 = vld [vmem:[%s1372_s11] sm:$0xff]  ;;  %v307_v1 = vld [vmem:[%s1372_s11 + $0x10] sm:$0xff] }
  0x17   : > { %v309_v2 = vld [vmem:[%s1372_s11 + $0x20] sm:$0xff]  ;;  %306 = vst [vmem:[%s1377_s12] sm:$0xff] %v305_v0  ;;  %v311_v3 = vld [vmem:[%s1372_s11 + $0x30] sm:$0xff] }
  0x18   : > { %308 = vst [vmem:[%s1377_s12 + $0x8] sm:$0xff] %v307_v1  ;;  %v313_v4 = vld [vmem:[%s1372_s11 + $0x40] sm:$0xff]  ;;  %v315_v5 = vld [vmem:[%s1372_s11 + $0x50] sm:$0xff] }
  0x19   : > { %310 = vst [vmem:[%s1377_s12 + $0x10] sm:$0xff] %v309_v2  ;;  %v317_v6 = vld [vmem:[%s1372_s11 + $0x60] sm:$0xff]  ;;  %v319_v7 = vld [vmem:[%s1372_s11 + $0x70] sm:$0xff] }
  0x1a   : > { %312 = vst [vmem:[%s1377_s12 + $0x18] sm:$0xff] %v311_v3  ;;  %v321_v8 = vld [vmem:[%s1372_s11 + $0x80] sm:$0xff]  ;;  %v323_v9 = vld [vmem:[%s1372_s11 + $0x90] sm:$0xff] }
  0x1b   : > { %314 = vst [vmem:[%s1377_s12 + $0x20] sm:$0xff] %v313_v4  ;;  %v325_v10 = vld [vmem:[%s1372_s11 + $0xa0] sm:$0xff]  ;;  %v327_v11 = vld [vmem:[%s1372_s11 + $0xb0] sm:$0xff] }
  0x1c   : > { %316 = vst [vmem:[%s1377_s12 + $0x28] sm:$0xff] %v315_v5  ;;  %v329_v12 = vld [vmem:[%s1372_s11 + $0xc0] sm:$0xff]  ;;  %v331_v13 = vld [vmem:[%s1372_s11 + $0xd0] sm:$0xff] }
  0x1d   : > { %318 = vst [vmem:[%s1377_s12 + $0x30] sm:$0xff] %v317_v6  ;;  %v333_v14 = vld [vmem:[%s1372_s11 + $0xe0] sm:$0xff]  ;;  %v335_v15 = vld [vmem:[%s1372_s11 + $0xf0] sm:$0xff] }
  0x1e   : > { %320 = vst [vmem:[%s1377_s12 + $0x38] sm:$0xff] %v319_v7  ;;  %v337_v16 = vld [vmem:[%s1372_s11 + $0x100] sm:$0xff]  ;;  %v339_v17 = vld [vmem:[%s1372_s11 + $0x110] sm:$0xff] }
  0x1f   : > { %322 = vst [vmem:[%s1377_s12 + $0x40] sm:$0xff] %v321_v8  ;;  %v341_v18 = vld [vmem:[%s1372_s11 + $0x120] sm:$0xff]  ;;  %v343_v19 = vld [vmem:[%s1372_s11 + $0x130] sm:$0xff] }
  0x20   : > { %324 = vst [vmem:[%s1377_s12 + $0x48] sm:$0xff] %v323_v9  ;;  %v345_v20 = vld [vmem:[%s1372_s11 + $0x140] sm:$0xff]  ;;  %v347_v21 = vld [vmem:[%s1372_s11 + $0x150] sm:$0xff] }
  0x21   : > { %326 = vst [vmem:[%s1377_s12 + $0x50] sm:$0xff] %v325_v10  ;;  %v349_v22 = vld [vmem:[%s1372_s11 + $0x160] sm:$0xff]  ;;  %v351_v23 = vld [vmem:[%s1372_s11 + $0x170] sm:$0xff] }
  0x22   : > { %328 = vst [vmem:[%s1377_s12 + $0x58] sm:$0xff] %v327_v11  ;;  %v353_v24 = vld [vmem:[%s1372_s11 + $0x180] sm:$0xff]  ;;  %v355_v25 = vld [vmem:[%s1372_s11 + $0x190] sm:$0xff] }
  0x23   : > { %330 = vst [vmem:[%s1377_s12 + $0x60] sm:$0xff] %v329_v12  ;;  %v357_v26 = vld [vmem:[%s1372_s11 + $0x1a0] sm:$0xff]  ;;  %v359_v27 = vld [vmem:[%s1372_s11 + $0x1b0] sm:$0xff] }
  0x24   : > { %332 = vst [vmem:[%s1377_s12 + $0x68] sm:$0xff] %v331_v13  ;;  %v361_v28 = vld [vmem:[%s1372_s11 + $0x1c0] sm:$0xff]  ;;  %v363_v29 = vld [vmem:[%s1372_s11 + $0x1d0] sm:$0xff] }
  0x25   : > { %334 = vst [vmem:[%s1377_s12 + $0x70] sm:$0xff] %v333_v14  ;;  %v365_v30 = vld [vmem:[%s1372_s11 + $0x1e0] sm:$0xff]  ;;  %v367_v31 = vld [vmem:[%s1372_s11 + $0x1f0] sm:$0xff] }
  0x26   : > { %336 = vst [vmem:[%s1377_s12 + $0x78] sm:$0xff] %v335_v15 }
  0x27   : > { %338 = vst [vmem:[%s1377_s12 + $0x80] sm:$0xff] %v337_v16 }
  0x28   : > { %340 = vst [vmem:[%s1377_s12 + $0x88] sm:$0xff] %v339_v17 }
  0x29   : > { %342 = vst [vmem:[%s1377_s12 + $0x90] sm:$0xff] %v341_v18 }
  0x2a   : > { %344 = vst [vmem:[%s1377_s12 + $0x98] sm:$0xff] %v343_v19 }
  0x2b   : > { %346 = vst [vmem:[%s1377_s12 + $0xa0] sm:$0xff] %v345_v20 }
  0x2c   : > { %348 = vst [vmem:[%s1377_s12 + $0xa8] sm:$0xff] %v347_v21 }
  0x2d   : > { %350 = vst [vmem:[%s1377_s12 + $0xb0] sm:$0xff] %v349_v22 }
  0x2e   : > { %352 = vst [vmem:[%s1377_s12 + $0xb8] sm:$0xff] %v351_v23 }
  0x2f   : > { %354 = vst [vmem:[%s1377_s12 + $0xc0] sm:$0xff] %v353_v24 }
  0x30   : > { %356 = vst [vmem:[%s1377_s12 + $0xc8] sm:$0xff] %v355_v25 }
  0x31   : > { %358 = vst [vmem:[%s1377_s12 + $0xd0] sm:$0xff] %v357_v26 }
  0x32   : > { %360 = vst [vmem:[%s1377_s12 + $0xd8] sm:$0xff] %v359_v27 }
  0x33   : > { %362 = vst [vmem:[%s1377_s12 + $0xe0] sm:$0xff] %v361_v28 }
  0x34   : > { %364 = vst [vmem:[%s1377_s12 + $0xe8] sm:$0xff] %v363_v29 }
  0x35   : > { %366 = vst [vmem:[%s1377_s12 + $0xf0] sm:$0xff] %v365_v30 }
  0x36   : > { %368 = vst [vmem:[%s1377_s12 + $0xf8] sm:$0xff] %v367_v31 }
  0x37 PF: > { %p1000_p7 = scmp.ge.s32.totalorder %s1284_s21, 1  ;;  %p373_p8 = scmp.lt.s32.totalorder %s1284_s21, 19 }
  0x39   : > { %p374_p9 = pnand %p1000_p7, %p373_p8 }
  0x3a   : > { %s380_s13 = sand.u32 (!%p374_p9), 1, %s1260_s15   ;;  %s1002_s14 = sshll.u32 (!%p374_p9), %s1268_s17, 1 }
  0x3b   : > { %377 = sbr.rel (%p374_p9) target bundleno = 274 (0x112), region = 62  ;;  %s1001_s24 = sshll.u32 (!%p374_p9), %s380_s13, 8 }
  0x3c   : > { %p437_p10 = scmp.lt.s32.totalorder (!%p374_p9), %s1002_s14, 17  ;;  %s1004_s25 = sshll.u32 (!%p374_p9), %s1272_s18, 1 }
  0x3d   : > { %p449_p11 = scmp.lt.s32.totalorder (!%p374_p9), %s1004_s25, 3  ;;  %s1466_s13 = scalar_lea.vmem (!%p374_p9), [#allocation3], %s1001_s24 }
  0x3e   : > { %p1008_p12 = scmp.ne.s32.totalorder (!%p374_p9), %s1268_s17, 0 }
  0x40   : > { %s1586_s14 = smov (!%p437_p10, %s1002_s14), 17  ;;  %s1588_s25 = smov (!%p449_p11, %s1004_s25), 3 }
  0x41   : > { %s1003_s26 = sshll.u32 %s1586_s14, 2  ;;  %s1005_s5 = sshll.u32 %s1588_s25, 3 }
  0x42   : > { %s1448_s30 = scalar_lea.vmem %s1568_s0, %s1003_s26  ;;  %s463_s7 = scalar_lea.vmem %s1571_s3, %s1588_s25 }
  0x43   : > { %s1460_s9 = scalar_lea.vmem %s1570_s2, %s1005_s5  ;;  %s472_s12 = scalar_lea.vmem %s1572_s4, %s1588_s25 }
  0x44   : > { %477 = sbr.rel (%p1008_p12) target bundleno = 76 (0x4c), region = 70 }
  0x49   : > { %v1286_v32 = vmov 0.0  }
  0x4a   : > { %478 = vst [vmem:[#allocation2] sm:$0xff] %v1286_v32 }
  0x4b   : > { %479 = vst [vmem:[#allocation2 + $0x8] sm:$0xff] %v1286_v32 }
  0x4c PF: > { %v1067_v33 = vld [vmem:[%s1466_s13 + $0x70] sm:$0xf]  ;;  %v1156_v34 = vld [vmem:[%s1466_s13 + $0x74] sm:$0xf0]  ;;  %v1155_v38 = vld [vmem:[%s1466_s13 + $0x74] sm:$0xf] }
  0x4d   : > { %v1131_v35 = vld [vmem:[%s1466_s13 + $0xf0] sm:$0xf]  ;;  %v1068_v36 = vor.u32 %v1156_v34, %v1067_v33  ;;  %v1172_v37 = vld [vmem:[%s1466_s13 + $0xf4] sm:$0xf0]  ;;  %v1069_v39 = vld [vmem:[%s1466_s13 + $0x78] sm:$0xf0] }
  0x4e   : > { %v1132_v40 = vor.u32 %v1172_v37, %v1131_v35  ;;  %v1072_v41 = vor.u32 %v1155_v38, %v1069_v39  ;;  %v1171_v42 = vld [vmem:[%s1466_s13 + $0xf4] sm:$0xf]  ;;  %v1133_v43 = vld [vmem:[%s1466_s13 + $0xf8] sm:$0xf0]  ;;  %v1059_v44 = vld [vmem:[%s1466_s13 + $0x60] sm:$0xf] }
  0x4f   : > { %682 = vmatpush.bf16.msra.mxu0 %v1068_v36  ;;  %v1136_v45 = vor.u32 %v1171_v42, %v1133_v43  ;;  %v1154_v46 = vld [vmem:[%s1466_s13 + $0x64] sm:$0xf0]  ;;  %v1123_v47 = vld [vmem:[%s1466_s13 + $0xe0] sm:$0xf]  ;;  %v1153_v51 = vld [vmem:[%s1466_s13 + $0x64] sm:$0xf] }
  0x50   : > { %v1170_v48 = vld [vmem:[%s1466_s13 + $0xe4] sm:$0xf0]  ;;  %695 = vmatpush.bf16.msra.mxu1 %v1132_v40  ;;  %708 = vmatpush.bf16.msra.mxu2 %v1072_v41  ;;  %v1060_v49 = vor.u32 %v1154_v46, %v1059_v44  ;;  %v1061_v52 = vld [vmem:[%s1466_s13 + $0x68] sm:$0xf0]  ;;  %v1169_v53 = vld [vmem:[%s1466_s13 + $0xe4] sm:$0xf] }
  0x51   : > { %v1124_v50 = vor.u32 %v1170_v48, %v1123_v47  ;;  %721 = vmatpush.bf16.msra.mxu3 %v1136_v45  ;;  %v1064_v54 = vor.u32 %v1153_v51, %v1061_v52  ;;  %v1125_v55 = vld [vmem:[%s1466_s13 + $0xe8] sm:$0xf0]  ;;  %v1051_v56 = vld [vmem:[%s1466_s13 + $0x50] sm:$0xf]  ;;  %v1152_v57 = vld [vmem:[%s1466_s13 + $0x54] sm:$0xf0] }
  0x52   : > { %v1128_v58 = vor.u32 %v1169_v53, %v1125_v55  ;;  %v1115_v59 = vld [vmem:[%s1466_s13 + $0xd0] sm:$0xf]  ;;  %v1168_v60 = vld [vmem:[%s1466_s13 + $0xd4] sm:$0xf0]  ;;  %v1151_v61 = vld [vmem:[%s1466_s13 + $0x54] sm:$0xf]  ;;  %v1052_v62 = vor.u32 %v1152_v57, %v1051_v56 }
  0x53   : > { %683 = vmatpush.bf16.msra.mxu0 %v1060_v49  ;;  %v1053_v63 = vld [vmem:[%s1466_s13 + $0x58] sm:$0xf0]  ;;  %v1167_v0 = vld [vmem:[%s1466_s13 + $0xd4] sm:$0xf]  ;;  %v1116_v2 = vor.u32 %v1168_v60, %v1115_v59  ;;  %v1043_v4 = vld [vmem:[%s1466_s13 + $0x40] sm:$0xf] }
  0x54   : > { %v1117_v1 = vld [vmem:[%s1466_s13 + $0xd8] sm:$0xf0]  ;;  %696 = vmatpush.bf16.msra.mxu1 %v1124_v50  ;;  %709 = vmatpush.bf16.msra.mxu2 %v1064_v54  ;;  %v1056_v3 = vor.u32 %v1151_v61, %v1053_v63  ;;  %v1150_v5 = vld [vmem:[%s1466_s13 + $0x44] sm:$0xf0]  ;;  %v1107_v6 = vld [vmem:[%s1466_s13 + $0xc0] sm:$0xf] }
  0x55   : > { %722 = vmatpush.bf16.msra.mxu3 %v1128_v58  ;;  %v1120_v7 = vor.u32 %v1167_v0, %v1117_v1  ;;  %v1166_v8 = vld [vmem:[%s1466_s13 + $0xc4] sm:$0xf0]  ;;  %v1149_v9 = vld [vmem:[%s1466_s13 + $0x44] sm:$0xf]  ;;  %v1045_v10 = vld [vmem:[%s1466_s13 + $0x48] sm:$0xf0]  ;;  %v1044_v13 = vor.u32 %v1150_v5, %v1043_v4 }
  0x56   : > { %v1165_v11 = vld [vmem:[%s1466_s13 + $0xc4] sm:$0xf]  ;;  %v1109_v12 = vld [vmem:[%s1466_s13 + $0xc8] sm:$0xf0]  ;;  %v1108_v14 = vor.u32 %v1166_v8, %v1107_v6  ;;  %v1048_v15 = vor.u32 %v1149_v9, %v1045_v10  ;;  %v1035_v16 = vld [vmem:[%s1466_s13 + $0x30] sm:$0xf] }
  0x57   : > { %684 = vmatpush.bf16.msra.mxu0 %v1052_v62  ;;  %v1148_v17 = vld [vmem:[%s1466_s13 + $0x34] sm:$0xf0]  ;;  %v1099_v18 = vld [vmem:[%s1466_s13 + $0xb0] sm:$0xf]  ;;  %v1112_v19 = vor.u32 %v1165_v11, %v1109_v12  ;;  %v1147_v21 = vld [vmem:[%s1466_s13 + $0x34] sm:$0xf] }
  0x58   : > { %697 = vmatpush.bf16.msra.mxu1 %v1116_v2  ;;  %710 = vmatpush.bf16.msra.mxu2 %v1056_v3  ;;  %v1164_v20 = vld [vmem:[%s1466_s13 + $0xb4] sm:$0xf0]  ;;  %v1037_v22 = vld [vmem:[%s1466_s13 + $0x38] sm:$0xf0]  ;;  %v1163_v23 = vld [vmem:[%s1466_s13 + $0xb4] sm:$0xf]  ;;  %v1036_v25 = vor.u32 %v1148_v17, %v1035_v16 }
  0x59   : > { %723 = vmatpush.bf16.msra.mxu3 %v1120_v7  ;;  %v1101_v24 = vld [vmem:[%s1466_s13 + $0xb8] sm:$0xf0]  ;;  %v1100_v26 = vor.u32 %v1164_v20, %v1099_v18  ;;  %v1040_v27 = vor.u32 %v1147_v21, %v1037_v22  ;;  %v1027_v28 = vld [vmem:[%s1466_s13 + $0x20] sm:$0xf]  ;;  %v1146_v29 = vld [vmem:[%s1466_s13 + $0x24] sm:$0xf0] }
  0x5a   : > { %v1091_v30 = vld [vmem:[%s1466_s13 + $0xa0] sm:$0xf]  ;;  %v1104_v31 = vor.u32 %v1163_v23, %v1101_v24  ;;  %v1162_v32 = vld [vmem:[%s1466_s13 + $0xa4] sm:$0xf0]  ;;  %v1145_v33 = vld [vmem:[%s1466_s13 + $0x24] sm:$0xf]  ;;  %v1028_v37 = vor.u32 %v1146_v29, %v1027_v28 }
  0x5b   : > { %685 = vmatpush.bf16.msra.mxu0 %v1044_v13  ;;  %v1029_v34 = vld [vmem:[%s1466_s13 + $0x28] sm:$0xf0]  ;;  %v1161_v35 = vld [vmem:[%s1466_s13 + $0xa4] sm:$0xf]  ;;  %v1092_v38 = vor.u32 %v1162_v32, %v1091_v30  ;;  %v1019_v40 = vld [vmem:[%s1466_s13 + $0x10] sm:$0xf] }
  0x5c   : > { %698 = vmatpush.bf16.msra.mxu1 %v1108_v14  ;;  %711 = vmatpush.bf16.msra.mxu2 %v1048_v15  ;;  %v1093_v36 = vld [vmem:[%s1466_s13 + $0xa8] sm:$0xf0]  ;;  %v1032_v39 = vor.u32 %v1145_v33, %v1029_v34  ;;  %v1144_v41 = vld [vmem:[%s1466_s13 + $0x14] sm:$0xf0]  ;;  %v1083_v42 = vld [vmem:[%s1466_s13 + $0x90] sm:$0xf] }
  0x5d   : > { %724 = vmatpush.bf16.msra.mxu3 %v1112_v19  ;;  %v1096_v43 = vor.u32 %v1161_v35, %v1093_v36  ;;  %v1160_v44 = vld [vmem:[%s1466_s13 + $0x94] sm:$0xf0]  ;;  %v1143_v45 = vld [vmem:[%s1466_s13 + $0x14] sm:$0xf]  ;;  %v1021_v46 = vld [vmem:[%s1466_s13 + $0x18] sm:$0xf0]  ;;  %v1020_v49 = vor.u32 %v1144_v41, %v1019_v40 }
  0x5e   : > { %v1159_v47 = vld [vmem:[%s1466_s13 + $0x94] sm:$0xf]  ;;  %v1085_v48 = vld [vmem:[%s1466_s13 + $0x98] sm:$0xf0]  ;;  %v1084_v51 = vor.u32 %v1160_v44, %v1083_v42  ;;  %v1024_v52 = vor.u32 %v1143_v45, %v1021_v46  ;;  %v1011_v53 = vld [vmem:[%s1466_s13] sm:$0xf] }
  0x5f   : > { %686 = vmatpush.bf16.msra.mxu0 %v1036_v25  ;;  %v482_v50 = vld [vmem:[%s1448_s30] sm:$0xff]  ;;  %v1142_v54 = vld [vmem:[%s1466_s13 + $0x4] sm:$0xf0]  ;;  %v1075_v55 = vld [vmem:[%s1466_s13 + $0x80] sm:$0xf]  ;;  %v1088_v56 = vor.u32 %v1159_v47, %v1085_v48  ;;  %p1137_p13 = scmp.ne.s32.totalorder %s1268_s17, 8 }
  0x60   : > { %699 = vmatpush.bf16.msra.mxu1 %v1100_v26  ;;  %712 = vmatpush.bf16.msra.mxu2 %v1040_v27  ;;  %v1158_v57 = vld [vmem:[%s1466_s13 + $0x84] sm:$0xf0]  ;;  %v1141_v58 = vld [vmem:[%s1466_s13 + $0x4] sm:$0xf]  ;;  %v1013_v59 = vld [vmem:[%s1466_s13 + $0x8] sm:$0xf0]  ;;  %v516_v62 = vunpack.c.l.b16 %v482_v50  ;;  %v1012_v63 = vor.u32 %v1142_v54, %v1011_v53  ;;  %v517_v0 = vunpack.c.h.b16 %v482_v50 }
  0x61   : > { %725 = vmatpush.bf16.msra.mxu3 %v1104_v31  ;;  %v1157_v60 = vld [vmem:[%s1466_s13 + $0x84] sm:$0xf]  ;;  %v1077_v61 = vld [vmem:[%s1466_s13 + $0x88] sm:$0xf0]  ;;  %v1076_v1 = vor.u32 %v1158_v57, %v1075_v55  ;;  %v1016_v2 = vor.u32 %v1141_v58, %v1013_v59  ;;  %v480_v7 = vld [vmem:[#allocation2] sm:$0xff] }
  0x62   : > { %v1080_v3 = vor.u32 %v1157_v60, %v1077_v61  ;;  %v518_v4 = vpack.c.b16 %v516_v62, %v516_v62  ;;  %v519_v5 = vpack.c.b16 %v517_v0, %v517_v0  ;;  %v481_v12 = vld [vmem:[#allocation2 + $0x8] sm:$0xff] }
  0x63   : > { %687 = vmatpush.bf16.msra.mxu0 %v1028_v37 }
  0x64   : > { %700 = vmatpush.bf16.msra.mxu1 %v1092_v38  ;;  %713 = vmatpush.bf16.msra.mxu2 %v1032_v39 }
  0x65   : > { %726 = vmatpush.bf16.msra.mxu3 %v1096_v43 }
  0x67   : > { %688 = vmatpush.bf16.msra.mxu0 %v1020_v49 }
  0x68   : > { %701 = vmatpush.bf16.msra.mxu1 %v1084_v51  ;;  %714 = vmatpush.bf16.msra.mxu2 %v1024_v52 }
  0x69   : > { %727 = vmatpush.bf16.msra.mxu3 %v1088_v56 }
  0x6b   : > { %689 = vmatpush.bf16.msra.mxu0 %v1012_v63 }
  0x6c   : > { %702 = vmatpush.bf16.msra.mxu1 %v1076_v1  ;;  %715 = vmatpush.bf16.msra.mxu2 %v1016_v2 }
  0x6d   : > { %728 = vmatpush.bf16.msra.mxu3 %v1080_v3 }
  0x6e   : > { %690 = vmatmul.bf16.vlgmr.msra.gmra.mxu0 %v518_v4 }
  0x6f   : > { %703 = vmatmul.bf16.vlgmr.msra.gmra.mxu1 %v519_v5  ;;  %716 = vmatmul.bf16.vlgmr.msra.gmra.mxu2 %v518_v4 }
  0x70   : > { %729 = vmatmul.bf16.vlgmr.msra.gmra.mxu3 %v519_v5 }
  0xeb   : > { %v691_v6 = vpop.f32.mrf.mxu0 }
  0xec   : > { %v704_v8 = vpop.f32.mrf.mxu1 }
  0xed   : > { %v705_v9 = vadd.f32 %v704_v8, %v691_v6 }
  0xef   : > { %v734_v10 = vadd.f32 %v705_v9, %v480_v7 }
  0xf1   : > { %736 = vst [vmem:[#allocation2] sm:$0xff] %v734_v10 }
  0xf2   : > { %v717_v11 = vpop.f32.mrf.mxu2 }
  0xf3   : > { %v730_v13 = vpop.f32.mrf.mxu3  ;;  %v693_v14 = vpop.f32.mrf.mxu0 }
  0xf4   : > { %v731_v15 = vadd.f32 %v730_v13, %v717_v11  ;;  %v706_v16 = vpop.f32.mrf.mxu1 }
  0xf6   : > { %v735_v17 = vadd.f32 %v731_v15, %v481_v12 }
  0xf7   : > { %741 = sbr.rel (%p1137_p13) target bundleno = 274 (0x112), region = 74 }
  0xf8   : > { %737 = vst [vmem:[#allocation2 + $0x8] sm:$0xff] %v735_v17 }
  0xfa   : > { %v719_v18 = vpop.f32.mrf.mxu2 }
  0xfb   : > { %v732_v19 = vpop.f32.mrf.mxu3 }
  0xfc   : > { %v742_v20 = vld [vmem:[#allocation2] sm:$0xff]  ;;  %v764_v38 = vlaneseq  ;;  %vm761_vm0 = vcmask 1040384  }
  0xfd   : > { %744 = vst [vmem:[%s1460_s9] sm:$0xff] %v742_v20  ;;  %v746_v22 = vrot.slane %v742_v20, 4  ;;  %v769_v23 = vmul.f32 %v742_v20, %v742_v20 }
  0xfe   : > { %vm766_vm1 = vcmp.lt.s32.totalorder %v764_v38, 256 }
  0xff   : > { %v743_v21 = vld [vmem:[#allocation2 + $0x8] sm:$0xff]  ;;  %v747_v26 = vadd.f32 %v746_v22, %v742_v20  ;;  %v771_v27 = vrot.slane %v769_v23, 4 }
 0x100   : > { %v752_v24 = vrot.slane %v743_v21, 4  ;;  %v770_v25 = vmul.f32 %v743_v21, %v743_v21  ;;  %745 = vst [vmem:[%s1460_s9 + $0x8] sm:$0xff] %v743_v21 }
 0x101   : > { %v748_v30 = vrot.slane %v747_v26, 2  ;;  %v772_v32 = vadd.f32 %v771_v27, %v769_v23 }
 0x102   : > { %v753_v28 = vadd.f32 %v752_v24, %v743_v21  ;;  %v777_v29 = vrot.slane %v770_v25, 4 }
 0x103   : > { %v749_v34 = vadd.f32 %v748_v30, %v747_v26  ;;  %v773_v36 = vrot.slane %v772_v32, 2 }
 0x104   : > { %v754_v31 = vrot.slane %v753_v28, 2  ;;  %v778_v33 = vadd.f32 %v777_v29, %v770_v25 }
 0x105   : > { %v750_v39 = vrot.slane %v749_v34, 1  ;;  %v774_v41 = vadd.f32 %v773_v36, %v772_v32 }
 0x106   : > { %v755_v35 = vadd.f32 %v754_v31, %v753_v28  ;;  %v779_v37 = vrot.slane %v778_v33, 2 }
 0x107   : > { %v751_v43 = vadd.f32 %v750_v39, %v749_v34  ;;  %v775_v45 = vrot.slane %v774_v41, 1 }
 0x108   : > { %v756_v40 = vrot.slane %v755_v35, 1  ;;  %v780_v42 = vadd.f32 %v779_v37, %v778_v33 }
 0x109   : > { %v776_v48 = vadd.f32 %v775_v45, %v774_v41 }
 0x10a   : > { %v757_v44 = vadd.f32 %v756_v40, %v755_v35  ;;  %v781_v46 = vrot.slane %v780_v42, 1 }
 0x10c   : > { %v760_v47 = vrot.slane %v757_v44, 7  ;;  %v782_v49 = vadd.f32 %v781_v46, %v780_v42 }
 0x10e   : > { %v762_v50 = vsel %vm761_vm0, %v751_v43, %v760_v47  ;;  %v785_v51 = vrot.slane %v782_v49, 7 }
 0x10f   : > { %768 = vst.msk [vmem:[%s463_s7] sm:$0x3] %vm766_vm1, %v762_v50 }
 0x110   : > { %v786_v52 = vsel %vm761_vm0, %v776_v48, %v785_v51 }
 0x111   : > { %788 = vst.msk [vmem:[%s472_s12] sm:$0x3] %vm766_vm1, %v786_v52 }
 0x112 PF: > { %s15_s21 = sadd.s32 1, %s1284_s21   ;;  %s1573_s15 = smov %s1264_s16 }
 0x113   : > { %p12_p0 = scmp.ge.s32.totalorder %s15_s21, 20   ;;  %s1574_s16 = smov %s1363_s28 }
 0x114   : > { %s1575_s17 = smov %s1276_s19  ;;  %s1576_s18 = smov %s1280_s20 }
 0x115   : > { %s1577_s19 = smov %s1580_s22  ;;  %s1578_s20 = smov %s1584_s23 }
 0x116   :  { %14 = sbr.rel (!%p12_p0) target bundleno = 4 (0x4), region = 136 }

// kernel: _lambda_.47
= control target key start
LH: loop header
LB: loop body
LE: loop exit
PB: predicated region body
PF: predicated region fallthrough
CT: control target
= control target key end

     0   :  { %s548_s15 = smov 0   ;;  %s550_s16 = smov 0   ;;  %s590_s0 = inlined_call_operand.vmem [shape: f32[8,512], index: 0, kind: input, shape index: {}, may-alias: {0,4}]   ;;  %s591_s1 = inlined_call_operand.vmem [shape: f32[1,512], index: 1, kind: input, shape index: {}]   ;;  %s592_s2 = inlined_call_operand.vmem [shape: f32[1,512], index: 2, kind: input, shape index: {}]   ;;  %s593_s3 = inlined_call_operand.vmem [shape: f32[8,512], index: 3, kind: input, shape index: {}]   ;;  %s594_s4 = inlined_call_operand.vmem [shape: f32[8,512], index: 4, kind: output, shape index: {}, may-alias: {0,4}]  }
   0x1   :  { %s552_s17 = smov 0  }
   0x2 LB: > { %s23_s18 = sadd.s32 1, %s517_s16  ;;  %p464_p0 = scmp.ge.s32.totalorder %s521_s17, 1  ;;  %s521_s17 = sphi %s552_s17, %s14_s17   ;;  %s517_s16 = sphi %s550_s16, %s596_s16   ;;  %s513_s15 = sphi %s548_s15, %s595_s15  }
   0x3   : > { %p24_p1 = scmp.ge.s32.totalorder %s23_s18, 2  ;;  %p220_p2 = scmp.lt.s32.totalorder %s521_s17, 3 }
   0x5   : > { %s598_s18 = smov (%p24_p1, %s23_s18), 0  ;;  %p221_p3 = pnand %p464_p0, %p220_p2 }
   0x6   : > { %s465_s19 = sshll.u32 (!%p221_p3), %s513_s15, 1 }
   0x7   : > { %224 = sbr.rel (%p221_p3) target bundleno = 27 (0x1b), region = 36  ;;  %p274_p4 = scmp.lt.s32.totalorder (!%p221_p3), %s465_s19, 3 }
   0xc   : > { %s600_s19 = smov (!%p274_p4, %s465_s19), 3 }
   0xd   : > { %s466_s20 = sshll.u32 %s600_s19, 3  ;;  %s284_s23 = scalar_lea.vmem %s591_s1, %s600_s19 }
   0xe   : > { %s279_s26 = scalar_lea.vmem %s590_s0, %s466_s20  ;;  %s289_s29 = scalar_lea.vmem %s592_s2, %s600_s19  ;;  %v313_v0 = vld [vmem:[%s284_s23] sm:$0x3] }
   0xf   : > { %s299_s6 = scalar_lea.vmem %s593_s3, %s466_s20  ;;  %v311_v1 = vld [vmem:[%s279_s26] sm:$0xff]  ;;  %v312_v2 = vld [vmem:[%s279_s26 + $0x8] sm:$0xff]  ;;  %v315_v3 = vperm.slane %v313_v0, 0  ;;  %v316_v4 = vperm.slane %v313_v0, 1  ;;  %s309_s9 = scalar_lea.vmem %s594_s4, %s466_s20 }
  0x10   : > { %v321_v5 = vld [vmem:[%s289_s29] sm:$0x3]  ;;  %v330_v11 = vld [vmem:[%s299_s6 + $0x8] sm:$0xff] }
  0x11   : > { %v323_v6 = vperm.slane %v321_v5, 0  ;;  %v324_v7 = vperm.slane %v321_v5, 1  ;;  %v319_v8 = vmul.f32 %v315_v3, %v311_v1  ;;  %v320_v9 = vmul.f32 %v316_v4, %v312_v2  ;;  %v329_v10 = vld [vmem:[%s299_s6] sm:$0xff] }
  0x13   : > { %v327_v12 = vadd.f32 %v323_v6, %v319_v8  ;;  %v328_v13 = vadd.f32 %v324_v7, %v320_v9 }
  0x15   : > { %v331_v14 = vadd.f32 %v329_v10, %v327_v12  ;;  %v332_v15 = vadd.f32 %v330_v11, %v328_v13 }
  0x17   : > { %v333_v16 = vmax.f32 %v331_v14, 0.0  ;;  %v334_v17 = vmax.f32 %v332_v15, 0.0 }
  0x19   : > { %335 = vst [vmem:[%s309_s9] sm:$0xff] %v333_v16 }
  0x1a   : > { %336 = vst [vmem:[%s309_s9 + $0x8] sm:$0xff] %v334_v17 }
  0x1b PF: > { %s14_s17 = sadd.s32 1, %s521_s17   ;;  %s595_s15 = smov %s517_s16 }
  0x1c   : > { %p11_p5 = scmp.ge.s32.totalorder %s14_s17, 4   ;;  %s596_s16 = smov %s598_s18 }
  0x1e   :  { %13 = sbr.rel (!%p11_p5) target bundleno = 2 (0x2), region = 75 }

// kernel: _lambda_.46
= control target key start
LH: loop header
LB: loop body
LE: loop exit
PB: predicated region body
PF: predicated region fallthrough
CT: control target
= control target key end

     0   :  { %s1852_s15 = smov 0   ;;  %s1854_s16 = smov 0   ;;  %s2253_s0 = inlined_call_operand.vmem [shape: bf16[8,4608], index: 0, kind: input, shape index: {}]   ;;  %s2254_s1 = inlined_call_operand.vmem [shape: bf16[4608,512], index: 1, kind: input, shape index: {}]   ;;  %s2255_s2 = inlined_call_operand.vmem [shape: f32[8,512], index: 2, kind: output, shape index: {0}]   ;;  %s2256_s3 = inlined_call_operand.vmem [shape: f32[1,1,512], index: 3, kind: output, shape index: {1}]   ;;  %s2257_s4 = inlined_call_operand.vmem [shape: f32[1,1,512], index: 4, kind: output, shape index: {2}]  }
   0x1   :  { %s1856_s17 = smov 0   ;;  %s1858_s18 = smov 0  }
   0x2   :  { %s1860_s19 = smov 0   ;;  %s1862_s20 = smov 0  }
   0x3   :  { %s1864_s21 = smov 0  }
   0x4 LB: > { %s27_s22 = sadd.s32 1, %s1816_s19  ;;  %s30_s23 = sadd.s32 1, %s1820_s20  ;;  %s1824_s21 = sphi %s1864_s21, %s15_s21   ;;  %s1820_s20 = sphi %s1862_s20, %s2263_s20   ;;  %s1816_s19 = sphi %s1860_s19, %s2262_s19   ;;  %s1812_s18 = sphi %s1858_s18, %s2261_s18   ;;  %s1808_s17 = sphi %s1856_s17, %s2260_s17   ;;  %s1804_s16 = sphi %s1854_s16, %s2259_s16   ;;  %s1800_s15 = sphi %s1852_s15, %s2258_s15  }
   0x5   : > { %p28_p0 = scmp.ge.s32.totalorder %s27_s22, 9  ;;  %p78_p1 = scmp.ne.s32.totalorder %s1804_s16, %s1800_s15 }
   0x6   : > { %p79_p2 = scmp.eq.s32.totalorder %s1824_s21, 0  ;;  %s71_s27 = sadd.s32 1, %s1804_s16 }
   0x7   : > { %s2265_s22 = smov (%p28_p0, %s27_s22), 0  ;;  %s2267_s23 = smov (!%p28_p0, %s30_s23), %s1820_s20 }
   0x8   : > { %p80_p3 = por %p79_p2, %p78_p1  ;;  %p32_p4 = scmp.ge.s32.totalorder %s2267_s23, 2 }
   0x9   : > { %s66_s24 = ssub.s32 %s1816_s19, %s2265_s22  ;;  %p1374_p6 = scmp.ge.s32.totalorder %s1824_s21, 18 }
   0xa   : > { %s2269_s23 = smov (%p32_p4, %s2267_s23), 0 }
   0xb   : > { %s67_s25 = ssub.s32 %s1820_s20, %s2269_s23  ;;  %188 = sbr.rel (%p1374_p6) target bundleno = 87 (0x57), region = 16 }
   0xc   : > { %s68_s26 = sor.u32 %s67_s25, %s66_s24 }
   0xd   : > { %p69_p5 = scmp.eq.s32.totalorder %s68_s26, 0 }
   0xf   : > { %s1903_s28 = scalar_select %p69_p5, %s1804_s16, %s71_s27  }
  0x10   : > { %204 = sbr.rel (!%p80_p3) target bundleno = 87 (0x57), region = 24  ;;  %s206_s29 = sand.u32 (%p80_p3), 1, %s1804_s16  }
  0x11   : > { %s1377_s30 = sshll.u32 (%p80_p3), %s1820_s20, 1  ;;  %s1375_s5 = sshll.u32 (%p80_p3), %s206_s29, 9 }
  0x12   : > { %s1648_s6 = sshll.u32 (%p80_p3), %s1816_s19, 8  ;;  %s1917_s12 = scalar_lea.vmem (%p80_p3), [#allocation3], %s1375_s5 }
  0x13   : > { %s212_s7 = sadd.s32 (%p80_p3), %s1648_s6, %s1377_s30 }
  0x14   : > { %s1379_s8 = sshll.u32 (%p80_p3), %s212_s7, 2 }
  0x15   : > { %s1912_s11 = scalar_lea.vmem %s2254_s1, %s1379_s8 }
  0x16   : > { %v369_v0 = vld [vmem:[%s1912_s11] sm:$0xff]  ;;  %v371_v1 = vld [vmem:[%s1912_s11 + $0x10] sm:$0xff] }
  0x17   : > { %v373_v2 = vld [vmem:[%s1912_s11 + $0x20] sm:$0xff]  ;;  %370 = vst [vmem:[%s1917_s12] sm:$0xff] %v369_v0  ;;  %v375_v3 = vld [vmem:[%s1912_s11 + $0x30] sm:$0xff] }
  0x18   : > { %372 = vst [vmem:[%s1917_s12 + $0x8] sm:$0xff] %v371_v1  ;;  %v377_v4 = vld [vmem:[%s1912_s11 + $0x40] sm:$0xff]  ;;  %v379_v5 = vld [vmem:[%s1912_s11 + $0x50] sm:$0xff] }
  0x19   : > { %374 = vst [vmem:[%s1917_s12 + $0x10] sm:$0xff] %v373_v2  ;;  %v381_v6 = vld [vmem:[%s1912_s11 + $0x60] sm:$0xff]  ;;  %v383_v7 = vld [vmem:[%s1912_s11 + $0x70] sm:$0xff] }
  0x1a   : > { %376 = vst [vmem:[%s1917_s12 + $0x18] sm:$0xff] %v375_v3  ;;  %v385_v8 = vld [vmem:[%s1912_s11 + $0x80] sm:$0xff]  ;;  %v387_v9 = vld [vmem:[%s1912_s11 + $0x90] sm:$0xff] }
  0x1b   : > { %378 = vst [vmem:[%s1917_s12 + $0x20] sm:$0xff] %v377_v4  ;;  %v389_v10 = vld [vmem:[%s1912_s11 + $0xa0] sm:$0xff]  ;;  %v391_v11 = vld [vmem:[%s1912_s11 + $0xb0] sm:$0xff] }
  0x1c   : > { %380 = vst [vmem:[%s1917_s12 + $0x28] sm:$0xff] %v379_v5  ;;  %v393_v12 = vld [vmem:[%s1912_s11 + $0xc0] sm:$0xff]  ;;  %v395_v13 = vld [vmem:[%s1912_s11 + $0xd0] sm:$0xff] }
  0x1d   : > { %382 = vst [vmem:[%s1917_s12 + $0x30] sm:$0xff] %v381_v6  ;;  %v397_v14 = vld [vmem:[%s1912_s11 + $0xe0] sm:$0xff]  ;;  %v399_v15 = vld [vmem:[%s1912_s11 + $0xf0] sm:$0xff] }
  0x1e   : > { %384 = vst [vmem:[%s1917_s12 + $0x38] sm:$0xff] %v383_v7  ;;  %v401_v16 = vld [vmem:[%s1912_s11 + $0x100] sm:$0xff]  ;;  %v403_v17 = vld [vmem:[%s1912_s11 + $0x110] sm:$0xff] }
  0x1f   : > { %386 = vst [vmem:[%s1917_s12 + $0x40] sm:$0xff] %v385_v8  ;;  %v405_v18 = vld [vmem:[%s1912_s11 + $0x120] sm:$0xff]  ;;  %v407_v19 = vld [vmem:[%s1912_s11 + $0x130] sm:$0xff] }
  0x20   : > { %388 = vst [vmem:[%s1917_s12 + $0x48] sm:$0xff] %v387_v9  ;;  %v409_v20 = vld [vmem:[%s1912_s11 + $0x140] sm:$0xff]  ;;  %v411_v21 = vld [vmem:[%s1912_s11 + $0x150] sm:$0xff] }
  0x21   : > { %390 = vst [vmem:[%s1917_s12 + $0x50] sm:$0xff] %v389_v10  ;;  %v413_v22 = vld [vmem:[%s1912_s11 + $0x160] sm:$0xff]  ;;  %v415_v23 = vld [vmem:[%s1912_s11 + $0x170] sm:$0xff] }
  0x22   : > { %392 = vst [vmem:[%s1917_s12 + $0x58] sm:$0xff] %v391_v11  ;;  %v417_v24 = vld [vmem:[%s1912_s11 + $0x180] sm:$0xff]  ;;  %v419_v25 = vld [vmem:[%s1912_s11 + $0x190] sm:$0xff] }
  0x23   : > { %394 = vst [vmem:[%s1917_s12 + $0x60] sm:$0xff] %v393_v12  ;;  %v421_v26 = vld [vmem:[%s1912_s11 + $0x1a0] sm:$0xff]  ;;  %v423_v27 = vld [vmem:[%s1912_s11 + $0x1b0] sm:$0xff] }
  0x24   : > { %396 = vst [vmem:[%s1917_s12 + $0x68] sm:$0xff] %v395_v13  ;;  %v425_v28 = vld [vmem:[%s1912_s11 + $0x1c0] sm:$0xff]  ;;  %v427_v29 = vld [vmem:[%s1912_s11 + $0x1d0] sm:$0xff] }
  0x25   : > { %398 = vst [vmem:[%s1917_s12 + $0x70] sm:$0xff] %v397_v14  ;;  %v429_v30 = vld [vmem:[%s1912_s11 + $0x1e0] sm:$0xff]  ;;  %v431_v31 = vld [vmem:[%s1912_s11 + $0x1f0] sm:$0xff] }
  0x26   : > { %400 = vst [vmem:[%s1917_s12 + $0x78] sm:$0xff] %v399_v15  ;;  %v433_v32 = vld [vmem:[%s1912_s11 + $0x200] sm:$0xff]  ;;  %v435_v33 = vld [vmem:[%s1912_s11 + $0x210] sm:$0xff] }
  0x27   : > { %402 = vst [vmem:[%s1917_s12 + $0x80] sm:$0xff] %v401_v16  ;;  %v437_v34 = vld [vmem:[%s1912_s11 + $0x220] sm:$0xff]  ;;  %v439_v35 = vld [vmem:[%s1912_s11 + $0x230] sm:$0xff] }
  0x28   : > { %404 = vst [vmem:[%s1917_s12 + $0x88] sm:$0xff] %v403_v17  ;;  %v441_v36 = vld [vmem:[%s1912_s11 + $0x240] sm:$0xff]  ;;  %v443_v37 = vld [vmem:[%s1912_s11 + $0x250] sm:$0xff] }
  0x29   : > { %406 = vst [vmem:[%s1917_s12 + $0x90] sm:$0xff] %v405_v18  ;;  %v445_v38 = vld [vmem:[%s1912_s11 + $0x260] sm:$0xff]  ;;  %v447_v39 = vld [vmem:[%s1912_s11 + $0x270] sm:$0xff] }
  0x2a   : > { %408 = vst [vmem:[%s1917_s12 + $0x98] sm:$0xff] %v407_v19  ;;  %v449_v40 = vld [vmem:[%s1912_s11 + $0x280] sm:$0xff]  ;;  %v451_v41 = vld [vmem:[%s1912_s11 + $0x290] sm:$0xff] }
  0x2b   : > { %410 = vst [vmem:[%s1917_s12 + $0xa0] sm:$0xff] %v409_v20  ;;  %v453_v42 = vld [vmem:[%s1912_s11 + $0x2a0] sm:$0xff]  ;;  %v455_v43 = vld [vmem:[%s1912_s11 + $0x2b0] sm:$0xff] }
  0x2c   : > { %412 = vst [vmem:[%s1917_s12 + $0xa8] sm:$0xff] %v411_v21  ;;  %v457_v44 = vld [vmem:[%s1912_s11 + $0x2c0] sm:$0xff]  ;;  %v459_v45 = vld [vmem:[%s1912_s11 + $0x2d0] sm:$0xff] }
  0x2d   : > { %414 = vst [vmem:[%s1917_s12 + $0xb0] sm:$0xff] %v413_v22  ;;  %v461_v46 = vld [vmem:[%s1912_s11 + $0x2e0] sm:$0xff]  ;;  %v463_v47 = vld [vmem:[%s1912_s11 + $0x2f0] sm:$0xff] }
  0x2e   : > { %416 = vst [vmem:[%s1917_s12 + $0xb8] sm:$0xff] %v415_v23  ;;  %v465_v48 = vld [vmem:[%s1912_s11 + $0x300] sm:$0xff]  ;;  %v467_v49 = vld [vmem:[%s1912_s11 + $0x310] sm:$0xff] }
  0x2f   : > { %418 = vst [vmem:[%s1917_s12 + $0xc0] sm:$0xff] %v417_v24  ;;  %v469_v50 = vld [vmem:[%s1912_s11 + $0x320] sm:$0xff]  ;;  %v471_v51 = vld [vmem:[%s1912_s11 + $0x330] sm:$0xff] }
  0x30   : > { %420 = vst [vmem:[%s1917_s12 + $0xc8] sm:$0xff] %v419_v25  ;;  %v473_v52 = vld [vmem:[%s1912_s11 + $0x340] sm:$0xff]  ;;  %v475_v53 = vld [vmem:[%s1912_s11 + $0x350] sm:$0xff] }
  0x31   : > { %422 = vst [vmem:[%s1917_s12 + $0xd0] sm:$0xff] %v421_v26  ;;  %v477_v54 = vld [vmem:[%s1912_s11 + $0x360] sm:$0xff]  ;;  %v479_v55 = vld [vmem:[%s1912_s11 + $0x370] sm:$0xff] }
  0x32   : > { %424 = vst [vmem:[%s1917_s12 + $0xd8] sm:$0xff] %v423_v27  ;;  %v481_v56 = vld [vmem:[%s1912_s11 + $0x380] sm:$0xff]  ;;  %v483_v57 = vld [vmem:[%s1912_s11 + $0x390] sm:$0xff] }
  0x33   : > { %426 = vst [vmem:[%s1917_s12 + $0xe0] sm:$0xff] %v425_v28  ;;  %v485_v58 = vld [vmem:[%s1912_s11 + $0x3a0] sm:$0xff]  ;;  %v487_v59 = vld [vmem:[%s1912_s11 + $0x3b0] sm:$0xff] }
  0x34   : > { %428 = vst [vmem:[%s1917_s12 + $0xe8] sm:$0xff] %v427_v29  ;;  %v489_v60 = vld [vmem:[%s1912_s11 + $0x3c0] sm:$0xff]  ;;  %v491_v61 = vld [vmem:[%s1912_s11 + $0x3d0] sm:$0xff] }
  0x35   : > { %430 = vst [vmem:[%s1917_s12 + $0xf0] sm:$0xff] %v429_v30  ;;  %v493_v62 = vld [vmem:[%s1912_s11 + $0x3e0] sm:$0xff]  ;;  %v495_v63 = vld [vmem:[%s1912_s11 + $0x3f0] sm:$0xff] }
  0x36   : > { %432 = vst [vmem:[%s1917_s12 + $0xf8] sm:$0xff] %v431_v31 }
  0x37   : > { %434 = vst [vmem:[%s1917_s12 + $0x100] sm:$0xff] %v433_v32 }
  0x38   : > { %436 = vst [vmem:[%s1917_s12 + $0x108] sm:$0xff] %v435_v33 }
  0x39   : > { %438 = vst [vmem:[%s1917_s12 + $0x110] sm:$0xff] %v437_v34 }
  0x3a   : > { %440 = vst [vmem:[%s1917_s12 + $0x118] sm:$0xff] %v439_v35 }
  0x3b   : > { %442 = vst [vmem:[%s1917_s12 + $0x120] sm:$0xff] %v441_v36 }
  0x3c   : > { %444 = vst [vmem:[%s1917_s12 + $0x128] sm:$0xff] %v443_v37 }
  0x3d   : > { %446 = vst [vmem:[%s1917_s12 + $0x130] sm:$0xff] %v445_v38 }
  0x3e   : > { %448 = vst [vmem:[%s1917_s12 + $0x138] sm:$0xff] %v447_v39 }
  0x3f   : > { %450 = vst [vmem:[%s1917_s12 + $0x140] sm:$0xff] %v449_v40 }
  0x40   : > { %452 = vst [vmem:[%s1917_s12 + $0x148] sm:$0xff] %v451_v41 }
  0x41   : > { %454 = vst [vmem:[%s1917_s12 + $0x150] sm:$0xff] %v453_v42 }
  0x42   : > { %456 = vst [vmem:[%s1917_s12 + $0x158] sm:$0xff] %v455_v43 }
  0x43   : > { %458 = vst [vmem:[%s1917_s12 + $0x160] sm:$0xff] %v457_v44 }
  0x44   : > { %460 = vst [vmem:[%s1917_s12 + $0x168] sm:$0xff] %v459_v45 }
  0x45   : > { %462 = vst [vmem:[%s1917_s12 + $0x170] sm:$0xff] %v461_v46 }
  0x46   : > { %464 = vst [vmem:[%s1917_s12 + $0x178] sm:$0xff] %v463_v47 }
  0x47   : > { %466 = vst [vmem:[%s1917_s12 + $0x180] sm:$0xff] %v465_v48 }
  0x48   : > { %468 = vst [vmem:[%s1917_s12 + $0x188] sm:$0xff] %v467_v49 }
  0x49   : > { %470 = vst [vmem:[%s1917_s12 + $0x190] sm:$0xff] %v469_v50 }
  0x4a   : > { %472 = vst [vmem:[%s1917_s12 + $0x198] sm:$0xff] %v471_v51 }
  0x4b   : > { %474 = vst [vmem:[%s1917_s12 + $0x1a0] sm:$0xff] %v473_v52 }
  0x4c   : > { %476 = vst [vmem:[%s1917_s12 + $0x1a8] sm:$0xff] %v475_v53 }
  0x4d   : > { %478 = vst [vmem:[%s1917_s12 + $0x1b0] sm:$0xff] %v477_v54 }
  0x4e   : > { %480 = vst [vmem:[%s1917_s12 + $0x1b8] sm:$0xff] %v479_v55 }
  0x4f   : > { %482 = vst [vmem:[%s1917_s12 + $0x1c0] sm:$0xff] %v481_v56 }
  0x50   : > { %484 = vst [vmem:[%s1917_s12 + $0x1c8] sm:$0xff] %v483_v57 }
  0x51   : > { %486 = vst [vmem:[%s1917_s12 + $0x1d0] sm:$0xff] %v485_v58 }
  0x52   : > { %488 = vst [vmem:[%s1917_s12 + $0x1d8] sm:$0xff] %v487_v59 }
  0x53   : > { %490 = vst [vmem:[%s1917_s12 + $0x1e0] sm:$0xff] %v489_v60 }
  0x54   : > { %492 = vst [vmem:[%s1917_s12 + $0x1e8] sm:$0xff] %v491_v61 }
  0x55   : > { %494 = vst [vmem:[%s1917_s12 + $0x1f0] sm:$0xff] %v493_v62 }
  0x56   : > { %496 = vst [vmem:[%s1917_s12 + $0x1f8] sm:$0xff] %v495_v63 }
  0x57 PF: > { %p1380_p7 = scmp.ge.s32.totalorder %s1824_s21, 1  ;;  %p501_p8 = scmp.lt.s32.totalorder %s1824_s21, 19 }
  0x59   : > { %p502_p9 = pnand %p1380_p7, %p501_p8 }
  0x5a   : > { %s508_s13 = sand.u32 (!%p502_p9), 1, %s1800_s15   ;;  %s1382_s14 = sshll.u32 (!%p502_p9), %s1808_s17, 2 }
  0x5b   : > { %505 = sbr.rel (%p502_p9) target bundleno = 340 (0x154), region = 62  ;;  %s1381_s24 = sshll.u32 (!%p502_p9), %s508_s13, 9 }
  0x5c   : > { %p565_p10 = scmp.lt.s32.totalorder (!%p502_p9), %s1382_s14, 35  ;;  %s1384_s25 = sshll.u32 (!%p502_p9), %s1812_s18, 1 }
  0x5d   : > { %p577_p11 = scmp.lt.s32.totalorder (!%p502_p9), %s1384_s25, 3  ;;  %s2070_s13 = scalar_lea.vmem (!%p502_p9), [#allocation3], %s1381_s24 }
  0x5e   : > { %p1388_p12 = scmp.ne.s32.totalorder (!%p502_p9), %s1808_s17, 0 }
  0x60   : > { %s2271_s14 = smov (!%p565_p10, %s1382_s14), 35  ;;  %s2273_s25 = smov (!%p577_p11, %s1384_s25), 3 }
  0x61   : > { %s1383_s26 = sshll.u32 %s2271_s14, 2  ;;  %s1385_s5 = sshll.u32 %s2273_s25, 3 }
  0x62   : > { %s2052_s30 = scalar_lea.vmem %s2253_s0, %s1383_s26  ;;  %s591_s7 = scalar_lea.vmem %s2256_s3, %s2273_s25 }
  0x63   : > { %s2064_s9 = scalar_lea.vmem %s2255_s2, %s1385_s5  ;;  %s600_s12 = scalar_lea.vmem %s2257_s4, %s2273_s25 }
  0x64   : > { %605 = sbr.rel (%p1388_p12) target bundleno = 108 (0x6c), region = 70 }
  0x69   : > { %v1826_v0 = vmov 0.0  }
  0x6a   : > { %606 = vst [vmem:[#allocation2] sm:$0xff] %v1826_v0 }
  0x6b   : > { %607 = vst [vmem:[#allocation2 + $0x8] sm:$0xff] %v1826_v0 }
  0x6c PF: > { %v1447_v1 = vld [vmem:[%s2070_s13 + $0x70] sm:$0xf]  ;;  %v1664_v2 = vld [vmem:[%s2070_s13 + $0x74] sm:$0xf0]  ;;  %v1439_v12 = vld [vmem:[%s2070_s13 + $0x60] sm:$0xf] }
  0x6d   : > { %v1511_v3 = vld [vmem:[%s2070_s13 + $0xf0] sm:$0xf]  ;;  %v1448_v4 = vor.u32 %v1664_v2, %v1447_v1  ;;  %v1680_v5 = vld [vmem:[%s2070_s13 + $0xf4] sm:$0xf0]  ;;  %v1662_v14 = vld [vmem:[%s2070_s13 + $0x64] sm:$0xf0] }
  0x6e   : > { %v1575_v6 = vld [vmem:[%s2070_s13 + $0x170] sm:$0xf]  ;;  %v1696_v7 = vld [vmem:[%s2070_s13 + $0x174] sm:$0xf0]  ;;  %v1512_v8 = vor.u32 %v1680_v5, %v1511_v3  ;;  %v1503_v15 = vld [vmem:[%s2070_s13 + $0xe0] sm:$0xf]  ;;  %v1440_v17 = vor.u32 %v1662_v14, %v1439_v12 }
  0x6f   : > { %v1576_v9 = vor.u32 %v1696_v7, %v1575_v6  ;;  %v1639_v10 = vld [vmem:[%s2070_s13 + $0x1f0] sm:$0xf]  ;;  %v1712_v11 = vld [vmem:[%s2070_s13 + $0x1f4] sm:$0xf0]  ;;  %1010 = vmatpush.bf16.msra.mxu0 %v1448_v4  ;;  %v1678_v16 = vld [vmem:[%s2070_s13 + $0xe4] sm:$0xf0] }
  0x70   : > { %v1640_v13 = vor.u32 %v1712_v11, %v1639_v10  ;;  %1023 = vmatpush.bf16.msra.mxu1 %v1512_v8  ;;  %v1504_v18 = vor.u32 %v1678_v16, %v1503_v15  ;;  %v1567_v19 = vld [vmem:[%s2070_s13 + $0x160] sm:$0xf]  ;;  %v1694_v20 = vld [vmem:[%s2070_s13 + $0x164] sm:$0xf0]  ;;  %v1431_v24 = vld [vmem:[%s2070_s13 + $0x50] sm:$0xf] }
  0x71   : > { %1036 = vmatpush.bf16.msra.mxu2 %v1576_v9  ;;  %v1631_v21 = vld [vmem:[%s2070_s13 + $0x1e0] sm:$0xf]  ;;  %v1568_v22 = vor.u32 %v1694_v20, %v1567_v19  ;;  %v1710_v23 = vld [vmem:[%s2070_s13 + $0x1e4] sm:$0xf0]  ;;  %v1660_v25 = vld [vmem:[%s2070_s13 + $0x54] sm:$0xf0] }
  0x72   : > { %1049 = vmatpush.bf16.msra.mxu3 %v1640_v13  ;;  %v1632_v26 = vor.u32 %v1710_v23, %v1631_v21  ;;  %v1495_v27 = vld [vmem:[%s2070_s13 + $0xd0] sm:$0xf]  ;;  %v1676_v28 = vld [vmem:[%s2070_s13 + $0xd4] sm:$0xf0]  ;;  %v1432_v30 = vor.u32 %v1660_v25, %v1431_v24  ;;  %v1423_v36 = vld [vmem:[%s2070_s13 + $0x40] sm:$0xf] }
  0x73   : > { %v1559_v29 = vld [vmem:[%s2070_s13 + $0x150] sm:$0xf]  ;;  %1011 = vmatpush.bf16.msra.mxu0 %v1440_v17  ;;  %v1692_v31 = vld [vmem:[%s2070_s13 + $0x154] sm:$0xf0]  ;;  %v1496_v34 = vor.u32 %v1676_v28, %v1495_v27  ;;  %v1658_v37 = vld [vmem:[%s2070_s13 + $0x44] sm:$0xf0] }
  0x74   : > { %v1623_v32 = vld [vmem:[%s2070_s13 + $0x1d0] sm:$0xf]  ;;  %v1708_v33 = vld [vmem:[%s2070_s13 + $0x1d4] sm:$0xf0]  ;;  %1024 = vmatpush.bf16.msra.mxu1 %v1504_v18  ;;  %v1560_v35 = vor.u32 %v1692_v31, %v1559_v29  ;;  %v1487_v38 = vld [vmem:[%s2070_s13 + $0xc0] sm:$0xf]  ;;  %v1424_v45 = vor.u32 %v1658_v37, %v1423_v36 }
  0x75   : > { %1037 = vmatpush.bf16.msra.mxu2 %v1568_v22  ;;  %v1624_v39 = vor.u32 %v1708_v33, %v1623_v32  ;;  %v1674_v40 = vld [vmem:[%s2070_s13 + $0xc4] sm:$0xf0]  ;;  %v1551_v41 = vld [vmem:[%s2070_s13 + $0x140] sm:$0xf]  ;;  %v1415_v48 = vld [vmem:[%s2070_s13 + $0x30] sm:$0xf] }
  0x76   : > { %1050 = vmatpush.bf16.msra.mxu3 %v1632_v26  ;;  %v1690_v42 = vld [vmem:[%s2070_s13 + $0x144] sm:$0xf0]  ;;  %v1615_v43 = vld [vmem:[%s2070_s13 + $0x1c0] sm:$0xf]  ;;  %v1488_v46 = vor.u32 %v1674_v40, %v1487_v38  ;;  %v1656_v49 = vld [vmem:[%s2070_s13 + $0x34] sm:$0xf0] }
  0x77   : > { %v1706_v44 = vld [vmem:[%s2070_s13 + $0x1c4] sm:$0xf0]  ;;  %1012 = vmatpush.bf16.msra.mxu0 %v1432_v30  ;;  %v1552_v47 = vor.u32 %v1690_v42, %v1551_v41  ;;  %v1479_v50 = vld [vmem:[%s2070_s13 + $0xb0] sm:$0xf]  ;;  %v1672_v52 = vld [vmem:[%s2070_s13 + $0xb4] sm:$0xf0]  ;;  %v1416_v57 = vor.u32 %v1656_v49, %v1415_v48 }
  0x78   : > { %1025 = vmatpush.bf16.msra.mxu1 %v1496_v34  ;;  %v1616_v51 = vor.u32 %v1706_v44, %v1615_v43  ;;  %v1543_v53 = vld [vmem:[%s2070_s13 + $0x130] sm:$0xf]  ;;  %v1688_v54 = vld [vmem:[%s2070_s13 + $0x134] sm:$0xf0]  ;;  %v1480_v58 = vor.u32 %v1672_v52, %v1479_v50  ;;  %v1407_v60 = vld [vmem:[%s2070_s13 + $0x20] sm:$0xf] }
  0x79   : > { %1038 = vmatpush.bf16.msra.mxu2 %v1560_v35  ;;  %v1607_v55 = vld [vmem:[%s2070_s13 + $0x1b0] sm:$0xf]  ;;  %v1704_v56 = vld [vmem:[%s2070_s13 + $0x1b4] sm:$0xf0]  ;;  %v1544_v59 = vor.u32 %v1688_v54, %v1543_v53  ;;  %v1654_v61 = vld [vmem:[%s2070_s13 + $0x24] sm:$0xf0] }
  0x7a   : > { %1051 = vmatpush.bf16.msra.mxu3 %v1624_v39  ;;  %v1471_v62 = vld [vmem:[%s2070_s13 + $0xa0] sm:$0xf]  ;;  %v1608_v63 = vor.u32 %v1704_v56, %v1607_v55  ;;  %v1670_v0 = vld [vmem:[%s2070_s13 + $0xa4] sm:$0xf0]  ;;  %v1408_v5 = vor.u32 %v1654_v61, %v1407_v60  ;;  %v1399_v8 = vld [vmem:[%s2070_s13 + $0x10] sm:$0xf] }
  0x7b   : > { %1013 = vmatpush.bf16.msra.mxu0 %v1424_v45  ;;  %v1535_v1 = vld [vmem:[%s2070_s13 + $0x120] sm:$0xf]  ;;  %v1686_v2 = vld [vmem:[%s2070_s13 + $0x124] sm:$0xf0]  ;;  %v1472_v6 = vor.u32 %v1670_v0, %v1471_v62  ;;  %v1652_v9 = vld [vmem:[%s2070_s13 + $0x14] sm:$0xf0] }
  0x7c   : > { %1026 = vmatpush.bf16.msra.mxu1 %v1488_v46  ;;  %v1599_v3 = vld [vmem:[%s2070_s13 + $0x1a0] sm:$0xf]  ;;  %v1702_v4 = vld [vmem:[%s2070_s13 + $0x1a4] sm:$0xf0]  ;;  %v1536_v7 = vor.u32 %v1686_v2, %v1535_v1  ;;  %v1463_v10 = vld [vmem:[%s2070_s13 + $0x90] sm:$0xf]  ;;  %v1400_v17 = vor.u32 %v1652_v9, %v1399_v8 }
  0x7d   : > { %1039 = vmatpush.bf16.msra.mxu2 %v1552_v47  ;;  %v1600_v11 = vor.u32 %v1702_v4, %v1599_v3  ;;  %v1668_v12 = vld [vmem:[%s2070_s13 + $0x94] sm:$0xf0]  ;;  %v1527_v13 = vld [vmem:[%s2070_s13 + $0x110] sm:$0xf]  ;;  %v1391_v18 = vld [vmem:[%s2070_s13] sm:$0xf] }
  0x7e   : > { %1052 = vmatpush.bf16.msra.mxu3 %v1616_v51  ;;  %v1684_v14 = vld [vmem:[%s2070_s13 + $0x114] sm:$0xf0]  ;;  %v1591_v15 = vld [vmem:[%s2070_s13 + $0x190] sm:$0xf]  ;;  %v1650_v19 = vld [vmem:[%s2070_s13 + $0x4] sm:$0xf0]  ;;  %v1464_v21 = vor.u32 %v1668_v12, %v1463_v10 }
  0x7f   : > { %1014 = vmatpush.bf16.msra.mxu0 %v1416_v57  ;;  %v1700_v16 = vld [vmem:[%s2070_s13 + $0x194] sm:$0xf0]  ;;  %v1455_v20 = vld [vmem:[%s2070_s13 + $0x80] sm:$0xf]  ;;  %v1528_v22 = vor.u32 %v1684_v14, %v1527_v13  ;;  %v1666_v23 = vld [vmem:[%s2070_s13 + $0x84] sm:$0xf0]  ;;  %v1392_v33 = vor.u32 %v1650_v19, %v1391_v18 }
  0x80   : > { %1027 = vmatpush.bf16.msra.mxu1 %v1480_v58  ;;  %v1519_v24 = vld [vmem:[%s2070_s13 + $0x100] sm:$0xf]  ;;  %v1682_v25 = vld [vmem:[%s2070_s13 + $0x104] sm:$0xf0]  ;;  %v1592_v26 = vor.u32 %v1700_v16, %v1591_v15  ;;  %v1663_v29 = vld [vmem:[%s2070_s13 + $0x74] sm:$0xf]  ;;  %v1456_v38 = vor.u32 %v1666_v23, %v1455_v20 }
  0x81   : > { %1040 = vmatpush.bf16.msra.mxu2 %v1544_v59  ;;  %v1583_v27 = vld [vmem:[%s2070_s13 + $0x180] sm:$0xf]  ;;  %v1698_v28 = vld [vmem:[%s2070_s13 + $0x184] sm:$0xf0]  ;;  %v1449_v30 = vld [vmem:[%s2070_s13 + $0x78] sm:$0xf0]  ;;  %v1520_v39 = vor.u32 %v1682_v25, %v1519_v24 }
  0x82   : > { %1053 = vmatpush.bf16.msra.mxu3 %v1608_v63  ;;  %v1679_v31 = vld [vmem:[%s2070_s13 + $0xf4] sm:$0xf]  ;;  %v611_v32 = vld [vmem:[%s2052_s30 + $0x8] sm:$0xff]  ;;  %v1584_v43 = vor.u32 %v1698_v28, %v1583_v27  ;;  %v1452_v44 = vor.u32 %v1663_v29, %v1449_v30  ;;  %v1661_v48 = vld [vmem:[%s2070_s13 + $0x64] sm:$0xf]  ;;  %p1645_p13 = scmp.ne.s32.totalorder %s1808_s17, 8 }
  0x83   : > { %1015 = vmatpush.bf16.msra.mxu0 %v1408_v5  ;;  %v1513_v34 = vld [vmem:[%s2070_s13 + $0xf8] sm:$0xf0]  ;;  %v1695_v35 = vld [vmem:[%s2070_s13 + $0x174] sm:$0xf]  ;;  %v680_v37 = vunpack.c.l.b16 %v611_v32  ;;  %v681_v42 = vunpack.c.h.b16 %v611_v32  ;;  %v1441_v49 = vld [vmem:[%s2070_s13 + $0x68] sm:$0xf0] }
  0x84   : > { %1028 = vmatpush.bf16.msra.mxu1 %v1472_v6  ;;  %v1577_v36 = vld [vmem:[%s2070_s13 + $0x178] sm:$0xf0]  ;;  %v1711_v40 = vld [vmem:[%s2070_s13 + $0x1f4] sm:$0xf]  ;;  %v1516_v46 = vor.u32 %v1679_v31, %v1513_v34  ;;  %v1677_v50 = vld [vmem:[%s2070_s13 + $0xe4] sm:$0xf]  ;;  %v1444_v62 = vor.u32 %v1661_v48, %v1441_v49 }
  0x85   : > { %1041 = vmatpush.bf16.msra.mxu2 %v1536_v7  ;;  %v1641_v41 = vld [vmem:[%s2070_s13 + $0x1f8] sm:$0xf0]  ;;  %v610_v45 = vld [vmem:[%s2052_s30] sm:$0xff]  ;;  %v1580_v47 = vor.u32 %v1695_v35, %v1577_v36  ;;  %v1505_v54 = vld [vmem:[%s2070_s13 + $0xe8] sm:$0xf0]  ;;  %v2153_v57 = vpack.c.b16 %v680_v37, %v680_v37  ;;  %v2157_v60 = vpack.c.b16 %v681_v42, %v681_v42 }
  0x86   : > { %1054 = vmatpush.bf16.msra.mxu3 %v1600_v11  ;;  %v678_v51 = vunpack.c.l.b16 %v610_v45  ;;  %v679_v52 = vunpack.c.h.b16 %v610_v45  ;;  %v1644_v53 = vor.u32 %v1711_v40, %v1641_v41  ;;  %v1693_v55 = vld [vmem:[%s2070_s13 + $0x164] sm:$0xf]  ;;  %v1569_v56 = vld [vmem:[%s2070_s13 + $0x168] sm:$0xf0]  ;;  %v1508_v0 = vor.u32 %v1677_v50, %v1505_v54  ;;  %v1659_v2 = vld [vmem:[%s2070_s13 + $0x54] sm:$0xf] }
  0x87   : > { %1016 = vmatpush.bf16.msra.mxu0 %v1400_v17  ;;  %v1709_v58 = vld [vmem:[%s2070_s13 + $0x1e4] sm:$0xf]  ;;  %v1633_v59 = vld [vmem:[%s2070_s13 + $0x1e8] sm:$0xf0]  ;;  %v1572_v1 = vor.u32 %v1693_v55, %v1569_v56  ;;  %v1433_v3 = vld [vmem:[%s2070_s13 + $0x58] sm:$0xf0] }
  0x88   : > { %1029 = vmatpush.bf16.msra.mxu1 %v1464_v21  ;;  %v2159_v61 = vpack.c.b16 %v678_v51, %v678_v51  ;;  %v2161_v63 = vpack.c.b16 %v679_v52, %v679_v52  ;;  %v1675_v4 = vld [vmem:[%s2070_s13 + $0xd4] sm:$0xf]  ;;  %v1636_v5 = vor.u32 %v1709_v58, %v1633_v59  ;;  %v1497_v6 = vld [vmem:[%s2070_s13 + $0xd8] sm:$0xf0]  ;;  %v1436_v11 = vor.u32 %v1659_v2, %v1433_v3  ;;  %v1657_v14 = vld [vmem:[%s2070_s13 + $0x44] sm:$0xf] }
  0x89   : > { %1042 = vmatpush.bf16.msra.mxu2 %v1528_v22  ;;  %v1691_v7 = vld [vmem:[%s2070_s13 + $0x154] sm:$0xf]  ;;  %v1561_v8 = vld [vmem:[%s2070_s13 + $0x158] sm:$0xf0]  ;;  %v1500_v12 = vor.u32 %v1675_v4, %v1497_v6  ;;  %v1425_v15 = vld [vmem:[%s2070_s13 + $0x48] sm:$0xf0] }
  0x8a   : > { %1055 = vmatpush.bf16.msra.mxu3 %v1592_v26  ;;  %v1707_v9 = vld [vmem:[%s2070_s13 + $0x1d4] sm:$0xf]  ;;  %v1625_v10 = vld [vmem:[%s2070_s13 + $0x1d8] sm:$0xf0]  ;;  %v1564_v13 = vor.u32 %v1691_v7, %v1561_v8  ;;  %v1673_v16 = vld [vmem:[%s2070_s13 + $0xc4] sm:$0xf]  ;;  %v1428_v23 = vor.u32 %v1657_v14, %v1425_v15 }
  0x8b   : > { %1017 = vmatpush.bf16.msra.mxu0 %v1392_v33  ;;  %v1628_v17 = vor.u32 %v1707_v9, %v1625_v10  ;;  %v1489_v18 = vld [vmem:[%s2070_s13 + $0xc8] sm:$0xf0]  ;;  %v1689_v19 = vld [vmem:[%s2070_s13 + $0x144] sm:$0xf]  ;;  %v1655_v26 = vld [vmem:[%s2070_s13 + $0x34] sm:$0xf] }
  0x8c   : > { %1030 = vmatpush.bf16.msra.mxu1 %v1456_v38  ;;  %v1553_v20 = vld [vmem:[%s2070_s13 + $0x148] sm:$0xf0]  ;;  %v1705_v21 = vld [vmem:[%s2070_s13 + $0x1c4] sm:$0xf]  ;;  %v1492_v24 = vor.u32 %v1673_v16, %v1489_v18  ;;  %v1417_v27 = vld [vmem:[%s2070_s13 + $0x38] sm:$0xf0] }
  0x8d   : > { %1043 = vmatpush.bf16.msra.mxu2 %v1520_v39  ;;  %v1617_v22 = vld [vmem:[%s2070_s13 + $0x1c8] sm:$0xf0]  ;;  %v1556_v25 = vor.u32 %v1689_v19, %v1553_v20  ;;  %v1671_v28 = vld [vmem:[%s2070_s13 + $0xb4] sm:$0xf]  ;;  %v1481_v30 = vld [vmem:[%s2070_s13 + $0xb8] sm:$0xf0]  ;;  %v1420_v35 = vor.u32 %v1655_v26, %v1417_v27 }
  0x8e   : > { %1056 = vmatpush.bf16.msra.mxu3 %v1584_v43  ;;  %1018 = vmatmul.bf16.vlgmr.msra.gmra.mxu0 %v2159_v61  ;;  %v1620_v29 = vor.u32 %v1705_v21, %v1617_v22  ;;  %v1687_v31 = vld [vmem:[%s2070_s13 + $0x134] sm:$0xf]  ;;  %v1545_v32 = vld [vmem:[%s2070_s13 + $0x138] sm:$0xf0]  ;;  %v1484_v36 = vor.u32 %v1671_v28, %v1481_v30  ;;  %v1653_v38 = vld [vmem:[%s2070_s13 + $0x24] sm:$0xf] }
  0x8f   : > { %1062 = vmatpush.bf16.msrb.mxu0 %v1452_v44  ;;  %1031 = vmatmul.bf16.vlgmr.msra.gmra.mxu1 %v2161_v63  ;;  %v1703_v33 = vld [vmem:[%s2070_s13 + $0x1b4] sm:$0xf]  ;;  %v1609_v34 = vld [vmem:[%s2070_s13 + $0x1b8] sm:$0xf0]  ;;  %v1548_v37 = vor.u32 %v1687_v31, %v1545_v32  ;;  %v1409_v39 = vld [vmem:[%s2070_s13 + $0x28] sm:$0xf0] }
  0x90   : > { %1075 = vmatpush.bf16.msrb.mxu1 %v1516_v46  ;;  %1044 = vmatmul.bf16.vlgmr.msra.gmra.mxu2 %v2153_v57  ;;  %v1669_v40 = vld [vmem:[%s2070_s13 + $0xa4] sm:$0xf]  ;;  %v1612_v41 = vor.u32 %v1703_v33, %v1609_v34  ;;  %v1473_v42 = vld [vmem:[%s2070_s13 + $0xa8] sm:$0xf0]  ;;  %v1651_v50 = vld [vmem:[%s2070_s13 + $0x14] sm:$0xf] }
  0x91   : > { %1088 = vmatpush.bf16.msrb.mxu2 %v1580_v47  ;;  %1057 = vmatmul.bf16.vlgmr.msra.gmra.mxu3 %v2157_v60  ;;  %v1685_v43 = vld [vmem:[%s2070_s13 + $0x124] sm:$0xf]  ;;  %v1537_v44 = vld [vmem:[%s2070_s13 + $0x128] sm:$0xf0]  ;;  %v1412_v47 = vor.u32 %v1653_v38, %v1409_v39  ;;  %v1476_v48 = vor.u32 %v1669_v40, %v1473_v42  ;;  %v1401_v51 = vld [vmem:[%s2070_s13 + $0x18] sm:$0xf0] }
  0x92   : > { %1101 = vmatpush.bf16.msrb.mxu3 %v1644_v53  ;;  %v1701_v45 = vld [vmem:[%s2070_s13 + $0x1a4] sm:$0xf]  ;;  %v1601_v46 = vld [vmem:[%s2070_s13 + $0x1a8] sm:$0xf0]  ;;  %v1540_v49 = vor.u32 %v1685_v43, %v1537_v44  ;;  %v1667_v52 = vld [vmem:[%s2070_s13 + $0x94] sm:$0xf] }
  0x93   : > { %1063 = vmatpush.bf16.msrb.mxu0 %v1444_v62  ;;  %v1604_v53 = vor.u32 %v1701_v45, %v1601_v46  ;;  %v1465_v54 = vld [vmem:[%s2070_s13 + $0x98] sm:$0xf0]  ;;  %v1683_v55 = vld [vmem:[%s2070_s13 + $0x114] sm:$0xf]  ;;  %v1404_v62 = vor.u32 %v1651_v50, %v1401_v51  ;;  %v1649_v2 = vld [vmem:[%s2070_s13 + $0x4] sm:$0xf] }
  0x94   : > { %1076 = vmatpush.bf16.msrb.mxu1 %v1508_v0  ;;  %v1529_v56 = vld [vmem:[%s2070_s13 + $0x118] sm:$0xf0]  ;;  %v1699_v58 = vld [vmem:[%s2070_s13 + $0x194] sm:$0xf]  ;;  %v1468_v0 = vor.u32 %v1667_v52, %v1465_v54  ;;  %v1393_v3 = vld [vmem:[%s2070_s13 + $0x8] sm:$0xf0] }
  0x95   : > { %1089 = vmatpush.bf16.msrb.mxu2 %v1572_v1  ;;  %v1593_v59 = vld [vmem:[%s2070_s13 + $0x198] sm:$0xf0]  ;;  %v1532_v1 = vor.u32 %v1683_v55, %v1529_v56  ;;  %v1665_v4 = vld [vmem:[%s2070_s13 + $0x84] sm:$0xf]  ;;  %v1457_v6 = vld [vmem:[%s2070_s13 + $0x88] sm:$0xf0] }
  0x96   : > { %1102 = vmatpush.bf16.msrb.mxu3 %v1636_v5  ;;  %v1596_v5 = vor.u32 %v1699_v58, %v1593_v59  ;;  %v1681_v7 = vld [vmem:[%s2070_s13 + $0x104] sm:$0xf]  ;;  %v1521_v8 = vld [vmem:[%s2070_s13 + $0x108] sm:$0xf0]  ;;  %v608_v21 = vld [vmem:[#allocation2] sm:$0xff] }
  0x97   : > { %1064 = vmatpush.bf16.msrb.mxu0 %v1436_v11  ;;  %v1697_v9 = vld [vmem:[%s2070_s13 + $0x184] sm:$0xf]  ;;  %v1585_v10 = vld [vmem:[%s2070_s13 + $0x188] sm:$0xf0]  ;;  %v1396_v11 = vor.u32 %v1649_v2, %v1393_v3  ;;  %v609_v31 = vld [vmem:[#allocation2 + $0x8] sm:$0xff] }
  0x98   : > { %1077 = vmatpush.bf16.msrb.mxu1 %v1500_v12  ;;  %v1460_v12 = vor.u32 %v1665_v4, %v1457_v6  ;;  %v1588_v14 = vor.u32 %v1697_v9, %v1585_v10 }
  0x99   : > { %1090 = vmatpush.bf16.msrb.mxu2 %v1564_v13  ;;  %v1524_v13 = vor.u32 %v1681_v7, %v1521_v8 }
  0x9a   : > { %1103 = vmatpush.bf16.msrb.mxu3 %v1628_v17 }
  0x9b   : > { %1065 = vmatpush.bf16.msrb.mxu0 %v1428_v23 }
  0x9c   : > { %1078 = vmatpush.bf16.msrb.mxu1 %v1492_v24 }
  0x9d   : > { %1091 = vmatpush.bf16.msrb.mxu2 %v1556_v25 }
  0x9e   : > { %1104 = vmatpush.bf16.msrb.mxu3 %v1620_v29 }
  0x9f   : > { %1066 = vmatpush.bf16.msrb.mxu0 %v1420_v35 }
  0xa0   : > { %1079 = vmatpush.bf16.msrb.mxu1 %v1484_v36 }
  0xa1   : > { %1092 = vmatpush.bf16.msrb.mxu2 %v1548_v37 }
  0xa2   : > { %1105 = vmatpush.bf16.msrb.mxu3 %v1612_v41 }
  0xa3   : > { %1067 = vmatpush.bf16.msrb.mxu0 %v1412_v47 }
  0xa4   : > { %1080 = vmatpush.bf16.msrb.mxu1 %v1476_v48 }
  0xa5   : > { %1093 = vmatpush.bf16.msrb.mxu2 %v1540_v49 }
  0xa6   : > { %1106 = vmatpush.bf16.msrb.mxu3 %v1604_v53 }
  0xa7   : > { %1068 = vmatpush.bf16.msrb.mxu0 %v1404_v62 }
  0xa8   : > { %1081 = vmatpush.bf16.msrb.mxu1 %v1468_v0 }
  0xa9   : > { %1094 = vmatpush.bf16.msrb.mxu2 %v1532_v1 }
  0xaa   : > { %1107 = vmatpush.bf16.msrb.mxu3 %v1596_v5 }
  0xab   : > { %1069 = vmatpush.bf16.msrb.mxu0 %v1396_v11 }
  0xac   : > { %1082 = vmatpush.bf16.msrb.mxu1 %v1460_v12 }
  0xad   : > { %1095 = vmatpush.bf16.msrb.mxu2 %v1524_v13 }
  0xae   : > { %1108 = vmatpush.bf16.msrb.mxu3 %v1588_v14  ;;  %1070 = vmatmul.bf16.vlgmr.msrb.gmra.mxu0 %v2159_v61 }
  0xaf   : > { %1083 = vmatmul.bf16.vlgmr.msrb.gmra.mxu1 %v2161_v63 }
  0xb0   : > { %1096 = vmatmul.bf16.vlgmr.msrb.gmra.mxu2 %v2153_v57 }
  0xb1   : > { %1109 = vmatmul.bf16.vlgmr.msrb.gmra.mxu3 %v2157_v60 }
 0x10b   : > { %v1019_v15 = vpop.f32.mrf.mxu0 }
 0x10c   : > { %v1032_v16 = vpop.f32.mrf.mxu1 }
 0x10d   : > { %v1033_v17 = vadd.f32 %v1032_v16, %v1019_v15 }
 0x113   : > { %v1045_v18 = vpop.f32.mrf.mxu2  ;;  %v1021_v23 = vpop.f32.mrf.mxu0 }
 0x114   : > { %v1046_v19 = vadd.f32 %v1045_v18, %v1033_v17  ;;  %v1058_v20 = vpop.f32.mrf.mxu3  ;;  %v1034_v24 = vpop.f32.mrf.mxu1 }
 0x116   : > { %v1059_v22 = vadd.f32 %v1058_v20, %v1046_v19 }
 0x118   : > { %v1114_v25 = vadd.f32 %v1059_v22, %v608_v21 }
 0x11a   : > { %1116 = vst [vmem:[#allocation2] sm:$0xff] %v1114_v25 }
 0x11b   : > { %v1047_v26 = vpop.f32.mrf.mxu2 }
 0x11c   : > { %v1060_v61 = vpop.f32.mrf.mxu3 }
 0x12b   : > { %v1071_v27 = vpop.f32.mrf.mxu0 }
 0x12c   : > { %v1084_v63 = vpop.f32.mrf.mxu1 }
 0x12d   : > { %v1085_v28 = vadd.f32 %v1084_v63, %v1071_v27 }
 0x133   : > { %v1097_v57 = vpop.f32.mrf.mxu2  ;;  %v1073_v30 = vpop.f32.mrf.mxu0 }
 0x134   : > { %v1098_v29 = vadd.f32 %v1097_v57, %v1085_v28  ;;  %v1110_v60 = vpop.f32.mrf.mxu3  ;;  %v1086_v32 = vpop.f32.mrf.mxu1 }
 0x136   : > { %v1111_v33 = vadd.f32 %v1110_v60, %v1098_v29 }
 0x138   : > { %v1115_v34 = vadd.f32 %v1111_v33, %v609_v31  ;;  %1121 = sbr.rel (%p1645_p13) target bundleno = 340 (0x154), region = 74 }
 0x13a   : > { %1117 = vst [vmem:[#allocation2 + $0x8] sm:$0xff] %v1115_v34 }
 0x13b   : > { %v1099_v35 = vpop.f32.mrf.mxu2 }
 0x13c   : > { %v1112_v36 = vpop.f32.mrf.mxu3 }
 0x13d   : > { %v1122_v37 = vld [vmem:[#allocation2] sm:$0xff]  ;;  %v1144_v55 = vlaneseq  ;;  %vm1141_vm0 = vcmask 1040384  }
 0x13e   : > { %1124 = vst [vmem:[%s2064_s9] sm:$0xff] %v1122_v37  ;;  %v1126_v39 = vrot.slane %v1122_v37, 4  ;;  %v1149_v40 = vmul.f32 %v1122_v37, %v1122_v37 }
 0x13f   : > { %vm1146_vm1 = vcmp.lt.s32.totalorder %v1144_v55, 256 }
 0x140   : > { %v1127_v43 = vadd.f32 %v1126_v39, %v1122_v37  ;;  %v1151_v44 = vrot.slane %v1149_v40, 4 }
 0x141   : > { %v1123_v38 = vld [vmem:[#allocation2 + $0x8] sm:$0xff] }
 0x142   : > { %v1132_v41 = vrot.slane %v1123_v38, 4  ;;  %v1150_v42 = vmul.f32 %v1123_v38, %v1123_v38  ;;  %1125 = vst [vmem:[%s2064_s9 + $0x8] sm:$0xff] %v1123_v38  ;;  %v1128_v47 = vrot.slane %v1127_v43, 2  ;;  %v1152_v49 = vadd.f32 %v1151_v44, %v1149_v40 }
 0x144   : > { %v1133_v45 = vadd.f32 %v1132_v41, %v1123_v38  ;;  %v1157_v46 = vrot.slane %v1150_v42, 4  ;;  %v1129_v51 = vadd.f32 %v1128_v47, %v1127_v43  ;;  %v1153_v53 = vrot.slane %v1152_v49, 2 }
 0x146   : > { %v1134_v48 = vrot.slane %v1133_v45, 2  ;;  %v1158_v50 = vadd.f32 %v1157_v46, %v1150_v42  ;;  %v1130_v56 = vrot.slane %v1129_v51, 1  ;;  %v1154_v59 = vadd.f32 %v1153_v53, %v1152_v49 }
 0x148   : > { %v1135_v52 = vadd.f32 %v1134_v48, %v1133_v45  ;;  %v1159_v54 = vrot.slane %v1158_v50, 2  ;;  %v1131_v0 = vadd.f32 %v1130_v56, %v1129_v51  ;;  %v1155_v2 = vrot.slane %v1154_v59, 1 }
 0x14a   : > { %v1136_v58 = vrot.slane %v1135_v52, 1  ;;  %v1160_v62 = vadd.f32 %v1159_v54, %v1158_v50  ;;  %v1156_v5 = vadd.f32 %v1155_v2, %v1154_v59 }
 0x14c   : > { %v1137_v1 = vadd.f32 %v1136_v58, %v1135_v52  ;;  %v1161_v3 = vrot.slane %v1160_v62, 1 }
 0x14e   : > { %v1140_v4 = vrot.slane %v1137_v1, 7  ;;  %v1162_v6 = vadd.f32 %v1161_v3, %v1160_v62 }
 0x150   : > { %v1142_v7 = vsel %vm1141_vm0, %v1131_v0, %v1140_v4  ;;  %v1165_v8 = vrot.slane %v1162_v6, 7 }
 0x151   : > { %1148 = vst.msk [vmem:[%s591_s7] sm:$0x3] %vm1146_vm1, %v1142_v7 }
 0x152   : > { %v1166_v9 = vsel %vm1141_vm0, %v1156_v5, %v1165_v8 }
 0x153   : > { %1168 = vst.msk [vmem:[%s600_s12] sm:$0x3] %vm1146_vm1, %v1166_v9 }
 0x154 PF: > { %s15_s21 = sadd.s32 1, %s1824_s21   ;;  %s2258_s15 = smov %s1804_s16 }
 0x155   : > { %p12_p0 = scmp.ge.s32.totalorder %s15_s21, 20   ;;  %s2259_s16 = smov %s1903_s28 }
 0x156   : > { %s2260_s17 = smov %s1816_s19  ;;  %s2261_s18 = smov %s1820_s20 }
 0x157   : > { %s2262_s19 = smov %s2265_s22  ;;  %s2263_s20 = smov %s2269_s23 }
 0x158   :  { %14 = sbr.rel (!%p12_p0) target bundleno = 4 (0x4), region = 136 }

</bundles_post_ra>
